<compile_context>
chip_gen: v7x
topology: tpu7x:2x2x1
jax: 0.10.0
libtpu: 0.0.40
codegen_flags: <defaults>
</compile_context>

<pallas_src>
import jax
import jax.numpy as jnp
import numpy as np
from jax.experimental import pallas as pl
from jax.experimental.pallas import tpu as pltpu

NEG_SLOPE = 0.01   # nn.LeakyReLU default
BN_EPS = 1e-5      # nn.BatchNorm2d default
HIDDEN = 128


# --------------------------------------------------------------------------------------
# In-kernel helpers (traced inside the Pallas kernel)
# --------------------------------------------------------------------------------------
def _conv3x3_grouped(x, w_fold, mm_dtype):
    """3x3 'same' conv as a single long-K matmul.

    x:      (N, H, W, Cin) float32
    w_fold: (3*Cin, 3*Cout) with w_fold[dx*Cin + c, dy*Cout + o] = kernel[dy, dx, c, o]
    Returns (N*H*W, Cout) float32  (no conv bias; it is cancelled by training-mode BN).
    """
    N, H, W, Cin = x.shape
    Cout = w_fold.shape[1] // 3
    P = N * H * W

    # dx taps of the input: tap[..., w, :] reads x[..., w + dx - 1, :] (zero padded).
    zcol = jnp.zeros((N, H, 1, Cin), x.dtype)
    x_m = jnp.concatenate([zcol, x[:, :, :W - 1, :]], axis=2)    # reads w-1   (dx=0)
    x_p = jnp.concatenate([x[:, :, 1:, :], zcol], axis=2)        # reads w+1   (dx=2)
    cat = jnp.concatenate([x_m, x, x_p], axis=-1)                # (N, H, W, 3*Cin)

    res = jnp.dot(cat.reshape(P, 3 * Cin).astype(mm_dtype), w_fold,
                  preferred_element_type=jnp.float32)            # (P, 3*Cout)
    res = res.reshape(N, H, W, 3 * Cout)
    g0 = res[..., 0 * Cout:1 * Cout]   # dy=0: contributes g0[h-1] at row h
    g1 = res[..., 1 * Cout:2 * Cout]   # dy=1: in place
    g2 = res[..., 2 * Cout:3 * Cout]   # dy=2: contributes g2[h+1] at row h

    # dy recombination with aligned H-axis shifts (H is not a lane/sublane dim).
    zrow = jnp.zeros((N, 1, W, Cout), jnp.float32)
    up = jnp.concatenate([zrow, g0[:, :H - 1]], axis=1)          # [h] = g0[h-1]
    dn = jnp.concatenate([g2[:, 1:], zrow], axis=1)              # [h] = g2[h+1]
    return (g1 + up + dn).reshape(P, Cout)


def _bn_fold(acc, gamma, beta):
    """Training-mode BatchNorm over rows of acc, folded to one scale/shift pass."""
    P = acc.shape[0]
    inv_p = 1.0 / P
    s1 = jnp.sum(acc, axis=0, keepdims=True)
    s2 = jnp.sum(acc * acc, axis=0, keepdims=True)
    mean = s1 * inv_p
    var = s2 * inv_p - mean * mean                  # biased variance (BN training mode)
    scale = gamma * jax.lax.rsqrt(var + BN_EPS)
    shift = beta - mean * scale
    return acc * scale + shift


# --------------------------------------------------------------------------------------
# Fused multi-step kernel
# --------------------------------------------------------------------------------------
def _ca_fused_kernel(x_ref, w1f_ref, g1_ref, be1_ref,
                     w2f_ref, g2_ref, be2_ref,
                     w3_ref, b3_ref, out_ref):
    N, H, W, S = x_ref.shape
    C = HIDDEN
    step = pl.program_id(0)

    # Step 0: seed the carried state from the input; afterwards the state lives in
    # out_ref, which stays resident in VMEM (constant output block index).
    @pl.when(step == 0)
    def _():
        out_ref[...] = x_ref[...]

    a = out_ref[...]                                             # (N, H, W, S) f32

    # ---------------- softmax over the state (channel) axis ----------------
    m = jnp.max(a, axis=-1, keepdims=True)
    e = jnp.exp(a - m)
    sm = e * pl.reciprocal(jnp.sum(e, axis=-1, keepdims=True), approx=True)

    # ---------------- conv1: 3x3, S -> 128 (f32, tiny K) --------------------
    acc1 = _conv3x3_grouped(sm, w1f_ref[...], jnp.float32)       # (P, 128)
    h1 = _bn_fold(acc1, g1_ref[...], be1_ref[...])
    h1 = jnp.where(h1 > 0, h1, NEG_SLOPE * h1)                   # LeakyReLU

    # ---------------- conv2: 3x3, 128 -> 128 (bf16 MXU, K=384) --------------
    acc2 = _conv3x3_grouped(h1.reshape(N, H, W, C), w2f_ref[...], jnp.bfloat16)
    h2 = _bn_fold(acc2, g2_ref[...], be2_ref[...])
    h2 = jnp.maximum(h2, 0.0)                                    # ReLU

    # ---------------- conv3: 1x1, 128 -> S -----------------------------------
    y = jnp.dot(h2.astype(jnp.bfloat16), w3_ref[...],
                preferred_element_type=jnp.float32) + b3_ref[...]
    out_ref[...] = y.reshape(N, H, W, S).astype(out_ref.dtype)


# --------------------------------------------------------------------------------------
# Host-side wrapper
# --------------------------------------------------------------------------------------
def _fold_conv_weights(w):
    """(3,3,Cin,Cout)[dy,dx,c,o] -> (3*Cin, 3*Cout)[dx*Cin + c, dy*Cout + o]."""
    kh, kw, cin, cout = w.shape
    return jnp.transpose(w, (1, 2, 0, 3)).reshape(kw * cin, kh * cout)


def ca_model_forward(x_nchw, params, steps=1):
    """Pallas implementation of CAModel.forward. Input/output are NCHW float32."""
    x = jnp.transpose(x_nchw, (0, 2, 3, 1)).astype(jnp.float32)  # -> NHWC
    if steps <= 0:
        return jnp.transpose(x, (0, 3, 1, 2))
    N, H, W, S = x.shape

    w1f = _fold_conv_weights(params["w1"]).astype(jnp.float32)        # (3*S,   384)
    w2f = _fold_conv_weights(params["w2"]).astype(jnp.bfloat16)       # (384,   384)
    w3 = params["w3"].astype(jnp.bfloat16)                            # (128,   S)

    def resident(shape):
        if len(shape) == 2:
            return pl.BlockSpec(shape, lambda s: (0, 0))
        return pl.BlockSpec(shape, lambda s: (0, 0, 0, 0))

    out = pl.pallas_call(
        _ca_fused_kernel,
        out_shape=jax.ShapeDtypeStruct((N, H, W, S), jnp.float32),
        grid=(steps,),
        in_specs=[
            resident((N, H, W, S)),                   # x (read only at step 0)
            resident(w1f.shape),
            resident(params["g1"].shape), resident(params["be1"].shape),
            resident(w2f.shape),
            resident(params["g2"].shape), resident(params["be2"].shape),
            resident(w3.shape), resident(params["b3"].shape),
        ],
        out_specs=resident((N, H, W, S)),
        compiler_params=pltpu.CompilerParams(
            dimension_semantics=("arbitrary",),        # steps are sequential
            vmem_limit_bytes=32 * 1024 * 1024),
    )(x, w1f, params["g1"], params["be1"],
      w2f, params["g2"], params["be2"], w3, params["b3"])
    return jnp.transpose(out, (0, 3, 1, 2))                      # -> NCHW


# --------------------------------------------------------------------------------------
# Pure-JAX reference (full f32, with conv biases) for validation
# --------------------------------------------------------------------------------------
def _reference_step(a, p):
    sm = jax.nn.softmax(a, axis=-1)

    def conv3x3(z, w, b):
        N, H, W, _ = z.shape
        zp = jnp.pad(z, ((0, 0), (1, 1), (1, 1), (0, 0)))
        acc = jnp.zeros((N, H, W, w.shape[-1]), jnp.float32) + b.reshape(1, 1, 1, -1)
        for dy in range(3):
            for dx in range(3):
                acc = acc + jnp.einsum("nhwc,co->nhwo",
                                       zp[:, dy:dy + H, dx:dx + W, :], w[dy, dx],
                                       precision="highest")
        return acc

    def bn(z, g, be):
        mu = jnp.mean(z, axis=(0, 1, 2), keepdims=True)
        var = jnp.mean((z - mu) ** 2, axis=(0, 1, 2), keepdims=True)
        return (z - mu) * jax.lax.rsqrt(var + BN_EPS) * g.reshape(1, 1, 1, -1) \
            + be.reshape(1, 1, 1, -1)

    h1 = bn(conv3x3(sm, p["w1"], p["b1"]), p["g1"], p["be1"])
    h1 = jnp.where(h1 > 0, h1, NEG_SLOPE * h1)
    h2 = jnp.maximum(bn(conv3x3(h1, p["w2"], p["b2"]), p["g2"], p["be2"]), 0.0)
    return jnp.einsum("nhwc,cs->nhws", h2, p["w3"], precision="highest") \
        + p["b3"].reshape(1, 1, 1, -1)


def reference_forward(x_nchw, params, steps=1):
    x = jnp.transpose(x_nchw, (0, 2, 3, 1)).astype(jnp.float32)
    for _ in range(steps):
        x = _reference_step(x, params)
    return jnp.transpose(x, (0, 3, 1, 2))


def init_params(key, num_states):
    ks = jax.random.split(key, 8)
    f32 = jnp.float32
    return {
        "w1": 0.1 * jax.random.normal(ks[0], (3, 3, num_states, HIDDEN), f32),
        "b1": 0.05 * jax.random.normal(ks[1], (1, HIDDEN), f32),
        "g1": 1.0 + 0.1 * jax.random.normal(ks[2], (1, HIDDEN), f32),
        "be1": 0.05 * jax.random.normal(ks[3], (1, HIDDEN), f32),
        "w2": 0.05 * jax.random.normal(ks[4], (3, 3, HIDDEN, HIDDEN), f32),
        "b2": 0.05 * jax.random.normal(ks[5], (1, HIDDEN), f32),
        "g2": 1.0 + 0.1 * jax.random.normal(ks[6], (1, HIDDEN), f32),
        "be2": 0.05 * jax.random.normal(ks[7], (1, HIDDEN), f32),
        "w3": 0.1 * jax.random.normal(ks[0], (HIDDEN, num_states), f32),
        "b3": 0.05 * jax.random.normal(ks[1], (1, num_states), f32),
    }


if __name__ == "__main__":
    N, S, H, W = 2, 10, 16, 16   # batch, num_states (ARC colors), spatial
    key = jax.random.PRNGKey(0)
    kx, kp = jax.random.split(key)
    x = jax.random.normal(kx, (N, S, H, W), jnp.float32)   # PyTorch-style NCHW
    params = init_params(kp, S)

    steps = 2
    out = jax.block_until_ready(ca_model_forward(x, params, steps=steps))
    assert out.shape == (N, S, H, W)

    ref = jax.block_until_ready(reference_forward(x, params, steps=steps))
    # bf16 MXU path for conv2/conv3 (per perf guidance); tolerance sized for bf16
    # rounding propagated through two normalized CA steps.
    np.testing.assert_allclose(np.asarray(out), np.asarray(ref), rtol=1e-1, atol=1e-1)

    print("KERNEL_OK")
</pallas_src>

<mosaic_0001>
module attributes {stable_mosaic.version = 11 : i64} {
  func.func @_ca_fused_kernel(%arg0: i32, %arg1: memref<2x16x16x10xf32, #tpu.memory_space<vmem>>, %arg2: memref<30x384xf32, #tpu.memory_space<vmem>>, %arg3: memref<1x128xf32, #tpu.memory_space<vmem>>, %arg4: memref<1x128xf32, #tpu.memory_space<vmem>>, %arg5: memref<384x384xbf16, #tpu.memory_space<vmem>>, %arg6: memref<1x128xf32, #tpu.memory_space<vmem>>, %arg7: memref<1x128xf32, #tpu.memory_space<vmem>>, %arg8: memref<128x10xbf16, #tpu.memory_space<vmem>>, %arg9: memref<1x10xf32, #tpu.memory_space<vmem>>, %arg10: memref<2x16x16x10xf32, #tpu.memory_space<vmem>>) attributes {dimension_semantics = [#tpu.dimension_semantics<arbitrary>], iteration_bounds = array<i64: 2>, scalar_prefetch = 0 : i64, scratch_operands = 0 : i64, tpu.core_type = #tpu.core_type<tc>, window_params = [{pipeline_mode = #tpu.pipeline_mode<synchronous>, transform_indices = @transform_0, window_bounds = array<i64: 2, 16, 16, 10>}, {pipeline_mode = #tpu.pipeline_mode<synchronous>, transform_indices = @transform_1, window_bounds = array<i64: 30, 384>}, {pipeline_mode = #tpu.pipeline_mode<synchronous>, transform_indices = @transform_2, window_bounds = array<i64: 1, 128>}, {pipeline_mode = #tpu.pipeline_mode<synchronous>, transform_indices = @transform_3, window_bounds = array<i64: 1, 128>}, {pipeline_mode = #tpu.pipeline_mode<synchronous>, transform_indices = @transform_4, window_bounds = array<i64: 384, 384>}, {pipeline_mode = #tpu.pipeline_mode<synchronous>, transform_indices = @transform_5, window_bounds = array<i64: 1, 128>}, {pipeline_mode = #tpu.pipeline_mode<synchronous>, transform_indices = @transform_6, window_bounds = array<i64: 1, 128>}, {pipeline_mode = #tpu.pipeline_mode<synchronous>, transform_indices = @transform_7, window_bounds = array<i64: 128, 10>}, {pipeline_mode = #tpu.pipeline_mode<synchronous>, transform_indices = @transform_8, window_bounds = array<i64: 1, 10>}, {pipeline_mode = #tpu.pipeline_mode<synchronous>, transform_indices = @transform_9, window_bounds = array<i64: 2, 16, 16, 10>}]} {
    %c0_i32 = arith.constant 0 : i32
    %0 = arith.cmpi eq, %arg0, %c0_i32 : i32
    %1 = arith.extui %0 : i1 to i32
    %c0_i32_0 = arith.constant 0 : i32
    %2 = arith.cmpi ne, %1, %c0_i32_0 : i32
    scf.if %2 {
      %c0_45 = arith.constant 0 : index
      %c0_46 = arith.constant 0 : index
      %c0_47 = arith.constant 0 : index
      %c0_48 = arith.constant 0 : index
      %119 = vector.load %arg1[%c0_45, %c0_46, %c0_47, %c0_48] : memref<2x16x16x10xf32, #tpu.memory_space<vmem>>, vector<2x16x16x10xf32>
      %c0_49 = arith.constant 0 : index
      %c0_50 = arith.constant 0 : index
      %c0_51 = arith.constant 0 : index
      %c0_52 = arith.constant 0 : index
      %120 = vector.load %arg10[%c0_49, %c0_50, %c0_51, %c0_52] : memref<2x16x16x10xf32, #tpu.memory_space<vmem>>, vector<2x16x16x10xf32>
      tpu.vector_store %arg10[%c0_49, %c0_50, %c0_51, %c0_52], %119 {strides = array<i32>} : memref<2x16x16x10xf32, #tpu.memory_space<vmem>>, vector<2x16x16x10xf32>,
    } else {
    }
    %c0 = arith.constant 0 : index
    %c0_1 = arith.constant 0 : index
    %c0_2 = arith.constant 0 : index
    %c0_3 = arith.constant 0 : index
    %3 = vector.load %arg10[%c0, %c0_1, %c0_2, %c0_3] : memref<2x16x16x10xf32, #tpu.memory_space<vmem>>, vector<2x16x16x10xf32>
    %cst = arith.constant dense<0xFF800000> : vector<2x16x16xf32>
    %4 = vector.multi_reduction <maximumf>, %3, %cst [3] : vector<2x16x16x10xf32> to vector<2x16x16xf32>
    %5 = vector.shape_cast %4 : vector<2x16x16xf32> to vector<2x16x16x1xf32>
    %6 = vector.broadcast %5 : vector<2x16x16x1xf32> to vector<2x16x16x10xf32>
    %7 = arith.subf %3, %6 : vector<2x16x16x10xf32>
    %8 = math.exp %7 : vector<2x16x16x10xf32>
    %cst_4 = arith.constant dense<0.000000e+00> : vector<2x16x16xf32>
    %9 = vector.multi_reduction <add>, %8, %cst_4 [3] : vector<2x16x16x10xf32> to vector<2x16x16xf32>
    %10 = vector.shape_cast %9 : vector<2x16x16xf32> to vector<2x16x16x1xf32>
    %11 = tpu.reciprocal %10 {approx = true} : vector<2x16x16x1xf32> -> vector<2x16x16x1xf32>
    %12 = vector.broadcast %11 : vector<2x16x16x1xf32> to vector<2x16x16x10xf32>
    %13 = arith.mulf %8, %12 : vector<2x16x16x10xf32>
    %c0_5 = arith.constant 0 : index
    %c0_6 = arith.constant 0 : index
    %14 = vector.load %arg2[%c0_5, %c0_6] : memref<30x384xf32, #tpu.memory_space<vmem>>, vector<30x384xf32>
    %cst_7 = arith.constant 0.000000e+00 : f32
    %15 = vector.broadcast %cst_7 : f32 to vector<2x16x1x10xf32>
    %16 = vector.extract_strided_slice %13 {offsets = [0, 0, 0, 0], sizes = [2, 16, 15, 10], strides = [1, 1, 1, 1]} : vector<2x16x16x10xf32> to vector<2x16x15x10xf32>
    %17 = tpu.concatenate %15, %16 in 2 : vector<2x16x1x10xf32>, vector<2x16x15x10xf32> -> vector<2x16x16x10xf32>
    %18 = vector.extract_strided_slice %13 {offsets = [0, 0, 1, 0], sizes = [2, 16, 15, 10], strides = [1, 1, 1, 1]} : vector<2x16x16x10xf32> to vector<2x16x15x10xf32>
    %19 = tpu.concatenate %18, %15 in 2 : vector<2x16x15x10xf32>, vector<2x16x1x10xf32> -> vector<2x16x16x10xf32>
    %20 = tpu.concatenate %17, %13, %19 in 3 : vector<2x16x16x10xf32>, vector<2x16x16x10xf32>, vector<2x16x16x10xf32> -> vector<2x16x16x30xf32>
    %21 = vector.shape_cast %20 : vector<2x16x16x30xf32> to vector<512x30xf32>
    %cst_8 = arith.constant dense<0.000000e+00> : vector<512x384xf32>
    %22 = tpu.matmul %21, %14, %cst_8 {dimension_numbers = #tpu.dot_dimension_numbers<[1], [0], [0], [1], [0, 0, 1, 1], [], []>} : vector<512x30xf32>, vector<30x384xf32>, vector<512x384xf32> -> vector<512x384xf32>
    %23 = vector.shape_cast %22 : vector<512x384xf32> to vector<2x16x16x384xf32>
    %24 = vector.extract_strided_slice %23 {offsets = [0, 0, 0, 0], sizes = [2, 16, 16, 128], strides = [1, 1, 1, 1]} : vector<2x16x16x384xf32> to vector<2x16x16x128xf32>
    %25 = vector.extract_strided_slice %23 {offsets = [0, 0, 0, 128], sizes = [2, 16, 16, 128], strides = [1, 1, 1, 1]} : vector<2x16x16x384xf32> to vector<2x16x16x128xf32>
    %26 = vector.extract_strided_slice %23 {offsets = [0, 0, 0, 256], sizes = [2, 16, 16, 128], strides = [1, 1, 1, 1]} : vector<2x16x16x384xf32> to vector<2x16x16x128xf32>
    %cst_9 = arith.constant 0.000000e+00 : f32
    %27 = vector.broadcast %cst_9 : f32 to vector<2x1x16x128xf32>
    %28 = vector.extract_strided_slice %24 {offsets = [0, 0, 0, 0], sizes = [2, 15, 16, 128], strides = [1, 1, 1, 1]} : vector<2x16x16x128xf32> to vector<2x15x16x128xf32>
    %29 = tpu.concatenate %27, %28 in 1 : vector<2x1x16x128xf32>, vector<2x15x16x128xf32> -> vector<2x16x16x128xf32>
    %30 = vector.extract_strided_slice %26 {offsets = [0, 1, 0, 0], sizes = [2, 15, 16, 128], strides = [1, 1, 1, 1]} : vector<2x16x16x128xf32> to vector<2x15x16x128xf32>
    %31 = tpu.concatenate %30, %27 in 1 : vector<2x15x16x128xf32>, vector<2x1x16x128xf32> -> vector<2x16x16x128xf32>
    %32 = arith.addf %25, %29 : vector<2x16x16x128xf32>
    %33 = arith.addf %32, %31 : vector<2x16x16x128xf32>
    %34 = vector.shape_cast %33 : vector<2x16x16x128xf32> to vector<512x128xf32>
    %c0_10 = arith.constant 0 : index
    %c0_11 = arith.constant 0 : index
    %35 = vector.load %arg3[%c0_10, %c0_11] : memref<1x128xf32, #tpu.memory_space<vmem>>, vector<1x128xf32>
    %c0_12 = arith.constant 0 : index
    %c0_13 = arith.constant 0 : index
    %36 = vector.load %arg4[%c0_12, %c0_13] : memref<1x128xf32, #tpu.memory_space<vmem>>, vector<1x128xf32>
    %cst_14 = arith.constant dense<0.000000e+00> : vector<128xf32>
    %37 = vector.multi_reduction <add>, %34, %cst_14 [0] : vector<512x128xf32> to vector<128xf32>
    %38 = vector.shape_cast %37 : vector<128xf32> to vector<1x128xf32>
    %39 = arith.mulf %34, %34 : vector<512x128xf32>
    %cst_15 = arith.constant dense<0.000000e+00> : vector<128xf32>
    %40 = vector.multi_reduction <add>, %39, %cst_15 [0] : vector<512x128xf32> to vector<128xf32>
    %41 = vector.shape_cast %40 : vector<128xf32> to vector<1x128xf32>
    %cst_16 = arith.constant 0.001953125 : f32
    %42 = vector.broadcast %cst_16 : f32 to vector<1x128xf32>
    %43 = arith.mulf %38, %42 : vector<1x128xf32>
    %cst_17 = arith.constant 0.001953125 : f32
    %44 = vector.broadcast %cst_17 : f32 to vector<1x128xf32>
    %45 = arith.mulf %41, %44 : vector<1x128xf32>
    %46 = arith.mulf %43, %43 : vector<1x128xf32>
    %47 = arith.subf %45, %46 : vector<1x128xf32>
    %cst_18 = arith.constant 9.99999974E-6 : f32
    %48 = vector.broadcast %cst_18 : f32 to vector<1x128xf32>
    %49 = arith.addf %47, %48 : vector<1x128xf32>
    %50 = math.rsqrt %49 : vector<1x128xf32>
    %51 = arith.mulf %35, %50 : vector<1x128xf32>
    %52 = arith.mulf %43, %51 : vector<1x128xf32>
    %53 = arith.subf %36, %52 : vector<1x128xf32>
    %54 = vector.broadcast %51 : vector<1x128xf32> to vector<512x128xf32>
    %55 = arith.mulf %34, %54 : vector<512x128xf32>
    %56 = vector.broadcast %53 : vector<1x128xf32> to vector<512x128xf32>
    %57 = arith.addf %55, %56 : vector<512x128xf32>
    %cst_19 = arith.constant 0.000000e+00 : f32
    %58 = vector.broadcast %cst_19 : f32 to vector<512x128xf32>
    %59 = arith.cmpf ogt, %57, %58 : vector<512x128xf32>
    %cst_20 = arith.constant 0.00999999977 : f32
    %60 = vector.broadcast %cst_20 : f32 to vector<512x128xf32>
    %61 = arith.mulf %60, %57 : vector<512x128xf32>
    %62 = arith.select %59, %57, %61 : vector<512x128xi1>, vector<512x128xf32>
    %63 = vector.shape_cast %62 : vector<512x128xf32> to vector<2x16x16x128xf32>
    %c0_21 = arith.constant 0 : index
    %c0_22 = arith.constant 0 : index
    %64 = vector.load %arg5[%c0_21, %c0_22] : memref<384x384xbf16, #tpu.memory_space<vmem>>, vector<384x384xbf16>
    %cst_23 = arith.constant 0.000000e+00 : f32
    %65 = vector.broadcast %cst_23 : f32 to vector<2x16x1x128xf32>
    %66 = vector.extract_strided_slice %63 {offsets = [0, 0, 0, 0], sizes = [2, 16, 15, 128], strides = [1, 1, 1, 1]} : vector<2x16x16x128xf32> to vector<2x16x15x128xf32>
    %67 = tpu.concatenate %65, %66 in 2 : vector<2x16x1x128xf32>, vector<2x16x15x128xf32> -> vector<2x16x16x128xf32>
    %68 = vector.extract_strided_slice %63 {offsets = [0, 0, 1, 0], sizes = [2, 16, 15, 128], strides = [1, 1, 1, 1]} : vector<2x16x16x128xf32> to vector<2x16x15x128xf32>
    %69 = tpu.concatenate %68, %65 in 2 : vector<2x16x15x128xf32>, vector<2x16x1x128xf32> -> vector<2x16x16x128xf32>
    %70 = tpu.concatenate %67, %63, %69 in 3 : vector<2x16x16x128xf32>, vector<2x16x16x128xf32>, vector<2x16x16x128xf32> -> vector<2x16x16x384xf32>
    %71 = vector.shape_cast %70 : vector<2x16x16x384xf32> to vector<512x384xf32>
    %72 = arith.truncf %71 : vector<512x384xf32> to vector<512x384xbf16>
    %cst_24 = arith.constant dense<0.000000e+00> : vector<512x384xf32>
    %73 = tpu.matmul %72, %64, %cst_24 {dimension_numbers = #tpu.dot_dimension_numbers<[1], [0], [0], [1], [0, 0, 1, 1], [], []>} : vector<512x384xbf16>, vector<384x384xbf16>, vector<512x384xf32> -> vector<512x384xf32>
    %74 = vector.shape_cast %73 : vector<512x384xf32> to vector<2x16x16x384xf32>
    %75 = vector.extract_strided_slice %74 {offsets = [0, 0, 0, 0], sizes = [2, 16, 16, 128], strides = [1, 1, 1, 1]} : vector<2x16x16x384xf32> to vector<2x16x16x128xf32>
    %76 = vector.extract_strided_slice %74 {offsets = [0, 0, 0, 128], sizes = [2, 16, 16, 128], strides = [1, 1, 1, 1]} : vector<2x16x16x384xf32> to vector<2x16x16x128xf32>
    %77 = vector.extract_strided_slice %74 {offsets = [0, 0, 0, 256], sizes = [2, 16, 16, 128], strides = [1, 1, 1, 1]} : vector<2x16x16x384xf32> to vector<2x16x16x128xf32>
    %cst_25 = arith.constant 0.000000e+00 : f32
    %78 = vector.broadcast %cst_25 : f32 to vector<2x1x16x128xf32>
    %79 = vector.extract_strided_slice %75 {offsets = [0, 0, 0, 0], sizes = [2, 15, 16, 128], strides = [1, 1, 1, 1]} : vector<2x16x16x128xf32> to vector<2x15x16x128xf32>
    %80 = tpu.concatenate %78, %79 in 1 : vector<2x1x16x128xf32>, vector<2x15x16x128xf32> -> vector<2x16x16x128xf32>
    %81 = vector.extract_strided_slice %77 {offsets = [0, 1, 0, 0], sizes = [2, 15, 16, 128], strides = [1, 1, 1, 1]} : vector<2x16x16x128xf32> to vector<2x15x16x128xf32>
    %82 = tpu.concatenate %81, %78 in 1 : vector<2x15x16x128xf32>, vector<2x1x16x128xf32> -> vector<2x16x16x128xf32>
    %83 = arith.addf %76, %80 : vector<2x16x16x128xf32>
    %84 = arith.addf %83, %82 : vector<2x16x16x128xf32>
    %85 = vector.shape_cast %84 : vector<2x16x16x128xf32> to vector<512x128xf32>
    %c0_26 = arith.constant 0 : index
    %c0_27 = arith.constant 0 : index
    %86 = vector.load %arg6[%c0_26, %c0_27] : memref<1x128xf32, #tpu.memory_space<vmem>>, vector<1x128xf32>
    %c0_28 = arith.constant 0 : index
    %c0_29 = arith.constant 0 : index
    %87 = vector.load %arg7[%c0_28, %c0_29] : memref<1x128xf32, #tpu.memory_space<vmem>>, vector<1x128xf32>
    %cst_30 = arith.constant dense<0.000000e+00> : vector<128xf32>
    %88 = vector.multi_reduction <add>, %85, %cst_30 [0] : vector<512x128xf32> to vector<128xf32>
    %89 = vector.shape_cast %88 : vector<128xf32> to vector<1x128xf32>
    %90 = arith.mulf %85, %85 : vector<512x128xf32>
    %cst_31 = arith.constant dense<0.000000e+00> : vector<128xf32>
    %91 = vector.multi_reduction <add>, %90, %cst_31 [0] : vector<512x128xf32> to vector<128xf32>
    %92 = vector.shape_cast %91 : vector<128xf32> to vector<1x128xf32>
    %cst_32 = arith.constant 0.001953125 : f32
    %93 = vector.broadcast %cst_32 : f32 to vector<1x128xf32>
    %94 = arith.mulf %89, %93 : vector<1x128xf32>
    %cst_33 = arith.constant 0.001953125 : f32
    %95 = vector.broadcast %cst_33 : f32 to vector<1x128xf32>
    %96 = arith.mulf %92, %95 : vector<1x128xf32>
    %97 = arith.mulf %94, %94 : vector<1x128xf32>
    %98 = arith.subf %96, %97 : vector<1x128xf32>
    %cst_34 = arith.constant 9.99999974E-6 : f32
    %99 = vector.broadcast %cst_34 : f32 to vector<1x128xf32>
    %100 = arith.addf %98, %99 : vector<1x128xf32>
    %101 = math.rsqrt %100 : vector<1x128xf32>
    %102 = arith.mulf %86, %101 : vector<1x128xf32>
    %103 = arith.mulf %94, %102 : vector<1x128xf32>
    %104 = arith.subf %87, %103 : vector<1x128xf32>
    %105 = vector.broadcast %102 : vector<1x128xf32> to vector<512x128xf32>
    %106 = arith.mulf %85, %105 : vector<512x128xf32>
    %107 = vector.broadcast %104 : vector<1x128xf32> to vector<512x128xf32>
    %108 = arith.addf %106, %107 : vector<512x128xf32>
    %cst_35 = arith.constant 0.000000e+00 : f32
    %109 = vector.broadcast %cst_35 : f32 to vector<512x128xf32>
    %110 = arith.maximumf %108, %109 : vector<512x128xf32>
    %111 = arith.truncf %110 : vector<512x128xf32> to vector<512x128xbf16>
    %c0_36 = arith.constant 0 : index
    %c0_37 = arith.constant 0 : index
    %112 = vector.load %arg8[%c0_36, %c0_37] : memref<128x10xbf16, #tpu.memory_space<vmem>>, vector<128x10xbf16>
    %cst_38 = arith.constant dense<0.000000e+00> : vector<512x10xf32>
    %113 = tpu.matmul %111, %112, %cst_38 {dimension_numbers = #tpu.dot_dimension_numbers<[1], [0], [0], [1], [0, 0, 1, 1], [], []>} : vector<512x128xbf16>, vector<128x10xbf16>, vector<512x10xf32> -> vector<512x10xf32>
    %c0_39 = arith.constant 0 : index
    %c0_40 = arith.constant 0 : index
    %114 = vector.load %arg9[%c0_39, %c0_40] : memref<1x10xf32, #tpu.memory_space<vmem>>, vector<1x10xf32>
    %115 = vector.broadcast %114 : vector<1x10xf32> to vector<512x10xf32>
    %116 = arith.addf %113, %115 : vector<512x10xf32>
    %117 = vector.shape_cast %116 : vector<512x10xf32> to vector<2x16x16x10xf32>
    %c0_41 = arith.constant 0 : index
    %c0_42 = arith.constant 0 : index
    %c0_43 = arith.constant 0 : index
    %c0_44 = arith.constant 0 : index
    %118 = vector.load %arg10[%c0_41, %c0_42, %c0_43, %c0_44] : memref<2x16x16x10xf32, #tpu.memory_space<vmem>>, vector<2x16x16x10xf32>
    tpu.vector_store %arg10[%c0_41, %c0_42, %c0_43, %c0_44], %117 {strides = array<i32>} : memref<2x16x16x10xf32, #tpu.memory_space<vmem>>, vector<2x16x16x10xf32>,
    return
  }
  func.func @transform_0(%arg0: i32) -> (i32, i32, i32, i32) {
    %c0_i32 = arith.constant 0 : i32
    %c0_i32_0 = arith.constant 0 : i32
    %c0_i32_1 = arith.constant 0 : i32
    %c0_i32_2 = arith.constant 0 : i32
    %c0_i32_3 = arith.constant 0 : i32
    return %c0_i32, %c0_i32_0, %c0_i32_1, %c0_i32_2 : i32, i32, i32, i32
  }
  func.func @transform_1(%arg0: i32) -> (i32, i32) {
    %c0_i32 = arith.constant 0 : i32
    %c0_i32_0 = arith.constant 0 : i32
    %c0_i32_1 = arith.constant 0 : i32
    return %c0_i32, %c0_i32_0 : i32, i32
  }
  func.func @transform_2(%arg0: i32) -> (i32, i32) {
    %c0_i32 = arith.constant 0 : i32
    %c0_i32_0 = arith.constant 0 : i32
    %c0_i32_1 = arith.constant 0 : i32
    return %c0_i32, %c0_i32_0 : i32, i32
  }
  func.func @transform_3(%arg0: i32) -> (i32, i32) {
    %c0_i32 = arith.constant 0 : i32
    %c0_i32_0 = arith.constant 0 : i32
    %c0_i32_1 = arith.constant 0 : i32
    return %c0_i32, %c0_i32_0 : i32, i32
  }
  func.func @transform_4(%arg0: i32) -> (i32, i32) {
    %c0_i32 = arith.constant 0 : i32
    %c0_i32_0 = arith.constant 0 : i32
    %c0_i32_1 = arith.constant 0 : i32
    return %c0_i32, %c0_i32_0 : i32, i32
  }
  func.func @transform_5(%arg0: i32) -> (i32, i32) {
    %c0_i32 = arith.constant 0 : i32
    %c0_i32_0 = arith.constant 0 : i32
    %c0_i32_1 = arith.constant 0 : i32
    return %c0_i32, %c0_i32_0 : i32, i32
  }
  func.func @transform_6(%arg0: i32) -> (i32, i32) {
    %c0_i32 = arith.constant 0 : i32
    %c0_i32_0 = arith.constant 0 : i32
    %c0_i32_1 = arith.constant 0 : i32
    return %c0_i32, %c0_i32_0 : i32, i32
  }
  func.func @transform_7(%arg0: i32) -> (i32, i32) {
    %c0_i32 = arith.constant 0 : i32
    %c0_i32_0 = arith.constant 0 : i32
    %c0_i32_1 = arith.constant 0 : i32
    return %c0_i32, %c0_i32_0 : i32, i32
  }
  func.func @transform_8(%arg0: i32) -> (i32, i32) {
    %c0_i32 = arith.constant 0 : i32
    %c0_i32_0 = arith.constant 0 : i32
    %c0_i32_1 = arith.constant 0 : i32
    return %c0_i32, %c0_i32_0 : i32, i32
  }
  func.func @transform_9(%arg0: i32) -> (i32, i32, i32, i32) {
    %c0_i32 = arith.constant 0 : i32
    %c0_i32_0 = arith.constant 0 : i32
    %c0_i32_1 = arith.constant 0 : i32
    %c0_i32_2 = arith.constant 0 : i32
    %c0_i32_3 = arith.constant 0 : i32
    return %c0_i32, %c0_i32_0, %c0_i32_1, %c0_i32_2 : i32, i32, i32, i32
  }
}

</mosaic_0001>

<bundles_post_ra>
// kernel: tpu_custom_call.1
= control target key start
LH: loop header
LB: loop body
LE: loop exit
PB: predicated region body
PF: predicated region fallthrough
CT: control target
= control target key end

     0   :  { %s8883_s30 = smov 0   ;;  %s15532_s0 = inlined_call_operand.vmem [shape: f32[2,16,16,10], index: 0, kind: input, shape index: {}]   ;;  %s15533_s1 = inlined_call_operand.vmem [shape: f32[30,384], index: 1, kind: input, shape index: {}]   ;;  %s15534_s2 = inlined_call_operand.vmem [shape: f32[1,128], index: 2, kind: input, shape index: {}]   ;;  %s15535_s3 = inlined_call_operand.vmem [shape: f32[1,128], index: 3, kind: input, shape index: {}]   ;;  %s15536_s4 = inlined_call_operand.vmem [shape: bf16[384,384], index: 4, kind: input, shape index: {}]   ;;  %s15537_s5 = inlined_call_operand.vmem [shape: f32[1,128], index: 5, kind: input, shape index: {}]   ;;  %s15538_s6 = inlined_call_operand.vmem [shape: f32[1,128], index: 6, kind: input, shape index: {}]   ;;  %s15539_s7 = inlined_call_operand.vmem [shape: bf16[128,10], index: 7, kind: input, shape index: {}]   ;;  %s15540_s8 = inlined_call_operand.vmem [shape: f32[1,10], index: 8, kind: input, shape index: {}]   ;;  %s15541_s9 = inlined_call_operand.vmem [shape: f32[2,16,16,10], index: 9, kind: output, shape index: {}]  }
   0x1 LB: > { %s7187_s10 = sadd.s32 4294967295, %s8826_s30   ;;  %p7189_p0 = scmp.ge.s32.totalorder %s8826_s30, 1  ;;  %s8826_s30 = sphi %s8883_s30, %s19_s30  }
   0x2   : > { %p272_p1 = scmp.lt.s32.totalorder %s8826_s30, 3 }
   0x4   : > { %p273_p2 = pnand %p7189_p0, %p272_p1 }
   0x6   : > { %276 = sbr.rel (%p273_p2) target bundleno = 2806 (0xaf6), region = 56 }
   0xd   : > { %p7190_p3 = scmp.ne.s32.totalorder %s7187_s10, 0 }
   0xe   : > { %v303_v0 = vld [vmem:[%s15532_s0] sm:$0xff] (!%p7190_p3)  ;;  %vm367_vm0 = vcmask (!%p7190_p3), 80896   ;;  %v304_v1 = vld [vmem:[%s15532_s0 + $0x8] sm:$0xff] (!%p7190_p3)  ;;  %v305_v2 = vld [vmem:[%s15532_s0 + $0x10] sm:$0xff] (!%p7190_p3) }
   0xf   : > { %302 = sbr.rel (%p7190_p3) target bundleno = 47 (0x2f), region = 60  ;;  %368 = vst.msk [vmem:[%s15541_s9] sm:$0xff] (!%p7190_p3), %vm367_vm0, %v303_v0  ;;  %369 = vst.msk [vmem:[%s15541_s9 + $0x8] sm:$0xff] (!%p7190_p3), %vm367_vm0, %v304_v1  ;;  %v306_v3 = vld [vmem:[%s15532_s0 + $0x18] sm:$0xff] (!%p7190_p3)  ;;  %v307_v4 = vld [vmem:[%s15532_s0 + $0x20] sm:$0xff] (!%p7190_p3) }
  0x10   : > { %370 = vst.msk [vmem:[%s15541_s9 + $0x10] sm:$0xff] (!%p7190_p3), %vm367_vm0, %v305_v2  ;;  %v308_v5 = vld [vmem:[%s15532_s0 + $0x28] sm:$0xff] (!%p7190_p3)  ;;  %371 = vst.msk [vmem:[%s15541_s9 + $0x18] sm:$0xff] (!%p7190_p3), %vm367_vm0, %v306_v3  ;;  %v309_v6 = vld [vmem:[%s15532_s0 + $0x30] sm:$0xff] (!%p7190_p3) }
  0x11   : > { %372 = vst.msk [vmem:[%s15541_s9 + $0x20] sm:$0xff] (!%p7190_p3), %vm367_vm0, %v307_v4  ;;  %373 = vst.msk [vmem:[%s15541_s9 + $0x28] sm:$0xff] (!%p7190_p3), %vm367_vm0, %v308_v5  ;;  %v310_v7 = vld [vmem:[%s15532_s0 + $0x38] sm:$0xff] (!%p7190_p3)  ;;  %v311_v8 = vld [vmem:[%s15532_s0 + $0x40] sm:$0xff] (!%p7190_p3) }
  0x12   : > { %374 = vst.msk [vmem:[%s15541_s9 + $0x30] sm:$0xff] (!%p7190_p3), %vm367_vm0, %v309_v6  ;;  %375 = vst.msk [vmem:[%s15541_s9 + $0x38] sm:$0xff] (!%p7190_p3), %vm367_vm0, %v310_v7  ;;  %v312_v9 = vld [vmem:[%s15532_s0 + $0x48] sm:$0xff] (!%p7190_p3)  ;;  %v313_v10 = vld [vmem:[%s15532_s0 + $0x50] sm:$0xff] (!%p7190_p3) }
  0x13   : > { %376 = vst.msk [vmem:[%s15541_s9 + $0x40] sm:$0xff] (!%p7190_p3), %vm367_vm0, %v311_v8  ;;  %v314_v11 = vld [vmem:[%s15532_s0 + $0x58] sm:$0xff] (!%p7190_p3)  ;;  %377 = vst.msk [vmem:[%s15541_s9 + $0x48] sm:$0xff] (!%p7190_p3), %vm367_vm0, %v312_v9  ;;  %v315_v12 = vld [vmem:[%s15532_s0 + $0x60] sm:$0xff] (!%p7190_p3) }
  0x14   : > { %378 = vst.msk [vmem:[%s15541_s9 + $0x50] sm:$0xff] (!%p7190_p3), %vm367_vm0, %v313_v10  ;;  %379 = vst.msk [vmem:[%s15541_s9 + $0x58] sm:$0xff] (!%p7190_p3), %vm367_vm0, %v314_v11  ;;  %v316_v13 = vld [vmem:[%s15532_s0 + $0x68] sm:$0xff] (!%p7190_p3)  ;;  %v317_v14 = vld [vmem:[%s15532_s0 + $0x70] sm:$0xff] (!%p7190_p3) }
  0x15   : > { %380 = vst.msk [vmem:[%s15541_s9 + $0x60] sm:$0xff] (!%p7190_p3), %vm367_vm0, %v315_v12  ;;  %381 = vst.msk [vmem:[%s15541_s9 + $0x68] sm:$0xff] (!%p7190_p3), %vm367_vm0, %v316_v13  ;;  %v318_v15 = vld [vmem:[%s15532_s0 + $0x78] sm:$0xff] (!%p7190_p3)  ;;  %v319_v16 = vld [vmem:[%s15532_s0 + $0x80] sm:$0xff] (!%p7190_p3) }
  0x16   : > { %382 = vst.msk [vmem:[%s15541_s9 + $0x70] sm:$0xff] %vm367_vm0, %v317_v14  ;;  %v320_v17 = vld [vmem:[%s15532_s0 + $0x88] sm:$0xff]  ;;  %383 = vst.msk [vmem:[%s15541_s9 + $0x78] sm:$0xff] %vm367_vm0, %v318_v15  ;;  %v321_v18 = vld [vmem:[%s15532_s0 + $0x90] sm:$0xff] }
  0x17   : > { %384 = vst.msk [vmem:[%s15541_s9 + $0x80] sm:$0xff] %vm367_vm0, %v319_v16  ;;  %385 = vst.msk [vmem:[%s15541_s9 + $0x88] sm:$0xff] %vm367_vm0, %v320_v17  ;;  %v322_v19 = vld [vmem:[%s15532_s0 + $0x98] sm:$0xff]  ;;  %v323_v20 = vld [vmem:[%s15532_s0 + $0xa0] sm:$0xff] }
  0x18   : > { %386 = vst.msk [vmem:[%s15541_s9 + $0x90] sm:$0xff] %vm367_vm0, %v321_v18  ;;  %387 = vst.msk [vmem:[%s15541_s9 + $0x98] sm:$0xff] %vm367_vm0, %v322_v19  ;;  %v324_v21 = vld [vmem:[%s15532_s0 + $0xa8] sm:$0xff]  ;;  %v325_v22 = vld [vmem:[%s15532_s0 + $0xb0] sm:$0xff] }
  0x19   : > { %388 = vst.msk [vmem:[%s15541_s9 + $0xa0] sm:$0xff] %vm367_vm0, %v323_v20  ;;  %v326_v23 = vld [vmem:[%s15532_s0 + $0xb8] sm:$0xff]  ;;  %389 = vst.msk [vmem:[%s15541_s9 + $0xa8] sm:$0xff] %vm367_vm0, %v324_v21  ;;  %v327_v24 = vld [vmem:[%s15532_s0 + $0xc0] sm:$0xff] }
  0x1a   : > { %390 = vst.msk [vmem:[%s15541_s9 + $0xb0] sm:$0xff] %vm367_vm0, %v325_v22  ;;  %391 = vst.msk [vmem:[%s15541_s9 + $0xb8] sm:$0xff] %vm367_vm0, %v326_v23  ;;  %v328_v25 = vld [vmem:[%s15532_s0 + $0xc8] sm:$0xff]  ;;  %v329_v26 = vld [vmem:[%s15532_s0 + $0xd0] sm:$0xff] }
  0x1b   : > { %392 = vst.msk [vmem:[%s15541_s9 + $0xc0] sm:$0xff] %vm367_vm0, %v327_v24  ;;  %393 = vst.msk [vmem:[%s15541_s9 + $0xc8] sm:$0xff] %vm367_vm0, %v328_v25  ;;  %v330_v27 = vld [vmem:[%s15532_s0 + $0xd8] sm:$0xff]  ;;  %v331_v28 = vld [vmem:[%s15532_s0 + $0xe0] sm:$0xff] }
  0x1c   : > { %394 = vst.msk [vmem:[%s15541_s9 + $0xd0] sm:$0xff] %vm367_vm0, %v329_v26  ;;  %v332_v29 = vld [vmem:[%s15532_s0 + $0xe8] sm:$0xff]  ;;  %395 = vst.msk [vmem:[%s15541_s9 + $0xd8] sm:$0xff] %vm367_vm0, %v330_v27  ;;  %v333_v30 = vld [vmem:[%s15532_s0 + $0xf0] sm:$0xff] }
  0x1d   : > { %396 = vst.msk [vmem:[%s15541_s9 + $0xe0] sm:$0xff] %vm367_vm0, %v331_v28  ;;  %397 = vst.msk [vmem:[%s15541_s9 + $0xe8] sm:$0xff] %vm367_vm0, %v332_v29  ;;  %v334_v31 = vld [vmem:[%s15532_s0 + $0xf8] sm:$0xff]  ;;  %v335_v32 = vld [vmem:[%s15532_s0 + $0x100] sm:$0xff] }
  0x1e   : > { %398 = vst.msk [vmem:[%s15541_s9 + $0xf0] sm:$0xff] %vm367_vm0, %v333_v30  ;;  %399 = vst.msk [vmem:[%s15541_s9 + $0xf8] sm:$0xff] %vm367_vm0, %v334_v31  ;;  %v336_v33 = vld [vmem:[%s15532_s0 + $0x108] sm:$0xff]  ;;  %v337_v34 = vld [vmem:[%s15532_s0 + $0x110] sm:$0xff] }
  0x1f   : > { %400 = vst.msk [vmem:[%s15541_s9 + $0x100] sm:$0xff] %vm367_vm0, %v335_v32  ;;  %v338_v35 = vld [vmem:[%s15532_s0 + $0x118] sm:$0xff]  ;;  %401 = vst.msk [vmem:[%s15541_s9 + $0x108] sm:$0xff] %vm367_vm0, %v336_v33  ;;  %v339_v36 = vld [vmem:[%s15532_s0 + $0x120] sm:$0xff] }
  0x20   : > { %402 = vst.msk [vmem:[%s15541_s9 + $0x110] sm:$0xff] %vm367_vm0, %v337_v34  ;;  %403 = vst.msk [vmem:[%s15541_s9 + $0x118] sm:$0xff] %vm367_vm0, %v338_v35  ;;  %v340_v37 = vld [vmem:[%s15532_s0 + $0x128] sm:$0xff]  ;;  %v341_v38 = vld [vmem:[%s15532_s0 + $0x130] sm:$0xff] }
  0x21   : > { %404 = vst.msk [vmem:[%s15541_s9 + $0x120] sm:$0xff] %vm367_vm0, %v339_v36  ;;  %405 = vst.msk [vmem:[%s15541_s9 + $0x128] sm:$0xff] %vm367_vm0, %v340_v37  ;;  %v342_v39 = vld [vmem:[%s15532_s0 + $0x138] sm:$0xff]  ;;  %v343_v40 = vld [vmem:[%s15532_s0 + $0x140] sm:$0xff] }
  0x22   : > { %406 = vst.msk [vmem:[%s15541_s9 + $0x130] sm:$0xff] %vm367_vm0, %v341_v38  ;;  %v344_v41 = vld [vmem:[%s15532_s0 + $0x148] sm:$0xff]  ;;  %407 = vst.msk [vmem:[%s15541_s9 + $0x138] sm:$0xff] %vm367_vm0, %v342_v39  ;;  %v345_v42 = vld [vmem:[%s15532_s0 + $0x150] sm:$0xff] }
  0x23   : > { %408 = vst.msk [vmem:[%s15541_s9 + $0x140] sm:$0xff] %vm367_vm0, %v343_v40  ;;  %409 = vst.msk [vmem:[%s15541_s9 + $0x148] sm:$0xff] %vm367_vm0, %v344_v41  ;;  %v346_v43 = vld [vmem:[%s15532_s0 + $0x158] sm:$0xff]  ;;  %v347_v44 = vld [vmem:[%s15532_s0 + $0x160] sm:$0xff] }
  0x24   : > { %410 = vst.msk [vmem:[%s15541_s9 + $0x150] sm:$0xff] %vm367_vm0, %v345_v42  ;;  %411 = vst.msk [vmem:[%s15541_s9 + $0x158] sm:$0xff] %vm367_vm0, %v346_v43  ;;  %v348_v45 = vld [vmem:[%s15532_s0 + $0x168] sm:$0xff]  ;;  %v349_v46 = vld [vmem:[%s15532_s0 + $0x170] sm:$0xff] }
  0x25   : > { %412 = vst.msk [vmem:[%s15541_s9 + $0x160] sm:$0xff] %vm367_vm0, %v347_v44  ;;  %v350_v47 = vld [vmem:[%s15532_s0 + $0x178] sm:$0xff]  ;;  %413 = vst.msk [vmem:[%s15541_s9 + $0x168] sm:$0xff] %vm367_vm0, %v348_v45  ;;  %v351_v48 = vld [vmem:[%s15532_s0 + $0x180] sm:$0xff] }
  0x26   : > { %414 = vst.msk [vmem:[%s15541_s9 + $0x170] sm:$0xff] %vm367_vm0, %v349_v46  ;;  %415 = vst.msk [vmem:[%s15541_s9 + $0x178] sm:$0xff] %vm367_vm0, %v350_v47  ;;  %v352_v49 = vld [vmem:[%s15532_s0 + $0x188] sm:$0xff]  ;;  %v353_v50 = vld [vmem:[%s15532_s0 + $0x190] sm:$0xff] }
  0x27   : > { %416 = vst.msk [vmem:[%s15541_s9 + $0x180] sm:$0xff] %vm367_vm0, %v351_v48  ;;  %417 = vst.msk [vmem:[%s15541_s9 + $0x188] sm:$0xff] %vm367_vm0, %v352_v49  ;;  %v354_v51 = vld [vmem:[%s15532_s0 + $0x198] sm:$0xff]  ;;  %v355_v52 = vld [vmem:[%s15532_s0 + $0x1a0] sm:$0xff] }
  0x28   : > { %418 = vst.msk [vmem:[%s15541_s9 + $0x190] sm:$0xff] %vm367_vm0, %v353_v50  ;;  %v356_v53 = vld [vmem:[%s15532_s0 + $0x1a8] sm:$0xff]  ;;  %419 = vst.msk [vmem:[%s15541_s9 + $0x198] sm:$0xff] %vm367_vm0, %v354_v51  ;;  %v357_v54 = vld [vmem:[%s15532_s0 + $0x1b0] sm:$0xff] }
  0x29   : > { %420 = vst.msk [vmem:[%s15541_s9 + $0x1a0] sm:$0xff] %vm367_vm0, %v355_v52  ;;  %421 = vst.msk [vmem:[%s15541_s9 + $0x1a8] sm:$0xff] %vm367_vm0, %v356_v53  ;;  %v358_v55 = vld [vmem:[%s15532_s0 + $0x1b8] sm:$0xff]  ;;  %v359_v56 = vld [vmem:[%s15532_s0 + $0x1c0] sm:$0xff] }
  0x2a   : > { %422 = vst.msk [vmem:[%s15541_s9 + $0x1b0] sm:$0xff] %vm367_vm0, %v357_v54  ;;  %423 = vst.msk [vmem:[%s15541_s9 + $0x1b8] sm:$0xff] %vm367_vm0, %v358_v55  ;;  %v360_v57 = vld [vmem:[%s15532_s0 + $0x1c8] sm:$0xff]  ;;  %v361_v58 = vld [vmem:[%s15532_s0 + $0x1d0] sm:$0xff] }
  0x2b   : > { %424 = vst.msk [vmem:[%s15541_s9 + $0x1c0] sm:$0xff] %vm367_vm0, %v359_v56  ;;  %v362_v59 = vld [vmem:[%s15532_s0 + $0x1d8] sm:$0xff]  ;;  %425 = vst.msk [vmem:[%s15541_s9 + $0x1c8] sm:$0xff] %vm367_vm0, %v360_v57  ;;  %v363_v60 = vld [vmem:[%s15532_s0 + $0x1e0] sm:$0xff] }
  0x2c   : > { %426 = vst.msk [vmem:[%s15541_s9 + $0x1d0] sm:$0xff] %vm367_vm0, %v361_v58  ;;  %427 = vst.msk [vmem:[%s15541_s9 + $0x1d8] sm:$0xff] %vm367_vm0, %v362_v59  ;;  %v364_v61 = vld [vmem:[%s15532_s0 + $0x1e8] sm:$0xff]  ;;  %v365_v62 = vld [vmem:[%s15532_s0 + $0x1f0] sm:$0xff] }
  0x2d   : > { %428 = vst.msk [vmem:[%s15541_s9 + $0x1e0] sm:$0xff] %vm367_vm0, %v363_v60  ;;  %429 = vst.msk [vmem:[%s15541_s9 + $0x1e8] sm:$0xff] %vm367_vm0, %v364_v61  ;;  %v366_v63 = vld [vmem:[%s15532_s0 + $0x1f8] sm:$0xff] }
  0x2e   : > { %430 = vst.msk [vmem:[%s15541_s9 + $0x1f0] sm:$0xff] %vm367_vm0, %v365_v62  ;;  %431 = vst.msk [vmem:[%s15541_s9 + $0x1f8] sm:$0xff] %vm367_vm0, %v366_v63 }
  0x2f PF: > { %v9342_v0 = vld [vmem:[%s15541_s9] sm:$0xff]  ;;  %vm496_vm1 = vcmask 80896   ;;  %v9352_v2 = vld [vmem:[%s15541_s9 + $0x8] sm:$0xff]  ;;  %v9422_v22 = vld [vmem:[%s15541_s9 + $0x190] sm:$0xff]  ;;  %vm2369_vm2 = vcmask 1045504   ;;  %vm8828_vm3 = vmmov 1  }
  0x30   : > { %v9347_v1 = vld [vmem:[%s15541_s9 + $0x10] sm:$0xff]  ;;  %v497_v3 = vsel %vm496_vm1, %v9342_v0, -inf  ;;  %v9361_v5 = vld [vmem:[%s15541_s9 + $0x18] sm:$0xff]  ;;  %v500_v6 = vsel %vm496_vm1, %v9352_v2, -inf  ;;  %v9398_v16 = vld [vmem:[%s15541_s9 + $0x180] sm:$0xff]  ;;  %v647_v28 = vsel %vm496_vm1, %v9422_v22, -inf }
  0x31   : > { %v503_v4 = vsel %vm496_vm1, %v9347_v1, -inf  ;;  %498 = vmax.xlane.f32.xlu0 %v497_v3  ;;  %v506_v7 = vsel %vm496_vm1, %v9361_v5, -inf  ;;  %v9370_v8 = vld [vmem:[%s15541_s9 + $0x20] sm:$0xff]  ;;  %v9375_v9 = vld [vmem:[%s15541_s9 + $0x28] sm:$0xff]  ;;  %v641_v18 = vsel %vm496_vm1, %v9398_v16, -inf  ;;  %v9427_v23 = vld [vmem:[%s15541_s9 + $0x198] sm:$0xff] }
  0x32   : > { %504 = vmax.xlane.f32.xlu1 %v503_v4  ;;  %v509_v10 = vsel %vm496_vm1, %v9370_v8, -inf  ;;  %v512_v11 = vsel %vm496_vm1, %v9375_v9, -inf  ;;  %v9384_v12 = vld [vmem:[%s15541_s9 + $0x30] sm:$0xff]  ;;  %v9389_v13 = vld [vmem:[%s15541_s9 + $0x38] sm:$0xff]  ;;  %v9403_v17 = vld [vmem:[%s15541_s9 + $0x188] sm:$0xff]  ;;  %v650_v29 = vsel %vm496_vm1, %v9427_v23, -inf }
  0x33   : > { %v515_v14 = vsel %vm496_vm1, %v9384_v12, -inf  ;;  %v518_v15 = vsel %vm496_vm1, %v9389_v13, -inf  ;;  %v644_v19 = vsel %vm496_vm1, %v9403_v17, -inf  ;;  %v9412_v20 = vld [vmem:[%s15541_s9 + $0x40] sm:$0xff]  ;;  %v9417_v21 = vld [vmem:[%s15541_s9 + $0x48] sm:$0xff]  ;;  %v9478_v38 = vld [vmem:[%s15541_s9 + $0x1b0] sm:$0xff] }
  0x34   : > { %v521_v24 = vsel %vm496_vm1, %v9412_v20, -inf  ;;  %v524_v25 = vsel %vm496_vm1, %v9417_v21, -inf  ;;  %v9436_v26 = vld [vmem:[%s15541_s9 + $0x50] sm:$0xff]  ;;  %v9441_v27 = vld [vmem:[%s15541_s9 + $0x58] sm:$0xff]  ;;  %v9452_v31 = vld [vmem:[%s15541_s9 + $0x1a0] sm:$0xff]  ;;  %v659_v43 = vsel %vm496_vm1, %v9478_v38, -inf }
  0x35   : > { %501 = vmax.xlane.f32.xlu0 %v500_v6  ;;  %v527_v30 = vsel %vm496_vm1, %v9436_v26, -inf  ;;  %v530_v32 = vsel %vm496_vm1, %v9441_v27, -inf  ;;  %v9459_v33 = vld [vmem:[%s15541_s9 + $0x1a8] sm:$0xff]  ;;  %v9464_v34 = vld [vmem:[%s15541_s9 + $0x60] sm:$0xff]  ;;  %v653_v35 = vsel %vm496_vm1, %v9452_v31, -inf  ;;  %v9483_v39 = vld [vmem:[%s15541_s9 + $0x1b8] sm:$0xff] }
  0x36   : > { %507 = vmax.xlane.f32.xlu1 %v506_v7  ;;  %v9471_v36 = vld [vmem:[%s15541_s9 + $0x68] sm:$0xff]  ;;  %v656_v37 = vsel %vm496_vm1, %v9459_v33, -inf  ;;  %v533_v40 = vsel %vm496_vm1, %v9464_v34, -inf  ;;  %v9492_v42 = vld [vmem:[%s15541_s9 + $0x70] sm:$0xff]  ;;  %v662_v44 = vsel %vm496_vm1, %v9483_v39, -inf  ;;  %v9501_v45 = vld [vmem:[%s15541_s9 + $0x78] sm:$0xff] }
  0x37   : > { %v536_v41 = vsel %vm496_vm1, %v9471_v36, -inf  ;;  %v9506_v46 = vld [vmem:[%s15541_s9 + $0x1c0] sm:$0xff]  ;;  %v9511_v47 = vld [vmem:[%s15541_s9 + $0x1c8] sm:$0xff]  ;;  %v539_v50 = vsel %vm496_vm1, %v9492_v42, -inf  ;;  %v9528_v51 = vld [vmem:[%s15541_s9 + $0x1d0] sm:$0xff]  ;;  %v542_v52 = vsel %vm496_vm1, %v9501_v45, -inf }
  0x38   : > { %v9516_v48 = vld [vmem:[%s15541_s9 + $0x80] sm:$0xff]  ;;  %v9521_v49 = vld [vmem:[%s15541_s9 + $0x88] sm:$0xff]  ;;  %v9535_v53 = vld [vmem:[%s15541_s9 + $0x1d8] sm:$0xff]  ;;  %v665_v54 = vsel %vm496_vm1, %v9506_v46, -inf  ;;  %v668_v55 = vsel %vm496_vm1, %v9511_v47, -inf  ;;  %v671_v58 = vsel %vm496_vm1, %v9528_v51, -inf }
  0x39   : > { %510 = vmax.xlane.f32.xlu0 %v509_v10  ;;  %v545_v56 = vsel %vm496_vm1, %v9516_v48, -inf  ;;  %v548_v57 = vsel %vm496_vm1, %v9521_v49, -inf  ;;  %v674_v59 = vsel %vm496_vm1, %v9535_v53, -inf  ;;  %v9552_v60 = vld [vmem:[%s15541_s9 + $0x90] sm:$0xff]  ;;  %v9557_v61 = vld [vmem:[%s15541_s9 + $0x98] sm:$0xff]  ;;  %v9566_v3 = vld [vmem:[%s15541_s9 + $0x1e0] sm:$0xff] }
  0x3a   : > { %513 = vmax.xlane.f32.xlu1 %v512_v11  ;;  %v551_v62 = vsel %vm496_vm1, %v9552_v60, -inf  ;;  %v554_v63 = vsel %vm496_vm1, %v9557_v61, -inf  ;;  %v9571_v4 = vld [vmem:[%s15541_s9 + $0x1e8] sm:$0xff]  ;;  %v677_v6 = vsel %vm496_vm1, %v9566_v3, -inf  ;;  %v9580_v10 = vld [vmem:[%s15541_s9 + $0xa0] sm:$0xff]  ;;  %vm9996_vm4 = vmpackc.low %vm2369_vm2, %vm8828_vm3  ;;  %s8830_s11 = smov 10  }
  0x3b   : > { %v680_v7 = vsel %vm496_vm1, %v9571_v4, -inf  ;;  %v9585_v11 = vld [vmem:[%s15541_s9 + $0xa8] sm:$0xff]  ;;  %vm1470_vm5 = vcmask 1046528   ;;  %vm1277_vm6 = vcmask 1040384   ;;  %s8831_s12 = smov 20   ;;  %vm2111_vm7 = vcmask 162816  }
  0x3c   : > { %vm2176_vm8 = vcmask 244736   ;;  %vm7394_vm14 = vmneg %vm1277_vm6 }
  0x3d   : > { %516 = vmax.xlane.f32.xlu0 %v515_v14  ;;  %v557_v14 = vsel %vm496_vm1, %v9580_v10, -inf  ;;  %vm12819_vm0 = vmpackc.low %vm8828_vm3, %vm7394_vm14 }
  0x3e   : > { %519 = vmax.xlane.f32.xlu1 %v518_v15  ;;  %v560_v15 = vsel %vm496_vm1, %v9585_v11, -inf }
  0x41   : > { %642 = vmax.xlane.f32.xlu0 %v641_v18  ;;  %v9594_v18 = vld [vmem:[%s15541_s9 + $0x1f0] sm:$0xff] }
  0x42   : > { %645 = vmax.xlane.f32.xlu1 %v644_v19  ;;  %v9599_v19 = vld [vmem:[%s15541_s9 + $0x1f8] sm:$0xff] }
  0x45   : > { %522 = vmax.xlane.f32.xlu0 %v521_v24  ;;  %v683_v24 = vsel %vm496_vm1, %v9594_v18, -inf }
  0x46   : > { %525 = vmax.xlane.f32.xlu1 %v524_v25  ;;  %v686_v25 = vsel %vm496_vm1, %v9599_v19, -inf }
  0x49   : > { %648 = vmax.xlane.f32.xlu0 %v647_v28  ;;  %v9608_v28 = vld [vmem:[%s15541_s9 + $0xb0] sm:$0xff] }
  0x4a   : > { %651 = vmax.xlane.f32.xlu1 %v650_v29  ;;  %v9613_v29 = vld [vmem:[%s15541_s9 + $0xb8] sm:$0xff] }
  0x4d   : > { %528 = vmax.xlane.f32.xlu0 %v527_v30  ;;  %v563_v30 = vsel %vm496_vm1, %v9608_v28, -inf }
  0x4e   : > { %531 = vmax.xlane.f32.xlu1 %v530_v32  ;;  %v566_v32 = vsel %vm496_vm1, %v9613_v29, -inf }
  0x51   : > { %654 = vmax.xlane.f32.xlu0 %v653_v35  ;;  %v9622_v35 = vld [vmem:[%s15541_s9 + $0xc0] sm:$0xff] }
  0x52   : > { %657 = vmax.xlane.f32.xlu1 %v656_v37  ;;  %v9627_v37 = vld [vmem:[%s15541_s9 + $0xc8] sm:$0xff] }
  0x55   : > { %534 = vmax.xlane.f32.xlu0 %v533_v40  ;;  %v569_v40 = vsel %vm496_vm1, %v9622_v35, -inf }
  0x56   : > { %537 = vmax.xlane.f32.xlu1 %v536_v41  ;;  %v572_v41 = vsel %vm496_vm1, %v9627_v37, -inf }
  0x59   : > { %660 = vmax.xlane.f32.xlu0 %v659_v43  ;;  %v9636_v43 = vld [vmem:[%s15541_s9 + $0xd0] sm:$0xff] }
  0x5a   : > { %663 = vmax.xlane.f32.xlu1 %v662_v44  ;;  %v9641_v44 = vld [vmem:[%s15541_s9 + $0xd8] sm:$0xff] }
  0x5d   : > { %540 = vmax.xlane.f32.xlu0 %v539_v50  ;;  %v575_v50 = vsel %vm496_vm1, %v9636_v43, -inf }
  0x5e   : > { %543 = vmax.xlane.f32.xlu1 %v542_v52  ;;  %v578_v52 = vsel %vm496_vm1, %v9641_v44, -inf }
  0x61   : > { %666 = vmax.xlane.f32.xlu0 %v665_v54  ;;  %v9650_v54 = vld [vmem:[%s15541_s9 + $0xe0] sm:$0xff] }
  0x62   : > { %669 = vmax.xlane.f32.xlu1 %v668_v55  ;;  %v9655_v55 = vld [vmem:[%s15541_s9 + $0xe8] sm:$0xff] }
  0x65   : > { %546 = vmax.xlane.f32.xlu0 %v545_v56  ;;  %v581_v56 = vsel %vm496_vm1, %v9650_v54, -inf }
  0x66   : > { %549 = vmax.xlane.f32.xlu1 %v548_v57  ;;  %v584_v57 = vsel %vm496_vm1, %v9655_v55, -inf }
  0x69   : > { %672 = vmax.xlane.f32.xlu0 %v671_v58  ;;  %v462_v58 = vld [vmem:[%s15541_s9 + $0xf0] sm:$0xff] }
  0x6a   : > { %675 = vmax.xlane.f32.xlu1 %v674_v59  ;;  %v463_v59 = vld [vmem:[%s15541_s9 + $0xf8] sm:$0xff] }
  0x6d   : > { %552 = vmax.xlane.f32.xlu0 %v551_v62  ;;  %v587_v62 = vsel %vm496_vm1, %v462_v58, -inf }
  0x6e   : > { %555 = vmax.xlane.f32.xlu1 %v554_v63  ;;  %v590_v63 = vsel %vm496_vm1, %v463_v59, -inf }
  0x71   : > { %678 = vmax.xlane.f32.xlu0 %v677_v6  ;;  %v464_v6 = vld [vmem:[%s15541_s9 + $0x100] sm:$0xff] }
  0x72   : > { %681 = vmax.xlane.f32.xlu1 %v680_v7  ;;  %v465_v7 = vld [vmem:[%s15541_s9 + $0x108] sm:$0xff] }
  0x75   : > { %558 = vmax.xlane.f32.xlu0 %v557_v14  ;;  %v593_v14 = vsel %vm496_vm1, %v464_v6, -inf }
  0x76   : > { %561 = vmax.xlane.f32.xlu1 %v560_v15  ;;  %v596_v15 = vsel %vm496_vm1, %v465_v7, -inf }
  0x79   : > { %684 = vmax.xlane.f32.xlu0 %v683_v24  ;;  %v466_v24 = vld [vmem:[%s15541_s9 + $0x110] sm:$0xff] }
  0x7a   : > { %687 = vmax.xlane.f32.xlu1 %v686_v25  ;;  %v467_v25 = vld [vmem:[%s15541_s9 + $0x118] sm:$0xff] }
  0x7d   : > { %564 = vmax.xlane.f32.xlu0 %v563_v30  ;;  %v599_v30 = vsel %vm496_vm1, %v466_v24, -inf }
  0x7e   : > { %567 = vmax.xlane.f32.xlu1 %v566_v32  ;;  %v602_v32 = vsel %vm496_vm1, %v467_v25, -inf }
  0x81   : > { %570 = vmax.xlane.f32.xlu0 %v569_v40  ;;  %v468_v40 = vld [vmem:[%s15541_s9 + $0x120] sm:$0xff] }
  0x82   : > { %573 = vmax.xlane.f32.xlu1 %v572_v41  ;;  %v469_v41 = vld [vmem:[%s15541_s9 + $0x128] sm:$0xff] }
  0x85   : > { %576 = vmax.xlane.f32.xlu0 %v575_v50  ;;  %v605_v50 = vsel %vm496_vm1, %v468_v40, -inf }
  0x86   : > { %579 = vmax.xlane.f32.xlu1 %v578_v52  ;;  %v608_v52 = vsel %vm496_vm1, %v469_v41, -inf }
  0x89   : > { %582 = vmax.xlane.f32.xlu0 %v581_v56  ;;  %v470_v56 = vld [vmem:[%s15541_s9 + $0x130] sm:$0xff] }
  0x8a   : > { %585 = vmax.xlane.f32.xlu1 %v584_v57  ;;  %v471_v57 = vld [vmem:[%s15541_s9 + $0x138] sm:$0xff]  ;;  %v611_v58 = vsel %vm496_vm1, %v470_v56, -inf }
  0x8b   : > { %v614_v59 = vsel %vm496_vm1, %v471_v57, -inf }
  0x8d   : > { %588 = vmax.xlane.f32.xlu0 %v587_v62 }
  0x8e   : > { %591 = vmax.xlane.f32.xlu1 %v590_v63 }
  0x91   : > { %594 = vmax.xlane.f32.xlu0 %v593_v14 }
  0x92   : > { %597 = vmax.xlane.f32.xlu1 %v596_v15 }
  0x95   : > { %600 = vmax.xlane.f32.xlu0 %v599_v30 }
  0x96   : > { %603 = vmax.xlane.f32.xlu1 %v602_v32 }
  0x99   : > { %606 = vmax.xlane.f32.xlu0 %v605_v50 }
  0x9a   : > { %609 = vmax.xlane.f32.xlu1 %v608_v52 }
  0x9d   : > { %612 = vmax.xlane.f32.xlu0 %v611_v58 }
  0x9e   : > { %615 = vmax.xlane.f32.xlu1 %v614_v59 }
  0xbe   : > { %v499_v62 = vpop.xlane.xlu0 %498 }
  0xbf   : > { %v505_v63 = vpop.xlane.xlu1 %504  ;;  %v689_v6 = vsub.f32 %v9342_v0, %v499_v62 }
  0xc0   : > { %v691_v7 = vsub.f32 %v9347_v1, %v505_v63 }
  0xc1   : > { %v753_v14 = vmul.f32 1.442695, %v689_v6 }
  0xc2   : > { %v757_v15 = vmul.f32 1.442695, %v691_v7  ;;  %v502_v24 = vpop.xlane.xlu0 %501 }
  0xc3   : > { %v508_v25 = vpop.xlane.xlu1 %507  ;;  %8542 = vpow2.f32 %v753_v14  ;;  %v690_v30 = vsub.f32 %v9352_v2, %v502_v24 }
  0xc4   : > { %v692_v32 = vsub.f32 %v9361_v5, %v508_v25  ;;  %8544 = vpow2.f32 %v757_v15 }
  0xc5   : > { %v755_v40 = vmul.f32 1.442695, %v690_v30 }
  0xc6   : > { %v759_v41 = vmul.f32 1.442695, %v692_v32  ;;  %v511_v50 = vpop.xlane.xlu0 %510 }
  0xc7   : > { %v514_v52 = vpop.xlane.xlu1 %513  ;;  %8546 = vpow2.f32 %v755_v40  ;;  %v693_v56 = vsub.f32 %v9370_v8, %v511_v50 }
  0xc8   : > { %v694_v0 = vsub.f32 %v9375_v9, %v514_v52  ;;  %8548 = vpow2.f32 %v759_v41 }
  0xc9   : > { %v761_v1 = vmul.f32 1.442695, %v693_v56 }
  0xca   : > { %v763_v57 = vmul.f32 1.442695, %v694_v0  ;;  %v517_v58 = vpop.xlane.xlu0 %516 }
  0xcb   : > { %v520_v59 = vpop.xlane.xlu1 %519  ;;  %8550 = vpow2.f32 %v761_v1  ;;  %v695_v2 = vsub.f32 %v9384_v12, %v517_v58 }
  0xcc   : > { %v696_v5 = vsub.f32 %v9389_v13, %v520_v59  ;;  %8552 = vpow2.f32 %v763_v57 }
  0xcd   : > { %v9709_v62 = vpop.eup %8542  ;;  %v765_v63 = vmul.f32 1.442695, %v695_v2 }
  0xce   : > { %v767_v6 = vmul.f32 1.442695, %v696_v5  ;;  %v9711_v7 = vpop.eup %8544  ;;  %v643_v8 = vpop.xlane.xlu0 %642  ;;  %v881_v9 = vsel %vm496_vm1, %v9709_v62, 0.0 }
  0xcf   : > { %v646_v14 = vpop.xlane.xlu1 %645  ;;  %8554 = vpow2.f32 %v765_v63  ;;  %v737_v15 = vsub.f32 %v9398_v16, %v643_v8  ;;  %882 = vadd.xlane.f32.xlu0 %v881_v9  ;;  %v887_v13 = vsel %vm496_vm1, %v9711_v7, 0.0 }
  0xd0   : > { %v738_v12 = vsub.f32 %v9403_v17, %v646_v14  ;;  %8556 = vpow2.f32 %v767_v6 }
  0xd1   : > { %v9719_v24 = vpop.eup %8546  ;;  %v849_v25 = vmul.f32 1.442695, %v737_v15 }
  0xd2   : > { %v851_v30 = vmul.f32 1.442695, %v738_v12  ;;  %v9721_v32 = vpop.eup %8548  ;;  %v523_v40 = vpop.xlane.xlu0 %522  ;;  %v884_v41 = vsel %vm496_vm1, %v9719_v24, 0.0 }
  0xd3   : > { %v526_v50 = vpop.xlane.xlu1 %525  ;;  %8558 = vpow2.f32 %v849_v25  ;;  %v697_v16 = vsub.f32 %v9412_v20, %v523_v40  ;;  %888 = vadd.xlane.f32.xlu0 %v887_v13  ;;  %885 = vadd.xlane.f32.xlu1 %v884_v41  ;;  %v890_v52 = vsel %vm496_vm1, %v9721_v32, 0.0 }
  0xd4   : > { %v698_v17 = vsub.f32 %v9417_v21, %v526_v50  ;;  %8560 = vpow2.f32 %v851_v30 }
  0xd5   : > { %v9729_v56 = vpop.eup %8550  ;;  %v769_v0 = vmul.f32 1.442695, %v697_v16 }
  0xd6   : > { %v771_v1 = vmul.f32 1.442695, %v698_v17  ;;  %v9731_v57 = vpop.eup %8552  ;;  %v649_v58 = vpop.xlane.xlu0 %648  ;;  %v893_v59 = vsel %vm496_vm1, %v9729_v56, 0.0 }
  0xd7   : > { %v652_v2 = vpop.xlane.xlu1 %651  ;;  %8562 = vpow2.f32 %v769_v0  ;;  %v739_v20 = vsub.f32 %v9422_v22, %v649_v58  ;;  %891 = vadd.xlane.f32.xlu1 %v890_v52  ;;  %894 = vadd.xlane.f32.xlu0 %v893_v59  ;;  %v896_v5 = vsel %vm496_vm1, %v9731_v57, 0.0 }
  0xd8   : > { %v740_v21 = vsub.f32 %v9427_v23, %v652_v2  ;;  %8564 = vpow2.f32 %v771_v1 }
  0xd9   : > { %v9739_v63 = vpop.eup %8554  ;;  %v853_v6 = vmul.f32 1.442695, %v739_v20 }
  0xda   : > { %v855_v8 = vmul.f32 1.442695, %v740_v21  ;;  %v9741_v9 = vpop.eup %8556  ;;  %v529_v14 = vpop.xlane.xlu0 %528  ;;  %v899_v15 = vsel %vm496_vm1, %v9739_v63, 0.0 }
  0xdb   : > { %v532_v12 = vpop.xlane.xlu1 %531  ;;  %8566 = vpow2.f32 %v853_v6  ;;  %v699_v22 = vsub.f32 %v9436_v26, %v529_v14  ;;  %897 = vadd.xlane.f32.xlu1 %v896_v5  ;;  %900 = vadd.xlane.f32.xlu0 %v899_v15  ;;  %v902_v13 = vsel %vm496_vm1, %v9741_v9, 0.0 }
  0xdc   : > { %v700_v23 = vsub.f32 %v9441_v27, %v532_v12  ;;  %8568 = vpow2.f32 %v855_v8 }
  0xdd   : > { %v9749_v25 = vpop.eup %8558  ;;  %v773_v30 = vmul.f32 1.442695, %v699_v22 }
  0xde   : > { %v775_v40 = vmul.f32 1.442695, %v700_v23  ;;  %v9751_v41 = vpop.eup %8560  ;;  %v655_v50 = vpop.xlane.xlu0 %654  ;;  %v1025_v16 = vsel %vm496_vm1, %v9749_v25, 0.0 }
  0xdf   : > { %v658_v17 = vpop.xlane.xlu1 %657  ;;  %8570 = vpow2.f32 %v773_v30  ;;  %v741_v26 = vsub.f32 %v9452_v31, %v655_v50  ;;  %903 = vadd.xlane.f32.xlu1 %v902_v13  ;;  %1026 = vadd.xlane.f32.xlu0 %v1025_v16  ;;  %v1028_v52 = vsel %vm496_vm1, %v9751_v41, 0.0 }
  0xe0   : > { %v742_v27 = vsub.f32 %v9459_v33, %v658_v17  ;;  %8572 = vpow2.f32 %v775_v40 }
  0xe1   : > { %v9759_v0 = vpop.eup %8562  ;;  %v857_v1 = vmul.f32 1.442695, %v741_v26 }
  0xe2   : > { %v859_v58 = vmul.f32 1.442695, %v742_v27  ;;  %v9761_v59 = vpop.eup %8564  ;;  %v535_v2 = vpop.xlane.xlu0 %534  ;;  %v905_v20 = vsel %vm496_vm1, %v9759_v0, 0.0 }
  0xe3   : > { %v538_v21 = vpop.xlane.xlu1 %537  ;;  %8574 = vpow2.f32 %v857_v1  ;;  %v701_v31 = vsub.f32 %v9464_v34, %v535_v2  ;;  %1029 = vadd.xlane.f32.xlu1 %v1028_v52  ;;  %906 = vadd.xlane.f32.xlu0 %v905_v20  ;;  %v908_v5 = vsel %vm496_vm1, %v9761_v59, 0.0 }
  0xe4   : > { %v702_v33 = vsub.f32 %v9471_v36, %v538_v21  ;;  %8576 = vpow2.f32 %v859_v58 }
  0xe5   : > { %v9769_v6 = vpop.eup %8566  ;;  %v777_v8 = vmul.f32 1.442695, %v701_v31 }
  0xe6   : > { %v779_v14 = vmul.f32 1.442695, %v702_v33  ;;  %v9771_v15 = vpop.eup %8568  ;;  %v661_v12 = vpop.xlane.xlu0 %660  ;;  %v1031_v22 = vsel %vm496_vm1, %v9769_v6, 0.0 }
  0xe7   : > { %v664_v23 = vpop.xlane.xlu1 %663  ;;  %8578 = vpow2.f32 %v777_v8  ;;  %v743_v34 = vsub.f32 %v9478_v38, %v661_v12  ;;  %909 = vadd.xlane.f32.xlu1 %v908_v5  ;;  %1032 = vadd.xlane.f32.xlu0 %v1031_v22  ;;  %v1034_v13 = vsel %vm496_vm1, %v9771_v15, 0.0 }
  0xe8   : > { %v744_v36 = vsub.f32 %v9483_v39, %v664_v23  ;;  %8580 = vpow2.f32 %v779_v14 }
  0xe9   : > { %v9779_v30 = vpop.eup %8570  ;;  %v861_v40 = vmul.f32 1.442695, %v743_v34 }
  0xea   : > { %v863_v50 = vmul.f32 1.442695, %v744_v36  ;;  %v9781_v16 = vpop.eup %8572  ;;  %v541_v17 = vpop.xlane.xlu0 %540  ;;  %v911_v26 = vsel %vm496_vm1, %v9779_v30, 0.0 }
  0xeb   : > { %v544_v27 = vpop.xlane.xlu1 %543  ;;  %8582 = vpow2.f32 %v861_v40  ;;  %v703_v38 = vsub.f32 %v9492_v42, %v541_v17  ;;  %1035 = vadd.xlane.f32.xlu1 %v1034_v13  ;;  %912 = vadd.xlane.f32.xlu0 %v911_v26  ;;  %v914_v52 = vsel %vm496_vm1, %v9781_v16, 0.0 }
  0xec   : > { %v704_v39 = vsub.f32 %v9501_v45, %v544_v27  ;;  %8584 = vpow2.f32 %v863_v50 }
  0xed   : > { %v9789_v1 = vpop.eup %8574  ;;  %v781_v58 = vmul.f32 1.442695, %v703_v38 }
  0xee   : > { %v783_v2 = vmul.f32 1.442695, %v704_v39  ;;  %v9791_v20 = vpop.eup %8576  ;;  %v667_v21 = vpop.xlane.xlu0 %666  ;;  %v1037_v31 = vsel %vm496_vm1, %v9789_v1, 0.0 }
  0xef   : > { %v670_v33 = vpop.xlane.xlu1 %669  ;;  %8586 = vpow2.f32 %v781_v58  ;;  %v745_v42 = vsub.f32 %v9506_v46, %v667_v21  ;;  %915 = vadd.xlane.f32.xlu1 %v914_v52  ;;  %1038 = vadd.xlane.f32.xlu0 %v1037_v31  ;;  %v1040_v5 = vsel %vm496_vm1, %v9791_v20, 0.0 }
  0xf0   : > { %v746_v45 = vsub.f32 %v9511_v47, %v670_v33  ;;  %8588 = vpow2.f32 %v783_v2 }
  0xf1   : > { %v9799_v8 = vpop.eup %8578  ;;  %v865_v14 = vmul.f32 1.442695, %v745_v42 }
  0xf2   : > { %v867_v12 = vmul.f32 1.442695, %v746_v45  ;;  %v9801_v22 = vpop.eup %8580  ;;  %v547_v23 = vpop.xlane.xlu0 %546  ;;  %v917_v34 = vsel %vm496_vm1, %v9799_v8, 0.0 }
  0xf3   : > { %v550_v36 = vpop.xlane.xlu1 %549  ;;  %8590 = vpow2.f32 %v865_v14  ;;  %v705_v46 = vsub.f32 %v9516_v48, %v547_v23  ;;  %1041 = vadd.xlane.f32.xlu1 %v1040_v5  ;;  %918 = vadd.xlane.f32.xlu0 %v917_v34  ;;  %v920_v13 = vsel %vm496_vm1, %v9801_v22, 0.0 }
  0xf4   : > { %v706_v47 = vsub.f32 %v9521_v49, %v550_v36  ;;  %8592 = vpow2.f32 %v867_v12 }
  0xf5   : > { %v9809_v40 = vpop.eup %8582  ;;  %v785_v50 = vmul.f32 1.442695, %v705_v46 }
  0xf6   : > { %v787_v17 = vmul.f32 1.442695, %v706_v47  ;;  %v9811_v26 = vpop.eup %8584  ;;  %v673_v27 = vpop.xlane.xlu0 %672  ;;  %v1043_v38 = vsel %vm496_vm1, %v9809_v40, 0.0 }
  0xf7   : > { %v676_v39 = vpop.xlane.xlu1 %675  ;;  %8594 = vpow2.f32 %v785_v50  ;;  %v747_v48 = vsub.f32 %v9528_v51, %v673_v27  ;;  %921 = vadd.xlane.f32.xlu1 %v920_v13  ;;  %1044 = vadd.xlane.f32.xlu0 %v1043_v38  ;;  %v1046_v52 = vsel %vm496_vm1, %v9811_v26, 0.0 }
  0xf8   : > { %v748_v49 = vsub.f32 %v9535_v53, %v676_v39  ;;  %8596 = vpow2.f32 %v787_v17 }
  0xf9   : > { %v9819_v58 = vpop.eup %8586  ;;  %v869_v2 = vmul.f32 1.442695, %v747_v48 }
  0xfa   : > { %v871_v21 = vmul.f32 1.442695, %v748_v49  ;;  %v9821_v31 = vpop.eup %8588  ;;  %v923_v33 = vsel %vm496_vm1, %v9819_v58, 0.0  ;;  %v553_v42 = vpop.xlane.xlu0 %552 }
  0xfb   : > { %15728 = vst [vmem:[#allocation2_spill] sm:$0xff] %v9821_v31  ;;  %v556_v45 = vpop.xlane.xlu1 %555  ;;  %8598 = vpow2.f32 %v869_v2  ;;  %1047 = vadd.xlane.f32.xlu1 %v1046_v52  ;;  %924 = vadd.xlane.f32.xlu0 %v923_v33  ;;  %v707_v51 = vsub.f32 %v9552_v60, %v553_v42  ;;  %v926_v5 = vsel %vm496_vm1, %v9821_v31, 0.0  ;;  %v472_v2 = vld [vmem:[%s15541_s9 + $0x140] sm:$0xff] }
  0xfc   : > { %v708_v53 = vsub.f32 %v9557_v61, %v556_v45  ;;  %8600 = vpow2.f32 %v871_v21 }
  0xfd   : > { %v9829_v14 = vpop.eup %8590  ;;  %v789_v12 = vmul.f32 1.442695, %v707_v51 }
  0xfe   : > { %15729 = vst [vmem:[#allocation3_spill] sm:$0xff] %v9829_v14  ;;  %v9831_v23 = vpop.eup %8592  ;;  %v1049_v34 = vsel %vm496_vm1, %v9829_v14, 0.0  ;;  %v791_v36 = vmul.f32 1.442695, %v708_v53  ;;  %v679_v46 = vpop.xlane.xlu0 %678 }
  0xff   : > { %15730 = vst [vmem:[#allocation4_spill] sm:$0xff] %v9831_v23  ;;  %v682_v47 = vpop.xlane.xlu1 %681  ;;  %8602 = vpow2.f32 %v789_v12  ;;  %927 = vadd.xlane.f32.xlu1 %v926_v5  ;;  %1050 = vadd.xlane.f32.xlu0 %v1049_v34  ;;  %v749_v60 = vsub.f32 %v9566_v3, %v679_v46  ;;  %v1052_v13 = vsel %vm496_vm1, %v9831_v23, 0.0  ;;  %v617_v5 = vsel %vm496_vm1, %v472_v2, -inf }
 0x100   : > { %v750_v61 = vsub.f32 %v9571_v4, %v682_v47  ;;  %8604 = vpow2.f32 %v791_v36  ;;  %v473_v36 = vld [vmem:[%s15541_s9 + $0x148] sm:$0xff] }
 0x101   : > { %v9839_v50 = vpop.eup %8594  ;;  %v873_v17 = vmul.f32 1.442695, %v749_v60  ;;  %v620_v60 = vsel %vm496_vm1, %v473_v36, -inf }
 0x102   : > { %15731 = vst [vmem:[#allocation5_spill] sm:$0xff] %v9839_v50  ;;  %v9841_v27 = vpop.eup %8596  ;;  %v929_v38 = vsel %vm496_vm1, %v9839_v50, 0.0  ;;  %v559_v39 = vpop.xlane.xlu0 %558  ;;  %v875_v3 = vmul.f32 1.442695, %v750_v61 }
 0x103   : > { %15732 = vst [vmem:[#allocation6_spill] sm:$0xff] %v9841_v27  ;;  %v562_v48 = vpop.xlane.xlu1 %561  ;;  %8606 = vpow2.f32 %v873_v17  ;;  %1053 = vadd.xlane.f32.xlu1 %v1052_v13  ;;  %930 = vadd.xlane.f32.xlu0 %v929_v38  ;;  %v709_v4 = vsub.f32 %v9580_v10, %v559_v39  ;;  %v932_v49 = vsel %vm496_vm1, %v9841_v27, 0.0 }
 0x104   : > { %v710_v42 = vsub.f32 %v9585_v11, %v562_v48  ;;  %8608 = vpow2.f32 %v875_v3  ;;  %v474_v48 = vld [vmem:[%s15541_s9 + $0x150] sm:$0xff] }
 0x105   : > { %v9848_v52 = vpop.eup %8598  ;;  %v793_v10 = vmul.f32 1.442695, %v709_v4  ;;  %v623_v4 = vsel %vm496_vm1, %v474_v48, -inf }
 0x106   : > { %15733 = vst [vmem:[#allocation7_spill] sm:$0xff] %v9848_v52  ;;  %v9853_v21 = vpop.eup %8600  ;;  %v1055_v33 = vsel %vm496_vm1, %v9848_v52, 0.0  ;;  %v685_v45 = vpop.xlane.xlu0 %684  ;;  %v795_v11 = vmul.f32 1.442695, %v710_v42 }
 0x107   : > { %15734 = vst [vmem:[#allocation8_spill] sm:$0xff] %v9853_v21  ;;  %933 = vadd.xlane.f32.xlu1 %v932_v49  ;;  %1056 = vadd.xlane.f32.xlu0 %v1055_v33  ;;  %v751_v51 = vsub.f32 %v9594_v18, %v685_v45  ;;  %v1058_v53 = vsel %vm496_vm1, %v9853_v21, 0.0  ;;  %v688_v12 = vpop.xlane.xlu1 %687  ;;  %8610 = vpow2.f32 %v793_v10  ;;  %v475_v33 = vld [vmem:[%s15541_s9 + $0x158] sm:$0xff] }
 0x108   : > { %v752_v47 = vsub.f32 %v9599_v19, %v688_v12  ;;  %8612 = vpow2.f32 %v795_v11  ;;  %v626_v10 = vsel %vm496_vm1, %v475_v33, -inf }
 0x109   : > { %v9862_v34 = vpop.eup %8602  ;;  %v877_v46 = vmul.f32 1.442695, %v751_v51 }
 0x10a   : > { %15735 = vst [vmem:[#allocation9_spill] sm:$0xff] %v9862_v34  ;;  %v9868_v18 = vpop.eup %8604  ;;  %v935_v61 = vsel %vm496_vm1, %v9862_v34, 0.0  ;;  %v879_v17 = vmul.f32 1.442695, %v752_v47  ;;  %v565_v49 = vpop.xlane.xlu0 %564  ;;  %v478_v47 = vld [vmem:[%s15541_s9 + $0x170] sm:$0xff] }
 0x10b   : > { %1059 = vadd.xlane.f32.xlu1 %v1058_v53  ;;  %618 = vmax.xlane.f32.xlu0 %v617_v5  ;;  %15736 = vst [vmem:[#allocation10_spill] sm:$0xff] %v9868_v18  ;;  %8614 = vpow2.f32 %v877_v46  ;;  %v938_v38 = vsel %vm496_vm1, %v9868_v18, 0.0  ;;  %v711_v42 = vsub.f32 %v9608_v28, %v565_v49  ;;  %v568_v53 = vpop.xlane.xlu1 %567 }
 0x10c   : > { %8616 = vpow2.f32 %v879_v17  ;;  %v712_v36 = vsub.f32 %v9613_v29, %v568_v53  ;;  %v635_v17 = vsel %vm496_vm1, %v478_v47, -inf }
 0x10d   : > { %v9873_v13 = vpop.eup %8606  ;;  %v797_v12 = vmul.f32 1.442695, %v711_v42 }
 0x10e   : > { %15737 = vst [vmem:[#allocation11_spill] sm:$0xff] %v9873_v13  ;;  %v1061_v19 = vsel %vm496_vm1, %v9873_v13, 0.0  ;;  %v9879_v39 = vpop.eup %8608  ;;  %v571_v29 = vpop.xlane.xlu0 %570 }
 0x10f   : > { %621 = vmax.xlane.f32.xlu1 %v620_v60  ;;  %936 = vadd.xlane.f32.xlu0 %v935_v61  ;;  %15738 = vst [vmem:[#allocation12_spill] sm:$0xff] %v9879_v39  ;;  %v1064_v3 = vsel %vm496_vm1, %v9879_v39, 0.0  ;;  %8618 = vpow2.f32 %v797_v12  ;;  %v799_v60 = vmul.f32 1.442695, %v712_v36 }
 0x111   : > { %v9887_v2 = vpop.eup %8610  ;;  %8620 = vpow2.f32 %v799_v60 }
 0x112   : > { %15739 = vst [vmem:[#allocation13_spill] sm:$0xff] %v9887_v2  ;;  %v9893_v45 = vpop.eup %8612  ;;  %v941_v51 = vsel %vm496_vm1, %v9887_v2, 0.0  ;;  %v9934_v36 = vpop.xlane.xlu0 %576 }
 0x113   : > { %939 = vadd.xlane.f32.xlu1 %v938_v38  ;;  %1062 = vadd.xlane.f32.xlu0 %v1061_v19  ;;  %15740 = vst [vmem:[#allocation14_spill] sm:$0xff] %v9893_v45  ;;  %v944_v11 = vsel %vm496_vm1, %v9893_v45, 0.0  ;;  %v476_v38 = vld [vmem:[%s15541_s9 + $0x160] sm:$0xff]  ;;  %v713_v19 = vsub.f32 %v9622_v35, %v571_v29  ;;  %v1208_v45 = vld [vmem:[%s15533_s1 + $0x38] sm:$0xff] }
 0x114   : > { %v629_v48 = vsel %vm496_vm1, %v476_v38, -inf }
 0x115   : > { %v9898_v5 = vpop.eup %8614  ;;  %v801_v49 = vmul.f32 1.442695, %v713_v19 }
 0x116   : > { %15741 = vst [vmem:[#allocation15_spill] sm:$0xff] %v9898_v5  ;;  %v1067_v28 = vsel %vm496_vm1, %v9898_v5, 0.0  ;;  %v9905_v46 = vpop.eup %8616 }
 0x117   : > { %1065 = vadd.xlane.f32.xlu1 %v1064_v3  ;;  %624 = vmax.xlane.f32.xlu0 %v623_v4  ;;  %15742 = vst [vmem:[#allocation16_spill] sm:$0xff] %v9905_v46  ;;  %v1070_v61 = vsel %vm496_vm1, %v9905_v46, 0.0  ;;  %v574_v3 = vpop.xlane.xlu1 %573  ;;  %v477_v4 = vld [vmem:[%s15541_s9 + $0x168] sm:$0xff]  ;;  %8622 = vpow2.f32 %v801_v49 }
 0x118   : > { %v714_v33 = vsub.f32 %v9627_v37, %v574_v3  ;;  %v632_v42 = vsel %vm496_vm1, %v477_v4, -inf  ;;  %v479_v37 = vld [vmem:[%s15541_s9 + $0x178] sm:$0xff] }
 0x11b   : > { %627 = vmax.xlane.f32.xlu1 %v626_v10  ;;  %942 = vadd.xlane.f32.xlu0 %v941_v51  ;;  %v9923_v10 = vpop.eup %8618  ;;  %v803_v51 = vmul.f32 1.442695, %v714_v33  ;;  %v9939_v47 = vpop.xlane.xlu1 %579 }
 0x11c   : > { %15743 = vst [vmem:[#allocation17_spill] sm:$0xff] %v9923_v10  ;;  %v947_v35 = vsel %vm496_vm1, %v9923_v10, 0.0  ;;  %v9927_v53 = vpop.eup %8620  ;;  %v716_v21 = vsub.f32 %v9641_v44, %v9939_v47 }
 0x11d   : > { %15744 = vst [vmem:[#allocation18_spill] sm:$0xff] %v9927_v53  ;;  %8624 = vpow2.f32 %v803_v51  ;;  %v950_v12 = vsel %vm496_vm1, %v9927_v53, 0.0 }
 0x11f   : > { %945 = vadd.xlane.f32.xlu1 %v944_v11  ;;  %1068 = vadd.xlane.f32.xlu0 %v1067_v28  ;;  %v638_v11 = vsel %vm496_vm1, %v479_v37, -inf  ;;  %v9949_v38 = vpop.xlane.xlu1 %585 }
 0x121   : > { %v9937_v28 = vpop.eup %8622 }
 0x122   : > { %15745 = vst [vmem:[#allocation19_spill] sm:$0xff] %v9937_v28  ;;  %v953_v60 = vsel %vm496_vm1, %v9937_v28, 0.0  ;;  %v1201_v28 = vld [vmem:[%s15533_s1] sm:$0xff] }
 0x123   : > { %1071 = vadd.xlane.f32.xlu1 %v1070_v61  ;;  %636 = vmax.xlane.f32.xlu0 %v635_v17  ;;  %v9943_v61 = vpop.xlane.xlu0 %582 }
 0x127   : > { %630 = vmax.xlane.f32.xlu1 %v629_v48  ;;  %v9945_v29 = vpop.eup %8624  ;;  %v9951_v19 = vpop.xlane.xlu0 %588 }
 0x128   : > { %15746 = vst [vmem:[#allocation20_spill] sm:$0xff] %v9945_v29  ;;  %v956_v17 = vsel %vm496_vm1, %v9945_v29, 0.0  ;;  %v9953_v48 = vpop.xlane.xlu1 %591  ;;  %v1204_v29 = vld [vmem:[%s15533_s1 + $0x18] sm:$0xff] }
 0x129   : > { %v8267_v53 = vpack.c.bf16 %v1204_v29, %v1201_v28  ;;  %v1207_v28 = vld [vmem:[%s15533_s1 + $0x30] sm:$0xff]  ;;  %v1210_v29 = vld [vmem:[%s15533_s1 + $0x48] sm:$0x3f] }
 0x12b   : > { %633 = vmax.xlane.f32.xlu1 %v632_v42  ;;  %v9955_v3 = vpop.xlane.xlu0 %594 }
 0x12c   : > { %v9957_v4 = vpop.xlane.xlu1 %597 }
 0x12f   : > { %948 = vadd.xlane.f32.xlu1 %v947_v35  ;;  %v9959_v49 = vpop.xlane.xlu0 %600 }
 0x130   : > { %v9961_v33 = vpop.xlane.xlu1 %603 }
 0x133   : > { %951 = vadd.xlane.f32.xlu1 %v950_v12  ;;  %v9963_v42 = vpop.xlane.xlu0 %606 }
 0x134   : > { %v9965_v51 = vpop.xlane.xlu1 %609 }
 0x137   : > { %639 = vmax.xlane.f32.xlu1 %v638_v11  ;;  %v9967_v35 = vpop.xlane.xlu0 %612  ;;  %v1202_v11 = vld [vmem:[%s15533_s1 + $0x8] sm:$0xff] }
 0x138   : > { %15747 = vst [vmem:[#allocation21_spill] sm:$0xff] %v9967_v35  ;;  %v9969_v12 = vpop.xlane.xlu1 %615 }
 0x139   : > { %15748 = vst [vmem:[#allocation22_spill] sm:$0xff] %v9969_v12  ;;  %v807_v12 = vmul.f32 1.442695, %v716_v21 }
 0x13b   : > { %954 = vadd.xlane.f32.xlu1 %v953_v60  ;;  %v1205_v60 = vld [vmem:[%s15533_s1 + $0x20] sm:$0xff] }
 0x13f   : > { %957 = vadd.xlane.f32.xlu1 %v956_v17  ;;  %v8265_v17 = vpack.c.bf16 %v1205_v60, %v1202_v11  ;;  %v15749_v60 = vmov 0 }
 0x140   : > { %v15750_v60 = vsel %vm9996_vm4, 4294967295, %v15749_v60 }
 0x141   : > { %8266 = vmatprep.subr.bf16.mxu0 %v8265_v17  ;;  %8285 = vmatprep.subr.bf16.mxu1 %v8265_v17  ;;  %15751 = vst [vmem:[#allocation23_spill] sm:$0xff] %v15750_v60  ;;  %v8272_v17 = vpack.c.bf16 %v1210_v29, %v1207_v28 }
 0x142   : > { %8268 = vmatpush1.bf16.msra.mxu0 %v8267_v53  ;;  %8287 = vmatpush1.bf16.msra.mxu1 %v8267_v53 }
 0x15c   : > { %v883_v37 = vpop.xlane.xlu0 %882 }
 0x15d   : > { %8626 = vrcp.f32 %v883_v37  ;;  %v1211_v37 = vld [vmem:[%s15533_s1 + $0x50] sm:$0x3f] }
 0x15e   : > { %v8269_v11 = vpack.c.bf16 %v1211_v37, %v1208_v45 }
 0x160   : > { %v886_v10 = vpop.xlane.xlu1 %885  ;;  %v889_v5 = vpop.xlane.xlu0 %888  ;;  %8271 = vmatprep.subr.msk.bf16.mxu0 %vm9996_vm4, %v8269_v11  ;;  %8286 = vmatprep.subr.msk.bf16.mxu1 %vm9996_vm4, %v8269_v11 }
 0x161   : > { %8628 = vrcp.f32 %v886_v10  ;;  %8274 = vmatpush1.bf16.msk.msra.mxu0 %vm9996_vm4, %v8272_v17  ;;  %8288 = vmatpush1.bf16.msk.msra.mxu1 %vm9996_vm4, %v8272_v17 }
 0x162   : > { %8630 = vrcp.f32 %v889_v5  ;;  %v15550_v5 = vmov 0.0  }
 0x163   : > { %2443 = vmatprep.mubr.f32.mxu0 %v15550_v5  ;;  %2729 = vmatprep.mubr.f32.mxu1 %v15550_v5 }
 0x164   : > { %v892_v45 = vpop.xlane.xlu1 %891  ;;  %v895_v10 = vpop.xlane.xlu0 %894 }
 0x165   : > { %8632 = vrcp.f32 %v892_v45 }
 0x166   : > { %8634 = vrcp.f32 %v895_v10 }
 0x167   : > { %v8627_v53 = vpop.eup %8626 }
 0x168   : > { %v898_v37 = vpop.xlane.xlu1 %897  ;;  %v10011_v28 = vmul.f32 %v8627_v53, %v9709_v62  ;;  %v10015_v17 = vpop.xlane.xlu0 %900 }
 0x169   : > { %8636 = vrcp.f32 %v898_v37 }
 0x16a   : > { %1631 = vrot.lane.b32.xlu0 %v10011_v28, %s8830_s11  ;;  %v1471_v62 = vrot.slane %v10011_v28, 1  ;;  %v15556_v37 = vrot.slane %v10011_v28, 7 }
 0x16b   : > { %v8629_v11 = vpop.eup %8628 }
 0x16c   : > { %v8631_v29 = vpop.eup %8630  ;;  %v10017_v45 = vpop.xlane.xlu1 %903  ;;  %v1138_v60 = vmul.f32 %v8629_v11, %v9719_v24 }
 0x16d   : > { %v10021_v10 = vmul.f32 %v8631_v29, %v9711_v7  ;;  %v10039_v11 = vpop.xlane.xlu0 %1026 }
 0x16e   : > { %1633 = vrot.lane.b32.xlu0 %v1138_v60, %s8830_s11  ;;  %v1472_v53 = vrot.slane %v1138_v60, 1  ;;  %v1279_v5 = vrot.slane %v1138_v60, 7 }
 0x16f   : > { %v8633_v46 = vpop.eup %8632  ;;  %v1474_v60 = vrot.slane %v10021_v10, 1 }
 0x170   : > { %v8635_v2 = vpop.eup %8634  ;;  %v10026_v13 = vpop.xlane.xlu1 %1029  ;;  %v1473_v18 = vsel %vm1470_vm5, %v1471_v62, %v1472_v53  ;;  %v10030_v24 = vmul.f32 %v8633_v46, %v9721_v32  ;;  %v10035_v7 = vsel %vm1277_vm6, %v15556_v37, %v1279_v5  ;;  %v15561_v46 = vrot.slane %v10021_v10, 7 }
 0x171   : > { %1855 = vrot.lane.b32.xlu1 %v1473_v18, %s8831_s12  ;;  %v10045_v32 = vmul.f32 %v8635_v2, %v9729_v56  ;;  %v10062_v52 = vpop.xlane.xlu0 %906 }
 0x172   : > { %1635 = vrot.lane.b32.xlu0 %v10021_v10, %s8830_s11  ;;  %v1475_v29 = vrot.slane %v10030_v24, 1  ;;  %v1282_v5 = vrot.slane %v10030_v24, 7 }
 0x173   : > { %v8637_v62 = vpop.eup %8636  ;;  %v15562_v56 = vrot.slane %v10045_v32, 7 }
 0x174   : > { %v10049_v37 = vpop.xlane.xlu1 %909  ;;  %v1476_v18 = vsel %vm1470_vm5, %v1474_v60, %v1475_v29  ;;  %v1142_v39 = vmul.f32 %v8637_v62, %v9731_v57  ;;  %v10056_v34 = vsel %vm1277_vm6, %v15561_v46, %v1282_v5  ;;  %v1599_v5 = vsel %vm1470_vm5, %v1472_v53, 0.0 }
 0x175   : > { %1859 = vrot.lane.b32.xlu1 %v1476_v18, %s8831_s12  ;;  %v715_v18 = vsub.f32 %v9636_v43, %v9934_v36 }
 0x176   : > { %1637 = vrot.lane.b32.xlu0 %v10030_v24, %s8830_s11  ;;  %v1285_v2 = vrot.slane %v1142_v39, 7  ;;  %v10076_v24 = vpop.xlane.xlu0 %1032 }
 0x178   : > { %v10064_v27 = vpop.xlane.xlu1 %1035  ;;  %v10069_v57 = vsel %vm1277_vm6, %v15562_v56, %v1285_v2  ;;  %v805_v56 = vmul.f32 1.442695, %v715_v18 }
 0x17a   : > { %1639 = vrot.lane.b32.xlu0 %v10045_v32, %s8830_s11  ;;  %v10083_v46 = vpop.xlane.xlu0 %912  ;;  %8638 = vpow2.f32 %v805_v56 }
 0x17b   : > { %8640 = vpow2.f32 %v807_v12 }
 0x17c   : > { %v10073_v60 = vpop.xlane.xlu1 %915  ;;  %8642 = vrcp.f32 %v10015_v17 }
 0x17e   : > { %1857 = vrot.lane.b32.xlu0 %v1599_v5, %s8831_s12  ;;  %v10091_v53 = vpop.xlane.xlu0 %1038 }
 0x180   : > { %v10079_v62 = vpop.xlane.xlu1 %1041 }
 0x182   : > { %v10095_v50 = vpop.xlane.xlu0 %918 }
 0x184   : > { %v10085_v2 = vpop.xlane.xlu1 %921  ;;  %v10101_v14 = vpop.eup %8638 }
 0x185   : > { %15755 = vst [vmem:[#allocation27_spill] sm:$0xff] %v10101_v14  ;;  %v959_v47 = vsel %vm496_vm1, %v10101_v14, 0.0  ;;  %v10109_v56 = vpop.eup %8640 }
 0x186   : > { %v10103_v18 = vpop.xlane.xlu0 %1044  ;;  %15757 = vst [vmem:[#allocation29_spill] sm:$0xff] %v10109_v56  ;;  %v962_v31 = vsel %vm496_vm1, %v10109_v56, 0.0  ;;  %v1600_v56 = vsel %vm1470_vm5, %v1475_v29, 0.0  ;;  %v717_v29 = vsub.f32 %v9650_v54, %v9943_v61 }
 0x188   : > { %v10089_v35 = vpop.xlane.xlu1 %1047 }
 0x18a   : > { %v10111_v21 = vpop.xlane.xlu0 %924 }
 0x18c   : > { %v10093_v5 = vpop.xlane.xlu1 %927 }
 0x18d   : > { %15752 = vst [vmem:[#allocation24_spill] sm:$0xff] %v10093_v5 }
 0x18e   : > { %v10119_v23 = vpop.xlane.xlu0 %1050 }
 0x190   : > { %v10097_v43 = vpop.xlane.xlu1 %1053 }
 0x191   : > { %15753 = vst [vmem:[#allocation25_spill] sm:$0xff] %v10097_v43  ;;  %v1478_v43 = vrot.slane %v1142_v39, 1 }
 0x194   : > { %v10099_v36 = vpop.xlane.xlu1 %933 }
 0x195   : > { %15754 = vst [vmem:[#allocation26_spill] sm:$0xff] %v10099_v36 }
 0x198   : > { %v10105_v44 = vpop.xlane.xlu1 %1059 }
 0x199   : > { %15756 = vst [vmem:[#allocation28_spill] sm:$0xff] %v10105_v44  ;;  %960 = vadd.xlane.f32.xlu1 %v959_v47  ;;  %v10123_v44 = vpop.xlane.xlu0 %930  ;;  %v1601_v47 = vsel %vm1470_vm5, %v1478_v43, 0.0 }
 0x19c   : > { %v10113_v12 = vpop.xlane.xlu1 %621 }
 0x19d   : > { %15758 = vst [vmem:[#allocation30_spill] sm:$0xff] %v10113_v12  ;;  %963 = vadd.xlane.f32.xlu0 %v962_v31  ;;  %v10130_v12 = vpop.xlane.xlu0 %1056 }
 0x19e   : > { %15762 = vst [vmem:[#allocation34_spill] sm:$0xff] %v10130_v12 }
 0x1a0   : > { %v10117_v36 = vpop.xlane.xlu1 %939 }
 0x1a1   : > { %15759 = vst [vmem:[#allocation31_spill] sm:$0xff] %v10117_v36  ;;  %v10137_v36 = vpop.xlane.xlu0 %618 }
 0x1a2   : > { %15764 = vst [vmem:[#allocation36_spill] sm:$0xff] %v10137_v36 }
 0x1a4   : > { %v10121_v5 = vpop.xlane.xlu1 %1065 }
 0x1a5   : > { %15760 = vst [vmem:[#allocation32_spill] sm:$0xff] %v10121_v5 }
 0x1a8   : > { %v10125_v14 = vpop.xlane.xlu1 %627 }
 0x1a9   : > { %15761 = vst [vmem:[#allocation33_spill] sm:$0xff] %v10125_v14  ;;  %v1477_v14 = vrot.slane %v10045_v32, 1 }
 0x1aa   : > { %1641 = vrot.lane.b32.xlu1 %v1142_v39, %s8830_s11  ;;  %v8643_v39 = vpop.eup %8642 }
 0x1ab   : > { %v1479_v17 = vsel %vm1470_vm5, %v1477_v14, %v1478_v43  ;;  %v10145_v12 = vmul.f32 %v8643_v39, %v9739_v63  ;;  %v718_v63 = vsub.f32 %v9655_v55, %v9949_v38 }
 0x1ac   : > { %v10133_v31 = vpop.xlane.xlu1 %945 }
 0x1ad   : > { %15763 = vst [vmem:[#allocation35_spill] sm:$0xff] %v10133_v31  ;;  %v811_v39 = vmul.f32 1.442695, %v718_v63 }
 0x1ae   : > { %1865 = vrot.lane.b32.xlu1 %v1601_v47, %s8831_s12  ;;  %v10147_v47 = vpop.xlane.xlu0 %936 }
 0x1b0   : > { %v10140_v5 = vpop.xlane.xlu1 %1071 }
 0x1b1   : > { %15765 = vst [vmem:[#allocation37_spill] sm:$0xff] %v10140_v5 }
 0x1b2   : > { %v10155_v5 = vpop.xlane.xlu0 %1062 }
 0x1b3   : > { %1861 = vrot.lane.b32.xlu0 %v1600_v56, %s8831_s12  ;;  %v809_v56 = vmul.f32 1.442695, %v717_v29 }
 0x1b4   : > { %v10149_v31 = vpop.xlane.xlu1 %630 }
 0x1b5   : > { %15766 = vst [vmem:[#allocation38_spill] sm:$0xff] %v10149_v31  ;;  %8644 = vpow2.f32 %v809_v56 }
 0x1b6   : > { %v10161_v14 = vpop.xlane.xlu0 %624  ;;  %8646 = vpow2.f32 %v811_v39 }
 0x1b7   : > { %1863 = vrot.lane.b32.xlu0 %v1479_v17, %s8831_s12  ;;  %8648 = vrcp.f32 %v10017_v45 }
 0x1b8   : > { %v10157_v36 = vpop.xlane.xlu1 %633  ;;  %8650 = vrcp.f32 %v10026_v13 }
 0x1b9   : > { %15767 = vst [vmem:[#allocation39_spill] sm:$0xff] %v10157_v36  ;;  %8652 = vrcp.f32 %v10039_v11 }
 0x1ba   : > { %v10165_v17 = vpop.xlane.xlu0 %942  ;;  %8654 = vrcp.f32 %v10062_v52 }
 0x1bb   : > { %1643 = vrot.lane.b32.xlu0 %v10145_v12, %s8830_s11 }
 0x1bc   : > { %v10163_v43 = vpop.xlane.xlu1 %948 }
 0x1bd   : > { %15768 = vst [vmem:[#allocation40_spill] sm:$0xff] %v10163_v43 }
 0x1be   : > { %v10173_v29 = vpop.xlane.xlu0 %1068 }
 0x1bf   : > { %v10169_v54 = vpop.eup %8644  ;;  %15771 = vst [vmem:[#allocation43_spill] sm:$0xff] %v10173_v29 }
 0x1c0   : > { %v10167_v31 = vpop.xlane.xlu1 %951  ;;  %15770 = vst [vmem:[#allocation42_spill] sm:$0xff] %v10169_v54  ;;  %v965_v61 = vsel %vm496_vm1, %v10169_v54, 0.0  ;;  %v10179_v55 = vpop.eup %8646 }
 0x1c1   : > { %15769 = vst [vmem:[#allocation41_spill] sm:$0xff] %v10167_v31  ;;  %15773 = vst [vmem:[#allocation45_spill] sm:$0xff] %v10179_v55  ;;  %v968_v39 = vsel %vm496_vm1, %v10179_v55, 0.0 }
 0x1c2   : > { %v10181_v38 = vpop.xlane.xlu0 %636 }
 0x1c3   : > { %15774 = vst [vmem:[#allocation46_spill] sm:$0xff] %v10181_v38  ;;  %v15777_v38 = vrot.slane %v10011_v28, 7 }
 0x1c4   : > { %v10175_v56 = vpop.xlane.xlu1 %639 }
 0x1c5   : > { %15772 = vst [vmem:[#allocation44_spill] sm:$0xff] %v10175_v56  ;;  %v1438_v11 = vsel %vm1277_vm6, 0.0, %v15777_v38  ;;  %v1480_v38 = vrot.slane %v10145_v12, 1 }
 0x1c8   : > { %v10184_v63 = vpop.xlane.xlu1 %954 }
 0x1c9   : > { %15775 = vst [vmem:[#allocation47_spill] sm:$0xff] %v10184_v63 }
 0x1cc   : > { %v10188_v56 = vpop.xlane.xlu1 %957 }
 0x1cd   : > { %15776 = vst [vmem:[#allocation48_spill] sm:$0xff] %v10188_v56 }
 0x1d2   : > { %966 = vadd.xlane.f32.xlu1 %v965_v61  ;;  %v8649_v61 = vpop.eup %8648 }
 0x1d3   : > { %v8651_v31 = vpop.eup %8650  ;;  %v10191_v13 = vmul.f32 %v8649_v61, %v9741_v9 }
 0x1d4   : > { %v8653_v36 = vpop.eup %8652  ;;  %v10197_v63 = vmul.f32 %v8651_v31, %v9751_v41  ;;  %v15779_v41 = vmov 0.0  }
 0x1d5   : > { %v10206_v9 = vmul.f32 %v8653_v36, %v9749_v25  ;;  %v1481_v25 = vrot.slane %v10191_v13, 1 }
 0x1d6   : > { %v1544_v28 = vrot.slane %v10197_v63, 1 }
 0x1d7   : > { %v1482_v61 = vsel %vm1470_vm5, %v1480_v38, %v1481_v25  ;;  %v1602_v38 = vsel %vm1470_vm5, %v1481_v25, 0.0 }
 0x1da   : > { %969 = vadd.xlane.f32.xlu0 %v968_v39 }
 0x1dc   : > { %v1632_v54 = vpop.permute.xlu0 %1631 }
 0x1dd   : > { %v2047_v39 = vsel %vm496_vm1, %v1438_v11, %v1632_v54  ;;  %v1543_v54 = vrot.slane %v10206_v9, 1 }
 0x1e0   : > { %v1634_v45 = vpop.permute.xlu0 %1633 }
 0x1e1   : > { %v2048_v11 = vsel %vm496_vm1, %v10035_v7, %v1634_v45 }
 0x1e3   : > { %v1856_v55 = vpop.permute.xlu1 %1855  ;;  %1645 = vrot.lane.b32.xlu1 %v10191_v13, %s8830_s11 }
 0x1e4   : > { %v10203_v56 = vsel %vm2111_vm7, %v2047_v39, %v1856_v55  ;;  %v1636_v43 = vpop.permute.xlu0 %1635  ;;  %v1545_v55 = vsel %vm1470_vm5, %v1543_v54, %v1544_v28 }
 0x1e5   : > { %15778 = vst [vmem:[#allocation49_spill] sm:$0xff] %v10203_v56  ;;  %7193 = vmatmul.mubr.msk.f32.vlgmr.msra.gmra.mrb[0].mxu0 %vm2176_vm8, %v10203_v56  ;;  %v15780_v56 = vrot.slane %v10021_v10, 7  ;;  %v8802_v10 = vld [vmem:[%s15541_s9 + $0xf8] sm:$0xff] }
 0x1e6   : > { %2449 = vmatprep.mubr.f32.mxu0 %v15779_v41 }
 0x1e7   : > { %1727 = vrot.lane.b32.xlu1 %v10206_v9, %s8830_s11  ;;  %v1860_v54 = vpop.permute.xlu1 %1859  ;;  %v1439_v29 = vsel %vm1277_vm6, 0.0, %v15780_v56 }
 0x1e8   : > { %v10214_v31 = vpop.permute.xlu0 %1637  ;;  %v2049_v7 = vsel %vm496_vm1, %v1439_v29, %v1636_v43  ;;  %v720_v43 = vsub.f32 %v8802_v10, %v9953_v48  ;;  %v8803_v29 = vld [vmem:[%s15541_s9 + $0xf0] sm:$0xff] }
 0x1e9   : > { %v10243_v45 = vsel %vm2111_vm7, %v2049_v7, %v1860_v54  ;;  %v719_v56 = vsub.f32 %v8803_v29, %v9951_v19  ;;  %v1623_v7 = vsel %vm1470_vm5, %v1544_v28, 0.0 }
 0x1ea   : > { %v815_v25 = vmul.f32 1.442695, %v720_v43 }
 0x1eb   : > { %1951 = vrot.lane.b32.xlu1 %v1545_v55, %s8831_s12  ;;  %v8655_v55 = vpop.eup %8654 }
 0x1ec   : > { %v10221_v36 = vpop.permute.xlu0 %1639  ;;  %8656 = vpow2.f32 %v815_v25  ;;  %v2050_v25 = vsel %vm496_vm1, %v10056_v34, %v10214_v31 }
 0x1ef   : > { %1729 = vrot.lane.b32.xlu1 %v10197_v63, %s8830_s11 }
 0x1f0   : > { %1867 = vrot.lane.b32.xlu0 %v1482_v61, %s8831_s12  ;;  %v1858_v52 = vpop.permute.xlu0 %1857  ;;  %v10248_v61 = vmul.f32 %v8655_v55, %v9759_v0  ;;  %v813_v0 = vmul.f32 1.442695, %v719_v56 }
 0x1f1   : > { %v10231_v39 = vsel %vm2111_vm7, %v2048_v11, %v1858_v52 }
 0x1f2   : > { %7194 = vmatmul.mubr.msk.f32.gmra.mrb[2].mxu0 %vm2176_vm8, %v10231_v39  ;;  %8658 = vpow2.f32 %v813_v0 }
 0x1f3   : > { %2455 = vmatprep.mubr.f32.mxu0 %v15779_v41  ;;  %8660 = vrcp.f32 %v10064_v27 }
 0x1f4   : > { %1869 = vrot.lane.b32.xlu0 %v1602_v38, %s8831_s12  ;;  %8662 = vrcp.f32 %v10049_v37 }
 0x1f5   : > { %8664 = vrcp.f32 %v10076_v24 }
 0x1f6   : > { %7195 = vmatmul.mubr.msk.f32.gmra.mrb[4].mxu0 %vm2176_vm8, %v10243_v45  ;;  %v10261_v11 = vpop.eup %8656  ;;  %8666 = vrcp.f32 %v10083_v46 }
 0x1f7   : > { %2461 = vmatprep.mubr.f32.mxu0 %v15779_v41  ;;  %v974_v52 = vsel %vm496_vm1, %v10261_v11, 0.0 }
 0x1f8   : > { %1647 = vrot.lane.b32.xlu0 %v10248_v61, %s8830_s11 }
 0x1fc   : > { %v10265_v54 = vpop.eup %8658 }
 0x1fd   : > { %v971_v48 = vsel %vm496_vm1, %v10265_v54, 0.0  ;;  %v8661_v19 = vpop.eup %8660 }
 0x1fe   : > { %v8663_v55 = vpop.eup %8662  ;;  %v10274_v10 = vmul.f32 %v8661_v19, %v9771_v15 }
 0x1ff   : > { %v8665_v38 = vpop.eup %8664  ;;  %v10278_v27 = vmul.f32 %v8663_v55, %v9761_v59  ;;  %v1483_v59 = vrot.slane %v10248_v61, 1 }
 0x200   : > { %v10281_v43 = vmul.f32 %v8665_v38, %v9769_v6  ;;  %v1547_v37 = vrot.slane %v10274_v10, 1  ;;  %v8667_v38 = vpop.eup %8666 }
 0x201   : > { %v1484_v24 = vrot.slane %v10278_v27, 1 }
 0x202   : > { %v1546_v15 = vrot.slane %v10281_v43, 1 }
 0x203   : > { %v1485_v56 = vsel %vm1470_vm5, %v1483_v59, %v1484_v24  ;;  %v10330_v59 = vmul.f32 %v8667_v38, %v9779_v30 }
 0x204   : > { %v1548_v6 = vsel %vm1470_vm5, %v1546_v15, %v1547_v37 }
 0x213   : > { %975 = vadd.xlane.f32.xlu1 %v974_v52 }
 0x217   : > { %972 = vadd.xlane.f32.xlu0 %v971_v48  ;;  %v15781_v48 = vrot.slane %v10045_v32, 7  ;;  %v1603_v32 = vsel %vm1470_vm5, %v1484_v24, 0.0  ;;  %v8804_v24 = vld [vmem:[%s15541_s9 + $0x108] sm:$0xff] }
 0x219   : > { %v1440_v19 = vsel %vm1277_vm6, 0.0, %v15781_v48 }
 0x21a   : > { %v2051_v34 = vsel %vm496_vm1, %v1440_v19, %v10221_v36 }
 0x224   : > { %1953 = vrot.lane.b32.xlu1 %v1623_v7, %s8831_s12 }
 0x226   : > { %v10284_v29 = vpop.xlane.xlu1 %960 }
 0x228   : > { %1731 = vrot.lane.b32.xlu1 %v10281_v43, %s8830_s11 }
 0x22a   : > { %v10291_v28 = vpop.xlane.xlu0 %963  ;;  %v1642_v0 = vpop.permute.xlu1 %1641 }
 0x22b   : > { %v2052_v15 = vsel %vm496_vm1, %v10069_v57, %v1642_v0  ;;  %v722_v57 = vsub.f32 %v8804_v24, %v9957_v4 }
 0x22c   : > { %1955 = vrot.lane.b32.xlu1 %v1548_v6, %s8831_s12  ;;  %v8805_v6 = vld [vmem:[%s15541_s9 + $0x100] sm:$0xff] }
 0x22d   : > { %1871 = vrot.lane.b32.xlu0 %v1485_v56, %s8831_s12  ;;  %v721_v30 = vsub.f32 %v8805_v6, %v9955_v3  ;;  %v819_v56 = vmul.f32 1.442695, %v722_v57 }
 0x22e   : > { %v1862_v52 = vpop.permute.xlu0 %1861  ;;  %v1866_v7 = vpop.permute.xlu1 %1865 }
 0x22f   : > { %v10302_v46 = vsel %vm2111_vm7, %v2050_v25, %v1862_v52  ;;  %v10327_v36 = vsel %vm2111_vm7, %v2052_v15, %v1866_v7  ;;  %v817_v25 = vmul.f32 1.442695, %v721_v30  ;;  %8668 = vpow2.f32 %v819_v56 }
 0x230   : > { %1733 = vrot.lane.b32.xlu1 %v10274_v10, %s8830_s11  ;;  %7196 = vmatmul.mubr.msk.f32.gmra.mrb[6].mxu0 %vm2176_vm8, %v10302_v46  ;;  %15782 = vst [vmem:[#allocation50_spill] sm:$0xff] %v10327_v36  ;;  %v1288_v30 = vrot.slane %v10191_v13, 7 }
 0x231   : > { %1649 = vrot.lane.b32.xlu0 %v10278_v27, %s8830_s11  ;;  %2467 = vmatprep.mubr.f32.mxu0 %v15779_v41  ;;  %8670 = vpow2.f32 %v817_v25 }
 0x232   : > { %v1864_v31 = vpop.permute.xlu0 %1863  ;;  %8672 = vrcp.f32 %v10079_v62 }
 0x233   : > { %v10317_v55 = vsel %vm2111_vm7, %v2051_v34, %v1864_v31  ;;  %8674 = vrcp.f32 %v10073_v60  ;;  %v1287_v60 = vrot.slane %v10145_v12, 7 }
 0x234   : > { %7197 = vmatmul.mubr.msk.f32.gmra.mrb[8].mxu0 %vm2176_vm8, %v10317_v55  ;;  %8676 = vrcp.f32 %v10091_v53  ;;  %v1350_v53 = vrot.slane %v10206_v9, 7 }
 0x235   : > { %1873 = vrot.lane.b32.xlu0 %v1603_v32, %s8831_s12  ;;  %2473 = vmatprep.mubr.f32.mxu0 %v15779_v41  ;;  %v1624_v32 = vsel %vm1470_vm5, %v1547_v37, 0.0  ;;  %8678 = vrcp.f32 %v10095_v50 }
 0x236   : > { %v1644_v38 = vpop.permute.xlu0 %1643  ;;  %v1462_v12 = vsel %vm1277_vm6, 0.0, %v1350_v53 }
 0x238   : > { %7198 = vmatmul.mubr.msk.f32.gmra.mrb[10].mxu0 %vm2176_vm8, %v10327_v36 }
 0x239   : > { %1651 = vrot.lane.b32.xlu0 %v10330_v59, %s8830_s11  ;;  %2479 = vmatprep.mubr.f32.mxu0 %v15779_v41  ;;  %v10345_v0 = vpop.eup %8668 }
 0x23a   : > { %v980_v52 = vsel %vm496_vm1, %v10345_v0, 0.0 }
 0x23b   : > { %v10349_v48 = vpop.eup %8670 }
 0x23c   : > { %v977_v4 = vsel %vm496_vm1, %v10349_v48, 0.0  ;;  %v8673_v19 = vpop.eup %8672 }
 0x23d   : > { %v8675_v34 = vpop.eup %8674  ;;  %v10360_v15 = vmul.f32 %v8673_v19, %v9791_v20  ;;  %v1486_v19 = vrot.slane %v10330_v59, 1 }
 0x23e   : > { %v8677_v31 = vpop.eup %8676  ;;  %v10364_v62 = vmul.f32 %v8675_v34, %v9781_v16  ;;  %v1441_v16 = vsel %vm1277_vm6, 0.0, %v1287_v60 }
 0x23f   : > { %v10369_v24 = vmul.f32 %v8677_v31, %v9789_v1  ;;  %v1550_v37 = vrot.slane %v10360_v15, 1  ;;  %v2053_v56 = vsel %vm496_vm1, %v1441_v16, %v1644_v38  ;;  %v1289_v38 = vsel %vm1277_vm6, %v1287_v60, %v1288_v30 }
 0x240   : > { %v1487_v20 = vrot.slane %v10364_v62, 1 }
 0x241   : > { %v1549_v1 = vrot.slane %v10369_v24, 1 }
 0x242   : > { %v1488_v50 = vsel %vm1470_vm5, %v1486_v19, %v1487_v20  ;;  %v1604_v60 = vsel %vm1470_vm5, %v1487_v20, 0.0 }
 0x243   : > { %v1551_v31 = vsel %vm1470_vm5, %v1549_v1, %v1550_v37 }
 0x254   : > { %981 = vadd.xlane.f32.xlu1 %v980_v52 }
 0x258   : > { %978 = vadd.xlane.f32.xlu0 %v977_v4 }
 0x25f   : > { %v10356_v3 = vpop.xlane.xlu1 %966 }
 0x263   : > { %v1646_v7 = vpop.permute.xlu1 %1645 }
 0x265   : > { %1957 = vrot.lane.b32.xlu1 %v1624_v32, %s8831_s12  ;;  %v2054_v32 = vsel %vm496_vm1, %v1289_v38, %v1646_v7  ;;  %v8679_v7 = vpop.eup %8678 }
 0x266   : > { %v10420_v30 = vmul.f32 %v8679_v7, %v9799_v8  ;;  %v1290_v7 = vrot.slane %v10248_v61, 7 }
 0x267   : > { %v1728_v57 = vpop.permute.xlu1 %1727  ;;  %v10371_v6 = vpop.xlane.xlu0 %969 }
 0x268   : > { %v2095_v25 = vsel %vm496_vm1, %v1462_v12, %v1728_v57  ;;  %v8806_v12 = vld [vmem:[%s15541_s9 + $0x118] sm:$0xff]  ;;  %v1442_v61 = vsel %vm1277_vm6, 0.0, %v1290_v7 }
 0x269   : > { %1735 = vrot.lane.b32.xlu1 %v10369_v24, %s8830_s11  ;;  %v724_v1 = vsub.f32 %v8806_v12, %v9961_v33 }
 0x26b   : > { %v1952_v52 = vpop.permute.xlu1 %1951  ;;  %v1868_v4 = vpop.permute.xlu0 %1867 }
 0x26c   : > { %v10388_v34 = vsel %vm2111_vm7, %v2095_v25, %v1952_v52  ;;  %v10391_v13 = vsel %vm2111_vm7, %v2053_v56, %v1868_v4  ;;  %v8807_v56 = vld [vmem:[%s15541_s9 + $0x110] sm:$0xff]  ;;  %v823_v25 = vmul.f32 1.442695, %v724_v1 }
 0x26d   : > { %15783 = vst [vmem:[#allocation51_spill] sm:$0xff] %v10388_v34  ;;  %15784 = vst [vmem:[#allocation52_spill] sm:$0xff] %v10391_v13  ;;  %7241 = vmatmul.mubr.msk.f32.vlgmr.msra.gmra.mrb[0].mxu1 %vm2176_vm8, %v10388_v34  ;;  %1959 = vrot.lane.b32.xlu1 %v1551_v31, %s8831_s12  ;;  %v723_v20 = vsub.f32 %v8807_v56, %v9959_v49  ;;  %v1351_v31 = vrot.slane %v10197_v63, 7  ;;  %v1625_v63 = vsel %vm1470_vm5, %v1550_v37, 0.0 }
 0x26e   : > { %7199 = vmatmul.mubr.msk.f32.gmra.mrb[12].mxu0 %vm2176_vm8, %v10391_v13  ;;  %1875 = vrot.lane.b32.xlu0 %v1488_v50, %s8831_s12  ;;  %8680 = vpow2.f32 %v823_v25 }
 0x26f   : > { %v1870_v57 = vpop.permute.xlu0 %1869  ;;  %2485 = vmatprep.mubr.f32.mxu0 %v15779_v41  ;;  %2735 = vmatprep.mubr.f32.mxu1 %v15779_v41  ;;  %v821_v52 = vmul.f32 1.442695, %v723_v20  ;;  %v1730_v49 = vpop.permute.xlu1 %1729 }
 0x270   : > { %v10408_v16 = vsel %vm2111_vm7, %v2054_v32, %v1870_v57 }
 0x271   : > { %15785 = vst [vmem:[#allocation53_spill] sm:$0xff] %v10408_v16  ;;  %1737 = vrot.lane.b32.xlu1 %v10360_v15, %s8830_s11  ;;  %8682 = vpow2.f32 %v821_v52 }
 0x272   : > { %7200 = vmatmul.mubr.msk.f32.gmra.mrb[14].mxu0 %vm2176_vm8, %v10408_v16  ;;  %1653 = vrot.lane.b32.xlu0 %v10364_v62, %s8830_s11  ;;  %8684 = vrcp.f32 %v10089_v35  ;;  %v1352_v35 = vsel %vm1277_vm6, %v1350_v53, %v1351_v31  ;;  %v1353_v53 = vrot.slane %v10281_v43, 7  ;;  %v15797_v43 = vld [vmem:[#allocation2_spill] sm:$0xff]  ;;  %v15849_v16 = vld [vmem:[#allocation16_spill] sm:$0xff] }
 0x273   : > { %2491 = vmatprep.mubr.f32.mxu0 %v15779_v41  ;;  %8686 = vrcp.f32 %v10085_v2  ;;  %v1648_v50 = vpop.permute.xlu0 %1647  ;;  %v2096_v2 = vsel %vm496_vm1, %v1352_v35, %v1730_v49 }
 0x274   : > { %8688 = vrcp.f32 %v10103_v18 }
 0x275   : > { %8690 = vrcp.f32 %v10111_v21 }
 0x276   : > { %1877 = vrot.lane.b32.xlu0 %v1604_v60, %s8831_s12 }
 0x278   : > { %v10432_v8 = vpop.eup %8680 }
 0x279   : > { %v986_v4 = vsel %vm496_vm1, %v10432_v8, 0.0 }
 0x27a   : > { %1655 = vrot.lane.b32.xlu0 %v10420_v30, %s8830_s11 }
 0x27b   : > { %v10436_v19 = vpop.eup %8682 }
 0x27c   : > { %v983_v33 = vsel %vm496_vm1, %v10436_v19, 0.0  ;;  %v8685_v32 = vpop.eup %8684 }
 0x27d   : > { %v8687_v57 = vpop.eup %8686  ;;  %v10460_v56 = vmul.f32 %v8685_v32, %v9811_v26  ;;  %v2055_v26 = vsel %vm496_vm1, %v1442_v61, %v1648_v50 }
 0x27e   : > { %v8689_v60 = vpop.eup %8688  ;;  %v10466_v9 = vmul.f32 %v8687_v57, %v9801_v22  ;;  %v1489_v57 = vrot.slane %v10420_v30, 1 }
 0x27f   : > { %v10471_v20 = vmul.f32 %v8689_v60, %v9809_v40  ;;  %v1463_v40 = vsel %vm1277_vm6, 0.0, %v1353_v53 }
 0x280   : > { %v1490_v22 = vrot.slane %v10466_v9, 1 }
 0x281   : > { %v1552_v49 = vrot.slane %v10471_v20, 1 }
 0x282   : > { %v1491_v21 = vsel %vm1470_vm5, %v1489_v57, %v1490_v22  ;;  %v1605_v61 = vsel %vm1470_vm5, %v1490_v22, 0.0  ;;  %v8809_v22 = vld [vmem:[%s15541_s9 + $0x120] sm:$0xff] }
 0x295   : > { %987 = vadd.xlane.f32.xlu1 %v986_v4  ;;  %v1553_v4 = vrot.slane %v10460_v56, 1 }
 0x297   : > { %v1554_v60 = vsel %vm1470_vm5, %v1552_v49, %v1553_v4  ;;  %v725_v49 = vsub.f32 %v8809_v22, %v9963_v42  ;;  %v15793_v42 = vld [vmem:[#allocation25_spill] sm:$0xff] }
 0x299   : > { %984 = vadd.xlane.f32.xlu0 %v983_v33  ;;  %v1291_v33 = vrot.slane %v10278_v27, 7 }
 0x29b   : > { %v1292_v27 = vsel %vm1277_vm6, %v1290_v7, %v1291_v33  ;;  %v8691_v7 = vpop.eup %8690 }
 0x2a0   : > { %v10444_v38 = vpop.xlane.xlu1 %975 }
 0x2a4   : > { %v1954_v12 = vpop.permute.xlu1 %1953  ;;  %v10451_v1 = vpop.xlane.xlu0 %972 }
 0x2a5   : > { %v10454_v18 = vsel %vm2111_vm7, %v2096_v2, %v1954_v12 }
 0x2a6   : > { %15786 = vst [vmem:[#allocation54_spill] sm:$0xff] %v10454_v18  ;;  %7242 = vmatmul.mubr.msk.f32.gmra.mrb[2].mxu1 %vm2176_vm8, %v10454_v18  ;;  %1961 = vrot.lane.b32.xlu1 %v1625_v63, %s8831_s12  ;;  %v15814_v18 = vld [vmem:[#allocation8_spill] sm:$0xff] }
 0x2a7   : > { %2741 = vmatprep.mubr.f32.mxu1 %v15779_v41 }
 0x2a8   : > { %v1732_v37 = vpop.permute.xlu1 %1731  ;;  %v1872_v25 = vpop.permute.xlu0 %1871 }
 0x2a9   : > { %v10476_v52 = vsel %vm2111_vm7, %v2055_v26, %v1872_v25  ;;  %v2097_v31 = vsel %vm496_vm1, %v1463_v40, %v1732_v37  ;;  %v10522_v25 = vmul.f32 %v8691_v7, %v9819_v58  ;;  %v8808_v40 = vld [vmem:[%s15541_s9 + $0x128] sm:$0xff]  ;;  %v15794_v7 = vld [vmem:[#allocation24_spill] sm:$0xff] }
 0x2aa   : > { %15787 = vst [vmem:[#allocation55_spill] sm:$0xff] %v10476_v52  ;;  %1739 = vrot.lane.b32.xlu1 %v10471_v20, %s8830_s11  ;;  %7201 = vmatmul.mubr.msk.f32.gmra.mrb[16].mxu0 %vm2176_vm8, %v10476_v52  ;;  %v726_v33 = vsub.f32 %v8808_v40, %v9965_v51 }
 0x2ab   : > { %2497 = vmatprep.mubr.f32.mxu0 %v15779_v41 }
 0x2ac   : > { %v1956_v50 = vpop.permute.xlu1 %1955  ;;  %v1650_v32 = vpop.permute.xlu0 %1649 }
 0x2ad   : > { %v10494_v35 = vsel %vm2111_vm7, %v2097_v31, %v1956_v50  ;;  %v2056_v2 = vsel %vm496_vm1, %v1292_v27, %v1650_v32  ;;  %v827_v31 = vmul.f32 1.442695, %v726_v33  ;;  %v825_v32 = vmul.f32 1.442695, %v725_v49 }
 0x2ae   : > { %15788 = vst [vmem:[#allocation56_spill] sm:$0xff] %v10494_v35  ;;  %7243 = vmatmul.mubr.msk.f32.gmra.mrb[4].mxu1 %vm2176_vm8, %v10494_v35  ;;  %1963 = vrot.lane.b32.xlu1 %v1554_v60, %s8831_s12 }
 0x2af   : > { %1879 = vrot.lane.b32.xlu0 %v1491_v21, %s8831_s12  ;;  %2747 = vmatprep.mubr.f32.mxu1 %v15779_v41  ;;  %8692 = vpow2.f32 %v827_v31 }
 0x2b0   : > { %v1874_v12 = vpop.permute.xlu0 %1873  ;;  %8694 = vpow2.f32 %v825_v32  ;;  %v1293_v32 = vrot.slane %v10330_v59, 7 }
 0x2b1   : > { %v10508_v63 = vsel %vm2111_vm7, %v2056_v2, %v1874_v12  ;;  %8696 = vrcp.f32 %v15793_v42 }
 0x2b2   : > { %15789 = vst [vmem:[#allocation57_spill] sm:$0xff] %v10508_v63  ;;  %1741 = vrot.lane.b32.xlu1 %v10460_v56, %s8830_s11  ;;  %7202 = vmatmul.mubr.msk.f32.gmra.mrb[18].mxu0 %vm2176_vm8, %v10508_v63  ;;  %8698 = vrcp.f32 %v15794_v7  ;;  %v15796_v7 = vld [vmem:[#allocation4_spill] sm:$0xff] }
 0x2b3   : > { %1657 = vrot.lane.b32.xlu0 %v10466_v9, %s8830_s11  ;;  %2503 = vmatprep.mubr.f32.mxu0 %v15779_v41  ;;  %8700 = vrcp.f32 %v10119_v23 }
 0x2b4   : > { %v1652_v40 = vpop.permute.xlu0 %1651  ;;  %8702 = vrcp.f32 %v10123_v44 }
 0x2b7   : > { %1881 = vrot.lane.b32.xlu0 %v1605_v61, %s8831_s12  ;;  %v1734_v61 = vpop.permute.xlu1 %1733 }
 0x2b8   : > { %v2445_v26 = vpop.f32.mrb[0].mxu0 }
 0x2b9   : > { %v10519_v37 = vpop.f32.mrb[1].mxu0  ;;  %v10542_v51 = vpop.eup %8692 }
 0x2ba   : > { %15790 = vst [vmem:[#allocation58_spill] sm:$0xff] %v10519_v37  ;;  %v992_v27 = vsel %vm496_vm1, %v10542_v51, 0.0  ;;  %v10546_v2 = vpop.eup %8694 }
 0x2bb   : > { %1659 = vrot.lane.b32.xlu0 %v10522_v25, %s8830_s11  ;;  %v989_v12 = vsel %vm496_vm1, %v10546_v2, 0.0  ;;  %v8697_v22 = vpop.eup %8696 }
 0x2bc   : > { %v8699_v49 = vpop.eup %8698 }
 0x2bd   : > { %v10576_v59 = vmul.f32 %v8699_v49, %v15797_v43 }
 0x2bf   : > { %v1493_v49 = vrot.slane %v10576_v59, 1 }
 0x2c5   : > { %v10534_v50 = vpop.f32.mrb[2].mxu0 }
 0x2c6   : > { %v10536_v58 = vpop.f32.mrb[3].mxu0 }
 0x2c7   : > { %15791 = vst [vmem:[#allocation59_spill] sm:$0xff] %v10536_v58 }
 0x2c9   : > { %v10538_v57 = vpop.f32.mrb[4].mxu0 }
 0x2ca   : > { %v2459_v60 = vpop.f32.mrb[5].mxu0 }
 0x2cb   : > { %v10540_v21 = vadd.f32 %v2459_v60, %v2445_v26  ;;  %v1354_v26 = vrot.slane %v10274_v10, 7  ;;  %v8701_v60 = vpop.eup %8700  ;;  %v1626_v10 = vsel %vm1470_vm5, %v1553_v4, 0.0 }
 0x2cd   : > { %15792 = vst [vmem:[#allocation60_spill] sm:$0xff] %v10540_v21  ;;  %v1355_v31 = vsel %vm1277_vm6, %v1353_v53, %v1354_v26  ;;  %v10570_v21 = vmul.f32 %v8697_v22, %v15796_v7  ;;  %v1443_v53 = vsel %vm1277_vm6, 0.0, %v1293_v32  ;;  %v15798_v26 = vld [vmem:[#allocation3_spill] sm:$0xff] }
 0x2ce   : > { %v2057_v4 = vsel %vm496_vm1, %v1443_v53, %v1652_v40  ;;  %v1294_v40 = vrot.slane %v10364_v62, 7 }
 0x2d0   : > { %v1295_v62 = vsel %vm1277_vm6, %v1293_v32, %v1294_v40  ;;  %v8703_v32 = vpop.eup %8702  ;;  %v15802_v40 = vld [vmem:[#allocation5_spill] sm:$0xff] }
 0x2d6   : > { %993 = vadd.xlane.f32.xlu1 %v992_v27  ;;  %v2098_v27 = vsel %vm496_vm1, %v1355_v31, %v1734_v61  ;;  %v15573_v61 = vrot.slane %v10369_v24, 7  ;;  %v10581_v31 = vmul.f32 %v8701_v60, %v15798_v26 }
 0x2d8   : > { %v1464_v60 = vsel %vm1277_vm6, 0.0, %v15573_v61  ;;  %v1555_v7 = vrot.slane %v10581_v31, 1 }
 0x2da   : > { %990 = vadd.xlane.f32.xlu0 %v989_v12 }
 0x2e1   : > { %v10554_v33 = vpop.xlane.xlu1 %981 }
 0x2e5   : > { %v1958_v42 = vpop.permute.xlu1 %1957  ;;  %v10561_v12 = vpop.xlane.xlu0 %978 }
 0x2e6   : > { %v10564_v23 = vsel %vm2111_vm7, %v2098_v27, %v1958_v42 }
 0x2e7   : > { %15795 = vst [vmem:[#allocation25_spill] sm:$0xff] %v10564_v23  ;;  %7244 = vmatmul.mubr.msk.f32.gmra.mrb[6].mxu1 %vm2176_vm8, %v10564_v23  ;;  %1965 = vrot.lane.b32.xlu1 %v1626_v10, %s8831_s12  ;;  %v15574_v10 = vrot.slane %v10570_v21, 1 }
 0x2e8   : > { %2753 = vmatprep.mubr.f32.mxu1 %v15779_v41 }
 0x2e9   : > { %v1736_v22 = vpop.permute.xlu1 %1735  ;;  %v1876_v27 = vpop.permute.xlu0 %1875  ;;  %v1557_v61 = vsel %vm1470_vm5, %v1555_v7, %v15574_v10  ;;  %v10630_v7 = vmul.f32 %v8703_v32, %v15802_v40 }
 0x2ea   : > { %v10586_v42 = vsel %vm2111_vm7, %v2057_v4, %v1876_v27  ;;  %v2099_v43 = vsel %vm496_vm1, %v1464_v60, %v1736_v22  ;;  %v1492_v4 = vrot.slane %v10522_v25, 1 }
 0x2eb   : > { %15799 = vst [vmem:[#allocation24_spill] sm:$0xff] %v10586_v42  ;;  %1743 = vrot.lane.b32.xlu1 %v10581_v31, %s8830_s11  ;;  %7203 = vmatmul.mubr.msk.f32.gmra.mrb[20].mxu0 %vm2176_vm8, %v10586_v42  ;;  %v15831_v42 = vld [vmem:[#allocation12_spill] sm:$0xff] }
 0x2ec   : > { %2509 = vmatprep.mubr.f32.mxu0 %v15779_v41  ;;  %v1494_v44 = vsel %vm1470_vm5, %v1492_v4, %v1493_v49 }
 0x2ed   : > { %v1960_v53 = vpop.permute.xlu1 %1959  ;;  %v1654_v26 = vpop.permute.xlu0 %1653 }
 0x2ee   : > { %v10604_v27 = vsel %vm2111_vm7, %v2099_v43, %v1960_v53  ;;  %v2058_v22 = vsel %vm496_vm1, %v1295_v62, %v1654_v26  ;;  %v8810_v53 = vld [vmem:[%s15541_s9 + $0x138] sm:$0xff]  ;;  %v15803_v26 = vld [vmem:[#allocation22_spill] sm:$0xff] }
 0x2ef   : > { %15800 = vst [vmem:[#allocation4_spill] sm:$0xff] %v10604_v27  ;;  %7245 = vmatmul.mubr.msk.f32.gmra.mrb[8].mxu1 %vm2176_vm8, %v10604_v27  ;;  %1967 = vrot.lane.b32.xlu1 %v1557_v61, %s8831_s12  ;;  %v1606_v61 = vsel %vm1470_vm5, %v1493_v49, 0.0  ;;  %v728_v4 = vsub.f32 %v8810_v53, %v15803_v26  ;;  %v8811_v49 = vld [vmem:[%s15541_s9 + $0x130] sm:$0xff] }
 0x2f0   : > { %1883 = vrot.lane.b32.xlu0 %v1494_v44, %s8831_s12  ;;  %2759 = vmatprep.mubr.f32.mxu1 %v15779_v41 }
 0x2f1   : > { %v1878_v60 = vpop.permute.xlu0 %1877 }
 0x2f2   : > { %v10618_v43 = vsel %vm2111_vm7, %v2058_v22, %v1878_v60  ;;  %v15804_v22 = vld [vmem:[#allocation21_spill] sm:$0xff] }
 0x2f3   : > { %15801 = vst [vmem:[#allocation2_spill] sm:$0xff] %v10618_v43  ;;  %1745 = vrot.lane.b32.xlu1 %v10570_v21, %s8830_s11  ;;  %7204 = vmatmul.mubr.msk.f32.gmra.mrb[22].mxu0 %vm2176_vm8, %v10618_v43  ;;  %v727_v60 = vsub.f32 %v8811_v49, %v15804_v22  ;;  %v15810_v49 = vld [vmem:[#allocation34_spill] sm:$0xff] }
 0x2f4   : > { %1661 = vrot.lane.b32.xlu0 %v10576_v59, %s8830_s11  ;;  %2515 = vmatprep.mubr.f32.mxu0 %v15779_v41 }
 0x2f5   : > { %v829_v37 = vmul.f32 1.442695, %v727_v60  ;;  %v1656_v22 = vpop.permute.xlu0 %1655 }
 0x2f8   : > { %1885 = vrot.lane.b32.xlu0 %v1606_v61, %s8831_s12  ;;  %v831_v61 = vmul.f32 1.442695, %v728_v4 }
 0x2fa   : > { %8704 = vpow2.f32 %v831_v61 }
 0x2fb   : > { %8706 = vpow2.f32 %v829_v37  ;;  %v1738_v37 = vpop.permute.xlu1 %1737 }
 0x2fc   : > { %1663 = vrot.lane.b32.xlu0 %v10630_v7, %s8830_s11 }
 0x303   : > { %v2463_v44 = vpop.f32.mrb[6].mxu0 }
 0x304   : > { %v2465_v62 = vpop.f32.mrb[7].mxu0  ;;  %v10654_v23 = vpop.eup %8704 }
 0x305   : > { %v10643_v32 = vadd.f32 %v2465_v62, %v10534_v50  ;;  %v998_v50 = vsel %vm496_vm1, %v10654_v23, 0.0  ;;  %v10658_v4 = vpop.eup %8706  ;;  %v15808_v62 = vld [vmem:[#allocation28_spill] sm:$0xff] }
 0x306   : > { %8708 = vrcp.f32 %v15808_v62 }
 0x307   : > { %15805 = vst [vmem:[#allocation3_spill] sm:$0xff] %v10643_v32  ;;  %v10645_v40 = vpop.f32.mrb[8].mxu0 }
 0x308   : > { %v2471_v10 = vpop.f32.mrb[9].mxu0 }
 0x309   : > { %v10648_v58 = vadd.f32 %v2471_v10, %v10538_v57  ;;  %v995_v57 = vsel %vm496_vm1, %v10658_v4, 0.0  ;;  %v15809_v10 = vld [vmem:[#allocation26_spill] sm:$0xff] }
 0x30a   : > { %8710 = vrcp.f32 %v15809_v10 }
 0x30b   : > { %15806 = vst [vmem:[#allocation5_spill] sm:$0xff] %v10648_v58  ;;  %v10650_v53 = vpop.f32.mrb[10].mxu0  ;;  %8712 = vrcp.f32 %v15810_v49  ;;  %v1296_v58 = vrot.slane %v10420_v30, 7 }
 0x30c   : > { %v2477_v26 = vpop.f32.mrb[11].mxu0  ;;  %8714 = vrcp.f32 %v10147_v47 }
 0x30d   : > { %v10652_v27 = vadd.f32 %v2477_v26, %v2463_v44  ;;  %v1357_v44 = vrot.slane %v10360_v15, 7  ;;  %v15813_v15 = vrot.slane %v10570_v21, 1 }
 0x30f   : > { %15807 = vst [vmem:[#allocation22_spill] sm:$0xff] %v10652_v27  ;;  %v1627_v35 = vsel %vm1470_vm5, %v15813_v15, 0.0 }
 0x310   : > { %v8709_v61 = vpop.eup %8708 }
 0x311   : > { %v10682_v34 = vmul.f32 %v8709_v61, %v15814_v18 }
 0x314   : > { %v8711_v26 = vpop.eup %8710 }
 0x315   : > { %v8713_v27 = vpop.eup %8712 }
 0x317   : > { %999 = vadd.xlane.f32.xlu1 %v998_v50  ;;  %v15811_v50 = vrot.slane %v10369_v24, 7  ;;  %v15815_v24 = vld [vmem:[#allocation6_spill] sm:$0xff] }
 0x318   : > { %v10688_v30 = vmul.f32 %v8711_v26, %v15815_v24 }
 0x319   : > { %v1358_v62 = vsel %vm1277_vm6, %v15811_v50, %v1357_v44  ;;  %v15580_v44 = vrot.slane %v10471_v20, 7  ;;  %v15816_v50 = vld [vmem:[#allocation7_spill] sm:$0xff] }
 0x31a   : > { %v2100_v10 = vsel %vm496_vm1, %v1358_v62, %v1738_v37  ;;  %v1444_v37 = vsel %vm1277_vm6, 0.0, %v1296_v58  ;;  %v10693_v62 = vmul.f32 %v8713_v27, %v15816_v50  ;;  %v1496_v27 = vrot.slane %v10688_v30, 1 }
 0x31b   : > { %996 = vadd.xlane.f32.xlu0 %v995_v57  ;;  %v2059_v18 = vsel %vm496_vm1, %v1444_v37, %v1656_v22  ;;  %v1465_v26 = vsel %vm1277_vm6, 0.0, %v15580_v44  ;;  %v1297_v22 = vrot.slane %v10466_v9, 7 }
 0x31c   : > { %v1558_v15 = vrot.slane %v10693_v62, 1 }
 0x31d   : > { %v1298_v9 = vsel %vm1277_vm6, %v1296_v58, %v1297_v22  ;;  %v8715_v58 = vpop.eup %8714  ;;  %v15820_v22 = vld [vmem:[#allocation9_spill] sm:$0xff] }
 0x322   : > { %v10666_v60 = vpop.xlane.xlu1 %987 }
 0x326   : > { %v1962_v57 = vpop.permute.xlu1 %1961  ;;  %v10673_v32 = vpop.xlane.xlu0 %984 }
 0x327   : > { %v10676_v49 = vsel %vm2111_vm7, %v2100_v10, %v1962_v57 }
 0x328   : > { %15812 = vst [vmem:[#allocation21_spill] sm:$0xff] %v10676_v49  ;;  %7246 = vmatmul.mubr.msk.f32.gmra.mrb[10].mxu1 %vm2176_vm8, %v10676_v49  ;;  %1969 = vrot.lane.b32.xlu1 %v1627_v35, %s8831_s12  ;;  %v15581_v35 = vrot.slane %v10682_v34, 1 }
 0x329   : > { %2765 = vmatprep.mubr.f32.mxu1 %v15779_v41 }
 0x32a   : > { %v1740_v61 = vpop.permute.xlu1 %1739  ;;  %v1880_v10 = vpop.permute.xlu0 %1879  ;;  %v1560_v44 = vsel %vm1470_vm5, %v1558_v15, %v15581_v35  ;;  %v10742_v15 = vmul.f32 %v8715_v58, %v15820_v22  ;;  %v15824_v22 = vld [vmem:[#allocation36_spill] sm:$0xff] }
 0x32b   : > { %v10698_v57 = vsel %vm2111_vm7, %v2059_v18, %v1880_v10  ;;  %v2101_v24 = vsel %vm496_vm1, %v1465_v26, %v1740_v61  ;;  %v1495_v18 = vrot.slane %v10630_v7, 1 }
 0x32c   : > { %15817 = vst [vmem:[#allocation28_spill] sm:$0xff] %v10698_v57  ;;  %1747 = vrot.lane.b32.xlu1 %v10693_v62, %s8830_s11  ;;  %7205 = vmatmul.mubr.msk.f32.gmra.mrb[24].mxu0 %vm2176_vm8, %v10698_v57 }
 0x32d   : > { %2521 = vmatprep.mubr.f32.mxu0 %v15779_v41  ;;  %v1497_v47 = vsel %vm1470_vm5, %v1495_v18, %v1496_v27 }
 0x32e   : > { %v1964_v37 = vpop.permute.xlu1 %1963  ;;  %v1658_v50 = vpop.permute.xlu0 %1657 }
 0x32f   : > { %v10716_v10 = vsel %vm2111_vm7, %v2101_v24, %v1964_v37  ;;  %v2060_v61 = vsel %vm496_vm1, %v1298_v9, %v1658_v50  ;;  %v15822_v9 = vld [vmem:[#allocation30_spill] sm:$0xff] }
 0x330   : > { %15818 = vst [vmem:[#allocation26_spill] sm:$0xff] %v10716_v10  ;;  %7247 = vmatmul.mubr.msk.f32.gmra.mrb[12].mxu1 %vm2176_vm8, %v10716_v10  ;;  %1971 = vrot.lane.b32.xlu1 %v1560_v44, %s8831_s12  ;;  %v1607_v44 = vsel %vm1470_vm5, %v1496_v27, 0.0 }
 0x331   : > { %1887 = vrot.lane.b32.xlu0 %v1497_v47, %s8831_s12  ;;  %2771 = vmatprep.mubr.f32.mxu1 %v15779_v41  ;;  %v8812_v47 = vld [vmem:[%s15541_s9 + $0x148] sm:$0xff] }
 0x332   : > { %v1882_v26 = vpop.permute.xlu0 %1881  ;;  %v730_v27 = vsub.f32 %v8812_v47, %v15822_v9 }
 0x333   : > { %v10730_v24 = vsel %vm2111_vm7, %v2060_v61, %v1882_v26 }
 0x334   : > { %15819 = vst [vmem:[#allocation34_spill] sm:$0xff] %v10730_v24  ;;  %1749 = vrot.lane.b32.xlu1 %v10682_v34, %s8830_s11  ;;  %7206 = vmatmul.mubr.msk.f32.gmra.mrb[26].mxu0 %vm2176_vm8, %v10730_v24  ;;  %v835_v10 = vmul.f32 1.442695, %v730_v27 }
 0x335   : > { %1665 = vrot.lane.b32.xlu0 %v10688_v30, %s8830_s11  ;;  %2527 = vmatprep.mubr.f32.mxu0 %v15779_v41 }
 0x336   : > { %8716 = vpow2.f32 %v835_v10  ;;  %v1660_v10 = vpop.permute.xlu0 %1659 }
 0x339   : > { %1889 = vrot.lane.b32.xlu0 %v1607_v44, %s8831_s12  ;;  %v8813_v44 = vld [vmem:[%s15541_s9 + $0x140] sm:$0xff] }
 0x33a   : > { %v729_v35 = vsub.f32 %v8813_v44, %v15824_v22  ;;  %v15827_v44 = vld [vmem:[#allocation31_spill] sm:$0xff] }
 0x33c   : > { %v833_v24 = vmul.f32 1.442695, %v729_v35  ;;  %v1360_v35 = vrot.slane %v10460_v56, 7  ;;  %v15830_v56 = vrot.slane %v10682_v34, 1 }
 0x33d   : > { %1667 = vrot.lane.b32.xlu0 %v10742_v15, %s8830_s11 }
 0x33e   : > { %8718 = vpow2.f32 %v833_v24  ;;  %v1628_v43 = vsel %vm1470_vm5, %v15830_v56, 0.0 }
 0x340   : > { %v10746_v37 = vpop.f32.mrb[0].mxu1  ;;  %v10768_v47 = vpop.eup %8716 }
 0x341   : > { %v10748_v50 = vpop.f32.mrb[12].mxu0  ;;  %v10750_v18 = vpop.f32.mrb[1].mxu1 }
 0x342   : > { %15821 = vst [vmem:[#allocation8_spill] sm:$0xff] %v10750_v18  ;;  %v2483_v61 = vpop.f32.mrb[13].mxu0 }
 0x343   : > { %v10757_v26 = vadd.f32 %v2483_v61, %v10645_v40  ;;  %v1004_v40 = vsel %vm496_vm1, %v10768_v47, 0.0  ;;  %v15826_v61 = vld [vmem:[#allocation32_spill] sm:$0xff] }
 0x344   : > { %8720 = vrcp.f32 %v15826_v61 }
 0x345   : > { %15823 = vst [vmem:[#allocation6_spill] sm:$0xff] %v10757_v26  ;;  %v10759_v58 = vpop.f32.mrb[14].mxu0  ;;  %8722 = vrcp.f32 %v15827_v44  ;;  %v1299_v26 = vrot.slane %v10522_v25, 7 }
 0x346   : > { %v2489_v18 = vpop.f32.mrb[15].mxu0  ;;  %8724 = vrcp.f32 %v10155_v5 }
 0x347   : > { %v10766_v49 = vadd.f32 %v2489_v18, %v10650_v53  ;;  %v1742_v53 = vpop.permute.xlu1 %1741  ;;  %8726 = vrcp.f32 %v10165_v17 }
 0x348   : > { %v10772_v9 = vpop.eup %8718 }
 0x349   : > { %15825 = vst [vmem:[#allocation7_spill] sm:$0xff] %v10766_v49  ;;  %v1001_v27 = vsel %vm496_vm1, %v10772_v9, 0.0 }
 0x34e   : > { %v8721_v18 = vpop.eup %8720 }
 0x34f   : > { %v8723_v22 = vpop.eup %8722  ;;  %v10796_v63 = vmul.f32 %v8721_v18, %v15831_v42 }
 0x350   : > { %v8725_v49 = vpop.eup %8724 }
 0x358   : > { %1005 = vadd.xlane.f32.xlu1 %v1004_v40  ;;  %v15828_v40 = vrot.slane %v10471_v20, 7  ;;  %v15832_v20 = vld [vmem:[#allocation10_spill] sm:$0xff] }
 0x359   : > { %v10802_v25 = vmul.f32 %v8723_v22, %v15832_v20 }
 0x35a   : > { %v1361_v61 = vsel %vm1277_vm6, %v15828_v40, %v1360_v35  ;;  %v15589_v35 = vrot.slane %v10581_v31, 7  ;;  %v15833_v40 = vld [vmem:[#allocation11_spill] sm:$0xff] }
 0x35b   : > { %v2102_v44 = vsel %vm496_vm1, %v1361_v61, %v1742_v53  ;;  %v1445_v53 = vsel %vm1277_vm6, 0.0, %v1299_v26  ;;  %v10807_v61 = vmul.f32 %v8725_v49, %v15833_v40  ;;  %v1499_v49 = vrot.slane %v10802_v25, 1 }
 0x35c   : > { %1002 = vadd.xlane.f32.xlu0 %v1001_v27  ;;  %v2061_v42 = vsel %vm496_vm1, %v1445_v53, %v1660_v10  ;;  %v1466_v22 = vsel %vm1277_vm6, 0.0, %v15589_v35  ;;  %v1300_v10 = vrot.slane %v10576_v59, 7 }
 0x35d   : > { %v1561_v56 = vrot.slane %v10807_v61, 1 }
 0x35e   : > { %v1301_v59 = vsel %vm1277_vm6, %v1299_v26, %v1300_v10  ;;  %v8727_v26 = vpop.eup %8726  ;;  %v1608_v10 = vsel %vm1470_vm5, %v1499_v49, 0.0 }
 0x363   : > { %v10780_v24 = vpop.xlane.xlu1 %993 }
 0x367   : > { %v1966_v27 = vpop.permute.xlu1 %1965  ;;  %v10787_v57 = vpop.xlane.xlu0 %990 }
 0x368   : > { %v10790_v5 = vsel %vm2111_vm7, %v2102_v44, %v1966_v27 }
 0x369   : > { %15829 = vst [vmem:[#allocation9_spill] sm:$0xff] %v10790_v5  ;;  %7248 = vmatmul.mubr.msk.f32.gmra.mrb[14].mxu1 %vm2176_vm8, %v10790_v5  ;;  %1973 = vrot.lane.b32.xlu1 %v1628_v43, %s8831_s12  ;;  %v15590_v43 = vrot.slane %v10796_v63, 1 }
 0x36a   : > { %2777 = vmatprep.mubr.f32.mxu1 %v15779_v41 }
 0x36b   : > { %v1744_v18 = vpop.permute.xlu1 %1743  ;;  %v1884_v44 = vpop.permute.xlu0 %1883  ;;  %v1563_v35 = vsel %vm1470_vm5, %v1561_v56, %v15590_v43 }
 0x36c   : > { %v10812_v27 = vsel %vm2111_vm7, %v2061_v42, %v1884_v44  ;;  %v2103_v20 = vsel %vm496_vm1, %v1466_v22, %v1744_v18  ;;  %v1498_v42 = vrot.slane %v10742_v15, 1 }
 0x36d   : > { %15834 = vst [vmem:[#allocation30_spill] sm:$0xff] %v10812_v27  ;;  %1751 = vrot.lane.b32.xlu1 %v10807_v61, %s8830_s11  ;;  %7207 = vmatmul.mubr.msk.f32.gmra.mrb[28].mxu0 %vm2176_vm8, %v10812_v27 }
 0x36e   : > { %2533 = vmatprep.mubr.f32.mxu0 %v15779_v41  ;;  %v1500_v17 = vsel %vm1470_vm5, %v1498_v42, %v1499_v49  ;;  %v8814_v49 = vld [vmem:[%s15541_s9 + $0x158] sm:$0xff] }
 0x36f   : > { %v1968_v53 = vpop.permute.xlu1 %1967  ;;  %v1662_v40 = vpop.permute.xlu0 %1661 }
 0x370   : > { %v10830_v44 = vsel %vm2111_vm7, %v2103_v20, %v1968_v53  ;;  %v2062_v18 = vsel %vm496_vm1, %v1301_v59, %v1662_v40  ;;  %v15838_v53 = vld [vmem:[#allocation13_spill] sm:$0xff] }
 0x371   : > { %15835 = vst [vmem:[#allocation36_spill] sm:$0xff] %v10830_v44  ;;  %7249 = vmatmul.mubr.msk.f32.gmra.mrb[16].mxu1 %vm2176_vm8, %v10830_v44  ;;  %1975 = vrot.lane.b32.xlu1 %v1563_v35, %s8831_s12  ;;  %v10860_v40 = vmul.f32 %v8727_v26, %v15838_v53 }
 0x372   : > { %1891 = vrot.lane.b32.xlu0 %v1500_v17, %s8831_s12  ;;  %2783 = vmatprep.mubr.f32.mxu1 %v15779_v41 }
 0x373   : > { %v1886_v22 = vpop.permute.xlu0 %1885 }
 0x374   : > { %v10844_v20 = vsel %vm2111_vm7, %v2062_v18, %v1886_v22 }
 0x375   : > { %15836 = vst [vmem:[#allocation32_spill] sm:$0xff] %v10844_v20  ;;  %1753 = vrot.lane.b32.xlu1 %v10796_v63, %s8830_s11  ;;  %7208 = vmatmul.mubr.msk.f32.gmra.mrb[30].mxu0 %vm2176_vm8, %v10844_v20 }
 0x376   : > { %1669 = vrot.lane.b32.xlu0 %v10802_v25, %s8830_s11  ;;  %2539 = vmatprep.mubr.f32.mxu0 %v15779_v41 }
 0x379   : > { %v10853_v35 = vpop.f32.mrb[2].mxu1 }
 0x37a   : > { %v10856_v56 = vpop.f32.mrb[3].mxu1  ;;  %1893 = vrot.lane.b32.xlu0 %v1608_v10, %s8831_s12  ;;  %v15840_v10 = vld [vmem:[#allocation33_spill] sm:$0xff] }
 0x37b   : > { %15837 = vst [vmem:[#allocation31_spill] sm:$0xff] %v10856_v56  ;;  %v732_v43 = vsub.f32 %v8814_v49, %v15840_v10  ;;  %v15843_v10 = vld [vmem:[#allocation37_spill] sm:$0xff] }
 0x37d   : > { %v10862_v42 = vpop.f32.mrb[16].mxu0 }
 0x37e   : > { %1671 = vrot.lane.b32.xlu0 %v10860_v40, %s8830_s11  ;;  %v2495_v17 = vpop.f32.mrb[17].mxu0 }
 0x37f   : > { %v10867_v59 = vadd.f32 %v2495_v17, %v10748_v50  ;;  %v8815_v50 = vld [vmem:[%s15541_s9 + $0x150] sm:$0xff] }
 0x380   : > { %v731_v17 = vsub.f32 %v8815_v50, %v10161_v14 }
 0x381   : > { %15839 = vst [vmem:[#allocation12_spill] sm:$0xff] %v10867_v59  ;;  %v10869_v18 = vpop.f32.mrb[4].mxu1  ;;  %v839_v59 = vmul.f32 1.442695, %v732_v43  ;;  %v15844_v43 = vld [vmem:[#allocation35_spill] sm:$0xff] }
 0x382   : > { %v2745_v22 = vpop.f32.mrb[5].mxu1  ;;  %v837_v5 = vmul.f32 1.442695, %v731_v17 }
 0x383   : > { %v10876_v26 = vadd.f32 %v2745_v22, %v10746_v37  ;;  %8728 = vpow2.f32 %v839_v59  ;;  %v1664_v59 = vpop.permute.xlu0 %1663 }
 0x384   : > { %8730 = vpow2.f32 %v837_v5  ;;  %v1363_v5 = vrot.slane %v10570_v21, 7  ;;  %v15848_v21 = vrot.slane %v10796_v63, 1 }
 0x385   : > { %15841 = vst [vmem:[#allocation10_spill] sm:$0xff] %v10876_v26  ;;  %v10878_v53 = vpop.f32.mrb[18].mxu0  ;;  %8732 = vrcp.f32 %v15843_v10 }
 0x386   : > { %v2501_v56 = vpop.f32.mrb[19].mxu0  ;;  %8734 = vrcp.f32 %v15844_v43  ;;  %v1629_v52 = vsel %vm1470_vm5, %v15848_v21, 0.0 }
 0x387   : > { %v10885_v44 = vadd.f32 %v2501_v56, %v10759_v58  ;;  %v15845_v58 = vld [vmem:[#allocation43_spill] sm:$0xff]  ;;  %v1746_v56 = vpop.permute.xlu1 %1745 }
 0x388   : > { %8736 = vrcp.f32 %v15845_v58 }
 0x389   : > { %15842 = vst [vmem:[#allocation11_spill] sm:$0xff] %v10885_v44  ;;  %v1302_v44 = vrot.slane %v10630_v7, 7 }
 0x38d   : > { %v10887_v49 = vpop.eup %8728 }
 0x38e   : > { %v1010_v37 = vsel %vm496_vm1, %v10887_v49, 0.0  ;;  %v10891_v22 = vpop.eup %8730 }
 0x38f   : > { %v1007_v14 = vsel %vm496_vm1, %v10891_v22, 0.0  ;;  %v8733_v17 = vpop.eup %8732 }
 0x390   : > { %v8735_v26 = vpop.eup %8734  ;;  %v10915_v13 = vmul.f32 %v8733_v17, %v15849_v16 }
 0x392   : > { %v8737_v20 = vpop.eup %8736 }
 0x399   : > { %1011 = vadd.xlane.f32.xlu1 %v1010_v37  ;;  %v15846_v37 = vrot.slane %v10581_v31, 7  ;;  %v15850_v31 = vld [vmem:[#allocation14_spill] sm:$0xff] }
 0x39a   : > { %v10921_v7 = vmul.f32 %v8735_v26, %v15850_v31  ;;  %v15853_v31 = vld [vmem:[#allocation40_spill] sm:$0xff] }
 0x39b   : > { %v1364_v10 = vsel %vm1277_vm6, %v15846_v37, %v1363_v5  ;;  %v15599_v5 = vrot.slane %v10693_v62, 7  ;;  %v15851_v37 = vld [vmem:[#allocation15_spill] sm:$0xff]  ;;  %8738 = vrcp.f32 %v15853_v31 }
 0x39c   : > { %v2104_v43 = vsel %vm496_vm1, %v1364_v10, %v1746_v56  ;;  %v1446_v56 = vsel %vm1277_vm6, 0.0, %v1302_v44  ;;  %v10926_v10 = vmul.f32 %v8737_v20, %v15851_v37  ;;  %v1502_v20 = vrot.slane %v10921_v7, 1 }
 0x39d   : > { %1008 = vadd.xlane.f32.xlu0 %v1007_v14  ;;  %v2063_v16 = vsel %vm496_vm1, %v1446_v56, %v1664_v59  ;;  %v1467_v26 = vsel %vm1277_vm6, 0.0, %v15599_v5  ;;  %v1303_v59 = vrot.slane %v10688_v30, 7 }
 0x39e   : > { %v1564_v21 = vrot.slane %v10926_v10, 1 }
 0x3a4   : > { %v10899_v50 = vpop.xlane.xlu1 %999 }
 0x3a8   : > { %v1970_v14 = vpop.permute.xlu1 %1969  ;;  %v10906_v27 = vpop.xlane.xlu0 %996 }
 0x3a9   : > { %v10909_v58 = vsel %vm2111_vm7, %v2104_v43, %v1970_v14 }
 0x3aa   : > { %15847 = vst [vmem:[#allocation13_spill] sm:$0xff] %v10909_v58  ;;  %7250 = vmatmul.mubr.msk.f32.gmra.mrb[18].mxu1 %vm2176_vm8, %v10909_v58  ;;  %1977 = vrot.lane.b32.xlu1 %v1629_v52, %s8831_s12  ;;  %v15855_v58 = vrot.slane %v10915_v13, 1 }
 0x3ab   : > { %2789 = vmatprep.mubr.f32.mxu1 %v15779_v41 }
 0x3ac   : > { %v1748_v17 = vpop.permute.xlu1 %1747  ;;  %v1888_v43 = vpop.permute.xlu0 %1887  ;;  %v1566_v5 = vsel %vm1470_vm5, %v1564_v21, %v15855_v58 }
 0x3ad   : > { %v10931_v14 = vsel %vm2111_vm7, %v2063_v16, %v1888_v43  ;;  %v2105_v56 = vsel %vm496_vm1, %v1467_v26, %v1748_v17  ;;  %v1501_v43 = vrot.slane %v10860_v40, 1  ;;  %v1304_v17 = vsel %vm1277_vm6, %v1302_v44, %v1303_v59  ;;  %v8739_v44 = vpop.eup %8738 }
 0x3ae   : > { %15852 = vst [vmem:[#allocation33_spill] sm:$0xff] %v10931_v14  ;;  %1755 = vrot.lane.b32.xlu1 %v10926_v10, %s8830_s11  ;;  %7209 = vmatmul.mubr.msk.f32.gmra.mrb[32].mxu0 %vm2176_vm8, %v10931_v14 }
 0x3af   : > { %2545 = vmatprep.mubr.f32.mxu0 %v15779_v41  ;;  %v1503_v30 = vsel %vm1470_vm5, %v1501_v43, %v1502_v20 }
 0x3b0   : > { %v1972_v37 = vpop.permute.xlu1 %1971  ;;  %v1666_v16 = vpop.permute.xlu0 %1665 }
 0x3b1   : > { %v10949_v52 = vsel %vm2111_vm7, %v2105_v56, %v1972_v37  ;;  %v2064_v26 = vsel %vm496_vm1, %v1304_v17, %v1666_v16  ;;  %v15858_v37 = vld [vmem:[#allocation17_spill] sm:$0xff] }
 0x3b2   : > { %15854 = vst [vmem:[#allocation37_spill] sm:$0xff] %v10949_v52  ;;  %7251 = vmatmul.mubr.msk.f32.gmra.mrb[20].mxu1 %vm2176_vm8, %v10949_v52  ;;  %1979 = vrot.lane.b32.xlu1 %v1566_v5, %s8831_s12  ;;  %v1609_v5 = vsel %vm1470_vm5, %v1502_v20, 0.0  ;;  %v10980_v16 = vmul.f32 %v8739_v44, %v15858_v37 }
 0x3b3   : > { %1895 = vrot.lane.b32.xlu0 %v1503_v30, %s8831_s12  ;;  %2795 = vmatprep.mubr.f32.mxu1 %v15779_v41 }
 0x3b4   : > { %v1890_v31 = vpop.permute.xlu0 %1889 }
 0x3b5   : > { %v10963_v56 = vsel %vm2111_vm7, %v2064_v26, %v1890_v31  ;;  %v15860_v31 = vld [vmem:[#allocation39_spill] sm:$0xff] }
 0x3b6   : > { %15856 = vst [vmem:[#allocation35_spill] sm:$0xff] %v10963_v56  ;;  %1757 = vrot.lane.b32.xlu1 %v10915_v13, %s8830_s11  ;;  %7210 = vmatmul.mubr.msk.f32.gmra.mrb[34].mxu0 %vm2176_vm8, %v10963_v56 }
 0x3b7   : > { %1673 = vrot.lane.b32.xlu0 %v10921_v7, %s8830_s11  ;;  %2551 = vmatprep.mubr.f32.mxu0 %v15779_v41 }
 0x3ba   : > { %v10972_v58 = vpop.f32.mrb[6].mxu1 }
 0x3bb   : > { %v2751_v59 = vpop.f32.mrb[7].mxu1  ;;  %1897 = vrot.lane.b32.xlu0 %v1609_v5, %s8831_s12 }
 0x3bc   : > { %v10977_v21 = vadd.f32 %v2751_v59, %v10853_v35  ;;  %v8816_v35 = vld [vmem:[%s15541_s9 + $0x168] sm:$0xff] }
 0x3bd   : > { %v734_v5 = vsub.f32 %v8816_v35, %v15860_v31 }
 0x3be   : > { %15857 = vst [vmem:[#allocation43_spill] sm:$0xff] %v10977_v21  ;;  %v10982_v43 = vpop.f32.mrb[20].mxu0 }
 0x3bf   : > { %1675 = vrot.lane.b32.xlu0 %v10980_v16, %s8830_s11  ;;  %v2507_v30 = vpop.f32.mrb[21].mxu0 }
 0x3c0   : > { %v10987_v17 = vadd.f32 %v2507_v30, %v10862_v42  ;;  %v8817_v42 = vld [vmem:[%s15541_s9 + $0x160] sm:$0xff] }
 0x3c1   : > { %v15862_v30 = vld [vmem:[#allocation38_spill] sm:$0xff] }
 0x3c2   : > { %15859 = vst [vmem:[#allocation16_spill] sm:$0xff] %v10987_v17  ;;  %v10989_v26 = vpop.f32.mrb[8].mxu1  ;;  %v733_v21 = vsub.f32 %v8817_v42, %v15862_v30  ;;  %v843_v17 = vmul.f32 1.442695, %v734_v5  ;;  %v1750_v5 = vpop.permute.xlu1 %1749 }
 0x3c3   : > { %v2757_v20 = vpop.f32.mrb[9].mxu1 }
 0x3c4   : > { %v10996_v44 = vadd.f32 %v2757_v20, %v10869_v18  ;;  %v841_v56 = vmul.f32 1.442695, %v733_v21  ;;  %8740 = vpow2.f32 %v843_v17  ;;  %v15864_v18 = vld [vmem:[#allocation41_spill] sm:$0xff]  ;;  %v1366_v21 = vrot.slane %v10682_v34, 7  ;;  %v1668_v17 = vpop.permute.xlu0 %1667  ;;  %v1206_v34 = vld [vmem:[%s15533_s1 + $0x28] sm:$0xff] }
 0x3c6   : > { %15861 = vst [vmem:[#allocation14_spill] sm:$0xff] %v10996_v44  ;;  %v10998_v59 = vpop.f32.mrb[22].mxu0  ;;  %8742 = vpow2.f32 %v841_v56 }
 0x3c7   : > { %v2513_v37 = vpop.f32.mrb[23].mxu0  ;;  %8744 = vrcp.f32 %v15864_v18  ;;  %v15867_v18 = vrot.slane %v10693_v62, 7 }
 0x3c8   : > { %v11005_v52 = vadd.f32 %v2513_v37, %v10878_v53  ;;  %v15866_v37 = vld [vmem:[#allocation18_spill] sm:$0xff] }
 0x3c9   : > { %v1367_v44 = vsel %vm1277_vm6, %v15867_v18, %v1366_v21  ;;  %v15869_v21 = vrot.slane %v10915_v13, 1 }
 0x3ca   : > { %15863 = vst [vmem:[#allocation15_spill] sm:$0xff] %v11005_v52  ;;  %v2106_v52 = vsel %vm496_vm1, %v1367_v44, %v1750_v5 }
 0x3ce   : > { %v11007_v35 = vpop.eup %8740 }
 0x3cf   : > { %v1016_v20 = vsel %vm496_vm1, %v11007_v35, 0.0 }
 0x3d0   : > { %v11012_v31 = vpop.eup %8742 }
 0x3d1   : > { %15865 = vst [vmem:[#allocation40_spill] sm:$0xff] %v11012_v31  ;;  %v1013_v42 = vsel %vm496_vm1, %v11012_v31, 0.0  ;;  %v8745_v53 = vpop.eup %8744 }
 0x3d2   : > { %v11020_v30 = vmul.f32 %v8745_v53, %v15866_v37 }
 0x3d4   : > { %v1505_v37 = vrot.slane %v11020_v30, 1 }
 0x3d6   : > { %v1610_v5 = vsel %vm1470_vm5, %v1505_v37, 0.0 }
 0x3da   : > { %1017 = vadd.xlane.f32.xlu1 %v1016_v20  ;;  %v1305_v20 = vrot.slane %v10742_v15, 7  ;;  %v1630_v15 = vsel %vm1470_vm5, %v15869_v21, 0.0 }
 0x3dc   : > { %v1447_v44 = vsel %vm1277_vm6, 0.0, %v1305_v20 }
 0x3dd   : > { %v2065_v18 = vsel %vm496_vm1, %v1447_v44, %v1668_v17  ;;  %v1306_v17 = vrot.slane %v10802_v25, 7 }
 0x3de   : > { %1014 = vadd.xlane.f32.xlu0 %v1013_v42  ;;  %v1203_v42 = vld [vmem:[%s15533_s1 + $0x10] sm:$0xff] }
 0x3df   : > { %v8275_v53 = vpack.c.bf16 %v1206_v34, %v1203_v42 }
 0x3e1   : > { %8276 = vmatprep.subr.bf16.mxu1 %v8275_v53 }
 0x3e2   : > { %8278 = vmatpush3.bf16.msra.mxu1 %v8275_v53 }
 0x3e5   : > { %v11017_v56 = vpop.xlane.xlu1 %1005 }
 0x3e9   : > { %v1974_v14 = vpop.permute.xlu1 %1973  ;;  %v11033_v36 = vpop.xlane.xlu0 %1002 }
 0x3ea   : > { %v11036_v62 = vsel %vm2111_vm7, %v2106_v52, %v1974_v14  ;;  %v1209_v14 = vld [vmem:[%s15533_s1 + $0x40] sm:$0xff]  ;;  %v1212_v52 = vld [vmem:[%s15533_s1 + $0x58] sm:$0x3f] }
 0x3eb   : > { %15868 = vst [vmem:[#allocation17_spill] sm:$0xff] %v11036_v62  ;;  %7252 = vmatmul.mubr.msk.f32.gmra.mrb[22].mxu1 %vm2176_vm8, %v11036_v62  ;;  %1981 = vrot.lane.b32.xlu1 %v1630_v15, %s8831_s12  ;;  %v8279_v21 = vpack.c.bf16 %v1212_v52, %v1209_v14  ;;  %v15870_v62 = vrot.slane %v10807_v61, 7 }
 0x3ec   : > { %2801 = vmatprep.mubr.f32.mxu1 %v15779_v41 }
 0x3ed   : > { %v1752_v42 = vpop.permute.xlu1 %1751  ;;  %v1892_v34 = vpop.permute.xlu0 %1891  ;;  %v1468_v31 = vsel %vm1277_vm6, 0.0, %v15870_v62  ;;  %8281 = vmatprep.subr.msk.bf16.mxu1 %vm9996_vm4, %v8279_v21  ;;  %v1307_v62 = vsel %vm1277_vm6, %v1305_v20, %v1306_v17  ;;  %v15874_v17 = vld [vmem:[#allocation44_spill] sm:$0xff] }
 0x3ee   : > { %v11056_v15 = vsel %vm2111_vm7, %v2065_v18, %v1892_v34  ;;  %v2107_v44 = vsel %vm496_vm1, %v1468_v31, %v1752_v42  ;;  %8284 = vmatpush3.bf16.msk.msra.mxu1 %vm9996_vm4, %v8279_v21  ;;  %v8818_v21 = vld [vmem:[%s15541_s9 + $0x178] sm:$0xff] }
 0x3ef   : > { %1901 = vrot.lane.b32.xlu1 %v1610_v5, %s8831_s12  ;;  %7211 = vmatmul.mubr.msk.f32.gmra.mrb[36].mxu0 %vm2176_vm8, %v11056_v15  ;;  %v1504_v5 = vrot.slane %v10980_v16, 1  ;;  %v736_v53 = vsub.f32 %v8818_v21, %v15874_v17 }
 0x3f0   : > { %2557 = vmatprep.mubr.f32.mxu0 %v15779_v41 }
 0x3f1   : > { %v1976_v14 = vpop.permute.xlu1 %1975  ;;  %v1670_v52 = vpop.permute.xlu0 %1669  ;;  %v1506_v25 = vsel %vm1470_vm5, %v1504_v5, %v1505_v37  ;;  %v847_v5 = vmul.f32 1.442695, %v736_v53 }
 0x3f2   : > { %v11074_v18 = vsel %vm2111_vm7, %v2107_v44, %v1976_v14  ;;  %v2066_v31 = vsel %vm496_vm1, %v1307_v62, %v1670_v52  ;;  %v15876_v62 = vld [vmem:[#allocation46_spill] sm:$0xff] }
 0x3f3   : > { %15872 = vst [vmem:[#allocation39_spill] sm:$0xff] %v11074_v18  ;;  %7253 = vmatmul.mubr.msk.f32.gmra.mrb[24].mxu1 %vm2176_vm8, %v11074_v18  ;;  %8746 = vpow2.f32 %v847_v5 }
 0x3f4   : > { %1899 = vrot.lane.b32.xlu0 %v1506_v25, %s8831_s12  ;;  %2807 = vmatprep.mubr.f32.mxu1 %v15779_v41  ;;  %v8819_v25 = vld [vmem:[%s15541_s9 + $0x170] sm:$0xff] }
 0x3f5   : > { %v1894_v42 = vpop.permute.xlu0 %1893 }
 0x3f6   : > { %v11084_v34 = vsel %vm2111_vm7, %v2066_v31, %v1894_v42  ;;  %v735_v31 = vsub.f32 %v8819_v25, %v15876_v62 }
 0x3f7   : > { %15873 = vst [vmem:[#allocation38_spill] sm:$0xff] %v11084_v34  ;;  %7212 = vmatmul.mubr.msk.f32.gmra.mrb[38].mxu0 %vm2176_vm8, %v11084_v34 }
 0x3f8   : > { %1677 = vrot.lane.b32.xlu0 %v11020_v30, %s8830_s11  ;;  %2563 = vmatprep.mubr.f32.mxu0 %v15779_v41  ;;  %v845_v21 = vmul.f32 1.442695, %v735_v31  ;;  %v15885_v31 = vld [vmem:[#allocation19_spill] sm:$0xff] }
 0x3fa   : > { %8748 = vpow2.f32 %v845_v21 }
 0x3fb   : > { %v11091_v37 = vpop.f32.mrb[10].mxu1 }
 0x3fc   : > { %v2763_v20 = vpop.f32.mrb[11].mxu1 }
 0x3fd   : > { %v11098_v44 = vadd.f32 %v2763_v20, %v10972_v58  ;;  %v11120_v25 = vpop.eup %8746 }
 0x3fe   : > { %15881 = vst [vmem:[#allocation46_spill] sm:$0xff] %v11120_v25 }
 0x3ff   : > { %15875 = vst [vmem:[#allocation41_spill] sm:$0xff] %v11098_v44  ;;  %v11100_v14 = vpop.f32.mrb[24].mxu0  ;;  %v15880_v44 = vld [vmem:[#allocation48_spill] sm:$0xff] }
 0x400   : > { %v2519_v52 = vpop.f32.mrb[25].mxu0  ;;  %8750 = vrcp.f32 %v15880_v44  ;;  %v15884_v44 = vld [vmem:[#allocation20_spill] sm:$0xff] }
 0x401   : > { %v11107_v42 = vadd.f32 %v2519_v52, %v10982_v43  ;;  %v15882_v43 = vld [vmem:[#allocation47_spill] sm:$0xff]  ;;  %v1022_v52 = vsel %vm496_vm1, %v11120_v25, 0.0 }
 0x402   : > { %8752 = vrcp.f32 %v15882_v43 }
 0x403   : > { %15877 = vst [vmem:[#allocation18_spill] sm:$0xff] %v11107_v42  ;;  %v11109_v18 = vpop.f32.mrb[12].mxu1  ;;  %8754 = vrcp.f32 %v10291_v28 }
 0x404   : > { %v2769_v34 = vpop.f32.mrb[13].mxu1  ;;  %v11125_v5 = vpop.eup %8748  ;;  %8756 = vrcp.f32 %v10284_v29 }
 0x405   : > { %v11112_v58 = vadd.f32 %v2769_v34, %v10989_v26  ;;  %15883 = vst [vmem:[#allocation48_spill] sm:$0xff] %v11125_v5  ;;  %v1019_v26 = vsel %vm496_vm1, %v11125_v5, 0.0  ;;  %8758 = vrcp.f32 %v10371_v6 }
 0x406   : > { %8760 = vrcp.f32 %v10356_v3 }
 0x407   : > { %15878 = vst [vmem:[#allocation23_spill] sm:$0xff] %v11112_v58  ;;  %v11114_v20 = vpop.f32.mrb[26].mxu0  ;;  %v15886_v58 = vld [vmem:[#allocation29_spill] sm:$0xff]  ;;  %8762 = vrcp.f32 %v10451_v1 }
 0x408   : > { %v2525_v17 = vpop.f32.mrb[27].mxu0  ;;  %8764 = vrcp.f32 %v10444_v38 }
 0x409   : > { %v11117_v53 = vadd.f32 %v2525_v17, %v10998_v59  ;;  %8766 = vrcp.f32 %v10561_v12 }
 0x40a   : > { %v8751_v59 = vpop.eup %8750  ;;  %8768 = vrcp.f32 %v10554_v33 }
 0x40b   : > { %15879 = vst [vmem:[#allocation44_spill] sm:$0xff] %v11117_v53  ;;  %v11132_v62 = vmul.f32 %v8751_v59, %v15884_v44  ;;  %v1369_v59 = vrot.slane %v10796_v63, 7  ;;  %v1672_v44 = vpop.permute.xlu0 %1671  ;;  %8770 = vrcp.f32 %v10673_v32 }
 0x40c   : > { %v8753_v34 = vpop.eup %8752  ;;  %8772 = vrcp.f32 %v10666_v60 }
 0x40d   : > { %v11135_v21 = vmul.f32 %v8753_v34, %v15885_v31  ;;  %v1508_v17 = vrot.slane %v11132_v62, 1  ;;  %v8755_v43 = vpop.eup %8754  ;;  %v15887_v34 = vld [vmem:[#allocation27_spill] sm:$0xff]  ;;  %8774 = vrcp.f32 %v10787_v57 }
 0x40e   : > { %v11143_v42 = vmul.f32 %v8755_v43, %v15886_v58  ;;  %v15888_v58 = vrot.slane %v10807_v61, 7  ;;  %v1308_v43 = vrot.slane %v10860_v40, 7  ;;  %v1371_v40 = vrot.slane %v10926_v10, 7 }
 0x40f   : > { %v1507_v28 = vrot.slane %v11135_v21, 1  ;;  %v1611_v31 = vsel %vm1470_vm5, %v1508_v17, 0.0  ;;  %8776 = vrcp.f32 %v10780_v24 }
 0x410   : > { %v1511_v53 = vrot.slane %v11143_v42, 1  ;;  %v1370_v63 = vsel %vm1277_vm6, %v15888_v58, %v1369_v59  ;;  %v1448_v61 = vsel %vm1277_vm6, 0.0, %v1308_v43  ;;  %v1469_v12 = vsel %vm1277_vm6, 0.0, %v1371_v40 }
 0x411   : > { %v1509_v29 = vsel %vm1470_vm5, %v1507_v28, %v1508_v17  ;;  %8778 = vrcp.f32 %v10906_v27 }
 0x412   : > { %8780 = vrcp.f32 %v10899_v50 }
 0x413   : > { %1023 = vadd.xlane.f32.xlu1 %v1022_v52  ;;  %v8757_v52 = vpop.eup %8756  ;;  %8782 = vrcp.f32 %v11033_v36 }
 0x414   : > { %v11148_v6 = vmul.f32 %v8757_v52, %v15887_v34  ;;  %v8759_v28 = vpop.eup %8758  ;;  %8784 = vrcp.f32 %v11017_v56 }
 0x415   : > { %v8761_v52 = vpop.eup %8760 }
 0x416   : > { %v1510_v1 = vrot.slane %v11148_v6, 1 }
 0x417   : > { %1020 = vadd.xlane.f32.xlu0 %v1019_v26  ;;  %v1754_v26 = vpop.permute.xlu1 %1753 }
 0x418   : > { %v1512_v38 = vsel %vm1470_vm5, %v1510_v1, %v1511_v53 }
 0x424   : > { %1903 = vrot.lane.b32.xlu1 %v1509_v29, %s8831_s12  ;;  %v2108_v29 = vsel %vm496_vm1, %v1370_v63, %v1754_v26  ;;  %v15890_v26 = vld [vmem:[#allocation42_spill] sm:$0xff] }
 0x425   : > { %v11181_v59 = vmul.f32 %v8761_v52, %v15890_v26 }
 0x426   : > { %v11151_v3 = vpop.xlane.xlu1 %1011 }
 0x428   : > { %1905 = vrot.lane.b32.xlu1 %v1611_v31, %s8831_s12  ;;  %v15889_v31 = vld [vmem:[#allocation45_spill] sm:$0xff] }
 0x429   : > { %v11170_v25 = vmul.f32 %v8759_v28, %v15889_v31  ;;  %v2067_v28 = vsel %vm496_vm1, %v1448_v61, %v1672_v44  ;;  %v1309_v44 = vrot.slane %v10921_v7, 7 }
 0x42a   : > { %v1978_v34 = vpop.permute.xlu1 %1977  ;;  %v11163_v17 = vpop.xlane.xlu0 %1008 }
 0x42b   : > { %v11166_v5 = vsel %vm2111_vm7, %v2108_v29, %v1978_v34  ;;  %v1612_v29 = vsel %vm1470_vm5, %v1511_v53, 0.0  ;;  %v1514_v34 = vrot.slane %v11170_v25, 1  ;;  %v1513_v53 = vrot.slane %v11181_v59, 1 }
 0x42c   : > { %7254 = vmatmul.mubr.msk.f32.gmra.mrb[26].mxu1 %vm2176_vm8, %v11166_v5  ;;  %1907 = vrot.lane.b32.xlu1 %v1512_v38, %s8831_s12  ;;  %v8763_v38 = vpop.eup %8762  ;;  %v1310_v7 = vsel %vm1277_vm6, %v1308_v43, %v1309_v44  ;;  %8786 = vrcp.f32 %v11163_v17 }
 0x42d   : > { %1679 = vrot.lane.b32.xlu0 %v11135_v21, %s8830_s11  ;;  %2813 = vmatprep.mubr.f32.mxu1 %v15779_v41  ;;  %v8765_v52 = vpop.eup %8764  ;;  %8788 = vrcp.f32 %v11151_v3 }
 0x42e   : > { %v1756_v58 = vpop.permute.xlu1 %1755  ;;  %v1896_v63 = vpop.permute.xlu0 %1895 }
 0x42f   : > { %v11186_v1 = vsel %vm2111_vm7, %v2067_v28, %v1896_v63  ;;  %v2109_v33 = vsel %vm496_vm1, %v1469_v12, %v1756_v58  ;;  %v1515_v28 = vsel %vm1470_vm5, %v1513_v53, %v1514_v34  ;;  %v11208_v63 = vmul.f32 %v8763_v38, %v10265_v54  ;;  %v8767_v44 = vpop.eup %8766 }
 0x430   : > { %1909 = vrot.lane.b32.xlu1 %v1612_v29, %s8831_s12  ;;  %7213 = vmatmul.mubr.msk.f32.gmra.mrb[40].mxu0 %vm2176_vm8, %v11186_v1  ;;  %v11217_v58 = vmul.f32 %v8765_v52, %v10261_v11  ;;  %v1613_v12 = vsel %vm1470_vm5, %v1514_v34, 0.0  ;;  %v8769_v32 = vpop.eup %8768  ;;  %v11237_v53 = vmul.f32 %v8767_v44, %v10349_v48 }
 0x431   : > { %1681 = vrot.lane.b32.xlu0 %v11132_v62, %s8830_s11  ;;  %2569 = vmatprep.mubr.f32.mxu0 %v15779_v41  ;;  %v1516_v43 = vrot.slane %v11208_v63, 1 }
 0x432   : > { %v1980_v31 = vpop.permute.xlu1 %1979  ;;  %v1674_v61 = vpop.permute.xlu0 %1673  ;;  %v1517_v11 = vrot.slane %v11217_v58, 1  ;;  %v1519_v48 = vrot.slane %v11237_v53, 1 }
 0x433   : > { %v11204_v26 = vsel %vm2111_vm7, %v2109_v33, %v1980_v31  ;;  %v2068_v54 = vsel %vm496_vm1, %v1310_v7, %v1674_v61  ;;  %v11245_v33 = vmul.f32 %v8769_v32, %v10345_v0 }
 0x434   : > { %7255 = vmatmul.mubr.msk.f32.gmra.mrb[28].mxu1 %vm2176_vm8, %v11204_v26  ;;  %1911 = vrot.lane.b32.xlu1 %v1515_v28, %s8831_s12  ;;  %v1518_v34 = vsel %vm1470_vm5, %v1516_v43, %v1517_v11  ;;  %v1614_v61 = vsel %vm1470_vm5, %v1517_v11, 0.0  ;;  %v8771_v28 = vpop.eup %8770 }
 0x435   : > { %1683 = vrot.lane.b32.xlu0 %v11148_v6, %s8830_s11  ;;  %2818 = vmatprep.mubr.f32.mxu1 %v15779_v41  ;;  %v1520_v57 = vrot.slane %v11245_v33, 1 }
 0x436   : > { %v1898_v29 = vpop.permute.xlu0 %1897 }
 0x437   : > { %v11223_v38 = vsel %vm2111_vm7, %v2068_v54, %v1898_v29  ;;  %v8773_v54 = vpop.eup %8772  ;;  %v1521_v29 = vsel %vm1470_vm5, %v1519_v48, %v1520_v57  ;;  %v1615_v11 = vsel %vm1470_vm5, %v1520_v57, 0.0 }
 0x438   : > { %1913 = vrot.lane.b32.xlu1 %v1613_v12, %s8831_s12  ;;  %7214 = vmatmul.mubr.msk.f32.gmra.mrb[42].mxu0 %vm2176_vm8, %v11223_v38  ;;  %v11265_v12 = vmul.f32 %v8771_v28, %v10436_v19  ;;  %v11273_v44 = vmul.f32 %v8773_v54, %v10432_v8  ;;  %v8775_v32 = vpop.eup %8774 }
 0x439   : > { %1685 = vrot.lane.b32.xlu0 %v11143_v42, %s8830_s11  ;;  %2575 = vmatprep.mubr.f32.mxu0 %v15779_v41 }
 0x43a   : > { %v1522_v19 = vrot.slane %v11265_v12, 1  ;;  %v1523_v27 = vrot.slane %v11273_v44, 1 }
 0x43c   : > { %v11239_v52 = vpop.f32.mrb[14].mxu1  ;;  %1915 = vrot.lane.b32.xlu1 %v1518_v34, %s8831_s12  ;;  %v1524_v48 = vsel %vm1470_vm5, %v1522_v19, %v1523_v27  ;;  %v1616_v28 = vsel %vm1470_vm5, %v1523_v27, 0.0 }
 0x43d   : > { %v2775_v60 = vpop.f32.mrb[15].mxu1  ;;  %1687 = vrot.lane.b32.xlu0 %v11181_v59, %s8830_s11 }
 0x43e   : > { %v11249_v31 = vadd.f32 %v2775_v60, %v11091_v37  ;;  %v8777_v60 = vpop.eup %8776 }
 0x43f   : > { %v11297_v50 = vmul.f32 %v8777_v60, %v10542_v51 }
 0x440   : > { %1917 = vrot.lane.b32.xlu1 %v1614_v61, %s8831_s12  ;;  %v11255_v7 = vpop.f32.mrb[28].mxu0  ;;  %v11292_v61 = vmul.f32 %v8775_v32, %v10546_v2 }
 0x441   : > { %1689 = vrot.lane.b32.xlu0 %v11170_v25, %s8830_s11  ;;  %v2531_v0 = vpop.f32.mrb[29].mxu0  ;;  %v1526_v51 = vrot.slane %v11297_v50, 1 }
 0x442   : > { %v11261_v37 = vadd.f32 %v2531_v0, %v11100_v14  ;;  %v8779_v0 = vpop.eup %8778 }
 0x443   : > { %v8781_v2 = vpop.eup %8780  ;;  %v11310_v57 = vmul.f32 %v8779_v0, %v10658_v4  ;;  %v1617_v56 = vsel %vm1470_vm5, %v1526_v51, 0.0  ;;  %v1676_v0 = vpop.permute.xlu0 %1675 }
 0x444   : > { %v11267_v24 = vpop.f32.mrb[16].mxu1  ;;  %1919 = vrot.lane.b32.xlu1 %v1521_v29, %s8831_s12  ;;  %v11315_v54 = vmul.f32 %v8781_v2, %v10654_v23 }
 0x445   : > { %v2781_v43 = vpop.f32.mrb[17].mxu1  ;;  %1691 = vrot.lane.b32.xlu0 %v11208_v63, %s8830_s11  ;;  %v1528_v29 = vrot.slane %v11310_v57, 1 }
 0x446   : > { %v11277_v14 = vadd.f32 %v2781_v43, %v11109_v18  ;;  %v8783_v43 = vpop.eup %8782  ;;  %v1529_v23 = vrot.slane %v11315_v54, 1 }
 0x447   : > { %v8785_v4 = vpop.eup %8784 }
 0x448   : > { %1921 = vrot.lane.b32.xlu1 %v1615_v11, %s8831_s12  ;;  %v11283_v34 = vpop.f32.mrb[30].mxu0  ;;  %v11328_v11 = vmul.f32 %v8783_v43, %v10772_v9  ;;  %v1530_v17 = vsel %vm1470_vm5, %v1528_v29, %v1529_v23  ;;  %v11333_v19 = vmul.f32 %v8785_v4, %v10768_v47  ;;  %v1618_v3 = vsel %vm1470_vm5, %v1529_v23, 0.0  ;;  %v1758_v47 = vpop.permute.xlu1 %1757 }
 0x449   : > { %1693 = vrot.lane.b32.xlu0 %v11217_v58, %s8830_s11  ;;  %v2537_v8 = vpop.f32.mrb[31].mxu0 }
 0x44a   : > { %v11289_v18 = vadd.f32 %v2537_v8, %v11114_v20  ;;  %v1525_v20 = vrot.slane %v11292_v61, 1  ;;  %v1531_v32 = vrot.slane %v11328_v11, 1  ;;  %v8787_v8 = vpop.eup %8786  ;;  %v1532_v9 = vrot.slane %v11333_v19, 1 }
 0x44b   : > { %v8789_v27 = vpop.eup %8788  ;;  %v11344_v60 = vmul.f32 %v8787_v8, %v10891_v22 }
 0x44c   : > { %1923 = vrot.lane.b32.xlu1 %v1524_v48, %s8831_s12  ;;  %v1527_v36 = vsel %vm1470_vm5, %v1525_v20, %v1526_v51  ;;  %v1533_v48 = vsel %vm1470_vm5, %v1531_v32, %v1532_v9  ;;  %v1372_v20 = vrot.slane %v10915_v13, 7  ;;  %v1619_v2 = vsel %vm1470_vm5, %v1532_v9, 0.0 }
 0x44d   : > { %1695 = vrot.lane.b32.xlu0 %v11237_v53, %s8830_s11  ;;  %v1534_v22 = vrot.slane %v11344_v60, 1  ;;  %v1311_v13 = vrot.slane %v10980_v16, 7  ;;  %v15891_v16 = vld [vmem:[#allocation49_spill] sm:$0xff]  ;;  %v1312_v32 = vrot.slane %v11020_v30, 7 }
 0x44f   : > { %v1449_v10 = vsel %vm1277_vm6, 0.0, %v1311_v13 }
 0x450   : > { %1925 = vrot.lane.b32.xlu1 %v1616_v28, %s8831_s12  ;;  %v11349_v28 = vmul.f32 %v8789_v27, %v10887_v49  ;;  %v1313_v27 = vsel %vm1277_vm6, %v1311_v13, %v1312_v32  ;;  %v15898_v32 = vld [vmem:[#allocation24_spill] sm:$0xff] }
 0x451   : > { %1697 = vrot.lane.b32.xlu0 %v11245_v33, %s8830_s11 }
 0x452   : > { %v1535_v49 = vrot.slane %v11349_v28, 1 }
 0x454   : > { %1927 = vrot.lane.b32.xlu1 %v1527_v36, %s8831_s12  ;;  %v1373_v36 = vsel %vm1277_vm6, %v1371_v40, %v1372_v20  ;;  %v1536_v23 = vsel %vm1470_vm5, %v1534_v22, %v1535_v49  ;;  %v2069_v40 = vsel %vm496_vm1, %v1449_v10, %v1676_v0 }
 0x455   : > { %1699 = vrot.lane.b32.xlu0 %v11265_v12, %s8830_s11 }
 0x458   : > { %1929 = vrot.lane.b32.xlu1 %v1617_v56, %s8831_s12  ;;  %v2110_v56 = vsel %vm496_vm1, %v1373_v36, %v1758_v47  ;;  %v15894_v36 = vld [vmem:[#allocation52_spill] sm:$0xff] }
 0x459   : > { %1701 = vrot.lane.b32.xlu0 %v11273_v44, %s8830_s11 }
 0x45c   : > { %1931 = vrot.lane.b32.xlu1 %v1530_v17, %s8831_s12 }
 0x45d   : > { %1703 = vrot.lane.b32.xlu0 %v11292_v61, %s8830_s11 }
 0x460   : > { %1933 = vrot.lane.b32.xlu1 %v1618_v3, %s8831_s12  ;;  %v1620_v3 = vsel %vm1470_vm5, %v1535_v49, 0.0 }
 0x461   : > { %1705 = vrot.lane.b32.xlu0 %v11297_v50, %s8830_s11 }
 0x464   : > { %1935 = vrot.lane.b32.xlu1 %v1533_v48, %s8831_s12 }
 0x465   : > { %1707 = vrot.lane.b32.xlu0 %v11310_v57, %s8830_s11 }
 0x467   : > { %v1018_v51 = vpop.xlane.xlu1 %1017 }
 0x468   : > { %8790 = vrcp.f32 %v1018_v51  ;;  %1937 = vrot.lane.b32.xlu1 %v1619_v2, %s8831_s12 }
 0x469   : > { %1709 = vrot.lane.b32.xlu0 %v11315_v54, %s8830_s11 }
 0x46b   : > { %v1982_v29 = vpop.permute.xlu1 %1981  ;;  %v1015_v43 = vpop.xlane.xlu0 %1014 }
 0x46c   : > { %v11367_v4 = vsel %vm2111_vm7, %v2110_v56, %v1982_v29  ;;  %8792 = vrcp.f32 %v1015_v43  ;;  %1939 = vrot.lane.b32.xlu1 %v1536_v23, %s8831_s12  ;;  %v15895_v29 = vld [vmem:[#allocation53_spill] sm:$0xff]  ;;  %v15896_v23 = vld [vmem:[#allocation55_spill] sm:$0xff] }
 0x46d   : > { %7256 = vmatmul.mubr.msk.f32.gmra.mrb[30].mxu1 %vm2176_vm8, %v11367_v4  ;;  %1711 = vrot.lane.b32.xlu0 %v11328_v11, %s8830_s11 }
 0x46e   : > { %8009 = vmatprep.mubr.msk.f32.mxu1 %vm2176_vm8, %v15891_v16 }
 0x46f   : > { %v1900_v17 = vpop.permute.xlu0 %1899  ;;  %v1902_v30 = vpop.permute.xlu1 %1901 }
 0x470   : > { %v2134_v8 = vsel %vm2111_vm7, %v2069_v40, %v1900_v17  ;;  %1941 = vrot.lane.b32.xlu1 %v1620_v3, %s8831_s12  ;;  %v15897_v17 = vld [vmem:[#allocation57_spill] sm:$0xff] }
 0x471   : > { %8010 = vmatmul.mubr.msk.f32.vlgmr.msra.gmra.mrb[32].mxu1 %vm2176_vm8, %v10231_v39  ;;  %1713 = vrot.lane.b32.xlu0 %v11333_v19, %s8830_s11 }
 0x472   : > { %v8791_v9 = vpop.eup %8790  ;;  %7215 = vmatmul.mubr.msk.f32.gmra.mrb[44].mxu0 %vm2176_vm8, %v2134_v8  ;;  %8012 = vmatprep.mubr.msk.f32.mxu1 %vm2176_vm8, %v10243_v45  ;;  %v15892_v45 = vld [vmem:[#allocation40_spill] sm:$0xff] }
 0x473   : > { %v1678_v47 = vpop.permute.xlu0 %1677  ;;  %2581 = vmatprep.mubr.f32.mxu0 %v15779_v41  ;;  %v1182_v20 = vmul.f32 %v8791_v9, %v11007_v35  ;;  %v15893_v35 = vld [vmem:[#allocation50_spill] sm:$0xff] }
 0x474   : > { %v2070_v48 = vsel %vm496_vm1, %v1313_v27, %v1678_v47  ;;  %v15899_v27 = vld [vmem:[#allocation2_spill] sm:$0xff] }
 0x475   : > { %8013 = vmatmul.mubr.msk.f32.gmra.mrb[34].mxu1 %vm2176_vm8, %v10302_v46  ;;  %1715 = vrot.lane.b32.xlu0 %v11344_v60, %s8830_s11  ;;  %v2135_v39 = vsel %vm2111_vm7, %v2070_v48, %v1902_v30  ;;  %v1538_v2 = vrot.slane %v1182_v20, 1  ;;  %v1345_v49 = vrot.slane %v1182_v20, 7  ;;  %v15900_v30 = vld [vmem:[#allocation28_spill] sm:$0xff] }
 0x476   : > { %v8793_v0 = vpop.eup %8792  ;;  %7216 = vmatmul.mubr.msk.f32.gmra.mrb[46].mxu0 %vm2176_vm8, %v2135_v39  ;;  %8015 = vmatprep.mubr.msk.f32.mxu1 %vm2176_vm8, %v10317_v55 }
 0x477   : > { %v11402_v51 = vmul.f32 %v8793_v0, %v15892_v45  ;;  %2587 = vmatprep.mubr.f32.mxu0 %v15779_v41  ;;  %v1621_v16 = vsel %vm1470_vm5, %v1538_v2, 0.0  ;;  %v15901_v0 = vld [vmem:[#allocation34_spill] sm:$0xff] }
 0x479   : > { %8016 = vmatmul.mubr.msk.f32.gmra.mrb[36].mxu1 %vm2176_vm8, %v15893_v35  ;;  %1717 = vrot.lane.b32.xlu0 %v11349_v28, %s8830_s11  ;;  %v1537_v46 = vrot.slane %v11402_v51, 1  ;;  %v1344_v22 = vrot.slane %v11402_v51, 7 }
 0x47a   : > { %8018 = vmatprep.mubr.msk.f32.mxu1 %vm2176_vm8, %v15894_v36 }
 0x47b   : > { %v1539_v55 = vsel %vm1470_vm5, %v1537_v46, %v1538_v2  ;;  %v11417_v13 = vsel %vm1277_vm6, %v1344_v22, %v1345_v49  ;;  %v15903_v46 = vld [vmem:[#allocation32_spill] sm:$0xff]  ;;  %v15904_v2 = vld [vmem:[#allocation33_spill] sm:$0xff]  ;;  %v15906_v49 = vld [vmem:[#allocation38_spill] sm:$0xff] }
 0x47c   : > { %1943 = vrot.lane.b32.xlu1 %v1539_v55, %s8831_s12 }
 0x47d   : > { %v11420_v56 = vpop.f32.mrb[18].mxu1  ;;  %8019 = vmatmul.mubr.msk.f32.gmra.mrb[38].mxu1 %vm2176_vm8, %v15895_v29  ;;  %1719 = vrot.lane.b32.xlu0 %v11402_v51, %s8830_s11  ;;  %v1314_v29 = vrot.slane %v11135_v21, 7 }
 0x47e   : > { %v2787_v43 = vpop.f32.mrb[19].mxu1  ;;  %8021 = vmatprep.mubr.msk.f32.mxu1 %vm2176_vm8, %v15896_v23 }
 0x47f   : > { %v11429_v10 = vadd.f32 %v2787_v43, %v11239_v52  ;;  %v1450_v43 = vsel %vm1277_vm6, 0.0, %v1314_v29 }
 0x480   : > { %1945 = vrot.lane.b32.xlu1 %v1621_v16, %s8831_s12 }
 0x481   : > { %v11433_v40 = vpop.f32.mrb[32].mxu0  ;;  %8022 = vmatmul.mubr.msk.f32.gmra.mrb[40].mxu1 %vm2176_vm8, %v15897_v17  ;;  %1721 = vrot.lane.b32.xlu0 %v1182_v20, %s8830_s11 }
 0x482   : > { %v2543_v3 = vpop.f32.mrb[33].mxu0  ;;  %8024 = vmatprep.mubr.msk.f32.mxu1 %vm2176_vm8, %v15898_v32 }
 0x483   : > { %v11441_v9 = vadd.f32 %v2543_v3, %v11255_v7  ;;  %v15902_v7 = vld [vmem:[#allocation30_spill] sm:$0xff] }
 0x484   : > { %v15907_v3 = vld [vmem:[#allocation46_spill] sm:$0xff] }
 0x485   : > { %v11443_v52 = vpop.f32.mrb[20].mxu1  ;;  %8025 = vmatmul.mubr.msk.f32.gmra.mrb[42].mxu1 %vm2176_vm8, %v15899_v27  ;;  %v1317_v27 = vrot.slane %v11148_v6, 7 }
 0x486   : > { %v2793_v47 = vpop.f32.mrb[21].mxu1  ;;  %8027 = vmatprep.mubr.msk.f32.mxu1 %vm2176_vm8, %v15900_v30 }
 0x487   : > { %v11450_v48 = vadd.f32 %v2793_v47, %v11267_v24  ;;  %v15905_v24 = vld [vmem:[#allocation35_spill] sm:$0xff] }
 0x489   : > { %v11452_v20 = vpop.f32.mrb[34].mxu0  ;;  %8028 = vmatmul.mubr.msk.f32.gmra.mrb[44].mxu1 %vm2176_vm8, %v15901_v0 }
 0x48a   : > { %v2549_v45 = vpop.f32.mrb[35].mxu0  ;;  %8030 = vmatprep.mubr.msk.f32.mxu1 %vm2176_vm8, %v15902_v7  ;;  %v1451_v7 = vsel %vm1277_vm6, 0.0, %v1317_v27 }
 0x48b   : > { %v11459_v35 = vadd.f32 %v2549_v45, %v11283_v34 }
 0x48d   : > { %8031 = vmatmul.mubr.msk.f32.gmra.mrb[46].mxu1 %vm2176_vm8, %v15903_v46 }
 0x48e   : > { %8033 = vmatprep.mubr.msk.f32.mxu1 %vm2176_vm8, %v15904_v2 }
 0x491   : > { %8034 = vmatmul.mubr.msk.f32.gmra.mrb[48].mxu1 %vm2176_vm8, %v15905_v24  ;;  %v15908_v24 = vld [vmem:[#allocation48_spill] sm:$0xff] }
 0x492   : > { %8036 = vmatprep.mubr.msk.f32.mxu1 %vm2176_vm8, %v11056_v15 }
 0x495   : > { %8037 = vmatmul.mubr.msk.f32.gmra.mrb[50].mxu1 %vm2176_vm8, %v15906_v49  ;;  %v1318_v49 = vrot.slane %v11143_v42, 7 }
 0x496   : > { %8039 = vmatprep.mubr.msk.f32.mxu1 %vm2176_vm8, %v11186_v1  ;;  %v1315_v1 = vrot.slane %v11132_v62, 7 }
 0x497   : > { %v1319_v42 = vsel %vm1277_vm6, %v1317_v27, %v1318_v49 }
 0x498   : > { %v1316_v17 = vsel %vm1277_vm6, %v1314_v29, %v1315_v1 }
 0x499   : > { %8040 = vmatmul.mubr.msk.f32.gmra.mrb[52].mxu1 %vm2176_vm8, %v11223_v38 }
 0x49a   : > { %8042 = vmatprep.mubr.msk.f32.mxu1 %vm2176_vm8, %v2134_v8 }
 0x49d   : > { %8043 = vmatmul.mubr.msk.f32.gmra.mrb[54].mxu1 %vm2176_vm8, %v2135_v39 }
 0x4a0   : > { %v1024_v34 = vpop.xlane.xlu1 %1023 }
 0x4a1   : > { %8794 = vrcp.f32 %v1024_v34 }
 0x4a4   : > { %v1904_v36 = vpop.permute.xlu1 %1903  ;;  %v1021_v55 = vpop.xlane.xlu0 %1020 }
 0x4a5   : > { %8796 = vrcp.f32 %v1021_v55 }
 0x4a8   : > { %v1906_v15 = vpop.permute.xlu1 %1905  ;;  %v1680_v23 = vpop.permute.xlu0 %1679 }
 0x4a9   : > { %v2071_v16 = vsel %vm496_vm1, %v1450_v43, %v1680_v23 }
 0x4aa   : > { %v2136_v38 = vsel %vm2111_vm7, %v2071_v16, %v1904_v36  ;;  %v1320_v16 = vrot.slane %v11181_v59, 7  ;;  %v1321_v59 = vrot.slane %v11170_v25, 7 }
 0x4ab   : > { %v8795_v8 = vpop.eup %8794  ;;  %7217 = vmatmul.mubr.msk.f32.gmra.mrb[48].mxu0 %vm2176_vm8, %v2136_v38  ;;  %8045 = vmatprep.mubr.msk.f32.mxu1 %vm2176_vm8, %v2136_v38 }
 0x4ac   : > { %v1908_v39 = vpop.permute.xlu1 %1907  ;;  %v1682_v21 = vpop.permute.xlu0 %1681  ;;  %v1184_v32 = vmul.f32 %v8795_v8, %v15907_v3  ;;  %2593 = vmatprep.mubr.f32.mxu0 %v15779_v41 }
 0x4ad   : > { %v2072_v62 = vsel %vm496_vm1, %v1316_v17, %v1682_v21  ;;  %v1452_v21 = vsel %vm1277_vm6, 0.0, %v1320_v16 }
 0x4ae   : > { %1725 = vrot.lane.b32.xlu1 %v1184_v32, %s8830_s11  ;;  %v2137_v47 = vsel %vm2111_vm7, %v2072_v62, %v1906_v15  ;;  %v1541_v30 = vrot.slane %v1184_v32, 1  ;;  %v1348_v29 = vrot.slane %v1184_v32, 7 }
 0x4af   : > { %v8797_v0 = vpop.eup %8796  ;;  %7218 = vmatmul.mubr.msk.f32.gmra.mrb[50].mxu0 %vm2176_vm8, %v2137_v47  ;;  %8046 = vmatmul.mubr.msk.f32.gmra.mrb[56].mxu1 %vm2176_vm8, %v2137_v47  ;;  %v1322_v47 = vsel %vm1277_vm6, %v1320_v16, %v1321_v59 }
 0x4b0   : > { %v1910_v45 = vpop.permute.xlu1 %1909  ;;  %v1684_v46 = vpop.permute.xlu0 %1683  ;;  %v1622_v2 = vsel %vm1470_vm5, %v1541_v30, 0.0  ;;  %v11496_v6 = vmul.f32 %v8797_v0, %v15908_v24  ;;  %2599 = vmatprep.mubr.f32.mxu0 %v15779_v41  ;;  %v1323_v0 = vrot.slane %v11208_v63, 7 }
 0x4b1   : > { %v2073_v34 = vsel %vm496_vm1, %v1451_v7, %v1684_v46 }
 0x4b2   : > { %1949 = vrot.lane.b32.xlu1 %v1622_v2, %s8831_s12  ;;  %1723 = vrot.lane.b32.xlu0 %v11496_v6, %s8830_s11  ;;  %v2138_v36 = vsel %vm2111_vm7, %v2073_v34, %v1908_v39  ;;  %v1540_v55 = vrot.slane %v11496_v6, 1  ;;  %v1347_v15 = vrot.slane %v11496_v6, 7  ;;  %v1453_v49 = vsel %vm1277_vm6, 0.0, %v1323_v0  ;;  %v15910_v6 = vld [vmem:[#allocation51_spill] sm:$0xff] }
 0x4b3   : > { %7219 = vmatmul.mubr.msk.f32.gmra.mrb[52].mxu0 %vm2176_vm8, %v2138_v36  ;;  %8048 = vmatprep.mubr.msk.f32.mxu1 %vm2176_vm8, %v2138_v36 }
 0x4b4   : > { %v1912_v43 = vpop.permute.xlu1 %1911  ;;  %v1686_v23 = vpop.permute.xlu0 %1685  ;;  %v1542_v1 = vsel %vm1470_vm5, %v1540_v55, %v1541_v30  ;;  %2605 = vmatprep.mubr.f32.mxu0 %v15779_v41  ;;  %v11516_v38 = vsel %vm1277_vm6, %v1347_v15, %v1348_v29  ;;  %v1324_v29 = vrot.slane %v11217_v58, 7 }
 0x4b5   : > { %v2074_v8 = vsel %vm496_vm1, %v1319_v42, %v1686_v23 }
 0x4b6   : > { %1947 = vrot.lane.b32.xlu0 %v1542_v1, %s8831_s12  ;;  %v2139_v39 = vsel %vm2111_vm7, %v2074_v8, %v1910_v45  ;;  %v1325_v42 = vsel %vm1277_vm6, %v1323_v0, %v1324_v29  ;;  %v1326_v1 = vrot.slane %v11237_v53, 7 }
 0x4b7   : > { %7220 = vmatmul.mubr.msk.f32.gmra.mrb[54].mxu0 %vm2176_vm8, %v2139_v39  ;;  %8049 = vmatmul.mubr.msk.f32.gmra.mrb[58].mxu1 %vm2176_vm8, %v2139_v39 }
 0x4b8   : > { %v1914_v17 = vpop.permute.xlu1 %1913  ;;  %v1688_v3 = vpop.permute.xlu0 %1687  ;;  %2611 = vmatprep.mubr.f32.mxu0 %v15779_v41  ;;  %v1454_v53 = vsel %vm1277_vm6, 0.0, %v1326_v1 }
 0x4b9   : > { %v2075_v32 = vsel %vm496_vm1, %v1452_v21, %v1688_v3 }
 0x4ba   : > { %v2140_v27 = vsel %vm2111_vm7, %v2075_v32, %v1912_v43 }
 0x4bb   : > { %7221 = vmatmul.mubr.msk.f32.gmra.mrb[56].mxu0 %vm2176_vm8, %v2140_v27  ;;  %8051 = vmatprep.mubr.msk.f32.mxu1 %vm2176_vm8, %v2140_v27 }
 0x4bc   : > { %v1916_v62 = vpop.permute.xlu1 %1915  ;;  %v1690_v30 = vpop.permute.xlu0 %1689  ;;  %2617 = vmatprep.mubr.f32.mxu0 %v15779_v41 }
 0x4bd   : > { %v2076_v45 = vsel %vm496_vm1, %v1322_v47, %v1690_v30 }
 0x4be   : > { %v11534_v7 = vpop.f32.mrb[22].mxu1  ;;  %v2141_v25 = vsel %vm2111_vm7, %v2076_v45, %v1914_v17  ;;  %v1329_v45 = vrot.slane %v11265_v12, 7 }
 0x4bf   : > { %7222 = vmatmul.mubr.msk.f32.gmra.mrb[58].mxu0 %vm2176_vm8, %v2141_v25  ;;  %v2799_v46 = vpop.f32.mrb[23].mxu1  ;;  %8052 = vmatmul.mubr.msk.f32.gmra.mrb[60].mxu1 %vm2176_vm8, %v2141_v25 }
 0x4c0   : > { %v11540_v2 = vadd.f32 %v2799_v46, %v11420_v56  ;;  %v1918_v24 = vpop.permute.xlu1 %1917  ;;  %v1692_v34 = vpop.permute.xlu0 %1691  ;;  %2623 = vmatprep.mubr.f32.mxu0 %v15779_v41 }
 0x4c1   : > { %v2077_v63 = vsel %vm496_vm1, %v1453_v49, %v1692_v34  ;;  %v1455_v49 = vsel %vm1277_vm6, 0.0, %v1329_v45 }
 0x4c2   : > { %v11545_v36 = vpop.f32.mrb[36].mxu0  ;;  %v2142_v55 = vsel %vm2111_vm7, %v2077_v63, %v1916_v62  ;;  %v1327_v62 = vrot.slane %v11245_v33, 7 }
 0x4c3   : > { %v2555_v43 = vpop.f32.mrb[37].mxu0  ;;  %7223 = vmatmul.mubr.msk.f32.gmra.mrb[60].mxu0 %vm2176_vm8, %v2142_v55  ;;  %8054 = vmatprep.mubr.msk.f32.mxu1 %vm2176_vm8, %v2142_v55 }
 0x4c4   : > { %v1920_v56 = vpop.permute.xlu1 %1919  ;;  %v1694_v23 = vpop.permute.xlu0 %1693  ;;  %2628 = vmatprep.mubr.f32.mxu0 %v15779_v41  ;;  %v11555_v16 = vadd.f32 %v2555_v43, %v11433_v40  ;;  %v1328_v30 = vsel %vm1277_vm6, %v1326_v1, %v1327_v62 }
 0x4c5   : > { %v2078_v8 = vsel %vm496_vm1, %v1325_v42, %v1694_v23 }
 0x4c6   : > { %v11558_v39 = vpop.f32.mrb[24].mxu1  ;;  %v2143_v58 = vsel %vm2111_vm7, %v2078_v8, %v1918_v24 }
 0x4c7   : > { %7224 = vmatmul.mubr.msk.f32.gmra.mrb[62].mxu0 %vm2176_vm8, %v2143_v58  ;;  %v2805_v17 = vpop.f32.mrb[25].mxu1  ;;  %8055 = vmatmul.mubr.msk.f32.gmra.mrb[62].mxu1 %vm2176_vm8, %v2143_v58 }
 0x4c8   : > { %v11564_v21 = vadd.f32 %v2805_v17, %v11443_v52  ;;  %v1922_v3 = vpop.permute.xlu1 %1921  ;;  %v1696_v59 = vpop.permute.xlu0 %1695  ;;  %2633 = vmatprep.mubr.f32.mxu0 %v15779_v41 }
 0x4c9   : > { %v2079_v40 = vsel %vm496_vm1, %v1454_v53, %v1696_v59 }
 0x4ca   : > { %v11569_v32 = vpop.f32.mrb[38].mxu0  ;;  %v2144_v27 = vsel %vm2111_vm7, %v2079_v40, %v1920_v56  ;;  %v1332_v56 = vrot.slane %v11292_v61, 7  ;;  %v1333_v61 = vrot.slane %v11297_v50, 7  ;;  %v1335_v40 = vrot.slane %v11310_v57, 7 }
 0x4cb   : > { %v2561_v47 = vpop.f32.mrb[39].mxu0  ;;  %7225 = vmatmul.mubr.msk.f32.gmra.mrb[64].mxu0 %vm2176_vm8, %v2144_v27  ;;  %8057 = vmatprep.mubr.msk.f32.mxu1 %vm2176_vm8, %v2144_v27  ;;  %v1336_v57 = vrot.slane %v11315_v54, 7 }
 0x4cc   : > { %v1924_v52 = vpop.permute.xlu1 %1923  ;;  %v1698_v0 = vpop.permute.xlu0 %1697  ;;  %2639 = vmatprep.mubr.f32.mxu0 %v15779_v41  ;;  %v11579_v25 = vadd.f32 %v2561_v47, %v11452_v20  ;;  %v1330_v20 = vrot.slane %v11273_v44, 7  ;;  %v1456_v1 = vsel %vm1277_vm6, 0.0, %v1332_v56  ;;  %v1334_v53 = vsel %vm1277_vm6, %v1332_v56, %v1333_v61 }
 0x4cd   : > { %v2080_v46 = vsel %vm496_vm1, %v1328_v30, %v1698_v0  ;;  %v1457_v47 = vsel %vm1277_vm6, 0.0, %v1335_v40 }
 0x4ce   : > { %v2145_v33 = vsel %vm2111_vm7, %v2080_v46, %v1922_v3  ;;  %v1331_v29 = vsel %vm1277_vm6, %v1329_v45, %v1330_v20  ;;  %v1337_v46 = vsel %vm1277_vm6, %v1335_v40, %v1336_v57 }
 0x4cf   : > { %7226 = vmatmul.mubr.msk.f32.gmra.mrb[66].mxu0 %vm2176_vm8, %v2145_v33  ;;  %8058 = vmatmul.mubr.msk.f32.gmra.mrb[64].mxu1 %vm2176_vm8, %v2145_v33 }
 0x4d0   : > { %v1926_v24 = vpop.permute.xlu1 %1925  ;;  %v1700_v34 = vpop.permute.xlu0 %1699  ;;  %2645 = vmatprep.mubr.f32.mxu0 %v15779_v41 }
 0x4d1   : > { %v2081_v63 = vsel %vm496_vm1, %v1455_v49, %v1700_v34 }
 0x4d2   : > { %v2146_v12 = vsel %vm2111_vm7, %v2081_v63, %v1924_v52 }
 0x4d3   : > { %7227 = vmatmul.mubr.msk.f32.gmra.mrb[68].mxu0 %vm2176_vm8, %v2146_v12  ;;  %8060 = vmatprep.mubr.msk.f32.mxu1 %vm2176_vm8, %v2146_v12 }
 0x4d4   : > { %v1928_v55 = vpop.permute.xlu1 %1927  ;;  %v1702_v43 = vpop.permute.xlu0 %1701  ;;  %2651 = vmatprep.mubr.f32.mxu0 %v15779_v41 }
 0x4d5   : > { %v2082_v42 = vsel %vm496_vm1, %v1331_v29, %v1702_v43 }
 0x4d6   : > { %v2147_v23 = vsel %vm2111_vm7, %v2082_v42, %v1926_v24  ;;  %v1338_v24 = vrot.slane %v11328_v11, 7  ;;  %v1339_v11 = vrot.slane %v11333_v19, 7  ;;  %v1341_v42 = vrot.slane %v11344_v60, 7 }
 0x4d7   : > { %7228 = vmatmul.mubr.msk.f32.gmra.mrb[70].mxu0 %vm2176_vm8, %v2147_v23  ;;  %8061 = vmatmul.mubr.msk.f32.gmra.mrb[66].mxu1 %vm2176_vm8, %v2147_v23  ;;  %v1342_v60 = vrot.slane %v11349_v28, 7  ;;  %v1460_v28 = vsel %vm1277_vm6, 0.0, %v1344_v22 }
 0x4d8   : > { %v1930_v44 = vpop.permute.xlu1 %1929  ;;  %v1704_v8 = vpop.permute.xlu0 %1703  ;;  %2657 = vmatprep.mubr.f32.mxu0 %v15779_v41  ;;  %v1458_v63 = vsel %vm1277_vm6, 0.0, %v1338_v24  ;;  %v1340_v43 = vsel %vm1277_vm6, %v1338_v24, %v1339_v11  ;;  %v1459_v19 = vsel %vm1277_vm6, 0.0, %v1341_v42 }
 0x4d9   : > { %v2083_v58 = vsel %vm496_vm1, %v1456_v1, %v1704_v8  ;;  %v1343_v61 = vsel %vm1277_vm6, %v1341_v42, %v1342_v60  ;;  %v15915_v42 = vld [vmem:[#allocation21_spill] sm:$0xff] }
 0x4da   : > { %v2148_v17 = vsel %vm2111_vm7, %v2083_v58, %v1928_v55  ;;  %v15921_v60 = vld [vmem:[#allocation17_spill] sm:$0xff] }
 0x4db   : > { %7229 = vmatmul.mubr.msk.f32.gmra.mrb[72].mxu0 %vm2176_vm8, %v2148_v17  ;;  %8063 = vmatprep.mubr.msk.f32.mxu1 %vm2176_vm8, %v2148_v17 }
 0x4dc   : > { %v1932_v3 = vpop.permute.xlu1 %1931  ;;  %v1706_v59 = vpop.permute.xlu0 %1705  ;;  %2663 = vmatprep.mubr.f32.mxu0 %v15779_v41 }
 0x4dd   : > { %v2084_v27 = vsel %vm496_vm1, %v1334_v53, %v1706_v59 }
 0x4de   : > { %v2149_v62 = vsel %vm2111_vm7, %v2084_v27, %v1930_v44 }
 0x4df   : > { %7230 = vmatmul.mubr.msk.f32.gmra.mrb[74].mxu0 %vm2176_vm8, %v2149_v62  ;;  %8064 = vmatmul.mubr.msk.f32.gmra.mrb[68].mxu1 %vm2176_vm8, %v2149_v62 }
 0x4e0   : > { %v1934_v50 = vpop.permute.xlu1 %1933  ;;  %v1708_v52 = vpop.permute.xlu0 %1707  ;;  %2669 = vmatprep.mubr.f32.mxu0 %v15779_v41 }
 0x4e1   : > { %v2085_v30 = vsel %vm496_vm1, %v1457_v47, %v1708_v52 }
 0x4e2   : > { %v2150_v0 = vsel %vm2111_vm7, %v2085_v30, %v1932_v3 }
 0x4e3   : > { %7231 = vmatmul.mubr.msk.f32.gmra.mrb[76].mxu0 %vm2176_vm8, %v2150_v0  ;;  %8066 = vmatprep.mubr.msk.f32.mxu1 %vm2176_vm8, %v2150_v0 }
 0x4e4   : > { %v1936_v45 = vpop.permute.xlu1 %1935  ;;  %v1710_v33 = vpop.permute.xlu0 %1709  ;;  %2675 = vmatprep.mubr.f32.mxu0 %v15779_v41 }
 0x4e5   : > { %v2086_v49 = vsel %vm496_vm1, %v1337_v46, %v1710_v33 }
 0x4e6   : > { %v2151_v34 = vsel %vm2111_vm7, %v2086_v49, %v1934_v50 }
 0x4e7   : > { %7232 = vmatmul.mubr.msk.f32.gmra.mrb[78].mxu0 %vm2176_vm8, %v2151_v34  ;;  %8067 = vmatmul.mubr.msk.f32.gmra.mrb[70].mxu1 %vm2176_vm8, %v2151_v34 }
 0x4e8   : > { %v1938_v54 = vpop.permute.xlu1 %1937  ;;  %v1712_v12 = vpop.permute.xlu0 %1711  ;;  %2681 = vmatprep.mubr.f32.mxu0 %v15779_v41 }
 0x4e9   : > { %v2087_v20 = vsel %vm496_vm1, %v1458_v63, %v1712_v12 }
 0x4ea   : > { %v2152_v55 = vsel %vm2111_vm7, %v2087_v20, %v1936_v45 }
 0x4eb   : > { %7233 = vmatmul.mubr.msk.f32.gmra.mrb[80].mxu0 %vm2176_vm8, %v2152_v55  ;;  %8069 = vmatprep.mubr.msk.f32.mxu1 %vm2176_vm8, %v2152_v55 }
 0x4ec   : > { %v1940_v29 = vpop.permute.xlu1 %1939  ;;  %v1714_v56 = vpop.permute.xlu0 %1713  ;;  %2687 = vmatprep.mubr.f32.mxu0 %v15779_v41 }
 0x4ed   : > { %v2088_v23 = vsel %vm496_vm1, %v1340_v43, %v1714_v56  ;;  %v15914_v56 = vld [vmem:[#allocation4_spill] sm:$0xff] }
 0x4ee   : > { %v2153_v44 = vsel %vm2111_vm7, %v2088_v23, %v1938_v54  ;;  %v15917_v23 = vld [vmem:[#allocation9_spill] sm:$0xff] }
 0x4ef   : > { %7234 = vmatmul.mubr.msk.f32.gmra.mrb[82].mxu0 %vm2176_vm8, %v2153_v44  ;;  %8070 = vmatmul.mubr.msk.f32.gmra.mrb[72].mxu1 %vm2176_vm8, %v2153_v44  ;;  %v15918_v44 = vld [vmem:[#allocation36_spill] sm:$0xff] }
 0x4f0   : > { %v1716_v1 = vpop.permute.xlu0 %1715  ;;  %2693 = vmatprep.mubr.f32.mxu0 %v15779_v41  ;;  %v1942_v8 = vpop.permute.xlu1 %1941 }
 0x4f1   : > { %v2089_v58 = vsel %vm496_vm1, %v1459_v19, %v1716_v1  ;;  %v15919_v19 = vld [vmem:[#allocation13_spill] sm:$0xff] }
 0x4f2   : > { %v2154_v17 = vsel %vm2111_vm7, %v2089_v58, %v1940_v29 }
 0x4f3   : > { %7235 = vmatmul.mubr.msk.f32.gmra.mrb[84].mxu0 %vm2176_vm8, %v2154_v17  ;;  %8072 = vmatprep.mubr.msk.f32.mxu1 %vm2176_vm8, %v2154_v17 }
 0x4f4   : > { %v1718_v3 = vpop.permute.xlu0 %1717  ;;  %2699 = vmatprep.mubr.f32.mxu0 %v15779_v41  ;;  %v1944_v40 = vpop.permute.xlu1 %1943 }
 0x4f5   : > { %v2090_v53 = vsel %vm496_vm1, %v1343_v61, %v1718_v3  ;;  %v15922_v3 = vld [vmem:[#allocation39_spill] sm:$0xff] }
 0x4f6   : > { %v2155_v59 = vsel %vm2111_vm7, %v2090_v53, %v1942_v8  ;;  %v15920_v8 = vld [vmem:[#allocation37_spill] sm:$0xff] }
 0x4f7   : > { %7236 = vmatmul.mubr.msk.f32.gmra.mrb[86].mxu0 %vm2176_vm8, %v2155_v59  ;;  %8073 = vmatmul.mubr.msk.f32.gmra.mrb[74].mxu1 %vm2176_vm8, %v2155_v59 }
 0x4f8   : > { %v1720_v27 = vpop.permute.xlu0 %1719  ;;  %2705 = vmatprep.mubr.f32.mxu0 %v15779_v41  ;;  %v1946_v52 = vpop.permute.xlu1 %1945 }
 0x4f9   : > { %v2091_v62 = vsel %vm496_vm1, %v1460_v28, %v1720_v27 }
 0x4fa   : > { %v2156_v50 = vsel %vm2111_vm7, %v2091_v62, %v1944_v40  ;;  %v15923_v62 = vld [vmem:[#allocation59_spill] sm:$0xff] }
 0x4fb   : > { %7237 = vmatmul.mubr.msk.f32.gmra.mrb[88].mxu0 %vm2176_vm8, %v2156_v50  ;;  %8075 = vmatprep.mubr.msk.f32.mxu1 %vm2176_vm8, %v2156_v50 }
 0x4fc   : > { %v1722_v47 = vpop.permute.xlu0 %1721  ;;  %2711 = vmatprep.mubr.f32.mxu0 %v15779_v41 }
 0x4fd   : > { %v2092_v51 = vsel %vm496_vm1, %v11417_v13, %v1722_v47 }
 0x4fe   : > { %v2157_v22 = vsel %vm2111_vm7, %v2092_v51, %v1946_v52  ;;  %v15924_v51 = vld [vmem:[#allocation58_spill] sm:$0xff] }
 0x4ff   : > { %7238 = vmatmul.mubr.msk.f32.gmra.mrb[90].mxu0 %vm2176_vm8, %v2157_v22  ;;  %v2809_v30 = vpop.f32.mrb[26].mxu1  ;;  %8076 = vmatmul.mubr.msk.f32.gmra.mrb[76].mxu1 %vm2176_vm8, %v2157_v22 }
 0x500   : > { %v2811_v0 = vpop.f32.mrb[27].mxu1  ;;  %2717 = vmatprep.mubr.f32.mxu0 %v15779_v41 }
 0x501   : > { %v11670_v57 = vadd.f32 %v2811_v0, %v11534_v7  ;;  %v1461_v7 = vsel %vm1277_vm6, 0.0, %v1347_v15  ;;  %v15911_v15 = vld [vmem:[#allocation54_spill] sm:$0xff] }
 0x503   : > { %v2565_v45 = vpop.f32.mrb[40].mxu0 }
 0x504   : > { %v2567_v46 = vpop.f32.mrb[41].mxu0 }
 0x505   : > { %v11673_v33 = vadd.f32 %v2567_v46, %v11545_v36 }
 0x507   : > { %v2815_v24 = vpop.f32.mrb[28].mxu1 }
 0x508   : > { %v2816_v13 = vpop.f32.mrb[29].mxu1  ;;  %v15926_v24 = vld [vmem:[#allocation60_spill] sm:$0xff] }
 0x509   : > { %v11676_v49 = vadd.f32 %v2816_v13, %v11558_v39 }
 0x50b   : > { %15909 = vst [vmem:[#allocation47_spill] sm:$0xff] %v11676_v49  ;;  %v2571_v34 = vpop.f32.mrb[42].mxu0 }
 0x50c   : > { %v2573_v54 = vpop.f32.mrb[43].mxu0 }
 0x50d   : > { %v11679_v63 = vadd.f32 %v2573_v54, %v11569_v32  ;;  %v15913_v32 = vld [vmem:[#allocation25_spill] sm:$0xff] }
 0x520   : > { %v1726_v12 = vpop.permute.xlu1 %1725 }
 0x521   : > { %v2094_v29 = vsel %vm496_vm1, %v11516_v38, %v1726_v12  ;;  %v15912_v38 = vld [vmem:[#allocation56_spill] sm:$0xff]  ;;  %v15927_v12 = vld [vmem:[#allocation22_spill] sm:$0xff] }
 0x524   : > { %v1724_v20 = vpop.permute.xlu0 %1723  ;;  %v1950_v55 = vpop.permute.xlu1 %1949 }
 0x525   : > { %v2093_v36 = vsel %vm496_vm1, %v1461_v7, %v1724_v20  ;;  %v2159_v43 = vsel %vm2111_vm7, %v2094_v29, %v1950_v55  ;;  %v15928_v7 = vld [vmem:[#allocation5_spill] sm:$0xff] }
 0x528   : > { %v1948_v11 = vpop.permute.xlu0 %1947 }
 0x529   : > { %v2158_v39 = vsel %vm2111_vm7, %v2093_v36, %v1948_v11 }
 0x52a   : > { %7239 = vmatmul.mubr.msk.f32.gmra.mrb[92].mxu0 %vm2176_vm8, %v2158_v39  ;;  %8078 = vmatprep.mubr.msk.f32.mxu1 %vm2176_vm8, %v2158_v39  ;;  %v15930_v39 = vld [vmem:[#allocation6_spill] sm:$0xff] }
 0x52b   : > { %8079 = vmatmul.mubr.msk.f32.gmra.mrb[78].mxu1 %vm2176_vm8, %v2159_v43  ;;  %2723 = vmatprep.mubr.f32.mxu0 %v15779_v41  ;;  %v15916_v41 = vld [vmem:[#allocation26_spill] sm:$0xff] }
 0x52c   : > { %8081 = vmatprep.mubr.msk.f32.mxu1 %vm2176_vm8, %v15910_v6 }
 0x52e   : > { %7240 = vmatmul.mubr.msk.f32.gmra.mrb[94].mxu0 %vm2176_vm8, %v2159_v43 }
 0x52f   : > { %8082 = vmatmul.mubr.msk.f32.gmra.mrb[80].mxu1 %vm2176_vm8, %v15911_v15  ;;  %v8438_v15 = vld [vmem:[%s15536_s4] ss:$12 sps:$4 sm:$0xff]  }
 0x530   : > { %8084 = vmatprep.mubr.msk.f32.mxu1 %vm2176_vm8, %v15912_v38  ;;  %v8440_v38 = vld [vmem:[%s15536_s4 + $0x4] ss:$12 sps:$4 sm:$0xff]  }
 0x531   : > { %4902 = vmatprep.subr.bf16.mxu1 %v8440_v38 }
 0x532   : > { %4903 = vmatpush1.bf16.msra.mxu1 %v8438_v15 }
 0x533   : > { %8085 = vmatmul.mubr.msk.f32.gmra.mrb[82].mxu1 %vm2176_vm8, %v15913_v32  ;;  %v15931_v32 = vld [vmem:[#allocation11_spill] sm:$0xff] }
 0x534   : > { %8087 = vmatprep.mubr.msk.f32.mxu1 %vm2176_vm8, %v15914_v56 }
 0x537   : > { %8088 = vmatmul.mubr.msk.f32.gmra.mrb[84].mxu1 %vm2176_vm8, %v15915_v42 }
 0x538   : > { %8090 = vmatprep.mubr.msk.f32.mxu1 %vm2176_vm8, %v15916_v41  ;;  %v8443_v41 = vld [vmem:[%s15536_s4 + $0x1c] ss:$12 sps:$4 sm:$0xff]  }
 0x539   : > { %4904 = vmatprep.subr.bf16.mxu1 %v8443_v41 }
 0x53b   : > { %8091 = vmatmul.mubr.msk.f32.gmra.mrb[86].mxu1 %vm2176_vm8, %v15917_v23  ;;  %v15932_v23 = vld [vmem:[#allocation12_spill] sm:$0xff] }
 0x53c   : > { %8093 = vmatprep.mubr.msk.f32.mxu1 %vm2176_vm8, %v15918_v44 }
 0x53f   : > { %8094 = vmatmul.mubr.msk.f32.gmra.mrb[88].mxu1 %vm2176_vm8, %v15919_v19  ;;  %v8441_v19 = vld [vmem:[%s15536_s4 + $0x18] ss:$12 sps:$4 sm:$0xff]  }
 0x540   : > { %v2820_v1 = vpop.f32.mrb[30].mxu1  ;;  %8096 = vmatprep.mubr.msk.f32.mxu1 %vm2176_vm8, %v15920_v8  ;;  %v8446_v8 = vld [vmem:[%s15536_s4 + $0x34] ss:$12 sps:$4 sm:$0xff]   ;;  %4905 = vmatpush1.bf16.msra.mxu1 %v8441_v19 }
 0x541   : > { %v2821_v58 = vpop.f32.mrb[31].mxu1  ;;  %4906 = vmatprep.subr.bf16.mxu1 %v8446_v8 }
 0x542   : > { %v11716_v17 = vadd.f32 %v2821_v58, %v2809_v30  ;;  %v15933_v58 = vld [vmem:[#allocation15_spill] sm:$0xff] }
 0x543   : > { %8097 = vmatmul.mubr.msk.f32.gmra.mrb[90].mxu1 %vm2176_vm8, %v15921_v60 }
 0x544   : > { %v8011_v61 = vpop.f32.mrb[32].mxu1  ;;  %8099 = vmatprep.mubr.msk.f32.mxu1 %vm2176_vm8, %v15922_v3  ;;  %v15934_v3 = vld [vmem:[#allocation16_spill] sm:$0xff] }
 0x545   : > { %v11722_v53 = vpop.f32.mrb[44].mxu0  ;;  %v2890_v59 = vpop.f32.mrb[33].mxu1 }
 0x546   : > { %v2579_v40 = vpop.f32.mrb[45].mxu0 }
 0x547   : > { %8100 = vmatmul.mubr.msk.f32.gmra.mrb[92].mxu1 %vm2176_vm8, %v11166_v5  ;;  %v11726_v28 = vadd.f32 %v2579_v40, %v2565_v45  ;;  %v15925_v45 = vld [vmem:[#allocation3_spill] sm:$0xff]  ;;  %v8444_v40 = vld [vmem:[%s15536_s4 + $0x30] ss:$12 sps:$4 sm:$0xff]  }
 0x548   : > { %v8014_v27 = vpop.f32.mrb[34].mxu1  ;;  %8102 = vmatprep.mubr.msk.f32.mxu1 %vm2176_vm8, %v11204_v26  ;;  %4907 = vmatpush1.bf16.msra.mxu1 %v8444_v40 }
 0x549   : > { %v11731_v50 = vadd.f32 %v8014_v27, %v15923_v62  ;;  %v11733_v47 = vpop.f32.mrb[46].mxu0  ;;  %v2898_v52 = vpop.f32.mrb[35].mxu1  ;;  %v8449_v62 = vld [vmem:[%s15536_s4 + $0x4c] ss:$12 sps:$4 sm:$0xff]  }
 0x54a   : > { %v11736_v22 = vadd.f32 %v2898_v52, %v15924_v51  ;;  %v2585_v30 = vpop.f32.mrb[47].mxu0  ;;  %v15935_v52 = vld [vmem:[#allocation44_spill] sm:$0xff]  ;;  %4908 = vmatprep.subr.bf16.mxu1 %v8449_v62 }
 0x54b   : > { %8103 = vmatmul.mubr.msk.f32.gmra.mrb[94].mxu1 %vm2176_vm8, %v11367_v4  ;;  %v11740_v5 = vadd.f32 %v2585_v30, %v2571_v34  ;;  %v15929_v4 = vld [vmem:[#allocation7_spill] sm:$0xff] }
 0x54c   : > { %v8017_v0 = vpop.f32.mrb[36].mxu1 }
 0x54d   : > { %v11743_v46 = vadd.f32 %v8017_v0, %v15925_v45  ;;  %v2908_v26 = vpop.f32.mrb[37].mxu1  ;;  %v15936_v0 = vld [vmem:[#allocation18_spill] sm:$0xff] }
 0x54e   : > { %v11746_v13 = vadd.f32 %v15926_v24, %v2908_v26  ;;  %v8447_v26 = vld [vmem:[%s15536_s4 + $0x48] ss:$12 sps:$4 sm:$0xff]  }
 0x54f   : > { %4909 = vmatpush1.bf16.msra.mxu1 %v8447_v26 }
 0x550   : > { %v8020_v54 = vpop.f32.mrb[38].mxu1 }
 0x551   : > { %v11749_v20 = vadd.f32 %v8020_v54, %v15927_v12  ;;  %v2918_v55 = vpop.f32.mrb[39].mxu1  ;;  %v8452_v54 = vld [vmem:[%s15536_s4 + $0x64] ss:$12 sps:$4 sm:$0xff]  }
 0x552   : > { %v11752_v36 = vadd.f32 %v15928_v7, %v2918_v55  ;;  %4910 = vmatprep.subr.bf16.mxu1 %v8452_v54 }
 0x554   : > { %v8023_v11 = vpop.f32.mrb[40].mxu1 }
 0x555   : > { %v11755_v34 = vadd.f32 %v8023_v11, %v15929_v4  ;;  %v2928_v29 = vpop.f32.mrb[41].mxu1  ;;  %v8450_v11 = vld [vmem:[%s15536_s4 + $0x60] ss:$12 sps:$4 sm:$0xff]  }
 0x556   : > { %v11758_v43 = vadd.f32 %v15930_v39, %v2928_v29  ;;  %4911 = vmatpush1.bf16.msra.mxu1 %v8450_v11 }
 0x558   : > { %v8026_v6 = vpop.f32.mrb[42].mxu1 }
 0x559   : > { %v11767_v56 = vadd.f32 %v8026_v6, %v15931_v32  ;;  %v2938_v42 = vpop.f32.mrb[43].mxu1 }
 0x55a   : > { %v11773_v44 = vadd.f32 %v15932_v23, %v2938_v42  ;;  %v3406_v42 = vmul.f32 %v11746_v13, %v11746_v13 }
 0x55c   : > { %v8029_v1 = vpop.f32.mrb[44].mxu1 }
 0x55d   : > { %v11782_v60 = vadd.f32 %v8029_v1, %v15933_v58  ;;  %v2948_v61 = vpop.f32.mrb[45].mxu1 }
 0x55e   : > { %v11785_v59 = vadd.f32 %v15934_v3, %v2948_v61  ;;  %v3407_v61 = vmul.f32 %v11743_v46, %v11743_v46 }
 0x560   : > { %v8032_v27 = vpop.f32.mrb[46].mxu1 }
 0x561   : > { %v11794_v51 = vadd.f32 %v8032_v27, %v15935_v52  ;;  %v2958_v30 = vpop.f32.mrb[47].mxu1 }
 0x562   : > { %v11797_v45 = vadd.f32 %v15936_v0, %v2958_v30 }
 0x564   : > { %v8035_v24 = vpop.f32.mrb[48].mxu1 }
 0x565   : > { %v11806_v12 = vadd.f32 %v8035_v24, %v11289_v18  ;;  %v2968_v55 = vpop.f32.mrb[49].mxu1  ;;  %v3405_v18 = vmul.f32 %v11731_v50, %v11731_v50 }
 0x566   : > { %v11809_v7 = vadd.f32 %v11261_v37, %v2968_v55  ;;  %v3404_v37 = vmul.f32 %v11736_v22, %v11736_v22 }
 0x567   : > { %15937 = vst [vmem:[#allocation20_spill] sm:$0xff] %v11806_v12 }
 0x568   : > { %15938 = vst [vmem:[#allocation19_spill] sm:$0xff] %v11809_v7  ;;  %v8038_v4 = vpop.f32.mrb[50].mxu1  ;;  %v3468_v41 = vadd.f32 %v3405_v18, %v3404_v37 }
 0x569   : > { %v11815_v29 = vadd.f32 %v8038_v4, %v11459_v35  ;;  %v2978_v39 = vpop.f32.mrb[51].mxu1  ;;  %v3335_v35 = vadd.f32 %v11731_v50, %v11736_v22 }
 0x56a   : > { %v11818_v6 = vadd.f32 %v11441_v9, %v2978_v39 }
 0x56b   : > { %v3336_v23 = vadd.f32 %v3335_v35, %v11746_v13 }
 0x56c   : > { %15939 = vst [vmem:[#allocation29_spill] sm:$0xff] %v11818_v6  ;;  %v8041_v15 = vpop.f32.mrb[52].mxu1 }
 0x56d   : > { %v11825_v38 = vadd.f32 %v8041_v15, %v11579_v25  ;;  %v2988_v32 = vpop.f32.mrb[53].mxu1  ;;  %v3469_v25 = vadd.f32 %v3468_v41, %v3406_v42  ;;  %v3337_v3 = vadd.f32 %v3336_v23, %v11743_v46  ;;  %v3411_v15 = vmul.f32 %v11755_v34, %v11755_v34 }
 0x56e   : > { %v11832_v9 = vadd.f32 %v11555_v16, %v2988_v32  ;;  %v3408_v16 = vmul.f32 %v11752_v36, %v11752_v36 }
 0x56f   : > { %v3470_v40 = vadd.f32 %v3469_v25, %v3407_v61  ;;  %v3338_v27 = vadd.f32 %v3337_v3, %v11752_v36 }
 0x570   : > { %15940 = vst [vmem:[#allocation27_spill] sm:$0xff] %v11832_v9  ;;  %v8044_v19 = vpop.f32.mrb[54].mxu1 }
 0x571   : > { %v11836_v1 = vadd.f32 %v8044_v19, %v11679_v63  ;;  %v2998_v8 = vpop.f32.mrb[55].mxu1  ;;  %v3471_v62 = vadd.f32 %v3470_v40, %v3408_v16  ;;  %v3409_v63 = vmul.f32 %v11749_v20, %v11749_v20  ;;  %v3339_v52 = vadd.f32 %v3338_v27, %v11749_v20 }
 0x572   : > { %v11839_v58 = vadd.f32 %v11673_v33, %v2998_v8  ;;  %v3410_v33 = vmul.f32 %v11758_v43, %v11758_v43  ;;  %v8455_v8 = vld [vmem:[%s15536_s4 + $0x7c] ss:$12 sps:$4 sm:$0xff]  }
 0x573   : > { %15941 = vst [vmem:[#allocation45_spill] sm:$0xff] %v11836_v1  ;;  %v3472_v30 = vadd.f32 %v3471_v62, %v3409_v63  ;;  %v3340_v24 = vadd.f32 %v3339_v52, %v11758_v43  ;;  %4912 = vmatprep.subr.bf16.mxu1 %v8455_v8  ;;  %v3413_v62 = vmul.f32 %v11767_v56, %v11767_v56 }
 0x575   : > { %v3473_v55 = vadd.f32 %v3472_v30, %v3410_v33  ;;  %v3341_v32 = vadd.f32 %v3340_v24, %v11755_v34  ;;  %v8456_v30 = vld [vmem:[%s15536_s4 + $0x90] ss:$12 sps:$4 sm:$0xff]  }
 0x577   : > { %v3474_v41 = vadd.f32 %v3473_v55, %v3411_v15  ;;  %v3342_v25 = vadd.f32 %v3341_v32, %v11773_v44  ;;  %v3415_v32 = vmul.f32 %v11782_v60, %v11782_v60 }
 0x579   : > { %v3343_v63 = vadd.f32 %v3342_v25, %v11767_v56  ;;  %v15610_v25 = vmov 0  }
 0x57a   : > { %5600 = vmatprep.subr.bf16.mxu0 %v15610_v25 }
 0x57e   : > { %v2589_v0 = vpop.f32.mrb[48].mxu0 }
 0x57f   : > { %v2591_v26 = vpop.f32.mrb[49].mxu0 }
 0x580   : > { %v3229_v54 = vadd.f32 %v2591_v26, %v11722_v53  ;;  %v3412_v53 = vmul.f32 %v11773_v44, %v11773_v44  ;;  %v3414_v26 = vmul.f32 %v11785_v59, %v11785_v59 }
 0x582   : > { %v2595_v11 = vpop.f32.mrb[50].mxu0  ;;  %v8047_v4 = vpop.f32.mrb[56].mxu1  ;;  %v3475_v61 = vadd.f32 %v3474_v41, %v3412_v53 }
 0x583   : > { %v11855_v39 = vadd.f32 %v8047_v4, %v11740_v5  ;;  %v2597_v18 = vpop.f32.mrb[51].mxu0  ;;  %v3008_v37 = vpop.f32.mrb[57].mxu1  ;;  %v8453_v5 = vld [vmem:[%s15536_s4 + $0x78] ss:$12 sps:$4 sm:$0xff]  }
 0x584   : > { %v11861_v35 = vadd.f32 %v11726_v28, %v3008_v37  ;;  %v3230_v42 = vadd.f32 %v2597_v18, %v11733_v47  ;;  %4913 = vmatpush1.bf16.msra.mxu1 %v8453_v5  ;;  %v3476_v24 = vadd.f32 %v3475_v61, %v3413_v62  ;;  %v3344_v18 = vadd.f32 %v3343_v63, %v11785_v59  ;;  %v8460_v61 = vld [vmem:[%s15536_s4 + $0xa8] ss:$12 sps:$4 sm:$0xff]  }
 0x585   : > { %15942 = vst [vmem:[#allocation42_spill] sm:$0xff] %v11855_v39 }
 0x586   : > { %15943 = vst [vmem:[#allocation49_spill] sm:$0xff] %v11861_v35  ;;  %v2601_v23 = vpop.f32.mrb[52].mxu0 }
 0x587   : > { %v2603_v19 = vpop.f32.mrb[53].mxu0 }
 0x588   : > { %v3231_v28 = vadd.f32 %v2603_v19, %v2589_v0  ;;  %v8458_v0 = vld [vmem:[%s15536_s4 + $0x94] ss:$12 sps:$4 sm:$0xff]   ;;  %v3345_v19 = vadd.f32 %v3344_v18, %v11782_v60  ;;  %v3417_v18 = vmul.f32 %v11794_v51, %v11794_v51 }
 0x589   : > { %4914 = vmatprep.subr.bf16.mxu1 %v8458_v0 }
 0x58a   : > { %v2607_v47 = vpop.f32.mrb[54].mxu0  ;;  %v8050_v3 = vpop.f32.mrb[58].mxu1  ;;  %4915 = vmatpush1.bf16.msra.mxu1 %v8456_v30  ;;  %v3346_v62 = vadd.f32 %v3345_v19, %v11797_v45 }
 0x58b   : > { %v11873_v16 = vadd.f32 %v8050_v3, %v3230_v42  ;;  %v2609_v40 = vpop.f32.mrb[55].mxu0  ;;  %v3018_v27 = vpop.f32.mrb[59].mxu1  ;;  %v8462_v3 = vld [vmem:[%s15536_s4 + $0xac] ss:$12 sps:$4 sm:$0xff]  }
 0x58c   : > { %v11878_v52 = vadd.f32 %v3229_v54, %v3018_v27  ;;  %v3232_v33 = vadd.f32 %v2609_v40, %v2595_v11  ;;  %v3477_v11 = vadd.f32 %v3476_v24, %v3414_v26  ;;  %4916 = vmatprep.subr.bf16.mxu1 %v8462_v3 }
 0x58d   : > { %15944 = vst [vmem:[#allocation40_spill] sm:$0xff] %v11873_v16 }
 0x58e   : > { %v2613_v55 = vpop.f32.mrb[56].mxu0  ;;  %v3478_v40 = vadd.f32 %v3477_v11, %v3415_v32  ;;  %4917 = vmatpush1.bf16.msra.mxu1 %v8460_v61  ;;  %v3347_v11 = vadd.f32 %v3346_v62, %v11794_v51 }
 0x58f   : > { %v2615_v4 = vpop.f32.mrb[57].mxu0 }
 0x590   : > { %v3233_v54 = vadd.f32 %v2615_v4, %v2601_v23  ;;  %v8459_v23 = vld [vmem:[%s15536_s4 + $0x8] ss:$12 sps:$4 sm:$0xff]  }
 0x591   : > { %5601 = vmatpush1.bf16.msra.mxu0 %v8459_v23 }
 0x592   : > { %v2619_v37 = vpop.f32.mrb[58].mxu0  ;;  %v8053_v15 = vpop.f32.mrb[60].mxu1  ;;  %5602 = vmatprep.subr.bf16.mxu0 %v15610_v25 }
 0x593   : > { %v11891_v42 = vadd.f32 %v8053_v15, %v3232_v33  ;;  %v2621_v53 = vpop.f32.mrb[59].mxu0  ;;  %v3028_v41 = vpop.f32.mrb[61].mxu1 }
 0x594   : > { %v11894_v5 = vadd.f32 %v3231_v28, %v3028_v41  ;;  %v3234_v8 = vadd.f32 %v2621_v53, %v2607_v47  ;;  %v3416_v28 = vmul.f32 %v11797_v45, %v11797_v45  ;;  %v8465_v53 = vld [vmem:[%s15536_s4 + $0xc4] ss:$12 sps:$4 sm:$0xff]   ;;  %v3418_v41 = vmul.f32 %v11809_v7, %v11809_v7 }
 0x595   : > { %15945 = vst [vmem:[#allocation50_spill] sm:$0xff] %v11891_v42  ;;  %4918 = vmatprep.subr.bf16.mxu1 %v8465_v53 }
 0x596   : > { %v2625_v47 = vpop.f32.mrb[60].mxu0  ;;  %v3479_v33 = vadd.f32 %v3478_v40, %v3416_v28 }
 0x597   : > { %v2626_v27 = vpop.f32.mrb[61].mxu0 }
 0x598   : > { %v11910_v63 = vadd.f32 %v2626_v27, %v2613_v55  ;;  %v8463_v55 = vld [vmem:[%s15536_s4 + $0xc0] ss:$12 sps:$4 sm:$0xff]   ;;  %v3480_v19 = vadd.f32 %v3479_v33, %v3417_v18  ;;  %v3419_v27 = vmul.f32 %v11806_v12, %v11806_v12  ;;  %v3420_v33 = vmul.f32 %v11818_v6, %v11818_v6 }
 0x599   : > { %4919 = vmatpush1.bf16.msra.mxu1 %v8463_v55 }
 0x59a   : > { %v2630_v30 = vpop.f32.mrb[62].mxu0  ;;  %v8056_v0 = vpop.f32.mrb[62].mxu1  ;;  %v3481_v61 = vadd.f32 %v3480_v19, %v3418_v41 }
 0x59b   : > { %v11912_v26 = vadd.f32 %v8056_v0, %v3234_v8  ;;  %v2631_v24 = vpop.f32.mrb[63].mxu0  ;;  %v3038_v4 = vpop.f32.mrb[63].mxu1 }
 0x59c   : > { %v11917_v15 = vadd.f32 %v2631_v24, %v2619_v37  ;;  %v11919_v32 = vadd.f32 %v3233_v54, %v3038_v4  ;;  %v3348_v37 = vadd.f32 %v3347_v11, %v11809_v7  ;;  %v8466_v54 = vld [vmem:[%s15536_s4 + $0x20] ss:$12 sps:$4 sm:$0xff]   ;;  %v3482_v30 = vadd.f32 %v3481_v61, %v3419_v27 }
 0x59d   : > { %5603 = vmatpush1.bf16.msra.mxu0 %v8466_v54  ;;  %v3422_v27 = vmul.f32 %v11832_v9, %v11832_v9 }
 0x59e   : > { %v2635_v8 = vpop.f32.mrb[64].mxu0  ;;  %5604 = vmatprep.subr.bf16.mxu0 %v15610_v25  ;;  %v3349_v62 = vadd.f32 %v3348_v37, %v11806_v12  ;;  %v3483_v11 = vadd.f32 %v3482_v30, %v3420_v33 }
 0x59f   : > { %v2637_v23 = vpop.f32.mrb[65].mxu0 }
 0x5a0   : > { %v3350_v4 = vadd.f32 %v3349_v62, %v11818_v6 }
 0x5a2   : > { %v2641_v3 = vpop.f32.mrb[66].mxu0  ;;  %v8059_v28 = vpop.f32.mrb[64].mxu1  ;;  %v3351_v37 = vadd.f32 %v3350_v4, %v11815_v29 }
 0x5a3   : > { %v2643_v40 = vpop.f32.mrb[67].mxu0  ;;  %v3048_v47 = vpop.f32.mrb[65].mxu1  ;;  %v3421_v28 = vmul.f32 %v11815_v29, %v11815_v29 }
 0x5a4   : > { %v3352_v30 = vadd.f32 %v3351_v37, %v11832_v9 }
 0x5a5   : > { %v3484_v62 = vadd.f32 %v3483_v11, %v3421_v28 }
 0x5a6   : > { %v2647_v0 = vpop.f32.mrb[68].mxu0 }
 0x5a7   : > { %v2649_v24 = vpop.f32.mrb[69].mxu0 }
 0x5a8   : > { %v3239_v18 = vadd.f32 %v2649_v24, %v2635_v8  ;;  %v3485_v24 = vadd.f32 %v3484_v62, %v3422_v27 }
 0x5aa   : > { %v2653_v55 = vpop.f32.mrb[70].mxu0  ;;  %v8062_v53 = vpop.f32.mrb[66].mxu1 }
 0x5ab   : > { %v11940_v41 = vadd.f32 %v8062_v53, %v2643_v40  ;;  %v2655_v19 = vpop.f32.mrb[71].mxu0  ;;  %v3056_v54 = vpop.f32.mrb[67].mxu1 }
 0x5ac   : > { %v11945_v47 = vadd.f32 %v3056_v54, %v2637_v23  ;;  %v3240_v61 = vadd.f32 %v2655_v19, %v2641_v3  ;;  %v3423_v23 = vmul.f32 %v11825_v38, %v11825_v38  ;;  %v3353_v3 = vadd.f32 %v3352_v30, %v11825_v38 }
 0x5ad   : > { %v3424_v19 = vmul.f32 %v11839_v58, %v11839_v58 }
 0x5ae   : > { %v2659_v8 = vpop.f32.mrb[72].mxu0  ;;  %v3486_v54 = vadd.f32 %v3485_v24, %v3423_v23  ;;  %v3354_v37 = vadd.f32 %v3353_v3, %v11839_v58 }
 0x5af   : > { %v2661_v33 = vpop.f32.mrb[73].mxu0 }
 0x5b0   : > { %v3241_v40 = vadd.f32 %v2661_v33, %v2647_v0  ;;  %v3425_v33 = vmul.f32 %v11836_v1, %v11836_v1 }
 0x5b2   : > { %v2665_v53 = vpop.f32.mrb[74].mxu0  ;;  %v8065_v25 = vpop.f32.mrb[68].mxu1 }
 0x5b3   : > { %v11950_v6 = vadd.f32 %v8065_v25, %v3240_v61  ;;  %v2667_v12 = vpop.f32.mrb[75].mxu0  ;;  %v3066_v7 = vpop.f32.mrb[69].mxu1  ;;  %v3487_v61 = vadd.f32 %v3486_v54, %v3424_v19  ;;  %v8470_v19 = vld [vmem:[%s15536_s4 + $0x38] ss:$12 sps:$4 sm:$0xff]  }
 0x5b4   : > { %v11955_v4 = vadd.f32 %v3239_v18, %v3066_v7  ;;  %v3242_v11 = vadd.f32 %v2667_v12, %v2653_v55  ;;  %v3355_v12 = vadd.f32 %v3354_v37, %v11836_v1  ;;  %v3426_v55 = vmul.f32 %v11861_v35, %v11861_v35  ;;  %5605 = vmatpush1.bf16.msra.mxu0 %v8470_v19 }
 0x5b5   : > { %v3488_v23 = vadd.f32 %v3487_v61, %v3425_v33  ;;  %v3427_v37 = vmul.f32 %v11855_v39, %v11855_v39 }
 0x5b6   : > { %v2671_v0 = vpop.f32.mrb[76].mxu0 }
 0x5b7   : > { %v2673_v28 = vpop.f32.mrb[77].mxu0  ;;  %v3489_v54 = vadd.f32 %v3488_v23, %v3426_v55 }
 0x5b8   : > { %v3243_v25 = vadd.f32 %v2673_v28, %v2659_v8  ;;  %v3356_v8 = vadd.f32 %v3355_v12, %v11861_v35  ;;  %v8475_v35 = vld [vmem:[%s15536_s4 + $0x68] ss:$12 sps:$4 sm:$0xff]  }
 0x5b9   : > { %v3490_v23 = vadd.f32 %v3489_v54, %v3427_v37 }
 0x5ba   : > { %v2677_v27 = vpop.f32.mrb[78].mxu0  ;;  %v8068_v62 = vpop.f32.mrb[70].mxu1 }
 0x5bb   : > { %v11962_v9 = vadd.f32 %v8068_v62, %v3242_v11  ;;  %v2679_v7 = vpop.f32.mrb[79].mxu0  ;;  %v3076_v18 = vpop.f32.mrb[71].mxu1  ;;  %v15946_v62 = vmov 0  }
 0x5bc   : > { %v11967_v30 = vadd.f32 %v3241_v40, %v3076_v18  ;;  %v3244_v24 = vadd.f32 %v2679_v7, %v2665_v53  ;;  %5606 = vmatprep.subr.bf16.mxu0 %v15946_v62  ;;  %v3357_v40 = vadd.f32 %v3356_v8, %v11855_v39  ;;  %v3428_v53 = vmul.f32 %v11878_v52, %v11878_v52  ;;  %v8471_v7 = vld [vmem:[%s15536_s4 + $0x50] ss:$12 sps:$4 sm:$0xff]  }
 0x5bd   : > { %5607 = vmatpush1.bf16.msra.mxu0 %v8471_v7  ;;  %v8476_v7 = vld [vmem:[%s15536_s4 + $0x80] ss:$12 sps:$4 sm:$0xff]  }
 0x5be   : > { %v2683_v3 = vpop.f32.mrb[80].mxu0  ;;  %v3358_v55 = vadd.f32 %v3357_v40, %v11878_v52  ;;  %5608 = vmatprep.subr.bf16.mxu0 %v15946_v62  ;;  %v3491_v8 = vadd.f32 %v3490_v23, %v3428_v53 }
 0x5bf   : > { %v2685_v11 = vpop.f32.mrb[81].mxu0 }
 0x5c0   : > { %v3245_v28 = vadd.f32 %v2685_v11, %v2671_v0 }
 0x5c1   : > { %5609 = vmatpush1.bf16.msra.mxu0 %v8475_v35  ;;  %v3431_v35 = vmul.f32 %v11891_v42, %v11891_v42 }
 0x5c2   : > { %v2689_v61 = vpop.f32.mrb[82].mxu0  ;;  %v8071_v33 = vpop.f32.mrb[72].mxu1  ;;  %5610 = vmatprep.subr.bf16.mxu0 %v15946_v62 }
 0x5c3   : > { %v11982_v18 = vadd.f32 %v8071_v33, %v3244_v24  ;;  %v2691_v0 = vpop.f32.mrb[83].mxu0  ;;  %v3086_v12 = vpop.f32.mrb[73].mxu1  ;;  %v3429_v24 = vmul.f32 %v11873_v16, %v11873_v16  ;;  %v3359_v33 = vadd.f32 %v3358_v55, %v11873_v16 }
 0x5c4   : > { %v11985_v19 = vadd.f32 %v3243_v25, %v3086_v12  ;;  %v3246_v11 = vadd.f32 %v2691_v0, %v2677_v27  ;;  %v3430_v25 = vmul.f32 %v11894_v5, %v11894_v5 }
 0x5c5   : > { %15947 = vst [vmem:[#allocation52_spill] sm:$0xff] %v11982_v18  ;;  %v3360_v27 = vadd.f32 %v3359_v33, %v11894_v5  ;;  %v3492_v37 = vadd.f32 %v3491_v8, %v3429_v24  ;;  %5611 = vmatpush1.bf16.msra.mxu0 %v8476_v7  ;;  %v3432_v8 = vmul.f32 %v11919_v32, %v11919_v32  ;;  %v8481_v7 = vld [vmem:[%s15536_s4 + $0xb0] ss:$12 sps:$4 sm:$0xff]  }
 0x5c6   : > { %15948 = vst [vmem:[#allocation53_spill] sm:$0xff] %v11985_v19  ;;  %v2695_v39 = vpop.f32.mrb[84].mxu0  ;;  %5612 = vmatprep.subr.bf16.mxu0 %v15946_v62 }
 0x5c7   : > { %v2697_v1 = vpop.f32.mrb[85].mxu0  ;;  %v3493_v23 = vadd.f32 %v3492_v37, %v3430_v25 }
 0x5c8   : > { %v3247_v54 = vadd.f32 %v2697_v1, %v2683_v3  ;;  %v3361_v3 = vadd.f32 %v3360_v27, %v11891_v42 }
 0x5c9   : > { %v3494_v33 = vadd.f32 %v3493_v23, %v3431_v35  ;;  %v3433_v23 = vmul.f32 %v11912_v26, %v11912_v26 }
 0x5ca   : > { %v2701_v40 = vpop.f32.mrb[86].mxu0  ;;  %v8074_v53 = vpop.f32.mrb[74].mxu1 }
 0x5cb   : > { %v12001_v0 = vadd.f32 %v8074_v53, %v3246_v11  ;;  %v2703_v12 = vpop.f32.mrb[87].mxu0  ;;  %v3096_v55 = vpop.f32.mrb[75].mxu1  ;;  %v8480_v11 = vld [vmem:[%s15536_s4 + $0x98] ss:$12 sps:$4 sm:$0xff]   ;;  %v3495_v37 = vadd.f32 %v3494_v33, %v3432_v8  ;;  %v3435_v33 = vmul.f32 %v11917_v15, %v11917_v15 }
 0x5cc   : > { %v12003_v16 = vadd.f32 %v3245_v28, %v3096_v55  ;;  %v3248_v1 = vadd.f32 %v2703_v12, %v2689_v61  ;;  %v3362_v61 = vadd.f32 %v3361_v3, %v11919_v32  ;;  %5613 = vmatpush1.bf16.msra.mxu0 %v8480_v11  ;;  %v3434_v11 = vmul.f32 %v11910_v63, %v11910_v63 }
 0x5cd   : > { %5614 = vmatprep.subr.bf16.mxu0 %v15946_v62  ;;  %v3496_v8 = vadd.f32 %v3495_v37, %v3433_v23 }
 0x5ce   : > { %v12011_v24 = vpop.f32.mrb[88].mxu0 }
 0x5cf   : > { %v2709_v28 = vpop.f32.mrb[89].mxu0 }
 0x5d0   : > { %v12017_v25 = vadd.f32 %v2709_v28, %v2695_v39  ;;  %v3363_v39 = vadd.f32 %v3362_v61, %v11912_v26  ;;  %5615 = vmatpush1.bf16.msra.mxu0 %v8481_v7  ;;  %v8486_v61 = vld [vmem:[%s15536_s4 + $0xe0] ss:$12 sps:$4 sm:$0xff]  }
 0x5d1   : > { %5616 = vmatprep.subr.bf16.mxu0 %v15946_v62  ;;  %v8474_v7 = vld [vmem:[%s15536_s4 + $0xf4] ss:$12 sps:$4 sm:$0xff]  }
 0x5d2   : > { %v12020_v27 = vpop.f32.mrb[90].mxu0  ;;  %v8077_v53 = vpop.f32.mrb[76].mxu1  ;;  %v3364_v28 = vadd.f32 %v3363_v39, %v11910_v63  ;;  %v8472_v39 = vld [vmem:[%s15536_s4 + $0xf0] ss:$12 sps:$4 sm:$0xff]  }
 0x5d3   : > { %v12025_v12 = vadd.f32 %v8077_v53, %v3248_v1  ;;  %v2715_v55 = vpop.f32.mrb[91].mxu0  ;;  %v3106_v42 = vpop.f32.mrb[77].mxu1  ;;  %v8485_v1 = vld [vmem:[%s15536_s4 + $0xc8] ss:$12 sps:$4 sm:$0xff]   ;;  %v3436_v53 = vmul.f32 %v11945_v47, %v11945_v47 }
 0x5d4   : > { %v12030_v35 = vadd.f32 %v2715_v55, %v2701_v40  ;;  %v12032_v3 = vadd.f32 %v3247_v54, %v3106_v42  ;;  %5617 = vmatpush1.bf16.msra.mxu0 %v8485_v1  ;;  %v8469_v40 = vld [vmem:[%s15536_s4 + $0xdc] ss:$12 sps:$4 sm:$0xff]   ;;  %v3497_v42 = vadd.f32 %v3496_v8, %v3434_v11  ;;  %v8467_v54 = vld [vmem:[%s15536_s4 + $0xd8] ss:$12 sps:$4 sm:$0xff]   ;;  %v3365_v37 = vadd.f32 %v3364_v28, %v11917_v15 }
 0x5d5   : > { %5618 = vmatprep.subr.bf16.mxu0 %v15946_v62  ;;  %4920 = vmatprep.subr.bf16.mxu1 %v8469_v40  ;;  %v8490_v8 = vld [vmem:[%s15536_s4 + $0xf8] ss:$12 sps:$4 sm:$0xff]   ;;  %v3437_v28 = vmul.f32 %v11940_v41, %v11940_v41 }
 0x5d6   : > { %4921 = vmatpush1.bf16.msra.mxu1 %v8467_v54  ;;  %v3366_v55 = vadd.f32 %v3365_v37, %v11945_v47  ;;  %v3498_v23 = vadd.f32 %v3497_v42, %v3435_v33  ;;  %v8479_v11 = vld [vmem:[%s15536_s4 + $0x10c] ss:$12 sps:$4 sm:$0xff]   ;;  %v3438_v42 = vmul.f32 %v11955_v4, %v11955_v4  ;;  %v8477_v54 = vld [vmem:[%s15536_s4 + $0x108] ss:$12 sps:$4 sm:$0xff]  }
 0x5d7   : > { %4922 = vmatprep.subr.bf16.mxu1 %v8474_v7 }
 0x5d8   : > { %5619 = vmatpush1.bf16.msra.mxu0 %v8486_v61  ;;  %v3499_v1 = vadd.f32 %v3498_v23, %v3436_v53  ;;  %v3367_v40 = vadd.f32 %v3366_v55, %v11940_v41  ;;  %v8491_v61 = vld [vmem:[%s15536_s4 + $0x110] ss:$12 sps:$4 sm:$0xff]   ;;  %v8482_v55 = vld [vmem:[%s15536_s4 + $0x120] ss:$12 sps:$4 sm:$0xff]   ;;  %v8495_v23 = vld [vmem:[%s15536_s4 + $0x128] ss:$12 sps:$4 sm:$0xff]  }
 0x5d9   : > { %5620 = vmatprep.subr.bf16.mxu0 %v15946_v62  ;;  %v8484_v53 = vld [vmem:[%s15536_s4 + $0x124] ss:$12 sps:$4 sm:$0xff]  }
 0x5da   : > { %4923 = vmatpush1.bf16.msra.mxu1 %v8472_v39  ;;  %v3368_v33 = vadd.f32 %v3367_v40, %v11955_v4  ;;  %v3500_v37 = vadd.f32 %v3499_v1, %v3437_v28  ;;  %v3439_v39 = vmul.f32 %v11950_v6, %v11950_v6  ;;  %v3440_v1 = vmul.f32 %v11967_v30, %v11967_v30 }
 0x5db   : > { %4924 = vmatprep.subr.bf16.mxu1 %v8479_v11  ;;  %v8489_v11 = vld [vmem:[%s15536_s4 + $0x13c] ss:$12 sps:$4 sm:$0xff]  }
 0x5dc   : > { %5621 = vmatpush1.bf16.msra.mxu0 %v8490_v8  ;;  %v3501_v7 = vadd.f32 %v3500_v37, %v3438_v42  ;;  %v3369_v8 = vadd.f32 %v3368_v33, %v11950_v6  ;;  %v8487_v42 = vld [vmem:[%s15536_s4 + $0x138] ss:$12 sps:$4 sm:$0xff]   ;;  %v8492_v33 = vld [vmem:[%s15536_s4 + $0x150] ss:$12 sps:$4 sm:$0xff]   ;;  %v8494_v37 = vld [vmem:[%s15536_s4 + $0x154] ss:$12 sps:$4 sm:$0xff]  }
 0x5dd   : > { %5622 = vmatprep.subr.bf16.mxu0 %v15946_v62 }
 0x5de   : > { %4925 = vmatpush1.bf16.msra.mxu1 %v8477_v54  ;;  %v3370_v28 = vadd.f32 %v3369_v8, %v11967_v30  ;;  %v3502_v40 = vadd.f32 %v3501_v7, %v3439_v39  ;;  %v8496_v54 = vld [vmem:[%s15536_s4 + $0x140] ss:$12 sps:$4 sm:$0xff]   ;;  %v8500_v39 = vld [vmem:[%s15536_s4 + $0x158] ss:$12 sps:$4 sm:$0xff]  }
 0x5df   : > { %4926 = vmatprep.subr.bf16.mxu1 %v8484_v53  ;;  %v3441_v53 = vmul.f32 %v11962_v9, %v11962_v9 }
 0x5e0   : > { %5623 = vmatpush1.bf16.msra.mxu0 %v8491_v61  ;;  %v3503_v61 = vadd.f32 %v3502_v40, %v3440_v1  ;;  %v3371_v7 = vadd.f32 %v3370_v28, %v11962_v9  ;;  %v8501_v40 = vld [vmem:[%s15536_s4 + $0x170] ss:$12 sps:$4 sm:$0xff]  }
 0x5e1   : > { %5624 = vmatprep.subr.bf16.mxu0 %v15946_v62 }
 0x5e2   : > { %4927 = vmatpush1.bf16.msra.mxu1 %v8482_v55  ;;  %v3442_v55 = vmul.f32 %v11985_v19, %v11985_v19  ;;  %v3372_v8 = vadd.f32 %v3371_v7, %v11985_v19  ;;  %v3504_v1 = vadd.f32 %v3503_v61, %v3441_v53  ;;  %v3444_v61 = vmul.f32 %v12003_v16, %v12003_v16 }
 0x5e3   : > { %4928 = vmatprep.subr.bf16.mxu1 %v8489_v11  ;;  %v8497_v11 = vld [vmem:[%s15536_s4 + $0x168] ss:$12 sps:$4 sm:$0xff]  }
 0x5e4   : > { %5625 = vmatpush1.bf16.msra.mxu0 %v8495_v23  ;;  %v8499_v23 = vld [vmem:[%s15536_s4 + $0x16c] ss:$12 sps:$4 sm:$0xff]   ;;  %v3505_v28 = vadd.f32 %v3504_v1, %v3442_v55  ;;  %v3445_v55 = vmul.f32 %v12001_v0, %v12001_v0 }
 0x5e5   : > { %5626 = vmatprep.subr.bf16.mxu0 %v15946_v62 }
 0x5e6   : > { %4929 = vmatpush1.bf16.msra.mxu1 %v8487_v42  ;;  %v3443_v42 = vmul.f32 %v11982_v18, %v11982_v18 }
 0x5e7   : > { %4930 = vmatprep.subr.bf16.mxu1 %v8494_v37 }
 0x5e8   : > { %5627 = vmatpush1.bf16.msra.mxu0 %v8496_v54  ;;  %v3373_v54 = vadd.f32 %v3372_v8, %v11982_v18  ;;  %v3506_v53 = vadd.f32 %v3505_v28, %v3443_v42 }
 0x5e9   : > { %5628 = vmatprep.subr.bf16.mxu0 %v15946_v62 }
 0x5ea   : > { %4931 = vmatpush1.bf16.msra.mxu1 %v8492_v33  ;;  %v8504_v33 = vld [vmem:[%s15536_s4 + $0x184] ss:$12 sps:$4 sm:$0xff]   ;;  %v3374_v37 = vadd.f32 %v3373_v54, %v12003_v16  ;;  %v3507_v7 = vadd.f32 %v3506_v53, %v3444_v61 }
 0x5eb   : > { %4932 = vmatprep.subr.bf16.mxu1 %v8499_v23 }
 0x5ec   : > { %5629 = vmatpush1.bf16.msra.mxu0 %v8500_v39  ;;  %v3375_v23 = vadd.f32 %v3374_v37, %v12001_v0  ;;  %v3446_v39 = vmul.f32 %v12032_v3, %v12032_v3  ;;  %v3508_v1 = vadd.f32 %v3507_v7, %v3445_v55 }
 0x5ed   : > { %5630 = vmatprep.subr.bf16.mxu0 %v15946_v62  ;;  %v15949_v62 = vld [vmem:[#allocation8_spill] sm:$0xff] }
 0x5ee   : > { %4933 = vmatpush1.bf16.msra.mxu1 %v8497_v11  ;;  %v3376_v8 = vadd.f32 %v3375_v23, %v12032_v3 }
 0x5ef   : > { %5251 = vmatprep.subr.bf16.mxu1 %v8504_v33  ;;  %v3447_v33 = vmul.f32 %v12025_v12, %v12025_v12 }
 0x5f0   : > { %5631 = vmatpush1.bf16.msra.mxu0 %v8501_v40  ;;  %v3509_v40 = vadd.f32 %v3508_v1, %v3446_v39  ;;  %v3377_v53 = vadd.f32 %v3376_v8, %v12025_v12 }
 0x5f2   : > { %v3510_v23 = vadd.f32 %v3509_v40, %v3447_v33 }
 0x5fd   : > { %v2719_v11 = vpop.f32.mrb[92].mxu0 }
 0x5fe   : > { %v3253_v18 = vadd.f32 %v15949_v62, %v2719_v11  ;;  %v2721_v19 = vpop.f32.mrb[93].mxu0  ;;  %v8080_v54 = vpop.f32.mrb[78].mxu1 }
 0x5ff   : > { %v3251_v28 = vadd.f32 %v2721_v19, %v12011_v24  ;;  %v12153_v42 = vadd.f32 %v8080_v54, %v12030_v35  ;;  %v3116_v61 = vpop.f32.mrb[79].mxu1  ;;  %v15951_v19 = vld [vmem:[#allocation31_spill] sm:$0xff] }
 0x600   : > { %v12158_v37 = vadd.f32 %v12017_v25, %v3116_v61 }
 0x601   : > { %v2725_v7 = vpop.f32.mrb[94].mxu0  ;;  %v3449_v25 = vmul.f32 %v12153_v42, %v12153_v42 }
 0x602   : > { %15950 = vst [vmem:[#allocation55_spill] sm:$0xff] %v12158_v37  ;;  %v3378_v55 = vadd.f32 %v3377_v53, %v12158_v37  ;;  %v3448_v62 = vmul.f32 %v12158_v37, %v12158_v37  ;;  %v3254_v24 = vadd.f32 %v15951_v19, %v2725_v7  ;;  %v2727_v35 = vpop.f32.mrb[95].mxu0  ;;  %v8083_v39 = vpop.f32.mrb[80].mxu1 }
 0x603   : > { %v3252_v1 = vadd.f32 %v2727_v35, %v12020_v27  ;;  %v3126_v11 = vpop.f32.mrb[81].mxu1 }
 0x604   : > { %v3511_v54 = vadd.f32 %v3510_v23, %v3448_v62  ;;  %v12168_v61 = vadd.f32 %v3251_v28, %v3126_v11  ;;  %v3379_v8 = vadd.f32 %v3378_v55, %v12153_v42 }
 0x605   : > { %v12171_v53 = vadd.f32 %v8083_v39, %v3252_v1 }
 0x606   : > { %v3380_v37 = vadd.f32 %v3379_v8, %v12168_v61  ;;  %v3450_v40 = vmul.f32 %v12168_v61, %v12168_v61  ;;  %v3512_v33 = vadd.f32 %v3511_v54, %v3449_v25  ;;  %v8086_v7 = vpop.f32.mrb[82].mxu1  ;;  %v15953_v25 = vld [vmem:[#allocation43_spill] sm:$0xff] }
 0x607   : > { %v3451_v27 = vmul.f32 %v12171_v53, %v12171_v53  ;;  %v12178_v19 = vadd.f32 %v8086_v7, %v3254_v24  ;;  %v3136_v35 = vpop.f32.mrb[83].mxu1 }
 0x608   : > { %v3513_v62 = vadd.f32 %v3512_v33, %v3450_v40  ;;  %v12180_v28 = vadd.f32 %v3253_v18, %v3136_v35  ;;  %v3381_v55 = vadd.f32 %v3380_v37, %v12171_v53  ;;  %v15954_v40 = vld [vmem:[#allocation10_spill] sm:$0xff] }
 0x609   : > { %v3453_v24 = vmul.f32 %v12178_v19, %v12178_v19 }
 0x60a   : > { %15952 = vst [vmem:[#allocation57_spill] sm:$0xff] %v12180_v28  ;;  %v3382_v23 = vadd.f32 %v3381_v55, %v12180_v28  ;;  %v3452_v39 = vmul.f32 %v12180_v28, %v12180_v28  ;;  %v3514_v1 = vadd.f32 %v3513_v62, %v3451_v27  ;;  %v8089_v11 = vpop.f32.mrb[84].mxu1  ;;  %v15956_v55 = vld [vmem:[#allocation41_spill] sm:$0xff] }
 0x60b   : > { %v12187_v54 = vadd.f32 %v8089_v11, %v15953_v25  ;;  %v3146_v8 = vpop.f32.mrb[85].mxu1 }
 0x60c   : > { %v3515_v7 = vadd.f32 %v3514_v1, %v3452_v39  ;;  %v12192_v18 = vadd.f32 %v15954_v40, %v3146_v8  ;;  %v3383_v37 = vadd.f32 %v3382_v23, %v12178_v19  ;;  %v15958_v1 = vld [vmem:[#allocation14_spill] sm:$0xff] }
 0x60d   : > { %v3455_v28 = vmul.f32 %v12187_v54, %v12187_v54 }
 0x60e   : > { %15955 = vst [vmem:[#allocation24_spill] sm:$0xff] %v12192_v18  ;;  %v3384_v33 = vadd.f32 %v3383_v37, %v12192_v18  ;;  %v3454_v35 = vmul.f32 %v12192_v18, %v12192_v18  ;;  %v3516_v27 = vadd.f32 %v3515_v7, %v3453_v24  ;;  %v8092_v62 = vpop.f32.mrb[86].mxu1 }
 0x60f   : > { %v12199_v11 = vadd.f32 %v8092_v62, %v15956_v55  ;;  %v3156_v25 = vpop.f32.mrb[87].mxu1 }
 0x610   : > { %v3517_v39 = vadd.f32 %v3516_v27, %v3454_v35  ;;  %v12204_v8 = vadd.f32 %v15958_v1, %v3156_v25  ;;  %v3385_v23 = vadd.f32 %v3384_v33, %v12187_v54  ;;  %v15961_v27 = vld [vmem:[#allocation23_spill] sm:$0xff] }
 0x611   : > { %15957 = vst [vmem:[#allocation2_spill] sm:$0xff] %v12199_v11  ;;  %v3457_v18 = vmul.f32 %v12199_v11, %v12199_v11 }
 0x612   : > { %15959 = vst [vmem:[#allocation28_spill] sm:$0xff] %v12204_v8  ;;  %v3386_v40 = vadd.f32 %v3385_v23, %v12204_v8  ;;  %v3456_v37 = vmul.f32 %v12204_v8, %v12204_v8  ;;  %v3518_v24 = vadd.f32 %v3517_v39, %v3455_v28  ;;  %v8095_v7 = vpop.f32.mrb[88].mxu1 }
 0x613   : > { %v12211_v62 = vadd.f32 %v8095_v7, %v11249_v31  ;;  %v3166_v55 = vpop.f32.mrb[89].mxu1 }
 0x614   : > { %v3519_v35 = vadd.f32 %v3518_v24, %v3456_v37  ;;  %v12216_v25 = vadd.f32 %v15961_v27, %v3166_v55  ;;  %v3387_v33 = vadd.f32 %v3386_v40, %v12199_v11 }
 0x615   : > { %15960 = vst [vmem:[#allocation34_spill] sm:$0xff] %v12211_v62  ;;  %v3459_v8 = vmul.f32 %v12211_v62, %v12211_v62 }
 0x616   : > { %15962 = vst [vmem:[#allocation30_spill] sm:$0xff] %v12216_v25  ;;  %v3388_v1 = vadd.f32 %v3387_v33, %v12216_v25  ;;  %v3458_v23 = vmul.f32 %v12216_v25, %v12216_v25  ;;  %v3520_v28 = vadd.f32 %v3519_v35, %v3457_v18  ;;  %v8098_v39 = vpop.f32.mrb[90].mxu1 }
 0x617   : > { %v12223_v31 = vadd.f32 %v8098_v39, %v11429_v10  ;;  %v3176_v7 = vpop.f32.mrb[91].mxu1 }
 0x618   : > { %v3521_v37 = vadd.f32 %v3520_v28, %v3458_v23  ;;  %v12228_v24 = vadd.f32 %v11277_v14, %v3176_v7  ;;  %v3389_v40 = vadd.f32 %v3388_v1, %v12211_v62 }
 0x619   : > { %15963 = vst [vmem:[#allocation32_spill] sm:$0xff] %v12223_v31  ;;  %v3461_v39 = vmul.f32 %v12223_v31, %v12223_v31 }
 0x61a   : > { %15964 = vst [vmem:[#allocation33_spill] sm:$0xff] %v12228_v24  ;;  %v3390_v55 = vadd.f32 %v3389_v40, %v12228_v24  ;;  %v3460_v27 = vmul.f32 %v12228_v24, %v12228_v24  ;;  %v3522_v18 = vadd.f32 %v3521_v37, %v3459_v8  ;;  %v8101_v35 = vpop.f32.mrb[92].mxu1 }
 0x61b   : > { %v12235_v10 = vadd.f32 %v8101_v35, %v11540_v2  ;;  %v3186_v33 = vpop.f32.mrb[93].mxu1 }
 0x61c   : > { %v3523_v23 = vadd.f32 %v3522_v18, %v3460_v27  ;;  %v12240_v14 = vadd.f32 %v11450_v48, %v3186_v33  ;;  %v3391_v1 = vadd.f32 %v3390_v55, %v12223_v31 }
 0x61d   : > { %15965 = vst [vmem:[#allocation35_spill] sm:$0xff] %v12235_v10  ;;  %v3463_v35 = vmul.f32 %v12235_v10, %v12235_v10 }
 0x61e   : > { %15966 = vst [vmem:[#allocation38_spill] sm:$0xff] %v12240_v14  ;;  %v3392_v28 = vadd.f32 %v3391_v1, %v12240_v14  ;;  %v3462_v7 = vmul.f32 %v12240_v14, %v12240_v14  ;;  %v3524_v8 = vadd.f32 %v3523_v23, %v3461_v39  ;;  %v8104_v37 = vpop.f32.mrb[94].mxu1 }
 0x61f   : > { %v12247_v2 = vadd.f32 %v8104_v37, %v11670_v57  ;;  %v3196_v40 = vpop.f32.mrb[95].mxu1  ;;  %v3466_v57 = vmul.f32 %v11676_v49, %v11676_v49 }
 0x620   : > { %v3525_v27 = vadd.f32 %v3524_v8, %v3462_v7  ;;  %v3329_v48 = vadd.f32 %v11564_v21, %v3196_v40  ;;  %v3393_v18 = vadd.f32 %v3392_v28, %v12235_v10  ;;  %v3467_v21 = vmul.f32 %v11716_v17, %v11716_v17 }
 0x621   : > { %15967 = vst [vmem:[#allocation46_spill] sm:$0xff] %v12247_v2  ;;  %v3465_v14 = vmul.f32 %v12247_v2, %v12247_v2 }
 0x622   : > { %v3394_v55 = vadd.f32 %v3393_v18, %v3329_v48  ;;  %v3464_v33 = vmul.f32 %v3329_v48, %v3329_v48  ;;  %v3526_v1 = vadd.f32 %v3525_v27, %v3463_v35 }
 0x624   : > { %v3395_v39 = vadd.f32 %v3394_v55, %v12247_v2  ;;  %v3527_v23 = vadd.f32 %v3526_v1, %v3464_v33 }
 0x626   : > { %v3396_v37 = vadd.f32 %v3395_v39, %v11676_v49  ;;  %v3528_v31 = vadd.f32 %v3527_v23, %v3465_v14 }
 0x628   : > { %v3397_v28 = vadd.f32 %v3396_v37, %v11716_v17  ;;  %v3529_v7 = vadd.f32 %v3528_v31, %v3466_v57  ;;  %v3547_v31 = vlaneseq  ;;  %v3333_v37 = vld [vmem:[%s15534_s2] sm:$0x1] }
 0x62a   : > { %v3398_v8 = vrot.slane %v3397_v28, 4  ;;  %v3530_v40 = vadd.f32 %v3529_v7, %v3467_v21  ;;  %v3548_v57 = vshrl.u32 %v3547_v31, 7 }
 0x62c   : > { %v3399_v35 = vadd.f32 %v3398_v8, %v3397_v28  ;;  %v3531_v27 = vrot.slane %v3530_v40, 4  ;;  %v12265_v21 = vsub.s32 0, %v3548_v57  ;;  %v15975_v57 = vld [vmem:[#allocation49_spill] sm:$0xff] }
 0x62e   : > { %v3400_v18 = vrot.slane %v3399_v35, 2  ;;  %v3532_v10 = vadd.f32 %v3531_v27, %v3530_v40  ;;  %15968 = vst [vmem:[#allocation48_spill] sm:$0xff] %v12265_v21 }
 0x630   : > { %v3401_v55 = vadd.f32 %v3400_v18, %v3399_v35  ;;  %v3533_v33 = vrot.slane %v3532_v10, 2 }
 0x632   : > { %v3402_v1 = vrot.slane %v3401_v55, 1  ;;  %v3534_v2 = vadd.f32 %v3533_v33, %v3532_v10 }
 0x634   : > { %v3403_v24 = vadd.f32 %v3402_v1, %v3401_v55  ;;  %v3535_v62 = vrot.slane %v3534_v2, 1  ;;  %v15973_v1 = vld [vmem:[#allocation27_spill] sm:$0xff] }
 0x636   : > { %v3536_v39 = vadd.f32 %v3535_v62, %v3534_v2  ;;  %v3537_v14 = vmul.f32 0.001953125, %v3403_v24  ;;  %v3334_v62 = vld [vmem:[%s15535_s3] sm:$0x1] }
 0x638   : > { %v3538_v23 = vmul.f32 0.001953125, %v3536_v39  ;;  %v3539_v49 = vmul.f32 %v3537_v14, %v3537_v14 }
 0x63a   : > { %v3540_v25 = vsub.f32 %v3538_v23, %v3539_v49  ;;  %v15974_v23 = vld [vmem:[#allocation45_spill] sm:$0xff] }
 0x63c   : > { %v3541_v11 = vadd.f32 1e-05, %v3540_v25 }
 0x63e   : > { %8798 = vrsqrt.f32 %v3541_v11 }
 0x648   : > { %v8799_v28 = vpop.eup %8798 }
 0x649   : > { %v3543_v7 = vmul.f32 %v8799_v28, %v3333_v37  ;;  %v15976_v37 = vld [vmem:[#allocation42_spill] sm:$0xff] }
 0x64b   : > { %v3544_v24 = vmul.f32 %v3543_v7, %v3537_v14  ;;  %v12271_v10 = vrot.slane %v3543_v7, %v12265_v21  ;;  %v15977_v7 = vld [vmem:[#allocation40_spill] sm:$0xff] }
 0x64d   : > { %v3545_v49 = vsub.f32 %v3334_v62, %v3544_v24  ;;  %v3612_v11 = vmul.f32 %v12271_v10, %v3329_v48  ;;  %v12276_v25 = vmul.f32 %v12271_v10, %v11736_v22  ;;  %v12280_v2 = vmul.f32 %v12271_v10, %v11731_v50  ;;  %v15978_v24 = vld [vmem:[#allocation50_spill] sm:$0xff] }
 0x64e   : > { %v12284_v8 = vmul.f32 %v12271_v10, %v11746_v13  ;;  %v12288_v40 = vmul.f32 %v12271_v10, %v11743_v46  ;;  %v12292_v35 = vmul.f32 %v12271_v10, %v11752_v36  ;;  %v12296_v22 = vmul.f32 %v12271_v10, %v11749_v20 }
 0x64f   : > { %v12299_v48 = vrot.slane %v3545_v49, %v12265_v21  ;;  %v12303_v50 = vmul.f32 %v12271_v10, %v11758_v43  ;;  %v12307_v13 = vmul.f32 %v12271_v10, %v11755_v34  ;;  %v12311_v46 = vmul.f32 %v12271_v10, %v11773_v44  ;;  %v15990_v21 = vld [vmem:[#allocation30_spill] sm:$0xff] }
 0x650   : > { %v12315_v36 = vmul.f32 %v12271_v10, %v11767_v56  ;;  %v12319_v20 = vmul.f32 %v12271_v10, %v11785_v59  ;;  %v12323_v43 = vmul.f32 %v12271_v10, %v11782_v60  ;;  %v12327_v34 = vmul.f32 %v12271_v10, %v11797_v45  ;;  %v15970_v56 = vld [vmem:[#allocation19_spill] sm:$0xff]  ;;  %v15971_v59 = vld [vmem:[#allocation20_spill] sm:$0xff]  ;;  %v15972_v60 = vld [vmem:[#allocation29_spill] sm:$0xff] }
 0x651   : > { %v12330_v27 = vadd.f32 %v12299_v48, %v3612_v11  ;;  %v12334_v44 = vmul.f32 %v12271_v10, %v11794_v51  ;;  %v12338_v18 = vmul.f32 %v12271_v10, %v15970_v56  ;;  %v12342_v55 = vmul.f32 %v12271_v10, %v15971_v59 }
 0x652   : > { %v12346_v33 = vmul.f32 %v12271_v10, %v15972_v60  ;;  %v12350_v45 = vmul.f32 %v12271_v10, %v11815_v29  ;;  %v12354_v51 = vmul.f32 %v12271_v10, %v15973_v1  ;;  %v12358_v39 = vmul.f32 %v12271_v10, %v11825_v38  ;;  %v15979_v60 = vld [vmem:[#allocation53_spill] sm:$0xff]  ;;  %v15980_v1 = vld [vmem:[#allocation52_spill] sm:$0xff] }
 0x653   : > { %15969 = vst [vmem:[#allocation51_spill] sm:$0xff] %v12330_v27  ;;  %v12362_v14 = vmul.f32 %v12271_v10, %v11839_v58  ;;  %v12366_v31 = vmul.f32 %v12271_v10, %v15974_v23  ;;  %v12370_v29 = vmul.f32 %v12271_v10, %v15975_v57  ;;  %v12374_v28 = vmul.f32 %v12271_v10, %v15976_v37  ;;  %v15981_v57 = vld [vmem:[#allocation55_spill] sm:$0xff]  ;;  %v15992_v27 = vld [vmem:[#allocation34_spill] sm:$0xff] }
 0x654   : > { %v12378_v38 = vmul.f32 %v12271_v10, %v11878_v52  ;;  %v12382_v58 = vmul.f32 %v12271_v10, %v15977_v7  ;;  %v12386_v62 = vmul.f32 %v12271_v10, %v11894_v5  ;;  %v12390_v49 = vmul.f32 %v12271_v10, %v15978_v24  ;;  %v15982_v7 = vld [vmem:[#allocation57_spill] sm:$0xff] }
 0x655   : > { %v12394_v11 = vmul.f32 %v12271_v10, %v11919_v32  ;;  %v12398_v52 = vmul.f32 %v12271_v10, %v11912_v26  ;;  %v12402_v56 = vmul.f32 %v12271_v10, %v11910_v63  ;;  %v12406_v5 = vmul.f32 %v12271_v10, %v11917_v15 }
 0x656   : > { %v12410_v59 = vmul.f32 %v12271_v10, %v11945_v47  ;;  %v12414_v32 = vmul.f32 %v12271_v10, %v11940_v41  ;;  %v12418_v26 = vmul.f32 %v12271_v10, %v11955_v4  ;;  %v12422_v63 = vmul.f32 %v12271_v10, %v11950_v6 }
 0x657   : > { %v12426_v15 = vmul.f32 %v12271_v10, %v11967_v30  ;;  %v12430_v47 = vmul.f32 %v12271_v10, %v11962_v9  ;;  %v12434_v41 = vmul.f32 %v12271_v10, %v15979_v60  ;;  %v12438_v4 = vmul.f32 %v12271_v10, %v15980_v1  ;;  %v15983_v60 = vld [vmem:[#allocation24_spill] sm:$0xff] }
 0x658   : > { %v12442_v6 = vmul.f32 %v12271_v10, %v12003_v16  ;;  %v12446_v30 = vmul.f32 %v12271_v10, %v12001_v0  ;;  %v12450_v9 = vmul.f32 %v12271_v10, %v12032_v3  ;;  %v12454_v23 = vmul.f32 %v12271_v10, %v12025_v12  ;;  %v15986_v1 = vld [vmem:[#allocation28_spill] sm:$0xff] }
 0x659   : > { %v12458_v37 = vmul.f32 %v12271_v10, %v15981_v57  ;;  %v12462_v16 = vmul.f32 %v12271_v10, %v12153_v42  ;;  %v12466_v0 = vmul.f32 %v12271_v10, %v12168_v61  ;;  %v12470_v3 = vmul.f32 %v12271_v10, %v12171_v53  ;;  %v15988_v57 = vld [vmem:[#allocation2_spill] sm:$0xff] }
 0x65a   : > { %v12474_v12 = vmul.f32 %v12271_v10, %v15982_v7  ;;  %v12478_v24 = vmul.f32 %v12271_v10, %v12178_v19  ;;  %v12482_v42 = vmul.f32 %v12271_v10, %v15983_v60  ;;  %v12486_v61 = vmul.f32 %v12271_v10, %v12187_v54 }
 0x65b   : > { %v12490_v53 = vmul.f32 %v12271_v10, %v15986_v1  ;;  %v12494_v7 = vmul.f32 %v12271_v10, %v15988_v57  ;;  %v12498_v19 = vmul.f32 %v12271_v10, %v15990_v21  ;;  %v12502_v60 = vmul.f32 %v12271_v10, %v15992_v27 }
 0x65c   : > { %15984 = vst [vmem:[#allocation54_spill] sm:$0xff] %v12482_v42  ;;  %15985 = vst [vmem:[#allocation56_spill] sm:$0xff] %v12486_v61  ;;  %v15994_v42 = vld [vmem:[#allocation33_spill] sm:$0xff]  ;;  %v15995_v61 = vld [vmem:[#allocation32_spill] sm:$0xff] }
 0x65d   : > { %15987 = vst [vmem:[#allocation25_spill] sm:$0xff] %v12490_v53  ;;  %15989 = vst [vmem:[#allocation4_spill] sm:$0xff] %v12494_v7  ;;  %v12506_v54 = vmul.f32 %v12271_v10, %v15994_v42  ;;  %v12510_v1 = vmul.f32 %v12271_v10, %v15995_v61  ;;  %v15996_v53 = vld [vmem:[#allocation38_spill] sm:$0xff]  ;;  %v15997_v7 = vld [vmem:[#allocation35_spill] sm:$0xff]  ;;  %v12530_v61 = vmul.f32 %v12271_v10, %v11716_v17 }
 0x65e   : > { %15991 = vst [vmem:[#allocation21_spill] sm:$0xff] %v12498_v19  ;;  %15993 = vst [vmem:[#allocation26_spill] sm:$0xff] %v12502_v60  ;;  %v12514_v57 = vmul.f32 %v12271_v10, %v15996_v53  ;;  %v12518_v21 = vmul.f32 %v12271_v10, %v15997_v7  ;;  %v15998_v19 = vld [vmem:[#allocation46_spill] sm:$0xff]  ;;  %v15999_v60 = vld [vmem:[#allocation47_spill] sm:$0xff]  ;;  %v12534_v53 = vadd.f32 %v12299_v48, %v12276_v25 }
 0x65f   : > { %v12522_v27 = vmul.f32 %v12271_v10, %v15998_v19  ;;  %v12526_v42 = vmul.f32 %v12271_v10, %v15999_v60  ;;  %v12538_v7 = vadd.f32 %v12299_v48, %v12280_v2  ;;  %v12542_v19 = vadd.f32 %v12299_v48, %v12284_v8 }
 0x660   : > { %v12546_v60 = vadd.f32 %v12299_v48, %v12288_v40  ;;  %v12550_v17 = vadd.f32 %v12299_v48, %v12292_v35  ;;  %v12554_v10 = vadd.f32 %v12299_v48, %v12296_v22  ;;  %v12558_v25 = vadd.f32 %v12299_v48, %v12303_v50 }
 0x661   : > { %v12562_v2 = vadd.f32 %v12299_v48, %v12307_v13  ;;  %v12566_v8 = vadd.f32 %v12299_v48, %v12311_v46  ;;  %v12570_v40 = vadd.f32 %v12299_v48, %v12315_v36  ;;  %v12574_v35 = vadd.f32 %v12299_v48, %v12319_v20 }
 0x662   : > { %v12578_v22 = vadd.f32 %v12299_v48, %v12323_v43  ;;  %v12582_v50 = vadd.f32 %v12299_v48, %v12327_v34  ;;  %v12586_v13 = vadd.f32 %v12299_v48, %v12334_v44  ;;  %v12590_v46 = vadd.f32 %v12299_v48, %v12338_v18 }
 0x663   : > { %v12594_v36 = vadd.f32 %v12299_v48, %v12342_v55  ;;  %v12598_v20 = vadd.f32 %v12299_v48, %v12346_v33  ;;  %v12602_v43 = vadd.f32 %v12299_v48, %v12350_v45  ;;  %v12606_v34 = vadd.f32 %v12299_v48, %v12354_v51 }
 0x664   : > { %v12610_v44 = vadd.f32 %v12299_v48, %v12358_v39  ;;  %v12614_v18 = vadd.f32 %v12299_v48, %v12362_v14  ;;  %v12618_v55 = vadd.f32 %v12299_v48, %v12366_v31  ;;  %v12622_v33 = vadd.f32 %v12299_v48, %v12370_v29 }
 0x665   : > { %v12626_v45 = vadd.f32 %v12299_v48, %v12374_v28  ;;  %v12630_v51 = vadd.f32 %v12299_v48, %v12378_v38  ;;  %v12634_v39 = vadd.f32 %v12299_v48, %v12382_v58  ;;  %v12638_v14 = vadd.f32 %v12299_v48, %v12386_v62 }
 0x666   : > { %v12642_v31 = vadd.f32 %v12299_v48, %v12390_v49  ;;  %v12646_v29 = vadd.f32 %v12299_v48, %v12394_v11  ;;  %v12650_v28 = vadd.f32 %v12299_v48, %v12398_v52  ;;  %v12654_v38 = vadd.f32 %v12299_v48, %v12402_v56 }
 0x667   : > { %v12658_v58 = vadd.f32 %v12299_v48, %v12406_v5  ;;  %v12662_v62 = vadd.f32 %v12299_v48, %v12410_v59  ;;  %v12666_v49 = vadd.f32 %v12299_v48, %v12414_v32  ;;  %v12670_v11 = vadd.f32 %v12299_v48, %v12418_v26 }
 0x668   : > { %v12674_v52 = vadd.f32 %v12299_v48, %v12422_v63  ;;  %v12678_v56 = vadd.f32 %v12299_v48, %v12426_v15  ;;  %v12682_v5 = vadd.f32 %v12299_v48, %v12430_v47  ;;  %v12686_v59 = vadd.f32 %v12299_v48, %v12434_v41  ;;  %v12699_v63 = vld [vmem:[%s15536_s4 + $0x188] ss:$12 sps:$4 sm:$0xff]  }
 0x669   : > { %v12690_v32 = vadd.f32 %v12299_v48, %v12438_v4  ;;  %v12694_v26 = vadd.f32 %v12299_v48, %v12442_v6  ;;  %v12703_v15 = vadd.f32 %v12299_v48, %v12446_v30  ;;  %v12707_v47 = vadd.f32 %v12299_v48, %v12450_v9  ;;  %8105 = vmatprep.subr.bf16.mxu0 %v12699_v63 }
 0x66a   : > { %v12711_v41 = vadd.f32 %v12299_v48, %v12454_v23  ;;  %v12715_v4 = vadd.f32 %v12299_v48, %v12458_v37  ;;  %v12719_v6 = vadd.f32 %v12299_v48, %v12462_v16  ;;  %v12723_v30 = vadd.f32 %v12299_v48, %v12466_v0  ;;  %v16006_v16 = vld [vmem:[#allocation54_spill] sm:$0xff]  ;;  %v16007_v0 = vld [vmem:[#allocation56_spill] sm:$0xff] }
 0x66b   : > { %v12727_v9 = vadd.f32 %v12299_v48, %v12470_v3  ;;  %v12731_v23 = vadd.f32 %v12299_v48, %v12474_v12  ;;  %v12736_v37 = vadd.f32 %v12299_v48, %v12478_v24  ;;  %v16008_v3 = vld [vmem:[#allocation25_spill] sm:$0xff]  ;;  %v16010_v12 = vld [vmem:[#allocation4_spill] sm:$0xff]  ;;  %vm3686_vm9 = vcmp.gt.f32.partialorder %v12534_v53, 0.0 }
 0x66c   : > { %16000 = vst [vmem:[#allocation9_spill] sm:$0xff] %v12715_v4  ;;  %16001 = vst [vmem:[#allocation36_spill] sm:$0xff] %v12719_v6  ;;  %v12740_v6 = vadd.f32 %v12299_v48, %v16006_v16  ;;  %v16012_v4 = vld [vmem:[#allocation21_spill] sm:$0xff]  ;;  %vm3687_vm10 = vcmp.gt.f32.partialorder %v12538_v7, 0.0  ;;  %vm3688_vm11 = vcmp.gt.f32.partialorder %v12542_v19, 0.0  ;;  %vm3689_vm12 = vcmp.gt.f32.partialorder %v12546_v60, 0.0 }
 0x66d   : > { %16002 = vst [vmem:[#allocation13_spill] sm:$0xff] %v12723_v30  ;;  %16003 = vst [vmem:[#allocation37_spill] sm:$0xff] %v12727_v9  ;;  %v12744_v30 = vadd.f32 %v12299_v48, %v16007_v0  ;;  %v12748_v9 = vadd.f32 %v12299_v48, %v16008_v3  ;;  %v12756_v24 = vadd.f32 %v12299_v48, %v16012_v4  ;;  %vm3690_vm13 = vcmp.gt.f32.partialorder %v12550_v17, 0.0 }
 0x66e   : > { %16004 = vst [vmem:[#allocation17_spill] sm:$0xff] %v12731_v23  ;;  %16005 = vst [vmem:[#allocation39_spill] sm:$0xff] %v12736_v37  ;;  %v12752_v23 = vadd.f32 %v12299_v48, %v16010_v12  ;;  %v16014_v37 = vld [vmem:[#allocation26_spill] sm:$0xff]  ;;  %v12764_v0 = vadd.f32 %v12299_v48, %v12506_v54  ;;  %v12768_v3 = vadd.f32 %v12299_v48, %v12510_v1  ;;  %vm3691_vm15 = vcmp.gt.f32.partialorder %v12554_v10, 0.0 }
 0x66f   : > { %16009 = vst [vmem:[#allocation59_spill] sm:$0xff] %v12748_v9  ;;  %16013 = vst [vmem:[#allocation3_spill] sm:$0xff] %v12756_v24  ;;  %v12760_v16 = vadd.f32 %v12299_v48, %v16014_v37  ;;  %v12772_v12 = vadd.f32 %v12299_v48, %v12514_v57  ;;  %v12776_v4 = vadd.f32 %v12299_v48, %v12518_v21  ;;  %v3750_v57 = vmul.f32 0.01, %v12534_v53 }
 0x670   : > { %16011 = vst [vmem:[#allocation58_spill] sm:$0xff] %v12752_v23  ;;  %16016 = vst [vmem:[#allocation22_spill] sm:$0xff] %v12764_v0  ;;  %v12780_v37 = vadd.f32 %v12299_v48, %v12522_v27  ;;  %v12784_v54 = vadd.f32 %v12299_v48, %v12526_v42  ;;  %v12788_v1 = vadd.f32 %v12299_v48, %v12530_v61  ;;  %v3751_v21 = vmul.f32 0.01, %v12538_v7  ;;  %v8502_v0 = vld [vmem:[%s15536_s4 + $0x180] ss:$12 sps:$4 sm:$0xff]  }
 0x671   : > { %16015 = vst [vmem:[#allocation60_spill] sm:$0xff] %v12760_v16  ;;  %16017 = vst [vmem:[#allocation5_spill] sm:$0xff] %v12768_v3  ;;  %v3752_v27 = vmul.f32 0.01, %v12542_v19  ;;  %v3753_v42 = vmul.f32 0.01, %v12546_v60  ;;  %v12801_v48 = vsel %vm3686_vm9, %v12534_v53, %v3750_v57 }
 0x672   : > { %16018 = vst [vmem:[#allocation7_spill] sm:$0xff] %v12772_v12  ;;  %16019 = vst [vmem:[#allocation6_spill] sm:$0xff] %v12776_v4  ;;  %v12804_v61 = vsel %vm3687_vm10, %v12538_v7, %v3751_v21  ;;  %vm3692_vm2 = vcmp.gt.f32.partialorder %v12558_v25, 0.0  ;;  %vm3693_vm4 = vcmp.gt.f32.partialorder %v12562_v2, 0.0  ;;  %vm3694_vm7 = vcmp.gt.f32.partialorder %v12566_v8, 0.0 }
 0x673   : > { %16020 = vst [vmem:[#allocation11_spill] sm:$0xff] %v12780_v37  ;;  %16021 = vst [vmem:[#allocation12_spill] sm:$0xff] %v12784_v54  ;;  %v3755_v54 = vmul.f32 0.01, %v12554_v10  ;;  %v4038_v37 = vrot.slane %v12801_v48, 7  ;;  %v4039_v4 = vrot.slane %v12804_v61, 7  ;;  %v4423_v12 = vpack.c.bf16 %v12804_v61, %v12801_v48 }
 0x674   : > { %16022 = vst [vmem:[#allocation15_spill] sm:$0xff] %v12788_v1  ;;  %v3754_v1 = vmul.f32 0.01, %v12550_v17  ;;  %v3816_v3 = vsel %vm3688_vm11, %v12542_v19, %v3752_v27  ;;  %v3817_v53 = vsel %vm3689_vm12, %v12546_v60, %v3753_v42  ;;  %vm3695_vm8 = vcmp.gt.f32.partialorder %v12570_v40, 0.0 }
 0x675   : > { %v4040_v21 = vsel %vm1277_vm6, %v4038_v37, %v4039_v4  ;;  %v4041_v16 = vrot.slane %v3816_v3, 7  ;;  %v4042_v24 = vrot.slane %v3817_v53, 7  ;;  %v4233_v23 = vrot.slane %v3816_v3, 1  ;;  %4934 = vmatprep.mubr.bf16.mxu1 %v4423_v12  ;;  %5632 = vmatprep.mubr.bf16.mxu0 %v4423_v12  ;;  %v8507_v4 = vld [vmem:[%s15536_s4 + $0x19c] ss:$12 sps:$4 sm:$0xff]  }
 0x676   : > { %v12816_v7 = vsel %vm3690_vm13, %v12550_v17, %v3754_v1  ;;  %v7396_v19 = vpack.c.bf16 %v4040_v21, %v4038_v37  ;;  %v4234_v60 = vrot.slane %v3817_v53, 1  ;;  %v4426_v17 = vpack.c.bf16 %v3817_v53, %v3816_v3  ;;  %v8505_v53 = vld [vmem:[%s15536_s4 + $0x198] ss:$12 sps:$4 sm:$0xff]  }
 0x677   : > { %v12830_v1 = vsel %vm3691_vm15, %v12554_v10, %v3755_v54  ;;  %v4043_v27 = vsel %vm1277_vm6, %v4041_v16, %v4042_v24  ;;  %v4044_v42 = vrot.slane %v12816_v7, 7  ;;  %v3756_v21 = vmul.f32 0.01, %v12558_v25 }
 0x678   : > { %v4045_v9 = vrot.slane %v12830_v1, 7  ;;  %7397 = vmatmul.mubr.msk.bf16.vlgmr.msra.gmra.mrb[96].mxu1 %vm12819_vm0, %v7396_v19  ;;  %7621 = vmatmul.mubr.msk.bf16.vlgmr.msra.gmra.mrb[96].mxu0 %vm12819_vm0, %v7396_v19  ;;  %v4235_v10 = vsel %vm1470_vm5, %v4233_v23, %v4234_v60  ;;  %v7400_v3 = vpack.c.bf16 %v4043_v27, %v4041_v16  ;;  %v4429_v12 = vpack.c.bf16 %v12830_v1, %v12816_v7  ;;  %v8510_v23 = vld [vmem:[%s15536_s4 + $0x1b4] ss:$12 sps:$4 sm:$0xff]  }
 0x679   : > { %5252 = vmatpush1.bf16.msra.mxu1 %v8502_v0  ;;  %4944 = vmatprep.mubr.bf16.mxu1 %v4426_v17  ;;  %v12846_v24 = vpack.c.bf16 %v4234_v60, %v4235_v10  ;;  %v3758_v19 = vmul.f32 0.01, %v12566_v8  ;;  %v3759_v60 = vmul.f32 0.01, %v12570_v40  ;;  %vm3696_vm9 = vcmp.gt.f32.partialorder %v12574_v35, 0.0 }
 0x67a   : > { %v4046_v54 = vsel %vm1277_vm6, %v4044_v42, %v4045_v9  ;;  %5638 = vmatprep.mubr.bf16.mxu0 %v4426_v17  ;;  %v3757_v9 = vmul.f32 0.01, %v12562_v2  ;;  %5253 = vmatprep.subr.bf16.mxu1 %v8507_v4  ;;  %v12871_v17 = vsel %vm3692_vm2, %v12558_v25, %v3756_v21  ;;  %vm3697_vm10 = vcmp.gt.f32.partialorder %v12578_v22, 0.0 }
 0x67b   : > { %16025 = vst [vmem:[#allocation16_spill] sm:$0xff] %v12846_v24  ;;  %v12858_v0 = vpack.c.bf16 %v4046_v54, %v4044_v42  ;;  %8106 = vmatpush3.bf16.msra.mxu0 %v12699_v63  ;;  %16026 = vst [vmem:[#allocation44_spill] sm:$0xff] %v12871_v17  ;;  %v3760_v42 = vmul.f32 0.01, %v12574_v35  ;;  %v4047_v10 = vrot.slane %v12871_v17, 7  ;;  %v12886_v63 = vsel %vm3694_vm7, %v12566_v8, %v3758_v19 }
 0x67c   : > { %v12876_v4 = vsel %vm3693_vm4, %v12562_v2, %v3757_v9  ;;  %16027 = vst [vmem:[#allocation18_spill] sm:$0xff] %v12886_v63  ;;  %v12889_v2 = vsel %vm3695_vm8, %v12570_v40, %v3759_v60  ;;  %v3761_v21 = vmul.f32 0.01, %v12578_v22  ;;  %v8508_v9 = vld [vmem:[%s15536_s4 + $0x1b0] ss:$12 sps:$4 sm:$0xff]   ;;  %v4050_v37 = vrot.slane %v12886_v63, 7 }
 0x67d   : > { %v4048_v54 = vrot.slane %v12876_v4, 7  ;;  %5254 = vmatpush1.bf16.msra.mxu1 %v8505_v53  ;;  %v4432_v25 = vpack.c.bf16 %v12876_v4, %v12871_v17  ;;  %v4051_v16 = vrot.slane %v12889_v2, 7  ;;  %v8513_v8 = vld [vmem:[%s15536_s4 + $0x1cc] ss:$12 sps:$4 sm:$0xff]   ;;  %v12911_v19 = vpack.c.bf16 %v12889_v2, %v12886_v63 }
 0x67e   : > { %5255 = vmatprep.subr.bf16.mxu1 %v8510_v23  ;;  %v12916_v60 = vsel %vm3696_vm9, %v12574_v35, %v3760_v42  ;;  %vm3698_vm11 = vcmp.gt.f32.partialorder %v12582_v50, 0.0  ;;  %vm3699_vm12 = vcmp.gt.f32.partialorder %v12586_v13, 0.0  ;;  %v3763_v42 = vmul.f32 0.01, %v12586_v13 }
 0x67f   : > { %v4049_v27 = vsel %vm1277_vm6, %v4047_v10, %v4048_v54  ;;  %v4052_v53 = vsel %vm1277_vm6, %v4050_v37, %v4051_v16  ;;  %v8511_v16 = vld [vmem:[%s15536_s4 + $0x1c8] ss:$12 sps:$4 sm:$0xff]   ;;  %vm3700_vm13 = vcmp.gt.f32.partialorder %v12590_v46, 0.0  ;;  %vm3701_vm14 = vcmp.gt.f32.partialorder %v12594_v36, 0.0 }
 0x680   : > { %7401 = vmatmul.mubr.msk.bf16.gmra.mrb[100].mxu1 %vm12819_vm0, %v7400_v3  ;;  %7625 = vmatmul.mubr.msk.bf16.gmra.mrb[100].mxu0 %vm12819_vm0, %v7400_v3  ;;  %v12907_v23 = vpack.c.bf16 %v4049_v27, %v4047_v10  ;;  %v12923_v3 = vsel %vm3697_vm10, %v12578_v22, %v3761_v21  ;;  %v4053_v27 = vrot.slane %v12916_v60, 7  ;;  %v12927_v40 = vpack.c.bf16 %v4052_v53, %v4050_v37  ;;  %v8517_v22 = vld [vmem:[%s15536_s4 + $0x1e4] ss:$12 sps:$4 sm:$0xff]  }
 0x681   : > { %4954 = vmatprep.mubr.bf16.mxu1 %v4429_v12  ;;  %5646 = vmatprep.mubr.bf16.mxu0 %v4429_v12  ;;  %v4054_v35 = vrot.slane %v12923_v3, 7  ;;  %v12932_v12 = vpack.c.bf16 %v12923_v3, %v12916_v60  ;;  %v3762_v37 = vmul.f32 0.01, %v12582_v50  ;;  %v12954_v54 = vsel %vm3699_vm12, %v12586_v13, %v3763_v42 }
 0x682   : > { %5256 = vmatpush1.bf16.msra.mxu1 %v8508_v9  ;;  %v3764_v9 = vmul.f32 0.01, %v12590_v46  ;;  %v3765_v24 = vmul.f32 0.01, %v12594_v36  ;;  %v4057_v17 = vrot.slane %v12954_v54, 7  ;;  %vm3702_vm15 = vcmp.gt.f32.partialorder %v12598_v20, 0.0 }
 0x683   : > { %5257 = vmatprep.subr.bf16.mxu1 %v8513_v8  ;;  %v4055_v21 = vsel %vm1277_vm6, %v4053_v27, %v4054_v35  ;;  %v12951_v10 = vsel %vm3698_vm11, %v12582_v50, %v3762_v37  ;;  %vm3703_vm2 = vcmp.gt.f32.partialorder %v12602_v43, 0.0  ;;  %vm3704_vm4 = vcmp.gt.f32.partialorder %v12606_v34, 0.0 }
 0x684   : > { %v12948_v53 = vpack.c.bf16 %v4055_v21, %v4053_v27  ;;  %v4056_v63 = vrot.slane %v12951_v10, 7  ;;  %v8515_v27 = vld [vmem:[%s15536_s4 + $0x1e0] ss:$12 sps:$4 sm:$0xff]   ;;  %v12967_v13 = vpack.c.bf16 %v12954_v54, %v12951_v10  ;;  %v12970_v37 = vsel %vm3700_vm13, %v12590_v46, %v3764_v9 }
 0x685   : > { %v12973_v42 = vsel %vm3701_vm14, %v12594_v36, %v3765_v24  ;;  %v4059_v35 = vrot.slane %v12970_v37, 7  ;;  %vm3705_vm7 = vcmp.gt.f32.partialorder %v12610_v44, 0.0  ;;  %v3768_v9 = vmul.f32 0.01, %v12606_v34 }
 0x686   : > { %5258 = vmatpush1.bf16.msra.mxu1 %v8511_v16  ;;  %v4058_v21 = vsel %vm1277_vm6, %v4056_v63, %v4057_v17  ;;  %v4060_v46 = vrot.slane %v12973_v42, 7  ;;  %v12989_v24 = vpack.c.bf16 %v12973_v42, %v12970_v37  ;;  %vm3706_vm8 = vcmp.gt.f32.partialorder %v12614_v18, 0.0 }
 0x687   : > { %5259 = vmatprep.subr.bf16.mxu1 %v8517_v22  ;;  %v12985_v36 = vpack.c.bf16 %v4058_v21, %v4056_v63  ;;  %v3766_v22 = vmul.f32 0.01, %v12598_v20  ;;  %v3769_v21 = vmul.f32 0.01, %v12610_v44  ;;  %vm3707_vm9 = vcmp.gt.f32.partialorder %v12618_v55, 0.0 }
 0x688   : > { %7405 = vmatmul.mubr.msk.bf16.gmra.mrb[104].mxu1 %vm12819_vm0, %v12858_v0  ;;  %7629 = vmatmul.mubr.msk.bf16.gmra.mrb[104].mxu0 %vm12819_vm0, %v12858_v0  ;;  %v8518_v0 = vld [vmem:[%s15536_s4 + $0x1a0] ss:$12 sps:$4 sm:$0xff]   ;;  %v4061_v17 = vsel %vm1277_vm6, %v4059_v35, %v4060_v46  ;;  %vm3708_vm10 = vcmp.gt.f32.partialorder %v12622_v33, 0.0  ;;  %vm3709_vm11 = vcmp.gt.f32.partialorder %v12626_v45, 0.0  ;;  %vm3710_vm12 = vcmp.gt.f32.partialorder %v12630_v51, 0.0 }
 0x689   : > { %4964 = vmatprep.mubr.bf16.mxu1 %v4432_v25  ;;  %5654 = vmatprep.mubr.bf16.mxu0 %v4432_v25  ;;  %v3767_v25 = vmul.f32 0.01, %v12602_v43  ;;  %v13000_v63 = vpack.c.bf16 %v4061_v17, %v4059_v35  ;;  %v13008_v50 = vsel %vm3702_vm15, %v12598_v20, %v3766_v22  ;;  %v13024_v20 = vsel %vm3704_vm4, %v12606_v34, %v3768_v9  ;;  %v8521_v34 = vld [vmem:[%s15536_s4 + $0x1fc] ss:$12 sps:$4 sm:$0xff]  }
 0x68a   : > { %5260 = vmatpush1.bf16.msra.mxu1 %v8515_v27  ;;  %8107 = vmatprep.subr.bf16.mxu0 %v8518_v0  ;;  %16028 = vst [vmem:[#allocation8_spill] sm:$0xff] %v13008_v50  ;;  %v4062_v27 = vrot.slane %v13008_v50, 7  ;;  %16030 = vst [vmem:[#allocation43_spill] sm:$0xff] %v13024_v20  ;;  %vm3711_vm13 = vcmp.gt.f32.partialorder %v12634_v39, 0.0  ;;  %vm3712_vm14 = vcmp.gt.f32.partialorder %v12638_v14, 0.0  ;;  %vm3713_vm15 = vcmp.gt.f32.partialorder %v12642_v31, 0.0 }
 0x68b   : > { %v13011_v8 = vsel %vm3703_vm2, %v12602_v43, %v3767_v25  ;;  %8108 = vmatpush3.bf16.msra.mxu0 %v8518_v0  ;;  %v13027_v43 = vsel %vm3705_vm7, %v12610_v44, %v3769_v21  ;;  %v3770_v0 = vmul.f32 0.01, %v12614_v18  ;;  %v4065_v25 = vrot.slane %v13024_v20, 7  ;;  %5261 = vmatprep.subr.bf16.mxu1 %v8521_v34 }
 0x68c   : > { %16029 = vst [vmem:[#allocation31_spill] sm:$0xff] %v13011_v8  ;;  %v4063_v17 = vrot.slane %v13011_v8, 7  ;;  %v13019_v16 = vpack.c.bf16 %v13011_v8, %v13008_v50  ;;  %16031 = vst [vmem:[#allocation10_spill] sm:$0xff] %v13027_v43  ;;  %v4066_v46 = vrot.slane %v13027_v43, 7  ;;  %v13045_v9 = vpack.c.bf16 %v13027_v43, %v13024_v20 }
 0x68d   : > { %v3771_v21 = vmul.f32 0.01, %v12618_v55  ;;  %v3775_v50 = vmul.f32 0.01, %v12634_v39  ;;  %vm3714_vm2 = vcmp.gt.f32.partialorder %v12646_v29, 0.0  ;;  %vm3715_vm4 = vcmp.gt.f32.partialorder %v12650_v28, 0.0 }
 0x68e   : > { %v4064_v22 = vsel %vm1277_vm6, %v4062_v27, %v4063_v17  ;;  %vm3716_vm7 = vcmp.gt.f32.partialorder %v12654_v38, 0.0 }
 0x68f   : > { %v13041_v44 = vpack.c.bf16 %v4064_v22, %v4062_v27  ;;  %v13056_v27 = vsel %vm3706_vm8, %v12614_v18, %v3770_v0  ;;  %v8519_v22 = vld [vmem:[%s15536_s4 + $0x1f8] ss:$12 sps:$4 sm:$0xff]   ;;  %v13069_v35 = vsel %vm3707_vm9, %v12618_v55, %v3771_v21  ;;  %v3773_v55 = vmul.f32 0.01, %v12626_v45 }
 0x690   : > { %7409 = vmatmul.mubr.msk.bf16.gmra.mrb[108].mxu1 %vm12819_vm0, %v12907_v23  ;;  %7633 = vmatmul.mubr.msk.bf16.gmra.mrb[108].mxu0 %vm12819_vm0, %v12907_v23  ;;  %v4067_v23 = vsel %vm1277_vm6, %v4065_v25, %v4066_v46  ;;  %16032 = vst [vmem:[#allocation41_spill] sm:$0xff] %v13056_v27  ;;  %16033 = vst [vmem:[#allocation14_spill] sm:$0xff] %v13069_v35  ;;  %v4068_v46 = vrot.slane %v13056_v27, 7  ;;  %v4069_v18 = vrot.slane %v13069_v35, 7  ;;  %v3774_v21 = vmul.f32 0.01, %v12630_v51 }
 0x691   : > { %4974 = vmatprep.mubr.bf16.mxu1 %v12911_v19  ;;  %5662 = vmatprep.mubr.bf16.mxu0 %v12911_v19  ;;  %v13064_v19 = vpack.c.bf16 %v4067_v23, %v4065_v25  ;;  %v13076_v0 = vpack.c.bf16 %v13069_v35, %v13056_v27  ;;  %v3772_v25 = vmul.f32 0.01, %v12622_v33  ;;  %v13094_v23 = vsel %vm3709_vm11, %v12626_v45, %v3773_v55 }
 0x692   : > { %5262 = vmatpush1.bf16.msra.mxu1 %v8519_v22  ;;  %v4070_v17 = vsel %vm1277_vm6, %v4068_v46, %v4069_v18  ;;  %v4072_v18 = vrot.slane %v13094_v23, 7  ;;  %v3779_v45 = vmul.f32 0.01, %v12650_v28  ;;  %vm3717_vm8 = vcmp.gt.f32.partialorder %v12658_v58, 0.0 }
 0x693   : > { %v13086_v20 = vsel %vm3708_vm10, %v12622_v33, %v3772_v25  ;;  %v13091_v8 = vpack.c.bf16 %v4070_v17, %v4068_v46  ;;  %v13104_v25 = vsel %vm3710_vm12, %v12630_v51, %v3774_v21  ;;  %v13114_v17 = vsel %vm3711_vm13, %v12634_v39, %v3775_v50 }
 0x694   : > { %16034 = vst [vmem:[#allocation23_spill] sm:$0xff] %v13086_v20  ;;  %v4071_v43 = vrot.slane %v13086_v20, 7  ;;  %v13101_v33 = vpack.c.bf16 %v13094_v23, %v13086_v20  ;;  %v4074_v46 = vrot.slane %v13104_v25, 7  ;;  %v4075_v55 = vrot.slane %v13114_v17, 7 }
 0x695   : > { %v3776_v50 = vmul.f32 0.01, %v12638_v14  ;;  %v3777_v21 = vmul.f32 0.01, %v12642_v31  ;;  %vm3718_vm9 = vcmp.gt.f32.partialorder %v12662_v62, 0.0  ;;  %vm3719_vm10 = vcmp.gt.f32.partialorder %v12666_v49, 0.0 }
 0x696   : > { %v4073_v51 = vsel %vm1277_vm6, %v4071_v43, %v4072_v18  ;;  %v3778_v18 = vmul.f32 0.01, %v12646_v29  ;;  %vm3720_vm11 = vcmp.gt.f32.partialorder %v12670_v11, 0.0  ;;  %vm3721_vm12 = vcmp.gt.f32.partialorder %v12674_v52, 0.0 }
 0x697   : > { %v13127_v39 = vpack.c.bf16 %v4073_v51, %v4071_v43  ;;  %v13142_v43 = vsel %vm3712_vm14, %v12638_v14, %v3776_v50  ;;  %v13145_v51 = vsel %vm3713_vm15, %v12642_v31, %v3777_v21  ;;  %v13159_v14 = vsel %vm3715_vm4, %v12650_v28, %v3779_v45 }
 0x698   : > { %7413 = vmatmul.mubr.msk.bf16.gmra.mrb[112].mxu1 %vm12819_vm0, %v12927_v40  ;;  %7637 = vmatmul.mubr.msk.bf16.gmra.mrb[112].mxu0 %vm12819_vm0, %v12927_v40  ;;  %v13124_v40 = vpack.c.bf16 %v13114_v17, %v13104_v25  ;;  %v4077_v27 = vrot.slane %v13142_v43, 7  ;;  %v4078_v35 = vrot.slane %v13145_v51, 7  ;;  %v3783_v31 = vmul.f32 0.01, %v12666_v49 }
 0x699   : > { %4984 = vmatprep.mubr.bf16.mxu1 %v12932_v12  ;;  %5670 = vmatprep.mubr.bf16.mxu0 %v12932_v12  ;;  %v4076_v12 = vsel %vm1277_vm6, %v4074_v46, %v4075_v55  ;;  %v4081_v55 = vrot.slane %v13159_v14, 7  ;;  %vm3722_vm13 = vcmp.gt.f32.partialorder %v12678_v56, 0.0  ;;  %vm3723_vm14 = vcmp.gt.f32.partialorder %v12682_v5, 0.0 }
 0x69a   : > { %v13137_v22 = vpack.c.bf16 %v4076_v12, %v4074_v46  ;;  %v13153_v46 = vpack.c.bf16 %v13145_v51, %v13142_v43  ;;  %v13156_v12 = vsel %vm3714_vm2, %v12646_v29, %v3778_v18  ;;  %v4079_v50 = vsel %vm1277_vm6, %v4077_v27, %v4078_v35 }
 0x69b   : > { %v4080_v21 = vrot.slane %v13156_v12, 7  ;;  %v13172_v29 = vpack.c.bf16 %v4079_v50, %v4077_v27  ;;  %v13176_v28 = vpack.c.bf16 %v13159_v14, %v13156_v12  ;;  %v3780_v35 = vmul.f32 0.01, %v12654_v38 }
 0x69c   : > { %v3781_v18 = vmul.f32 0.01, %v12658_v58  ;;  %v3782_v50 = vmul.f32 0.01, %v12662_v62  ;;  %vm3724_vm15 = vcmp.gt.f32.partialorder %v12686_v59, 0.0  ;;  %vm3725_vm2 = vcmp.gt.f32.partialorder %v12690_v32, 0.0 }
 0x69d   : > { %v4082_v45 = vsel %vm1277_vm6, %v4080_v21, %v4081_v55  ;;  %v13191_v27 = vsel %vm3716_vm7, %v12654_v38, %v3780_v35  ;;  %v13212_v55 = vsel %vm3719_vm10, %v12666_v49, %v3783_v31  ;;  %v3785_v49 = vmul.f32 0.01, %v12674_v52 }
 0x69e   : > { %v13198_v20 = vsel %vm3717_vm8, %v12658_v58, %v3781_v18  ;;  %v4083_v34 = vrot.slane %v13191_v27, 7  ;;  %v13208_v35 = vsel %vm3718_vm9, %v12662_v62, %v3782_v50  ;;  %v3784_v50 = vmul.f32 0.01, %v12670_v11 }
 0x69f   : > { %v13205_v38 = vpack.c.bf16 %v13198_v20, %v13191_v27  ;;  %v4086_v58 = vrot.slane %v13208_v35, 7  ;;  %vm3726_vm4 = vcmp.gt.f32.partialorder %v12694_v26, 0.0  ;;  %vm3727_vm7 = vcmp.gt.f32.partialorder %v12703_v15, 0.0 }
 0x6a0   : > { %7417 = vmatmul.mubr.msk.bf16.gmra.mrb[116].mxu1 %vm12819_vm0, %v12948_v53  ;;  %7641 = vmatmul.mubr.msk.bf16.gmra.mrb[116].mxu0 %vm12819_vm0, %v12948_v53  ;;  %v13186_v53 = vpack.c.bf16 %v4082_v45, %v4080_v21  ;;  %v4084_v45 = vrot.slane %v13198_v20, 7  ;;  %v4087_v21 = vrot.slane %v13212_v55, 7  ;;  %vm3728_vm8 = vcmp.gt.f32.partialorder %v12707_v47, 0.0 }
 0x6a1   : > { %4994 = vmatprep.mubr.bf16.mxu1 %v12967_v13  ;;  %5678 = vmatprep.mubr.bf16.mxu0 %v12967_v13  ;;  %16036 = vst [vmem:[#allocation20_spill] sm:$0xff] %v13205_v38  ;;  %vm3729_vm9 = vcmp.gt.f32.partialorder %v12711_v41, 0.0 }
 0x6a2   : > { %16035 = vst [vmem:[#allocation19_spill] sm:$0xff] %v13186_v53  ;;  %v4085_v18 = vsel %vm1277_vm6, %v4083_v34, %v4084_v45  ;;  %v13220_v53 = vpack.c.bf16 %v13212_v55, %v13208_v35  ;;  %v4088_v31 = vsel %vm1277_vm6, %v4086_v58, %v4087_v21  ;;  %v3787_v45 = vmul.f32 0.01, %v12682_v5 }
 0x6a3   : > { %v13223_v62 = vpack.c.bf16 %v4085_v18, %v4083_v34  ;;  %v3786_v34 = vmul.f32 0.01, %v12678_v56  ;;  %v13241_v13 = vpack.c.bf16 %v4088_v31, %v4086_v58  ;;  %v13251_v21 = vsel %vm3721_vm12, %v12674_v52, %v3785_v49 }
 0x6a4   : > { %16037 = vst [vmem:[#allocation29_spill] sm:$0xff] %v13220_v53  ;;  %v8522_v53 = vld [vmem:[%s15536_s4 + $0x1b8] ss:$12 sps:$4 sm:$0xff]   ;;  %v4090_v31 = vrot.slane %v13251_v21, 7 }
 0x6a5   : > { %16038 = vst [vmem:[#allocation27_spill] sm:$0xff] %v13223_v62  ;;  %16039 = vst [vmem:[#allocation45_spill] sm:$0xff] %v13241_v13  ;;  %v13267_v52 = vsel %vm3722_vm13, %v12678_v56, %v3786_v34  ;;  %8109 = vmatprep.subr.bf16.mxu0 %v8522_v53 }
 0x6a6   : > { %v4092_v18 = vrot.slane %v13267_v52, 7  ;;  %8110 = vmatpush3.bf16.msra.mxu0 %v8522_v53 }
 0x6a8   : > { %7421 = vmatmul.mubr.msk.bf16.gmra.mrb[120].mxu1 %vm12819_vm0, %v12985_v36  ;;  %7645 = vmatmul.mubr.msk.bf16.gmra.mrb[120].mxu0 %vm12819_vm0, %v12985_v36  ;;  %v13246_v36 = vsel %vm3720_vm11, %v12670_v11, %v3784_v50  ;;  %v13272_v50 = vsel %vm3723_vm14, %v12682_v5, %v3787_v45  ;;  %v3788_v5 = vmul.f32 0.01, %v12686_v59  ;;  %v3789_v45 = vmul.f32 0.01, %v12690_v32 }
 0x6a9   : > { %5004 = vmatprep.mubr.bf16.mxu1 %v12989_v24  ;;  %5686 = vmatprep.mubr.bf16.mxu0 %v12989_v24  ;;  %v4089_v58 = vrot.slane %v13246_v36, 7  ;;  %v13262_v11 = vpack.c.bf16 %v13251_v21, %v13246_v36  ;;  %v13283_v56 = vpack.c.bf16 %v13272_v50, %v13267_v52 }
 0x6aa   : > { %v13296_v53 = vsel %vm3724_vm15, %v12686_v59, %v3788_v5 }
 0x6ab   : > { %16040 = vst [vmem:[#allocation49_spill] sm:$0xff] %v13262_v11  ;;  %v4091_v24 = vsel %vm1277_vm6, %v4089_v58, %v4090_v31  ;;  %v4093_v11 = vrot.slane %v13272_v50, 7  ;;  %16042 = vst [vmem:[#allocation40_spill] sm:$0xff] %v13283_v56  ;;  %v4095_v59 = vrot.slane %v13296_v53, 7  ;;  %v16049_v56 = vld [vmem:[#allocation36_spill] sm:$0xff] }
 0x6ac   : > { %v13279_v13 = vpack.c.bf16 %v4091_v24, %v4089_v58  ;;  %v3790_v24 = vmul.f32 0.01, %v12694_v26  ;;  %v3791_v58 = vmul.f32 0.01, %v12703_v15  ;;  %vm3731_vm11 = vcmp.gt.f32.partialorder %v16049_v56, 0.0 }
 0x6ad   : > { %v4094_v34 = vsel %vm1277_vm6, %v4092_v18, %v4093_v11 }
 0x6ae   : > { %16041 = vst [vmem:[#allocation42_spill] sm:$0xff] %v13279_v13  ;;  %v13291_v31 = vpack.c.bf16 %v4094_v34, %v4092_v18  ;;  %v13309_v34 = vsel %vm3725_vm2, %v12690_v32, %v3789_v45  ;;  %v13323_v11 = vsel %vm3726_vm4, %v12694_v26, %v3790_v24  ;;  %v8523_v32 = vld [vmem:[%s15536_s4 + $0x210] ss:$12 sps:$4 sm:$0xff]   ;;  %v13335_v5 = vsel %vm3727_vm7, %v12703_v15, %v3791_v58 }
 0x6af   : > { %v4096_v49 = vrot.slane %v13309_v34, 7  ;;  %16045 = vst [vmem:[#allocation52_spill] sm:$0xff] %v13323_v11  ;;  %v4098_v18 = vrot.slane %v13323_v11, 7  ;;  %v4099_v24 = vrot.slane %v13335_v5, 7  ;;  %v3792_v15 = vmul.f32 0.01, %v12707_v47 }
 0x6b0   : > { %16043 = vst [vmem:[#allocation50_spill] sm:$0xff] %v13291_v31  ;;  %7425 = vmatmul.mubr.msk.bf16.gmra.mrb[124].mxu1 %vm12819_vm0, %v13000_v63  ;;  %7649 = vmatmul.mubr.msk.bf16.gmra.mrb[124].mxu0 %vm12819_vm0, %v13000_v63  ;;  %v13318_v63 = vpack.c.bf16 %v13309_v34, %v13296_v53  ;;  %v3793_v58 = vmul.f32 0.01, %v12711_v41  ;;  %v16048_v31 = vld [vmem:[#allocation9_spill] sm:$0xff]  ;;  %vm3736_vm2 = vcmp.gt.f32.partialorder %v12740_v6, 0.0  ;;  %vm3737_vm4 = vcmp.gt.f32.partialorder %v12744_v30, 0.0 }
 0x6b1   : > { %5014 = vmatprep.mubr.bf16.mxu1 %v13019_v16  ;;  %5694 = vmatprep.mubr.bf16.mxu0 %v13019_v16  ;;  %v8525_v16 = vld [vmem:[%s15536_s4 + $0x214] ss:$12 sps:$4 sm:$0xff]   ;;  %v4097_v26 = vsel %vm1277_vm6, %v4095_v59, %v4096_v49  ;;  %vm3730_vm10 = vcmp.gt.f32.partialorder %v16048_v31, 0.0  ;;  %v4100_v49 = vsel %vm1277_vm6, %v4098_v18, %v4099_v24  ;;  %v3794_v13 = vmul.f32 0.01, %v16048_v31 }
 0x6b2   : > { %16044 = vst [vmem:[#allocation53_spill] sm:$0xff] %v13318_v63  ;;  %v13343_v63 = vpack.c.bf16 %v13335_v5, %v13323_v11  ;;  %5263 = vmatprep.subr.bf16.mxu1 %v8525_v16  ;;  %v13346_v45 = vpack.c.bf16 %v4097_v26, %v4095_v59  ;;  %v13356_v16 = vpack.c.bf16 %v4100_v49, %v4098_v18 }
 0x6b3   : > { %5264 = vmatpush1.bf16.msra.mxu1 %v8523_v32  ;;  %v3856_v59 = vsel %vm3728_vm8, %v12707_v47, %v3792_v15  ;;  %v3857_v26 = vsel %vm3729_vm9, %v12711_v41, %v3793_v58  ;;  %v13374_v47 = vsel %vm3730_vm10, %v16048_v31, %v3794_v13  ;;  %v16054_v31 = vld [vmem:[#allocation13_spill] sm:$0xff] }
 0x6b4   : > { %16046 = vst [vmem:[#allocation55_spill] sm:$0xff] %v13343_v63  ;;  %16047 = vst [vmem:[#allocation57_spill] sm:$0xff] %v13346_v45  ;;  %v3795_v63 = vmul.f32 0.01, %v16049_v56  ;;  %v4101_v45 = vrot.slane %v3856_v59, 7  ;;  %v4102_v32 = vrot.slane %v3857_v26, 7  ;;  %v13369_v49 = vpack.c.bf16 %v3857_v26, %v3856_v59 }
 0x6b5   : > { %16050 = vst [vmem:[#allocation24_spill] sm:$0xff] %v13356_v16  ;;  %v4293_v38 = vrot.slane %v3856_v59, 1  ;;  %v4294_v24 = vrot.slane %v3857_v26, 1  ;;  %v4104_v58 = vrot.slane %v13374_v47, 7  ;;  %vm3732_vm12 = vcmp.gt.f32.partialorder %v16054_v31, 0.0 }
 0x6b6   : > { %16051 = vst [vmem:[#allocation28_spill] sm:$0xff] %v13369_v49  ;;  %v13379_v41 = vsel %vm3731_vm11, %v16049_v56, %v3795_v63  ;;  %v4103_v15 = vsel %vm1277_vm6, %v4101_v45, %v4102_v32  ;;  %v16055_v56 = vld [vmem:[#allocation37_spill] sm:$0xff] }
 0x6b7   : > { %v4105_v59 = vrot.slane %v13379_v41, 7  ;;  %v13389_v13 = vpack.c.bf16 %v4103_v15, %v4101_v45  ;;  %vm3733_vm13 = vcmp.gt.f32.partialorder %v16055_v56, 0.0  ;;  %v13395_v63 = vpack.c.bf16 %v13379_v41, %v13374_v47  ;;  %v16059_v45 = vld [vmem:[#allocation39_spill] sm:$0xff] }
 0x6b8   : > { %7429 = vmatmul.mubr.msk.bf16.gmra.mrb[128].mxu1 %vm12819_vm0, %v13041_v44  ;;  %7653 = vmatmul.mubr.msk.bf16.gmra.mrb[128].mxu0 %vm12819_vm0, %v13041_v44  ;;  %v4295_v44 = vsel %vm1470_vm5, %v4293_v38, %v4294_v24  ;;  %v3796_v38 = vmul.f32 0.01, %v16054_v31  ;;  %v3797_v32 = vmul.f32 0.01, %v16055_v56  ;;  %vm3735_vm15 = vcmp.gt.f32.partialorder %v16059_v45, 0.0 }
 0x6b9   : > { %5024 = vmatprep.mubr.bf16.mxu1 %v13045_v9  ;;  %5702 = vmatprep.mubr.bf16.mxu0 %v13045_v9  ;;  %v13387_v26 = vpack.c.bf16 %v4294_v24, %v4295_v44  ;;  %16053 = vst [vmem:[#allocation30_spill] sm:$0xff] %v13389_v13  ;;  %16056 = vst [vmem:[#allocation34_spill] sm:$0xff] %v13395_v63  ;;  %v4106_v9 = vsel %vm1277_vm6, %v4104_v58, %v4105_v59  ;;  %v16058_v24 = vld [vmem:[#allocation17_spill] sm:$0xff]  ;;  %v3799_v59 = vmul.f32 0.01, %v16059_v45 }
 0x6ba   : > { %v13400_v18 = vpack.c.bf16 %v4106_v9, %v4104_v58  ;;  %vm3734_vm14 = vcmp.gt.f32.partialorder %v16058_v24, 0.0  ;;  %v3798_v44 = vmul.f32 0.01, %v16058_v24  ;;  %v3860_v62 = vsel %vm3732_vm12, %v16054_v31, %v3796_v38 }
 0x6bb   : > { %16052 = vst [vmem:[#allocation2_spill] sm:$0xff] %v13387_v26  ;;  %v3861_v26 = vsel %vm3733_vm13, %v16055_v56, %v3797_v32  ;;  %v4107_v63 = vrot.slane %v3860_v62, 7  ;;  %v4299_v49 = vrot.slane %v3860_v62, 1  ;;  %v13416_v11 = vsel %vm3735_vm15, %v16059_v45, %v3799_v59 }
 0x6bc   : > { %16057 = vst [vmem:[#allocation33_spill] sm:$0xff] %v13400_v18  ;;  %v4108_v13 = vrot.slane %v3861_v26, 7  ;;  %v4300_v16 = vrot.slane %v3861_v26, 1  ;;  %v13410_v9 = vpack.c.bf16 %v3861_v26, %v3860_v62  ;;  %v13413_v18 = vsel %vm3734_vm14, %v16058_v24, %v3798_v44 }
 0x6bd   : > { %v4110_v62 = vrot.slane %v13413_v18, 7  ;;  %v4111_v26 = vrot.slane %v13416_v11, 7  ;;  %v3801_v24 = vmul.f32 0.01, %v12744_v30 }
 0x6be   : > { %v4301_v31 = vsel %vm1470_vm5, %v4299_v49, %v4300_v16  ;;  %v4109_v56 = vsel %vm1277_vm6, %v4107_v63, %v4108_v13  ;;  %v3800_v13 = vmul.f32 0.01, %v12740_v6 }
 0x6bf   : > { %v13430_v38 = vpack.c.bf16 %v4300_v16, %v4301_v31  ;;  %v13432_v32 = vpack.c.bf16 %v4109_v56, %v4107_v63  ;;  %v4112_v49 = vsel %vm1277_vm6, %v4110_v62, %v4111_v26  ;;  %v16064_v16 = vld [vmem:[#allocation58_spill] sm:$0xff]  ;;  %v3865_v31 = vsel %vm3737_vm4, %v12744_v30, %v3801_v24 }
 0x6c0   : > { %7433 = vmatmul.mubr.msk.bf16.gmra.mrb[132].mxu1 %vm12819_vm0, %v13064_v19  ;;  %7657 = vmatmul.mubr.msk.bf16.gmra.mrb[132].mxu0 %vm12819_vm0, %v13064_v19  ;;  %v13438_v19 = vpack.c.bf16 %v13416_v11, %v13413_v18  ;;  %v13443_v45 = vpack.c.bf16 %v4112_v49, %v4110_v62  ;;  %vm3739_vm8 = vcmp.gt.f32.partialorder %v16064_v16, 0.0  ;;  %v3864_v59 = vsel %vm3736_vm2, %v12740_v6, %v3800_v13 }
 0x6c1   : > { %5034 = vmatprep.mubr.bf16.mxu1 %v13076_v0  ;;  %5710 = vmatprep.mubr.bf16.mxu0 %v13076_v0  ;;  %16060 = vst [vmem:[#allocation32_spill] sm:$0xff] %v13430_v38  ;;  %v16063_v0 = vld [vmem:[#allocation59_spill] sm:$0xff]  ;;  %v3803_v56 = vmul.f32 0.01, %v16064_v16  ;;  %v4113_v26 = vrot.slane %v3864_v59, 7  ;;  %v4114_v58 = vrot.slane %v3865_v31, 7  ;;  %v13453_v49 = vpack.c.bf16 %v3865_v31, %v3864_v59 }
 0x6c2   : > { %16061 = vst [vmem:[#allocation38_spill] sm:$0xff] %v13438_v19  ;;  %16062 = vst [vmem:[#allocation35_spill] sm:$0xff] %v13443_v45  ;;  %vm3738_vm7 = vcmp.gt.f32.partialorder %v16063_v0, 0.0  ;;  %v3802_v63 = vmul.f32 0.01, %v16063_v0  ;;  %v4305_v15 = vrot.slane %v3864_v59, 1 }
 0x6c3   : > { %v4306_v38 = vrot.slane %v3865_v31, 1  ;;  %16065 = vst [vmem:[#allocation46_spill] sm:$0xff] %v13453_v49  ;;  %v13459_v19 = vsel %vm3739_vm8, %v16064_v16, %v3803_v56  ;;  %v4115_v30 = vsel %vm1277_vm6, %v4113_v26, %v4114_v58  ;;  %v16072_v56 = vld [vmem:[#allocation22_spill] sm:$0xff] }
 0x6c4   : > { %v13456_v45 = vsel %vm3738_vm7, %v16063_v0, %v3802_v63  ;;  %v4117_v24 = vrot.slane %v13459_v19, 7  ;;  %v13473_v16 = vpack.c.bf16 %v4115_v30, %v4113_v26  ;;  %v16068_v63 = vld [vmem:[#allocation3_spill] sm:$0xff]  ;;  %vm3742_vm11 = vcmp.gt.f32.partialorder %v16072_v56, 0.0  ;;  %v16073_v26 = vld [vmem:[#allocation5_spill] sm:$0xff] }
 0x6c5   : > { %v4307_v6 = vsel %vm1470_vm5, %v4305_v15, %v4306_v38  ;;  %v4116_v13 = vrot.slane %v13456_v45, 7  ;;  %vm3740_vm9 = vcmp.gt.f32.partialorder %v16068_v63, 0.0  ;;  %v16069_v15 = vld [vmem:[#allocation60_spill] sm:$0xff]  ;;  %v13481_v58 = vpack.c.bf16 %v13459_v19, %v13456_v45 }
 0x6c6   : > { %v13471_v0 = vpack.c.bf16 %v4306_v38, %v4307_v6  ;;  %16067 = vst [vmem:[#allocation54_spill] sm:$0xff] %v13473_v16  ;;  %vm3741_vm10 = vcmp.gt.f32.partialorder %v16069_v15, 0.0  ;;  %v3805_v38 = vmul.f32 0.01, %v16069_v15  ;;  %vm3743_vm12 = vcmp.gt.f32.partialorder %v16073_v26, 0.0 }
 0x6c7   : > { %16070 = vst [vmem:[#allocation56_spill] sm:$0xff] %v13481_v58  ;;  %v4118_v59 = vsel %vm1277_vm6, %v4116_v13, %v4117_v24  ;;  %v3806_v6 = vmul.f32 0.01, %v16072_v56  ;;  %v3807_v24 = vmul.f32 0.01, %v16073_v26 }
 0x6c8   : > { %7437 = vmatmul.mubr.msk.bf16.gmra.mrb[136].mxu1 %vm12819_vm0, %v13091_v8  ;;  %7661 = vmatmul.mubr.msk.bf16.gmra.mrb[136].mxu0 %vm12819_vm0, %v13091_v8  ;;  %16066 = vst [vmem:[#allocation47_spill] sm:$0xff] %v13471_v0  ;;  %v3804_v8 = vmul.f32 0.01, %v16068_v63  ;;  %v13486_v31 = vpack.c.bf16 %v4118_v59, %v4116_v13  ;;  %v3869_v62 = vsel %vm3741_vm10, %v16069_v15, %v3805_v38 }
 0x6c9   : > { %5044 = vmatprep.mubr.bf16.mxu1 %v13101_v33  ;;  %5718 = vmatprep.mubr.bf16.mxu0 %v13101_v33  ;;  %v4120_v0 = vrot.slane %v3869_v62, 7  ;;  %v4312_v16 = vrot.slane %v3869_v62, 1  ;;  %v13502_v33 = vsel %vm3742_vm11, %v16072_v56, %v3806_v6  ;;  %v16078_v56 = vld [vmem:[#allocation6_spill] sm:$0xff] }
 0x6ca   : > { %16071 = vst [vmem:[#allocation25_spill] sm:$0xff] %v13486_v31  ;;  %v3868_v30 = vsel %vm3740_vm9, %v16068_v63, %v3804_v8  ;;  %v8526_v31 = vld [vmem:[%s15536_s4 + $0x1d0] ss:$12 sps:$4 sm:$0xff]   ;;  %v13505_v63 = vsel %vm3743_vm12, %v16073_v26, %v3807_v24  ;;  %v4122_v38 = vrot.slane %v13502_v33, 7  ;;  %vm3745_vm14 = vcmp.gt.f32.partialorder %v16078_v56, 0.0  ;;  %v16081_v24 = vld [vmem:[#allocation51_spill] sm:$0xff] }
 0x6cb   : > { %v4119_v44 = vrot.slane %v3868_v30, 7  ;;  %v4311_v58 = vrot.slane %v3868_v30, 1  ;;  %v13496_v59 = vpack.c.bf16 %v3869_v62, %v3868_v30  ;;  %v4123_v13 = vrot.slane %v13505_v63, 7  ;;  %8111 = vmatprep.subr.bf16.mxu0 %v8526_v31  ;;  %v8527_v26 = vld [vmem:[%s15536_s4 + $0x228] ss:$12 sps:$4 sm:$0xff]  }
 0x6cc   : > { %vm3746_vm15 = vcmp.gt.f32.partialorder %v16081_v24, 0.0  ;;  %8112 = vmatpush3.bf16.msra.mxu0 %v8526_v31 }
 0x6cd   : > { %16074 = vst [vmem:[#allocation4_spill] sm:$0xff] %v13496_v59  ;;  %v4313_v15 = vsel %vm1470_vm5, %v4311_v58, %v4312_v16  ;;  %v4121_v8 = vsel %vm1277_vm6, %v4119_v44, %v4120_v0  ;;  %v16077_v59 = vld [vmem:[#allocation7_spill] sm:$0xff]  ;;  %v13525_v0 = vpack.c.bf16 %v13505_v63, %v13502_v33  ;;  %v3809_v58 = vmul.f32 0.01, %v16078_v56 }
 0x6ce   : > { %v13511_v62 = vpack.c.bf16 %v4312_v16, %v4313_v15  ;;  %v13513_v30 = vpack.c.bf16 %v4121_v8, %v4119_v44  ;;  %vm3744_vm13 = vcmp.gt.f32.partialorder %v16077_v59, 0.0  ;;  %v4124_v16 = vsel %vm1277_vm6, %v4122_v38, %v4123_v13  ;;  %v16082_v13 = vld [vmem:[#allocation11_spill] sm:$0xff] }
 0x6cf   : > { %16079 = vst [vmem:[#allocation9_spill] sm:$0xff] %v13525_v0  ;;  %v3808_v44 = vmul.f32 0.01, %v16077_v59  ;;  %v13538_v6 = vpack.c.bf16 %v4124_v16, %v4122_v38  ;;  %vm3747_vm2 = vcmp.gt.f32.partialorder %v16082_v13, 0.0  ;;  %v16083_v15 = vrot.slane %v12804_v61, 1 }
 0x6d0   : > { %16075 = vst [vmem:[#allocation21_spill] sm:$0xff] %v13511_v62  ;;  %16076 = vst [vmem:[#allocation26_spill] sm:$0xff] %v13513_v30  ;;  %7441 = vmatmul.mubr.msk.bf16.gmra.mrb[140].mxu1 %vm12819_vm0, %v13127_v39  ;;  %7665 = vmatmul.mubr.msk.bf16.gmra.mrb[140].mxu0 %vm12819_vm0, %v13127_v39  ;;  %v8529_v39 = vld [vmem:[%s15536_s4 + $0x22c] ss:$12 sps:$4 sm:$0xff]   ;;  %v16084_v8 = vrot.slane %v12801_v48, 1  ;;  %v3873_v38 = vsel %vm3745_vm14, %v16078_v56, %v3809_v58  ;;  %v16093_v61 = vrot.slane %v12876_v4, 1 }
 0x6d1   : > { %5054 = vmatprep.mubr.bf16.mxu1 %v13124_v40  ;;  %5726 = vmatprep.mubr.bf16.mxu0 %v13124_v40  ;;  %16080 = vst [vmem:[#allocation36_spill] sm:$0xff] %v13538_v6  ;;  %v3872_v62 = vsel %vm3744_vm13, %v16077_v59, %v3808_v44  ;;  %v3810_v16 = vmul.f32 0.01, %v16081_v24  ;;  %v3811_v6 = vmul.f32 0.01, %v16082_v13  ;;  %v4126_v30 = vrot.slane %v3873_v38, 7 }
 0x6d2   : > { %v4232_v40 = vsel %vm1470_vm5, %v16084_v8, %v16083_v15  ;;  %5265 = vmatprep.subr.bf16.mxu1 %v8529_v39  ;;  %v4125_v0 = vrot.slane %v3872_v62, 7  ;;  %v4317_v49 = vrot.slane %v3872_v62, 1  ;;  %v4318_v48 = vrot.slane %v3873_v38, 1 }
 0x6d3   : > { %5266 = vmatpush1.bf16.msra.mxu1 %v8527_v26  ;;  %v13556_v31 = vpack.c.bf16 %v3873_v38, %v3872_v62  ;;  %v13561_v59 = vsel %vm3746_vm15, %v16081_v24, %v3810_v16  ;;  %v13566_v56 = vsel %vm3747_vm2, %v16082_v13, %v3811_v6  ;;  %v16086_v24 = vld [vmem:[#allocation12_spill] sm:$0xff]  ;;  %v16087_v13 = vld [vmem:[#allocation15_spill] sm:$0xff]  ;;  %v16102_v4 = vrot.slane %v12916_v60, 1 }
 0x6d4   : > { %v4319_v44 = vsel %vm1470_vm5, %v4317_v49, %v4318_v48  ;;  %v4127_v58 = vsel %vm1277_vm6, %v4125_v0, %v4126_v30  ;;  %v4128_v39 = vrot.slane %v13561_v59, 7  ;;  %v4129_v26 = vrot.slane %v13566_v56, 7 }
 0x6d5   : > { %v13573_v8 = vpack.c.bf16 %v4318_v48, %v4319_v44  ;;  %v13575_v38 = vpack.c.bf16 %v4127_v58, %v4125_v0  ;;  %vm3748_vm4 = vcmp.gt.f32.partialorder %v16086_v24, 0.0  ;;  %v13580_v6 = vpack.c.bf16 %v13566_v56, %v13561_v59 }
 0x6d6   : > { %v4130_v49 = vsel %vm1277_vm6, %v4128_v39, %v4129_v26  ;;  %vm3749_vm7 = vcmp.gt.f32.partialorder %v16087_v13, 0.0  ;;  %v3812_v30 = vmul.f32 0.01, %v16086_v24  ;;  %v3813_v16 = vmul.f32 0.01, %v16087_v13 }
 0x6d7   : > { %16085 = vst [vmem:[#allocation13_spill] sm:$0xff] %v13573_v8  ;;  %v13591_v0 = vpack.c.bf16 %v4130_v49, %v4128_v39  ;;  %v16088_v48 = vmov %v16083_v15  ;;  %v16090_v58 = vrot.slane %v12830_v1, 1  ;;  %v16091_v26 = vrot.slane %v12816_v7, 1 }
 0x6d8   : > { %7445 = vmatmul.mubr.msk.bf16.gmra.mrb[144].mxu1 %vm12819_vm0, %v13137_v22  ;;  %7669 = vmatmul.mubr.msk.bf16.gmra.mrb[144].mxu0 %vm12819_vm0, %v13137_v22  ;;  %v13596_v44 = vpack.c.bf16 %v16088_v48, %v4232_v40  ;;  %v3876_v39 = vsel %vm3748_vm4, %v16086_v24, %v3812_v30  ;;  %v16094_v40 = vld [vmem:[#allocation44_spill] sm:$0xff]  ;;  %v16097_v1 = vrot.slane %v12889_v2, 1 }
 0x6d9   : > { %v4238_v62 = vsel %vm1470_vm5, %v16091_v26, %v16090_v58  ;;  %5064 = vmatprep.mubr.bf16.mxu1 %v13153_v46  ;;  %5734 = vmatprep.mubr.bf16.mxu0 %v13153_v46  ;;  %v16092_v49 = vmov %v16090_v58  ;;  %v16095_v48 = vrot.slane %v16094_v40, 1  ;;  %v3877_v58 = vsel %vm3749_vm7, %v16087_v13, %v3813_v16 }
 0x6da   : > { %16089 = vst [vmem:[#allocation37_spill] sm:$0xff] %v13596_v44  ;;  %v13609_v15 = vpack.c.bf16 %v16092_v49, %v4238_v62  ;;  %v4131_v26 = vrot.slane %v3876_v39, 7  ;;  %v4323_v8 = vrot.slane %v3876_v39, 1  ;;  %v16096_v46 = vmov %v16093_v61  ;;  %v16098_v62 = vld [vmem:[#allocation18_spill] sm:$0xff] }
 0x6db   : > { %v4241_v7 = vsel %vm1470_vm5, %v16095_v48, %v16093_v61  ;;  %v4132_v22 = vrot.slane %v3877_v58, 7  ;;  %v4324_v24 = vrot.slane %v3877_v58, 1  ;;  %v13621_v30 = vpack.c.bf16 %v3877_v58, %v3876_v39 }
 0x6dc   : > { %v13619_v44 = vpack.c.bf16 %v16096_v46, %v4241_v7  ;;  %v16099_v49 = vrot.slane %v16098_v62, 1  ;;  %v16100_v61 = vmov %v16097_v1  ;;  %v16101_v13 = vrot.slane %v12923_v3, 1 }
 0x6dd   : > { %v16103_v7 = vrot.slane %v12954_v54, 1  ;;  %v16104_v39 = vrot.slane %v12951_v10, 1  ;;  %v16105_v46 = vrot.slane %v12973_v42, 1  ;;  %v4325_v62 = vsel %vm1470_vm5, %v4323_v8, %v4324_v24  ;;  %v16115_v54 = vld [vmem:[#allocation10_spill] sm:$0xff] }
 0x6de   : > { %v4244_v40 = vsel %vm1470_vm5, %v16099_v49, %v16097_v1  ;;  %v4247_v16 = vsel %vm1470_vm5, %v16102_v4, %v16101_v13  ;;  %v16106_v1 = vrot.slane %v12970_v37, 1  ;;  %v4133_v49 = vsel %vm1277_vm6, %v4131_v26, %v4132_v22  ;;  %vm13993_vm6 = vmpackc.low %vm1470_vm5, %vm8828_vm3 }
 0x6df   : > { %v13630_v48 = vpack.c.bf16 %v16100_v61, %v4244_v40  ;;  %v4250_v58 = vsel %vm1470_vm5, %v16104_v39, %v16103_v7  ;;  %v16107_v60 = vmov %v16101_v13  ;;  %v16108_v61 = vmov %v16103_v7  ;;  %v16110_v39 = vld [vmem:[#allocation31_spill] sm:$0xff] }
 0x6e0   : > { %v4253_v2 = vsel %vm1470_vm5, %v16106_v1, %v16105_v46  ;;  %v13651_v40 = vpack.c.bf16 %v16107_v60, %v4247_v16  ;;  %v13655_v13 = vpack.c.bf16 %v16108_v61, %v4250_v58  ;;  %v13657_v10 = vpack.c.bf16 %v4324_v24, %v4325_v62  ;;  %v16117_v24 = vld [vmem:[#allocation43_spill] sm:$0xff]  ;;  %7449 = vmatmul.mubr.msk.bf16.gmra.mrb[148].mxu1 %vm12819_vm0, %v13172_v29 }
 0x6e1   : > { %v13659_v4 = vpack.c.bf16 %v4133_v49, %v4131_v26  ;;  %v16109_v37 = vmov %v16105_v46  ;;  %v16111_v8 = vrot.slane %v16110_v39, 1  ;;  %v16112_v46 = vld [vmem:[#allocation8_spill] sm:$0xff]  ;;  %v16116_v58 = vrot.slane %v16115_v54, 1  ;;  %v16119_v49 = vld [vmem:[#allocation14_spill] sm:$0xff]  ;;  %7673 = vmatmul.mubr.msk.bf16.gmra.mrb[148].mxu0 %vm12819_vm0, %v13172_v29  ;;  %5074 = vmatprep.mubr.bf16.mxu1 %v13176_v28 }
 0x6e2   : > { %v13663_v7 = vpack.c.bf16 %v16109_v37, %v4253_v2  ;;  %v16113_v22 = vrot.slane %v16112_v46, 1  ;;  %v16118_v62 = vrot.slane %v16117_v24, 1  ;;  %v16120_v42 = vrot.slane %v16119_v49, 1  ;;  %v16121_v2 = vld [vmem:[#allocation41_spill] sm:$0xff]  ;;  %v16124_v46 = vld [vmem:[#allocation23_spill] sm:$0xff]  ;;  %5742 = vmatprep.mubr.bf16.mxu0 %v13176_v28 }
 0x6e3   : > { %v16114_v16 = vmov %v16111_v8  ;;  %v16122_v60 = vrot.slane %v16121_v2, 1  ;;  %v16123_v37 = vrot.slane %v13094_v23, 1  ;;  %v4321_v29 = vrot.slane %v13566_v56, 1 }
 0x6e4   : > { %v4256_v3 = vsel %vm1470_vm5, %v16113_v22, %v16111_v8  ;;  %v4259_v26 = vsel %vm1470_vm5, %v16118_v62, %v16116_v58  ;;  %v16125_v8 = vrot.slane %v16124_v46, 1  ;;  %v4320_v22 = vrot.slane %v13561_v59, 1 }
 0x6e5   : > { %v13672_v1 = vpack.c.bf16 %v16114_v16, %v4256_v3  ;;  %v4262_v61 = vsel %vm1470_vm5, %v16122_v60, %v16120_v42  ;;  %v16126_v3 = vmov %v16116_v58  ;;  %v16127_v58 = vmov %v16120_v42 }
 0x6e6   : > { %v4265_v39 = vsel %vm1470_vm5, %v16125_v8, %v16123_v37  ;;  %v13698_v16 = vpack.c.bf16 %v16126_v3, %v4259_v26  ;;  %v13702_v24 = vpack.c.bf16 %v16127_v58, %v4262_v61  ;;  %v16128_v62 = vmov %v16123_v37 }
 0x6e7   : > { %v13706_v42 = vpack.c.bf16 %v16128_v62, %v4265_v39  ;;  %v16129_v59 = vrot.slane %v13114_v17, 1  ;;  %v16130_v54 = vrot.slane %v13104_v25, 1  ;;  %v16131_v49 = vrot.slane %v13145_v51, 1 }
 0x6e8   : > { %v16132_v2 = vrot.slane %v13142_v43, 1  ;;  %v16133_v60 = vrot.slane %v13159_v14, 1  ;;  %v16134_v61 = vrot.slane %v13156_v12, 1  ;;  %v16138_v43 = vrot.slane %v13198_v20, 1 }
 0x6e9   : > { %v4268_v26 = vsel %vm1470_vm5, %v16130_v54, %v16129_v59  ;;  %v16135_v56 = vmov %v16129_v59  ;;  %v16136_v25 = vmov %v16131_v49  ;;  %v16139_v3 = vrot.slane %v13191_v27, 1 }
 0x6ea   : > { %v4271_v23 = vsel %vm1470_vm5, %v16132_v2, %v16131_v49  ;;  %v4274_v28 = vsel %vm1470_vm5, %v16134_v61, %v16133_v60  ;;  %v13728_v37 = vpack.c.bf16 %v16135_v56, %v4268_v26  ;;  %v16137_v8 = vmov %v16133_v60 }
 0x6eb   : > { %v13732_v46 = vpack.c.bf16 %v16136_v25, %v4271_v23  ;;  %v13736_v39 = vpack.c.bf16 %v16137_v8, %v4274_v28  ;;  %v4277_v12 = vsel %vm1470_vm5, %v16139_v3, %v16138_v43  ;;  %v16140_v58 = vmov %v16138_v43  ;;  %v16154_v43 = vld [vmem:[#allocation52_spill] sm:$0xff] }
 0x6ec   : > { %v13745_v62 = vpack.c.bf16 %v16140_v58, %v4277_v12  ;;  %v16141_v17 = vrot.slane %v13212_v55, 1  ;;  %v16142_v51 = vrot.slane %v13208_v35, 1  ;;  %v16143_v14 = vrot.slane %v13251_v21, 1 }
 0x6ed   : > { %v16144_v54 = vrot.slane %v13246_v36, 1  ;;  %v16145_v27 = vrot.slane %v13272_v50, 1  ;;  %v16146_v49 = vrot.slane %v13267_v52, 1  ;;  %v16150_v36 = vrot.slane %v13309_v34, 1 }
 0x6ee   : > { %v4280_v59 = vsel %vm1470_vm5, %v16142_v51, %v16141_v17  ;;  %v16147_v2 = vmov %v16141_v17  ;;  %v16148_v35 = vmov %v16143_v14  ;;  %v16151_v56 = vrot.slane %v13296_v53, 1 }
 0x6ef   : > { %v4283_v26 = vsel %vm1470_vm5, %v16144_v54, %v16143_v14  ;;  %v4286_v20 = vsel %vm1470_vm5, %v16146_v49, %v16145_v27  ;;  %v13764_v23 = vpack.c.bf16 %v16147_v2, %v4280_v59  ;;  %v16149_v61 = vmov %v16145_v27 }
 0x6f0   : > { %v13768_v60 = vpack.c.bf16 %v16148_v35, %v4283_v26  ;;  %v13772_v28 = vpack.c.bf16 %v16149_v61, %v4286_v20  ;;  %v4289_v52 = vsel %vm1470_vm5, %v16151_v56, %v16150_v36  ;;  %v16152_v25 = vmov %v16150_v36  ;;  %v16168_v61 = vld [vmem:[#allocation19_spill] sm:$0xff]  ;;  %v16170_v56 = vld [vmem:[#allocation20_spill] sm:$0xff] }
 0x6f1   : > { %v13781_v8 = vpack.c.bf16 %v16152_v25, %v4289_v52  ;;  %v16153_v55 = vrot.slane %v13335_v5, 1  ;;  %v16155_v21 = vrot.slane %v16154_v43, 1  ;;  %v16156_v50 = vrot.slane %v13379_v41, 1  ;;  %7453 = vmatmul.mubr.msk.bf16.gmra.mrb[152].mxu1 %vm12819_vm0, %v16168_v61  ;;  %7677 = vmatmul.mubr.msk.bf16.gmra.mrb[152].mxu0 %vm12819_vm0, %v16168_v61  ;;  %v16171_v52 = vld [vmem:[#allocation27_spill] sm:$0xff]  ;;  %v8533_v25 = vld [vmem:[%s15536_s4 + $0x230] ss:$12 sps:$4 sm:$0xff]  }
 0x6f2   : > { %v16157_v12 = vrot.slane %v13374_v47, 1  ;;  %v16158_v53 = vrot.slane %v13416_v11, 1  ;;  %v16159_v17 = vrot.slane %v13413_v18, 1  ;;  %v16163_v47 = vrot.slane %v13459_v19, 1  ;;  %v8530_v19 = vld [vmem:[%s15536_s4 + $0x1e8] ss:$12 sps:$4 sm:$0xff]   ;;  %5084 = vmatprep.mubr.bf16.mxu1 %v16170_v56  ;;  %5750 = vmatprep.mubr.bf16.mxu0 %v16170_v56 }
 0x6f3   : > { %v4292_v3 = vsel %vm1470_vm5, %v16155_v21, %v16153_v55  ;;  %v16160_v51 = vmov %v16153_v55  ;;  %v16161_v14 = vmov %v16156_v50  ;;  %v16164_v49 = vrot.slane %v13456_v45, 1  ;;  %8113 = vmatprep.subr.bf16.mxu0 %v8530_v19  ;;  %v16173_v55 = vld [vmem:[#allocation45_spill] sm:$0xff]  ;;  %v16175_v21 = vld [vmem:[#allocation42_spill] sm:$0xff]  ;;  %v16195_v56 = vld [vmem:[#allocation36_spill] sm:$0xff] }
 0x6f4   : > { %v4298_v58 = vsel %vm1470_vm5, %v16157_v12, %v16156_v50  ;;  %v4304_v34 = vsel %vm1470_vm5, %v16159_v17, %v16158_v53  ;;  %v13800_v59 = vpack.c.bf16 %v16160_v51, %v4292_v3  ;;  %v16162_v26 = vmov %v16158_v53  ;;  %8114 = vmatpush3.bf16.msra.mxu0 %v8530_v19  ;;  %v16174_v43 = vld [vmem:[#allocation49_spill] sm:$0xff]  ;;  %v16176_v3 = vld [vmem:[#allocation40_spill] sm:$0xff]  ;;  %v16177_v50 = vld [vmem:[#allocation50_spill] sm:$0xff] }
 0x6f5   : > { %v13804_v54 = vpack.c.bf16 %v16161_v14, %v4298_v58  ;;  %v13808_v27 = vpack.c.bf16 %v16162_v26, %v4304_v34  ;;  %v4310_v18 = vsel %vm1470_vm5, %v16164_v49, %v16163_v47  ;;  %v16165_v20 = vmov %v16163_v47  ;;  %v16178_v12 = vld [vmem:[#allocation53_spill] sm:$0xff]  ;;  %v16180_v53 = vld [vmem:[#allocation55_spill] sm:$0xff]  ;;  %v16181_v17 = vld [vmem:[#allocation24_spill] sm:$0xff] }
 0x6f6   : > { %v13817_v2 = vpack.c.bf16 %v16165_v20, %v4310_v18  ;;  %v16166_v5 = vrot.slane %v13505_v63, 1  ;;  %v16167_v41 = vrot.slane %v13502_v33, 1  ;;  %v4322_v11 = vsel %vm1470_vm5, %v4320_v22, %v4321_v29  ;;  %v8531_v22 = vld [vmem:[%s15536_s4 + $0x200] ss:$12 sps:$4 sm:$0xff]   ;;  %v8532_v63 = vld [vmem:[%s15536_s4 + $0x218] ss:$12 sps:$4 sm:$0xff]  }
 0x6f7   : > { %v13838_v33 = vpack.c.bf16 %v4321_v29, %v4322_v11  ;;  %8115 = vmatprep.subr.bf16.mxu0 %v8531_v22  ;;  %v16172_v29 = vld [vmem:[#allocation29_spill] sm:$0xff]  ;;  %v16182_v34 = vld [vmem:[#allocation28_spill] sm:$0xff]  ;;  %v16183_v51 = vld [vmem:[#allocation30_spill] sm:$0xff] }
 0x6f8   : > { %v4316_v35 = vsel %vm1470_vm5, %v16167_v41, %v16166_v5  ;;  %v16169_v45 = vmov %v16166_v5  ;;  %8116 = vmatpush3.bf16.msra.mxu0 %v8531_v22  ;;  %v16179_v58 = vld [vmem:[#allocation57_spill] sm:$0xff]  ;;  %v16184_v14 = vld [vmem:[#allocation34_spill] sm:$0xff]  ;;  %v16187_v49 = vld [vmem:[#allocation35_spill] sm:$0xff] }
 0x6f9   : > { %v13836_v36 = vpack.c.bf16 %v16169_v45, %v4316_v35  ;;  %7457 = vmatmul.mubr.msk.bf16.gmra.mrb[156].mxu1 %vm12819_vm0, %v16171_v52  ;;  %7681 = vmatmul.mubr.msk.bf16.gmra.mrb[156].mxu0 %vm12819_vm0, %v16171_v52  ;;  %v16185_v26 = vld [vmem:[#allocation33_spill] sm:$0xff]  ;;  %v16186_v47 = vld [vmem:[#allocation38_spill] sm:$0xff]  ;;  %v16192_v5 = vld [vmem:[#allocation4_spill] sm:$0xff] }
 0x6fa   : > { %5092 = vmatprep.mubr.bf16.mxu1 %v16172_v29  ;;  %5758 = vmatprep.mubr.bf16.mxu0 %v16172_v29  ;;  %v16189_v18 = vld [vmem:[#allocation54_spill] sm:$0xff]  ;;  %v16191_v20 = vld [vmem:[#allocation25_spill] sm:$0xff] }
 0x6fb   : > { %8117 = vmatprep.subr.bf16.mxu0 %v8532_v63  ;;  %v16193_v19 = vld [vmem:[#allocation26_spill] sm:$0xff]  ;;  %v16194_v45 = vld [vmem:[#allocation9_spill] sm:$0xff] }
 0x6fc   : > { %8118 = vmatpush3.bf16.msra.mxu0 %v8532_v63 }
 0x6fd   : > { %8119 = vmatprep.subr.bf16.mxu0 %v8533_v25 }
 0x700   : > { %8120 = vmatpush3.bf16.msra.mxu0 %v8533_v25 }
 0x701   : > { %7461 = vmatmul.mubr.msk.bf16.gmra.mrb[160].mxu1 %vm12819_vm0, %v16173_v55  ;;  %7685 = vmatmul.mubr.msk.bf16.gmra.mrb[160].mxu0 %vm12819_vm0, %v16173_v55 }
 0x702   : > { %5102 = vmatprep.mubr.bf16.mxu1 %v16174_v43  ;;  %5764 = vmatprep.mubr.bf16.mxu0 %v16174_v43 }
 0x709   : > { %7465 = vmatmul.mubr.msk.bf16.gmra.mrb[164].mxu1 %vm12819_vm0, %v16175_v21  ;;  %7689 = vmatmul.mubr.msk.bf16.gmra.mrb[164].mxu0 %vm12819_vm0, %v16175_v21 }
 0x70a   : > { %5112 = vmatprep.mubr.bf16.mxu1 %v16176_v3  ;;  %5772 = vmatprep.mubr.bf16.mxu0 %v16176_v3 }
 0x711   : > { %7469 = vmatmul.mubr.msk.bf16.gmra.mrb[168].mxu1 %vm12819_vm0, %v16177_v50  ;;  %7693 = vmatmul.mubr.msk.bf16.gmra.mrb[168].mxu0 %vm12819_vm0, %v16177_v50 }
 0x712   : > { %5122 = vmatprep.mubr.bf16.mxu1 %v16178_v12  ;;  %5780 = vmatprep.mubr.bf16.mxu0 %v16178_v12 }
 0x719   : > { %7473 = vmatmul.mubr.msk.bf16.gmra.mrb[172].mxu1 %vm12819_vm0, %v16179_v58  ;;  %7697 = vmatmul.mubr.msk.bf16.gmra.mrb[172].mxu0 %vm12819_vm0, %v16179_v58 }
 0x71a   : > { %5132 = vmatprep.mubr.bf16.mxu1 %v16180_v53  ;;  %5788 = vmatprep.mubr.bf16.mxu0 %v16180_v53 }
 0x721   : > { %7477 = vmatmul.mubr.msk.bf16.gmra.mrb[176].mxu1 %vm12819_vm0, %v16181_v17  ;;  %7701 = vmatmul.mubr.msk.bf16.gmra.mrb[176].mxu0 %vm12819_vm0, %v16181_v17 }
 0x722   : > { %5142 = vmatprep.mubr.bf16.mxu1 %v16182_v34  ;;  %5796 = vmatprep.mubr.bf16.mxu0 %v16182_v34  ;;  %v16200_v34 = vld [vmem:[#allocation16_spill] sm:$0xff] }
 0x729   : > { %7481 = vmatmul.mubr.msk.bf16.gmra.mrb[180].mxu1 %vm12819_vm0, %v16183_v51  ;;  %7705 = vmatmul.mubr.msk.bf16.gmra.mrb[180].mxu0 %vm12819_vm0, %v16183_v51 }
 0x72a   : > { %5152 = vmatprep.mubr.bf16.mxu1 %v16184_v14  ;;  %5804 = vmatprep.mubr.bf16.mxu0 %v16184_v14 }
 0x731   : > { %7485 = vmatmul.mubr.msk.bf16.gmra.mrb[184].mxu1 %vm12819_vm0, %v16185_v26  ;;  %7709 = vmatmul.mubr.msk.bf16.gmra.mrb[184].mxu0 %vm12819_vm0, %v16185_v26 }
 0x732   : > { %5162 = vmatprep.mubr.bf16.mxu1 %v13410_v9  ;;  %5812 = vmatprep.mubr.bf16.mxu0 %v13410_v9  ;;  %v16188_v9 = vld [vmem:[#allocation46_spill] sm:$0xff] }
 0x739   : > { %7489 = vmatmul.mubr.msk.bf16.gmra.mrb[188].mxu1 %vm12819_vm0, %v13432_v32  ;;  %7713 = vmatmul.mubr.msk.bf16.gmra.mrb[188].mxu0 %vm12819_vm0, %v13432_v32  ;;  %v16190_v32 = vld [vmem:[#allocation56_spill] sm:$0xff] }
 0x73a   : > { %5172 = vmatprep.mubr.bf16.mxu1 %v16186_v47  ;;  %5820 = vmatprep.mubr.bf16.mxu0 %v16186_v47 }
 0x741   : > { %7493 = vmatmul.mubr.msk.bf16.gmra.mrb[192].mxu1 %vm12819_vm0, %v16187_v49  ;;  %7717 = vmatmul.mubr.msk.bf16.gmra.mrb[192].mxu0 %vm12819_vm0, %v16187_v49 }
 0x742   : > { %5182 = vmatprep.mubr.bf16.mxu1 %v16188_v9  ;;  %5828 = vmatprep.mubr.bf16.mxu0 %v16188_v9 }
 0x749   : > { %7497 = vmatmul.mubr.msk.bf16.gmra.mrb[196].mxu1 %vm12819_vm0, %v16189_v18  ;;  %7721 = vmatmul.mubr.msk.bf16.gmra.mrb[196].mxu0 %vm12819_vm0, %v16189_v18 }
 0x74a   : > { %5192 = vmatprep.mubr.bf16.mxu1 %v16190_v32  ;;  %5836 = vmatprep.mubr.bf16.mxu0 %v16190_v32 }
 0x74b   : > { %v5634_v41 = vpop.f32.mrb[96].mxu0 }
 0x74c   : > { %v5635_v35 = vpop.f32.mrb[97].mxu0 }
 0x74d   : > { %v5636_v11 = vpop.f32.mrb[98].mxu0 }
 0x74e   : > { %v5637_v61 = vpop.f32.mrb[99].mxu0 }
 0x751   : > { %7501 = vmatmul.mubr.msk.bf16.gmra.mrb[200].mxu1 %vm12819_vm0, %v16191_v20  ;;  %7725 = vmatmul.mubr.msk.bf16.gmra.mrb[200].mxu0 %vm12819_vm0, %v16191_v20 }
 0x752   : > { %5202 = vmatprep.mubr.bf16.mxu1 %v16192_v5  ;;  %5844 = vmatprep.mubr.bf16.mxu0 %v16192_v5 }
 0x759   : > { %7505 = vmatmul.mubr.msk.bf16.gmra.mrb[204].mxu1 %vm12819_vm0, %v16193_v19  ;;  %7729 = vmatmul.mubr.msk.bf16.gmra.mrb[204].mxu0 %vm12819_vm0, %v16193_v19 }
 0x75a   : > { %5212 = vmatprep.mubr.bf16.mxu1 %v16194_v45  ;;  %5852 = vmatprep.mubr.bf16.mxu0 %v16194_v45 }
 0x75b   : > { %v13963_v22 = vpop.f32.mrb[104].mxu0 }
 0x75c   : > { %v5650_v52 = vpop.f32.mrb[105].mxu0 }
 0x75d   : > { %v13965_v63 = vpop.f32.mrb[106].mxu0 }
 0x75e   : > { %v5653_v29 = vpop.f32.mrb[107].mxu0 }
 0x761   : > { %7509 = vmatmul.mubr.msk.bf16.gmra.mrb[208].mxu1 %vm12819_vm0, %v16195_v56  ;;  %7733 = vmatmul.mubr.msk.bf16.gmra.mrb[208].mxu0 %vm12819_vm0, %v16195_v56 }
 0x762   : > { %5222 = vmatprep.mubr.bf16.mxu1 %v13556_v31  ;;  %5860 = vmatprep.mubr.bf16.mxu0 %v13556_v31 }
 0x763   : > { %v13975_v25 = vpop.f32.mrb[108].mxu0 }
 0x764   : > { %v5658_v31 = vpop.f32.mrb[109].mxu0 }
 0x765   : > { %v13977_v55 = vpop.f32.mrb[110].mxu0 }
 0x766   : > { %v5661_v43 = vpop.f32.mrb[111].mxu0 }
 0x769   : > { %7513 = vmatmul.mubr.msk.bf16.gmra.mrb[212].mxu1 %vm12819_vm0, %v13575_v38  ;;  %7737 = vmatmul.mubr.msk.bf16.gmra.mrb[212].mxu0 %vm12819_vm0, %v13575_v38 }
 0x76a   : > { %5232 = vmatprep.mubr.bf16.mxu1 %v13580_v6  ;;  %5868 = vmatprep.mubr.bf16.mxu0 %v13580_v6 }
 0x76b   : > { %v13987_v38 = vpop.f32.mrb[112].mxu0 }
 0x76c   : > { %v5666_v6 = vpop.f32.mrb[113].mxu0 }
 0x76d   : > { %v13989_v21 = vpop.f32.mrb[114].mxu0 }
 0x76e   : > { %v5669_v50 = vpop.f32.mrb[115].mxu0 }
 0x771   : > { %7517 = vmatmul.mubr.msk.bf16.gmra.mrb[216].mxu1 %vm12819_vm0, %v13591_v0  ;;  %7741 = vmatmul.mubr.msk.bf16.gmra.mrb[216].mxu0 %vm12819_vm0, %v13591_v0  ;;  %v16198_v0 = vld [vmem:[#allocation37_spill] sm:$0xff] }
 0x772   : > { %5242 = vmatprep.mubr.bf16.mxu1 %v13621_v30  ;;  %5876 = vmatprep.mubr.bf16.mxu0 %v13621_v30  ;;  %v16199_v30 = vmov 0  }
 0x773   : > { %v14007_v12 = vpop.f32.mrb[116].mxu0 }
 0x774   : > { %v5674_v58 = vpop.f32.mrb[117].mxu0 }
 0x775   : > { %v14009_v53 = vpop.f32.mrb[118].mxu0 }
 0x776   : > { %v5677_v17 = vpop.f32.mrb[119].mxu0 }
 0x779   : > { %7521 = vmatmul.mubr.msk.bf16.gmra.mrb[220].mxu1 %vm12819_vm0, %v13659_v4  ;;  %7745 = vmatmul.mubr.msk.bf16.gmra.mrb[220].mxu0 %vm12819_vm0, %v13659_v4 }
 0x77a   : > { %8121 = vmatprep.mubr.msk.bf16.mxu0 %vm13993_vm6, %v16198_v0  ;;  %5283 = vmatprep.mubr.bf16.mxu1 %v16199_v30 }
 0x77b   : > { %v14021_v57 = vpop.f32.mrb[120].mxu0 }
 0x77c   : > { %v5682_v4 = vpop.f32.mrb[121].mxu0 }
 0x77d   : > { %v14023_v51 = vpop.f32.mrb[122].mxu0 }
 0x77e   : > { %v5685_v14 = vpop.f32.mrb[123].mxu0 }
 0x781   : > { %7524 = vmatmul.mubr.msk.bf16.vlgmr.msra.gmra.mrb[96].mxu1 %vm13993_vm6, %v16198_v0  ;;  %8122 = vmatmul.mubr.msk.bf16.vlgmr.msra.gmra.mrb[100].mxu0 %vm13993_vm6, %v16200_v34 }
 0x782   : > { %8125 = vmatprep.mubr.msk.bf16.mxu0 %vm13993_vm6, %v13609_v15  ;;  %5293 = vmatprep.mubr.bf16.mxu1 %v16199_v30 }
 0x783   : > { %v14035_v26 = vpop.f32.mrb[124].mxu0 }
 0x784   : > { %v5690_v47 = vpop.f32.mrb[125].mxu0 }
 0x785   : > { %v14037_v49 = vpop.f32.mrb[126].mxu0 }
 0x786   : > { %v5693_v9 = vpop.f32.mrb[127].mxu0 }
 0x789   : > { %7527 = vmatmul.mubr.msk.bf16.gmra.mrb[100].mxu1 %vm13993_vm6, %v16200_v34  ;;  %8126 = vmatmul.mubr.msk.bf16.gmra.mrb[224].mxu0 %vm13993_vm6, %v13619_v44 }
 0x78a   : > { %8129 = vmatprep.mubr.msk.bf16.mxu0 %vm13993_vm6, %v13630_v48  ;;  %5303 = vmatprep.mubr.bf16.mxu1 %v16199_v30 }
 0x78b   : > { %v14049_v18 = vpop.f32.mrb[128].mxu0 }
 0x78c   : > { %v5698_v32 = vpop.f32.mrb[129].mxu0 }
 0x78d   : > { %v14051_v20 = vpop.f32.mrb[130].mxu0 }
 0x78e   : > { %v5701_v5 = vpop.f32.mrb[131].mxu0 }
 0x791   : > { %7530 = vmatmul.mubr.msk.bf16.gmra.mrb[104].mxu1 %vm13993_vm6, %v13609_v15  ;;  %8130 = vmatmul.mubr.msk.bf16.gmra.mrb[228].mxu0 %vm13993_vm6, %v13651_v40 }
 0x792   : > { %8133 = vmatprep.mubr.msk.bf16.mxu0 %vm13993_vm6, %v13655_v13  ;;  %5313 = vmatprep.mubr.bf16.mxu1 %v16199_v30 }
 0x793   : > { %v14063_v15 = vpop.f32.mrb[132].mxu0 }
 0x794   : > { %v5706_v41 = vpop.f32.mrb[133].mxu0 }
 0x795   : > { %v14065_v35 = vpop.f32.mrb[134].mxu0 }
 0x796   : > { %v5709_v11 = vpop.f32.mrb[135].mxu0 }
 0x799   : > { %7533 = vmatmul.mubr.msk.bf16.gmra.mrb[108].mxu1 %vm13993_vm6, %v13619_v44  ;;  %8134 = vmatmul.mubr.msk.bf16.gmra.mrb[232].mxu0 %vm13993_vm6, %v13663_v7 }
 0x79a   : > { %8137 = vmatprep.mubr.msk.bf16.mxu0 %vm13993_vm6, %v13672_v1  ;;  %5323 = vmatprep.mubr.bf16.mxu1 %v16199_v30 }
 0x79b   : > { %v14077_v44 = vpop.f32.mrb[136].mxu0 }
 0x79c   : > { %v5714_v61 = vpop.f32.mrb[137].mxu0 }
 0x79d   : > { %v14079_v19 = vpop.f32.mrb[138].mxu0  ;;  %v16202_v61 = vld [vmem:[#allocation32_spill] sm:$0xff] }
 0x79e   : > { %v5717_v45 = vpop.f32.mrb[139].mxu0 }
 0x7a1   : > { %7536 = vmatmul.mubr.msk.bf16.gmra.mrb[112].mxu1 %vm13993_vm6, %v13630_v48  ;;  %8138 = vmatmul.mubr.msk.bf16.gmra.mrb[236].mxu0 %vm13993_vm6, %v13698_v16 }
 0x7a2   : > { %8141 = vmatprep.mubr.msk.bf16.mxu0 %vm13993_vm6, %v13702_v24  ;;  %5333 = vmatprep.mubr.bf16.mxu1 %v16199_v30 }
 0x7a3   : > { %v14091_v48 = vpop.f32.mrb[140].mxu0 }
 0x7a4   : > { %v5722_v56 = vpop.f32.mrb[141].mxu0 }
 0x7a5   : > { %v14093_v52 = vpop.f32.mrb[142].mxu0 }
 0x7a6   : > { %v5725_v29 = vpop.f32.mrb[143].mxu0 }
 0x7a9   : > { %7539 = vmatmul.mubr.msk.bf16.gmra.mrb[116].mxu1 %vm13993_vm6, %v13651_v40  ;;  %8142 = vmatmul.mubr.msk.bf16.gmra.mrb[240].mxu0 %vm13993_vm6, %v13706_v42 }
 0x7aa   : > { %8145 = vmatprep.mubr.msk.bf16.mxu0 %vm13993_vm6, %v13728_v37  ;;  %5343 = vmatprep.mubr.bf16.mxu1 %v16199_v30 }
 0x7ab   : > { %v14105_v40 = vpop.f32.mrb[144].mxu0 }
 0x7ac   : > { %v5730_v31 = vpop.f32.mrb[145].mxu0 }
 0x7ad   : > { %v14107_v43 = vpop.f32.mrb[146].mxu0 }
 0x7ae   : > { %v5733_v6 = vpop.f32.mrb[147].mxu0 }
 0x7b1   : > { %7542 = vmatmul.mubr.msk.bf16.gmra.mrb[120].mxu1 %vm13993_vm6, %v13655_v13  ;;  %8146 = vmatmul.mubr.msk.bf16.gmra.mrb[244].mxu0 %vm13993_vm6, %v13732_v46 }
 0x7b2   : > { %8149 = vmatprep.mubr.msk.bf16.mxu0 %vm13993_vm6, %v13736_v39  ;;  %5353 = vmatprep.mubr.bf16.mxu1 %v16199_v30 }
 0x7b4   : > { %v14119_v13 = vpop.f32.mrb[148].mxu0 }
 0x7b5   : > { %v5738_v50 = vpop.f32.mrb[149].mxu0 }
 0x7b6   : > { %v14121_v0 = vpop.f32.mrb[150].mxu0 }
 0x7b7   : > { %v5741_v58 = vpop.f32.mrb[151].mxu0 }
 0x7b9   : > { %7545 = vmatmul.mubr.msk.bf16.gmra.mrb[124].mxu1 %vm13993_vm6, %v13663_v7  ;;  %8150 = vmatmul.mubr.msk.bf16.gmra.mrb[248].mxu0 %vm13993_vm6, %v13745_v62 }
 0x7ba   : > { %8153 = vmatprep.mubr.msk.bf16.mxu0 %vm13993_vm6, %v13764_v23  ;;  %5363 = vmatprep.mubr.bf16.mxu1 %v16199_v30 }
 0x7c1   : > { %7548 = vmatmul.mubr.msk.bf16.gmra.mrb[128].mxu1 %vm13993_vm6, %v13672_v1  ;;  %8154 = vmatmul.mubr.msk.bf16.gmra.mrb[164].mxu0 %vm13993_vm6, %v13768_v60 }
 0x7c2   : > { %8157 = vmatprep.mubr.msk.bf16.mxu0 %vm13993_vm6, %v13772_v28  ;;  %5373 = vmatprep.mubr.bf16.mxu1 %v16199_v30 }
 0x7c4   : > { %v14133_v7 = vpop.f32.mrb[152].mxu0 }
 0x7c5   : > { %v5746_v17 = vpop.f32.mrb[153].mxu0 }
 0x7c6   : > { %v14135_v34 = vpop.f32.mrb[154].mxu0 }
 0x7c7   : > { %v5749_v4 = vpop.f32.mrb[155].mxu0 }
 0x7c9   : > { %7551 = vmatmul.mubr.msk.bf16.gmra.mrb[132].mxu1 %vm13993_vm6, %v13698_v16  ;;  %8158 = vmatmul.mubr.msk.bf16.gmra.mrb[252].mxu0 %vm13993_vm6, %v13781_v8  ;;  %v16201_v16 = vld [vmem:[#allocation2_spill] sm:$0xff] }
 0x7ca   : > { %8161 = vmatprep.mubr.msk.bf16.mxu0 %vm13993_vm6, %v13800_v59  ;;  %5383 = vmatprep.mubr.bf16.mxu1 %v16199_v30 }
 0x7cc   : > { %v14147_v1 = vpop.f32.mrb[156].mxu0 }
 0x7cd   : > { %v5754_v14 = vpop.f32.mrb[157].mxu0 }
 0x7ce   : > { %v14149_v47 = vpop.f32.mrb[158].mxu0 }
 0x7cf   : > { %v5757_v9 = vpop.f32.mrb[159].mxu0 }
 0x7d1   : > { %7554 = vmatmul.mubr.msk.bf16.gmra.mrb[136].mxu1 %vm13993_vm6, %v13702_v24  ;;  %8162 = vmatmul.mubr.msk.bf16.gmra.mrb[0].mxu0 %vm13993_vm6, %v16201_v16  ;;  %v16203_v24 = vld [vmem:[#allocation47_spill] sm:$0xff] }
 0x7d2   : > { %8165 = vmatprep.mubr.msk.bf16.mxu0 %vm13993_vm6, %v13804_v54  ;;  %5393 = vmatprep.mubr.bf16.mxu1 %v16199_v30 }
 0x7d4   : > { %v5760_v32 = vpop.f32.mrb[160].mxu0 }
 0x7d5   : > { %v5761_v5 = vpop.f32.mrb[161].mxu0 }
 0x7d6   : > { %v5762_v41 = vpop.f32.mrb[162].mxu0 }
 0x7d7   : > { %v5763_v11 = vpop.f32.mrb[163].mxu0 }
 0x7d9   : > { %7557 = vmatmul.mubr.msk.bf16.gmra.mrb[140].mxu1 %vm13993_vm6, %v13706_v42  ;;  %8166 = vmatmul.mubr.msk.bf16.gmra.mrb[4].mxu0 %vm13993_vm6, %v16202_v61 }
 0x7da   : > { %8169 = vmatprep.mubr.msk.bf16.mxu0 %vm13993_vm6, %v13808_v27  ;;  %5403 = vmatprep.mubr.bf16.mxu1 %v16199_v30 }
 0x7e1   : > { %7560 = vmatmul.mubr.msk.bf16.gmra.mrb[144].mxu1 %vm13993_vm6, %v13728_v37  ;;  %8170 = vmatmul.mubr.msk.bf16.gmra.mrb[8].mxu0 %vm13993_vm6, %v16203_v24  ;;  %v16204_v37 = vld [vmem:[#allocation21_spill] sm:$0xff] }
 0x7e2   : > { %8173 = vmatprep.mubr.msk.bf16.mxu0 %vm13993_vm6, %v13817_v2  ;;  %5413 = vmatprep.mubr.bf16.mxu1 %v16199_v30 }
 0x7e4   : > { %v14181_v42 = vpop.f32.mrb[168].mxu0 }
 0x7e5   : > { %v5776_v45 = vpop.f32.mrb[169].mxu0 }
 0x7e6   : > { %v14183_v56 = vpop.f32.mrb[170].mxu0 }
 0x7e7   : > { %v5779_v29 = vpop.f32.mrb[171].mxu0 }
 0x7e9   : > { %7563 = vmatmul.mubr.msk.bf16.gmra.mrb[148].mxu1 %vm13993_vm6, %v13732_v46  ;;  %8174 = vmatmul.mubr.msk.bf16.gmra.mrb[12].mxu0 %vm13993_vm6, %v16204_v37  ;;  %v16205_v46 = vld [vmem:[#allocation13_spill] sm:$0xff] }
 0x7ea   : > { %8177 = vmatprep.mubr.msk.bf16.mxu0 %vm13993_vm6, %v13836_v36  ;;  %5423 = vmatprep.mubr.bf16.mxu1 %v16199_v30 }
 0x7ec   : > { %v14195_v31 = vpop.f32.mrb[172].mxu0 }
 0x7ed   : > { %v5784_v6 = vpop.f32.mrb[173].mxu0 }
 0x7ee   : > { %v14197_v50 = vpop.f32.mrb[174].mxu0 }
 0x7ef   : > { %v5787_v58 = vpop.f32.mrb[175].mxu0 }
 0x7f1   : > { %7566 = vmatmul.mubr.msk.bf16.gmra.mrb[152].mxu1 %vm13993_vm6, %v13736_v39  ;;  %8178 = vmatmul.mubr.msk.bf16.gmra.mrb[16].mxu0 %vm13993_vm6, %v16205_v46 }
 0x7f2   : > { %8181 = vmatprep.mubr.msk.bf16.mxu0 %vm13993_vm6, %v13838_v33  ;;  %5433 = vmatprep.mubr.bf16.mxu1 %v16199_v30 }
 0x7f4   : > { %v14209_v17 = vpop.f32.mrb[176].mxu0 }
 0x7f5   : > { %v5792_v4 = vpop.f32.mrb[177].mxu0 }
 0x7f6   : > { %v14211_v14 = vpop.f32.mrb[178].mxu0 }
 0x7f7   : > { %v5795_v9 = vpop.f32.mrb[179].mxu0 }
 0x7f9   : > { %7569 = vmatmul.mubr.msk.bf16.gmra.mrb[156].mxu1 %vm13993_vm6, %v13745_v62  ;;  %8182 = vmatmul.mubr.msk.bf16.gmra.mrb[20].mxu0 %vm13993_vm6, %v13657_v10 }
 0x7fa   : > { %5441 = vmatprep.mubr.bf16.mxu1 %v16199_v30 }
 0x7fc   : > { %v14220_v39 = vpop.f32.mrb[180].mxu0 }
 0x7fd   : > { %v5800_v32 = vpop.f32.mrb[181].mxu0 }
 0x7fe   : > { %v14222_v5 = vpop.f32.mrb[182].mxu0 }
 0x7ff   : > { %v5803_v41 = vpop.f32.mrb[183].mxu0 }
 0x801   : > { %7572 = vmatmul.mubr.msk.bf16.gmra.mrb[160].mxu1 %vm13993_vm6, %v13764_v23 }
 0x802   : > { %5451 = vmatprep.mubr.bf16.mxu1 %v16199_v30 }
 0x804   : > { %v14228_v11 = vpop.f32.mrb[184].mxu0 }
 0x805   : > { %v5808_v62 = vpop.f32.mrb[185].mxu0 }
 0x806   : > { %v14230_v45 = vpop.f32.mrb[186].mxu0 }
 0x807   : > { %16206 = vst [vmem:[#allocation17_spill] sm:$0xff] %v14230_v45  ;;  %v5811_v29 = vpop.f32.mrb[187].mxu0 }
 0x809   : > { %7575 = vmatmul.mubr.msk.bf16.gmra.mrb[164].mxu1 %vm13993_vm6, %v13768_v60 }
 0x80a   : > { %5461 = vmatprep.mubr.bf16.mxu1 %v16199_v30 }
 0x80c   : > { %v14236_v6 = vpop.f32.mrb[188].mxu0 }
 0x80d   : > { %v5816_v58 = vpop.f32.mrb[189].mxu0 }
 0x80e   : > { %v14238_v4 = vpop.f32.mrb[190].mxu0 }
 0x80f   : > { %v5819_v23 = vpop.f32.mrb[191].mxu0 }
 0x811   : > { %7578 = vmatmul.mubr.msk.bf16.gmra.mrb[168].mxu1 %vm13993_vm6, %v13772_v28 }
 0x812   : > { %5471 = vmatprep.mubr.bf16.mxu1 %v16199_v30 }
 0x814   : > { %v14244_v9 = vpop.f32.mrb[192].mxu0 }
 0x815   : > { %16207 = vst [vmem:[#allocation39_spill] sm:$0xff] %v14244_v9  ;;  %v5824_v32 = vpop.f32.mrb[193].mxu0 }
 0x816   : > { %v14246_v41 = vpop.f32.mrb[194].mxu0 }
 0x817   : > { %16208 = vst [vmem:[#allocation59_spill] sm:$0xff] %v14246_v41  ;;  %v5827_v60 = vpop.f32.mrb[195].mxu0 }
 0x819   : > { %7581 = vmatmul.mubr.msk.bf16.gmra.mrb[172].mxu1 %vm13993_vm6, %v13781_v8 }
 0x81a   : > { %5481 = vmatprep.mubr.bf16.mxu1 %v16199_v30 }
 0x81c   : > { %v14252_v62 = vpop.f32.mrb[196].mxu0 }
 0x81d   : > { %16209 = vst [vmem:[#allocation58_spill] sm:$0xff] %v14252_v62  ;;  %v5832_v29 = vpop.f32.mrb[197].mxu0 }
 0x81e   : > { %v14254_v58 = vpop.f32.mrb[198].mxu0 }
 0x81f   : > { %16210 = vst [vmem:[#allocation3_spill] sm:$0xff] %v14254_v58  ;;  %v5835_v28 = vpop.f32.mrb[199].mxu0 }
 0x821   : > { %7584 = vmatmul.mubr.msk.bf16.gmra.mrb[176].mxu1 %vm13993_vm6, %v13800_v59 }
 0x822   : > { %5491 = vmatprep.mubr.bf16.mxu1 %v16199_v30 }
 0x824   : > { %v14260_v23 = vpop.f32.mrb[200].mxu0 }
 0x825   : > { %16211 = vst [vmem:[#allocation60_spill] sm:$0xff] %v14260_v23  ;;  %v5840_v32 = vpop.f32.mrb[201].mxu0 }
 0x826   : > { %v14262_v60 = vpop.f32.mrb[202].mxu0 }
 0x827   : > { %16212 = vst [vmem:[#allocation22_spill] sm:$0xff] %v14262_v60  ;;  %v5843_v8 = vpop.f32.mrb[203].mxu0 }
 0x829   : > { %7587 = vmatmul.mubr.msk.bf16.gmra.mrb[180].mxu1 %vm13993_vm6, %v16201_v16 }
 0x82a   : > { %5501 = vmatprep.mubr.bf16.mxu1 %v16199_v30 }
 0x82c   : > { %v14268_v29 = vpop.f32.mrb[204].mxu0 }
 0x82d   : > { %16213 = vst [vmem:[#allocation5_spill] sm:$0xff] %v14268_v29  ;;  %v5848_v28 = vpop.f32.mrb[205].mxu0 }
 0x82e   : > { %v14270_v41 = vpop.f32.mrb[206].mxu0 }
 0x82f   : > { %16214 = vst [vmem:[#allocation7_spill] sm:$0xff] %v14270_v41  ;;  %v5851_v59 = vpop.f32.mrb[207].mxu0 }
 0x831   : > { %7590 = vmatmul.mubr.msk.bf16.gmra.mrb[184].mxu1 %vm13993_vm6, %v13804_v54 }
 0x832   : > { %5511 = vmatprep.mubr.bf16.mxu1 %v16199_v30 }
 0x834   : > { %v14276_v32 = vpop.f32.mrb[208].mxu0 }
 0x835   : > { %16215 = vst [vmem:[#allocation6_spill] sm:$0xff] %v14276_v32  ;;  %v5856_v8 = vpop.f32.mrb[209].mxu0 }
 0x836   : > { %v14278_v60 = vpop.f32.mrb[210].mxu0 }
 0x837   : > { %16216 = vst [vmem:[#allocation51_spill] sm:$0xff] %v14278_v60  ;;  %v5859_v16 = vpop.f32.mrb[211].mxu0 }
 0x839   : > { %7593 = vmatmul.mubr.msk.bf16.gmra.mrb[188].mxu1 %vm13993_vm6, %v16202_v61 }
 0x83a   : > { %5521 = vmatprep.mubr.bf16.mxu1 %v16199_v30 }
 0x83c   : > { %v14284_v28 = vpop.f32.mrb[212].mxu0 }
 0x83d   : > { %16217 = vst [vmem:[#allocation11_spill] sm:$0xff] %v14284_v28  ;;  %v5864_v59 = vpop.f32.mrb[213].mxu0 }
 0x83e   : > { %v14286_v41 = vpop.f32.mrb[214].mxu0 }
 0x83f   : > { %16218 = vst [vmem:[#allocation12_spill] sm:$0xff] %v14286_v41  ;;  %v5867_v54 = vpop.f32.mrb[215].mxu0 }
 0x841   : > { %7596 = vmatmul.mubr.msk.bf16.gmra.mrb[192].mxu1 %vm13993_vm6, %v13808_v27 }
 0x842   : > { %5531 = vmatprep.mubr.bf16.mxu1 %v16199_v30 }
 0x844   : > { %v14292_v8 = vpop.f32.mrb[216].mxu0 }
 0x845   : > { %16219 = vst [vmem:[#allocation15_spill] sm:$0xff] %v14292_v8  ;;  %v5872_v16 = vpop.f32.mrb[217].mxu0 }
 0x846   : > { %v14294_v60 = vpop.f32.mrb[218].mxu0 }
 0x847   : > { %16220 = vst [vmem:[#allocation44_spill] sm:$0xff] %v14294_v60  ;;  %v5875_v61 = vpop.f32.mrb[219].mxu0 }
 0x849   : > { %7599 = vmatmul.mubr.msk.bf16.gmra.mrb[196].mxu1 %vm13993_vm6, %v16203_v24 }
 0x84a   : > { %5541 = vmatprep.mubr.bf16.mxu1 %v16199_v30 }
 0x84c   : > { %v14300_v59 = vpop.f32.mrb[220].mxu0 }
 0x84d   : > { %16221 = vst [vmem:[#allocation18_spill] sm:$0xff] %v14300_v59  ;;  %v5880_v54 = vpop.f32.mrb[221].mxu0 }
 0x84e   : > { %v14302_v41 = vpop.f32.mrb[222].mxu0 }
 0x84f   : > { %16222 = vst [vmem:[#allocation31_spill] sm:$0xff] %v14302_v41  ;;  %v5883_v27 = vpop.f32.mrb[223].mxu0 }
 0x851   : > { %7602 = vmatmul.mubr.msk.bf16.gmra.mrb[200].mxu1 %vm13993_vm6, %v13817_v2 }
 0x852   : > { %5551 = vmatprep.mubr.bf16.mxu1 %v16199_v30 }
 0x854   : > { %v5285_v16 = vpop.f32.mrb[96].mxu1  ;;  %v8123_v61 = vpop.f32.mrb[100].mxu0 }
 0x855   : > { %v5287_v60 = vpop.f32.mrb[97].mxu1  ;;  %v5919_v8 = vpop.f32.mrb[101].mxu0 }
 0x856   : > { %v14308_v32 = vadd.f32 %v8123_v61, %v5287_v60  ;;  %v5289_v24 = vpop.f32.mrb[98].mxu1  ;;  %v8124_v28 = vpop.f32.mrb[102].mxu0 }
 0x857   : > { %v5291_v23 = vpop.f32.mrb[99].mxu1  ;;  %v5921_v59 = vpop.f32.mrb[103].mxu0 }
 0x858   : > { %v14310_v54 = vadd.f32 %v8124_v28, %v5291_v23 }
 0x859   : > { %7605 = vmatmul.mubr.msk.bf16.gmra.mrb[204].mxu1 %vm13993_vm6, %v16204_v37 }
 0x85a   : > { %5561 = vmatprep.mubr.bf16.mxu1 %v16199_v30 }
 0x85c   : > { %v5295_v2 = vpop.f32.mrb[100].mxu1  ;;  %v8127_v27 = vpop.f32.mrb[224].mxu0 }
 0x85d   : > { %v5942_v41 = vadd.f32 %v8127_v27, %v13975_v25  ;;  %v5297_v29 = vpop.f32.mrb[101].mxu1  ;;  %v5933_v8 = vpop.f32.mrb[225].mxu0 }
 0x85e   : > { %v6172_v60 = vadd.f32 %v5297_v29, %v5285_v16  ;;  %v5934_v61 = vadd.f32 %v5933_v8, %v13963_v22  ;;  %v5299_v58 = vpop.f32.mrb[102].mxu1  ;;  %v8128_v9 = vpop.f32.mrb[226].mxu0 }
 0x85f   : > { %v5945_v23 = vadd.f32 %v8128_v9, %v13977_v55  ;;  %v5301_v28 = vpop.f32.mrb[103].mxu1  ;;  %v5936_v59 = vpop.f32.mrb[227].mxu0 }
 0x860   : > { %v14319_v62 = vadd.f32 %v6172_v60, %v5934_v61  ;;  %v6173_v37 = vadd.f32 %v5301_v28, %v5289_v24  ;;  %v5937_v45 = vadd.f32 %v5936_v59, %v13965_v63 }
 0x861   : > { %7608 = vmatmul.mubr.msk.bf16.gmra.mrb[208].mxu1 %vm13993_vm6, %v13836_v36 }
 0x862   : > { %v14325_v25 = vadd.f32 %v6173_v37, %v5937_v45  ;;  %5571 = vmatprep.mubr.bf16.mxu1 %v16199_v30 }
 0x864   : > { %v5305_v22 = vpop.f32.mrb[104].mxu1  ;;  %v8131_v29 = vpop.f32.mrb[228].mxu0 }
 0x865   : > { %v5958_v16 = vadd.f32 %v8131_v29, %v14007_v12  ;;  %v5307_v55 = vpop.f32.mrb[105].mxu1  ;;  %v5949_v9 = vpop.f32.mrb[229].mxu0 }
 0x866   : > { %v6174_v27 = vadd.f32 %v5307_v55, %v5295_v2  ;;  %v5950_v8 = vadd.f32 %v5949_v9, %v13987_v38  ;;  %v5309_v24 = vpop.f32.mrb[106].mxu1  ;;  %v8132_v60 = vpop.f32.mrb[230].mxu0 }
 0x867   : > { %v5961_v63 = vadd.f32 %v8132_v60, %v14009_v53  ;;  %v5311_v61 = vpop.f32.mrb[107].mxu1  ;;  %v5952_v28 = vpop.f32.mrb[231].mxu0 }
 0x868   : > { %v14331_v36 = vadd.f32 %v6174_v27, %v5942_v41  ;;  %v6175_v45 = vadd.f32 %v5311_v61, %v5299_v58  ;;  %v5953_v59 = vadd.f32 %v5952_v28, %v13989_v21 }
 0x869   : > { %7611 = vmatmul.mubr.msk.bf16.gmra.mrb[212].mxu1 %vm13993_vm6, %v16205_v46 }
 0x86a   : > { %16223 = vst [vmem:[#allocation8_spill] sm:$0xff] %v14331_v36  ;;  %v14337_v12 = vadd.f32 %v6175_v45, %v5945_v23  ;;  %5581 = vmatprep.mubr.bf16.mxu1 %v16199_v30 }
 0x86c   : > { %16224 = vst [vmem:[#allocation10_spill] sm:$0xff] %v14337_v12  ;;  %v5315_v38 = vpop.f32.mrb[108].mxu1  ;;  %v8135_v2 = vpop.f32.mrb[232].mxu0 }
 0x86d   : > { %v5974_v37 = vadd.f32 %v8135_v2, %v14035_v26  ;;  %v5317_v53 = vpop.f32.mrb[109].mxu1  ;;  %v5965_v29 = vpop.f32.mrb[233].mxu0 }
 0x86e   : > { %v6176_v55 = vadd.f32 %v5317_v53, %v5305_v22  ;;  %v5966_v41 = vadd.f32 %v5965_v29, %v14021_v57  ;;  %v5319_v58 = vpop.f32.mrb[110].mxu1  ;;  %v8136_v9 = vpop.f32.mrb[234].mxu0 }
 0x86f   : > { %v5977_v21 = vadd.f32 %v8136_v9, %v14037_v49  ;;  %v5321_v27 = vpop.f32.mrb[111].mxu1  ;;  %v5968_v60 = vpop.f32.mrb[235].mxu0 }
 0x870   : > { %v14343_v46 = vadd.f32 %v6176_v55, %v5950_v8  ;;  %v6177_v23 = vadd.f32 %v5321_v27, %v5309_v24  ;;  %v5969_v61 = vadd.f32 %v5968_v60, %v14023_v51 }
 0x871   : > { %7614 = vmatmul.mubr.msk.bf16.gmra.mrb[216].mxu1 %vm13993_vm6, %v13838_v33 }
 0x872   : > { %16225 = vst [vmem:[#allocation43_spill] sm:$0xff] %v14343_v46  ;;  %v14349_v26 = vadd.f32 %v6177_v23, %v5953_v59  ;;  %5591 = vmatprep.mubr.bf16.mxu1 %v16199_v30 }
 0x874   : > { %16226 = vst [vmem:[#allocation14_spill] sm:$0xff] %v14349_v26  ;;  %v5325_v57 = vpop.f32.mrb[112].mxu1  ;;  %v8139_v22 = vpop.f32.mrb[236].mxu0 }
 0x875   : > { %v14353_v28 = vadd.f32 %v8139_v22, %v14063_v15  ;;  %v5327_v49 = vpop.f32.mrb[113].mxu1  ;;  %v5981_v45 = vpop.f32.mrb[237].mxu0 }
 0x876   : > { %v6178_v8 = vadd.f32 %v5327_v49, %v5315_v38  ;;  %v5982_v24 = vadd.f32 %v5981_v45, %v14049_v18  ;;  %v5329_v2 = vpop.f32.mrb[114].mxu1  ;;  %v8140_v51 = vpop.f32.mrb[238].mxu0 }
 0x877   : > { %v14357_v53 = vadd.f32 %v8140_v51, %v14065_v35  ;;  %v5331_v33 = vpop.f32.mrb[115].mxu1  ;;  %v5984_v59 = vpop.f32.mrb[239].mxu0 }
 0x878   : > { %v14359_v29 = vadd.f32 %v6178_v8, %v5958_v16  ;;  %v6179_v30 = vadd.f32 %v5331_v33, %v5319_v58  ;;  %v5985_v55 = vadd.f32 %v5984_v59, %v14051_v20 }
 0x879   : > { %7617 = vmatmul.mubr.msk.bf16.gmra.mrb[220].mxu1 %vm13993_vm6, %v13657_v10 }
 0x87a   : > { %16227 = vst [vmem:[#allocation41_spill] sm:$0xff] %v14359_v29  ;;  %v14365_v15 = vadd.f32 %v6179_v30, %v5961_v63 }
 0x87c   : > { %16228 = vst [vmem:[#allocation23_spill] sm:$0xff] %v14365_v15  ;;  %v5335_v38 = vpop.f32.mrb[116].mxu1  ;;  %v8143_v18 = vpop.f32.mrb[240].mxu0 }
 0x87d   : > { %v14368_v9 = vadd.f32 %v8143_v18, %v14091_v48  ;;  %v5337_v35 = vpop.f32.mrb[117].mxu1  ;;  %v5997_v27 = vpop.f32.mrb[241].mxu0 }
 0x87e   : > { %v6180_v60 = vadd.f32 %v5337_v35, %v5325_v57  ;;  %v14371_v16 = vadd.f32 %v5997_v27, %v14077_v44  ;;  %v5339_v58 = vpop.f32.mrb[118].mxu1  ;;  %v8144_v23 = vpop.f32.mrb[242].mxu0 }
 0x87f   : > { %v14374_v20 = vadd.f32 %v8144_v23, %v14093_v52  ;;  %v5341_v3 = vpop.f32.mrb[119].mxu1  ;;  %v6000_v10 = vpop.f32.mrb[243].mxu0 }
 0x880   : > { %v14376_v63 = vadd.f32 %v6180_v60, %v5966_v41  ;;  %v6181_v22 = vadd.f32 %v5341_v3, %v5329_v2  ;;  %v14379_v49 = vadd.f32 %v6000_v10, %v14079_v19  ;;  %v8534_v19 = vld [vmem:[%s15539_s7] sm:$0xff]  }
 0x881   : > { %8185 = vmatprep.subr.bf16.mxu0 %v8534_v19 }
 0x882   : > { %16229 = vst [vmem:[#allocation52_spill] sm:$0xff] %v14376_v63  ;;  %v14381_v48 = vadd.f32 %v6181_v22, %v5969_v61  ;;  %8186 = vmatpush3.bf16.msra.mxu0 %v8534_v19 }
 0x884   : > { %16230 = vst [vmem:[#allocation19_spill] sm:$0xff] %v14381_v48  ;;  %v5345_v45 = vpop.f32.mrb[120].mxu1  ;;  %v8147_v57 = vpop.f32.mrb[244].mxu0 }
 0x885   : > { %v14384_v44 = vadd.f32 %v8147_v57, %v14119_v13  ;;  %v5347_v8 = vpop.f32.mrb[121].mxu1  ;;  %v6013_v51 = vpop.f32.mrb[245].mxu0 }
 0x886   : > { %v6182_v33 = vadd.f32 %v5347_v8, %v5335_v38  ;;  %v14387_v52 = vadd.f32 %v6013_v51, %v14105_v40  ;;  %v5349_v59 = vpop.f32.mrb[122].mxu1  ;;  %v8148_v41 = vpop.f32.mrb[246].mxu0 }
 0x887   : > { %v14393_v61 = vadd.f32 %v8148_v41, %v14121_v0  ;;  %v5351_v2 = vpop.f32.mrb[123].mxu1  ;;  %v6016_v30 = vpop.f32.mrb[247].mxu0 }
 0x888   : > { %v14395_v18 = vadd.f32 %v6182_v33, %v5974_v37  ;;  %v6183_v13 = vadd.f32 %v5351_v2, %v5339_v58  ;;  %v14398_v35 = vadd.f32 %v6016_v30, %v14107_v43 }
 0x88a   : > { %16231 = vst [vmem:[#allocation20_spill] sm:$0xff] %v14395_v18  ;;  %v14400_v40 = vadd.f32 %v6183_v13, %v5977_v21 }
 0x88c   : > { %v5355_v38 = vpop.f32.mrb[124].mxu1  ;;  %v8151_v27 = vpop.f32.mrb[248].mxu0 }
 0x88d   : > { %v14403_v60 = vadd.f32 %v8151_v27, %v14147_v1  ;;  %v5357_v23 = vpop.f32.mrb[125].mxu1  ;;  %v6029_v0 = vpop.f32.mrb[249].mxu0  ;;  %v6371_v27 = vmul.f32 %v14319_v62, %v14319_v62 }
 0x88e   : > { %v6184_v3 = vadd.f32 %v5357_v23, %v5345_v45  ;;  %v14406_v10 = vadd.f32 %v6029_v0, %v14133_v7  ;;  %v5359_v37 = vpop.f32.mrb[126].mxu1  ;;  %v8152_v58 = vpop.f32.mrb[250].mxu0  ;;  %v6300_v23 = vadd.f32 %v14310_v54, %v14308_v32 }
 0x88f   : > { %v14409_v43 = vadd.f32 %v8152_v58, %v14149_v47  ;;  %v5361_v22 = vpop.f32.mrb[127].mxu1  ;;  %v6032_v57 = vpop.f32.mrb[251].mxu0  ;;  %v8535_v47 = vld [vmem:[%s15539_s7 + $0x8] sm:$0xff]  }
 0x890   : > { %v14411_v21 = vadd.f32 %v6184_v3, %v5982_v24  ;;  %v6185_v8 = vadd.f32 %v5361_v22, %v5349_v59  ;;  %v14414_v51 = vadd.f32 %v6032_v57, %v14135_v34  ;;  %v6370_v24 = vmul.f32 %v14310_v54, %v14310_v54  ;;  %8187 = vmatprep.subr.bf16.mxu0 %v8535_v47 }
 0x891   : > { %8188 = vmatpush3.bf16.msra.mxu0 %v8535_v47  ;;  %v6301_v58 = vadd.f32 %v6300_v23, %v14319_v62  ;;  %v6372_v57 = vmul.f32 %v14325_v25, %v14325_v25 }
 0x892   : > { %16232 = vst [vmem:[#allocation27_spill] sm:$0xff] %v14411_v21  ;;  %v14416_v1 = vadd.f32 %v6185_v8, %v5985_v55 }
 0x894   : > { %16233 = vst [vmem:[#allocation29_spill] sm:$0xff] %v14416_v1  ;;  %v5365_v33 = vpop.f32.mrb[128].mxu1  ;;  %v14418_v45 = vpop.f32.mrb[164].mxu0 }
 0x895   : > { %v5367_v7 = vpop.f32.mrb[129].mxu1  ;;  %v6045_v41 = vpop.f32.mrb[165].mxu0 }
 0x896   : > { %v6186_v19 = vadd.f32 %v5367_v7, %v5355_v38  ;;  %v5369_v2 = vpop.f32.mrb[130].mxu1  ;;  %v14420_v30 = vpop.f32.mrb[166].mxu0  ;;  %v6369_v38 = vmul.f32 %v14308_v32, %v14308_v32 }
 0x897   : > { %v5371_v34 = vpop.f32.mrb[131].mxu1  ;;  %v6047_v59 = vpop.f32.mrb[167].mxu0 }
 0x898   : > { %v14428_v55 = vadd.f32 %v6186_v19, %v14353_v28  ;;  %v6187_v13 = vadd.f32 %v5371_v34, %v5359_v37  ;;  %v6433_v3 = vadd.f32 %v6370_v24, %v6369_v38  ;;  %v6373_v24 = vmul.f32 %v14331_v36, %v14331_v36 }
 0x89a   : > { %16234 = vst [vmem:[#allocation45_spill] sm:$0xff] %v14428_v55  ;;  %v14437_v0 = vadd.f32 %v6187_v13, %v14357_v53  ;;  %v6434_v37 = vadd.f32 %v6433_v3, %v6371_v27  ;;  %v6302_v27 = vadd.f32 %v6301_v58, %v14325_v25 }
 0x89c   : > { %16235 = vst [vmem:[#allocation49_spill] sm:$0xff] %v14437_v0  ;;  %v5375_v28 = vpop.f32.mrb[132].mxu1  ;;  %v8159_v22 = vpop.f32.mrb[252].mxu0  ;;  %v6303_v3 = vadd.f32 %v6302_v27, %v14331_v36  ;;  %v16248_v36 = vld [vmem:[#allocation22_spill] sm:$0xff] }
 0x89d   : > { %v14443_v8 = vadd.f32 %v8159_v22, %v14195_v31  ;;  %v5377_v7 = vpop.f32.mrb[133].mxu1  ;;  %v6059_v41 = vpop.f32.mrb[253].mxu0 }
 0x89e   : > { %v6188_v19 = vadd.f32 %v5377_v7, %v5365_v33  ;;  %v14446_v47 = vadd.f32 %v6059_v41, %v14181_v42  ;;  %v5379_v53 = vpop.f32.mrb[134].mxu1  ;;  %v8160_v34 = vpop.f32.mrb[254].mxu0  ;;  %v6435_v42 = vadd.f32 %v6434_v37, %v6372_v57  ;;  %v6304_v37 = vadd.f32 %v6303_v3, %v14337_v12 }
 0x89f   : > { %v14451_v59 = vadd.f32 %v8160_v34, %v14197_v50  ;;  %v5381_v13 = vpop.f32.mrb[135].mxu1  ;;  %v6062_v38 = vpop.f32.mrb[255].mxu0  ;;  %v6374_v50 = vmul.f32 %v14337_v12, %v14337_v12 }
 0x8a0   : > { %v14455_v31 = vadd.f32 %v6188_v19, %v14371_v16  ;;  %v6189_v23 = vadd.f32 %v5381_v13, %v5369_v2  ;;  %v14458_v33 = vadd.f32 %v6062_v38, %v14183_v56  ;;  %v6436_v7 = vadd.f32 %v6435_v42, %v6373_v24  ;;  %v8536_v13 = vld [vmem:[%s15539_s7 + $0x10] sm:$0xff]  }
 0x8a1   : > { %v6375_v16 = vmul.f32 %v14343_v46, %v14343_v46  ;;  %v6305_v42 = vadd.f32 %v6304_v37, %v14343_v46  ;;  %8189 = vmatprep.subr.bf16.mxu0 %v8536_v13 }
 0x8a2   : > { %16236 = vst [vmem:[#allocation42_spill] sm:$0xff] %v14455_v31  ;;  %v14462_v22 = vadd.f32 %v6189_v23, %v14379_v49  ;;  %v6437_v38 = vadd.f32 %v6436_v7, %v6374_v50  ;;  %8190 = vmatpush3.bf16.msra.mxu0 %v8536_v13  ;;  %v6377_v7 = vmul.f32 %v14359_v29, %v14359_v29 }
 0x8a3   : > { %v6306_v50 = vadd.f32 %v6305_v42, %v14349_v26 }
 0x8a4   : > { %v5385_v41 = vpop.f32.mrb[136].mxu1  ;;  %v8163_v34 = vpop.f32.mrb[0].mxu0 }
 0x8a5   : > { %v14469_v2 = vadd.f32 %v8163_v34, %v14220_v39  ;;  %v5387_v56 = vpop.f32.mrb[137].mxu1  ;;  %v6075_v58 = vpop.f32.mrb[1].mxu0  ;;  %v6438_v34 = vadd.f32 %v6437_v38, %v6375_v16 }
 0x8a6   : > { %v6190_v57 = vadd.f32 %v5387_v56, %v5375_v28  ;;  %v14473_v49 = vadd.f32 %v6075_v58, %v14209_v17  ;;  %v5389_v19 = vpop.f32.mrb[138].mxu1  ;;  %v8164_v24 = vpop.f32.mrb[2].mxu0  ;;  %v6376_v56 = vmul.f32 %v14349_v26, %v14349_v26 }
 0x8a7   : > { %v14479_v27 = vadd.f32 %v8164_v24, %v14222_v5  ;;  %v5391_v39 = vpop.f32.mrb[139].mxu1  ;;  %v6078_v23 = vpop.f32.mrb[3].mxu0 }
 0x8a8   : > { %v14483_v3 = vadd.f32 %v6190_v57, %v14368_v9  ;;  %v6191_v28 = vadd.f32 %v5391_v39, %v5379_v53  ;;  %v14486_v17 = vadd.f32 %v6078_v23, %v14211_v14  ;;  %v6439_v53 = vadd.f32 %v6438_v34, %v6376_v56 }
 0x8a9   : > { %v6307_v57 = vadd.f32 %v6306_v50, %v14359_v29  ;;  %v6378_v23 = vmul.f32 %v14365_v15, %v14365_v15  ;;  %v16240_v50 = vld [vmem:[#allocation17_spill] sm:$0xff]  ;;  %v16242_v29 = vld [vmem:[#allocation39_spill] sm:$0xff] }
 0x8aa   : > { %16237 = vst [vmem:[#allocation40_spill] sm:$0xff] %v14483_v3  ;;  %v14491_v5 = vadd.f32 %v6191_v28, %v14374_v20  ;;  %v6440_v39 = vadd.f32 %v6439_v53, %v6377_v7 }
 0x8ab   : > { %v6308_v7 = vadd.f32 %v6307_v57, %v14365_v15 }
 0x8ac   : > { %16238 = vst [vmem:[#allocation50_spill] sm:$0xff] %v14491_v5  ;;  %v5395_v9 = vpop.f32.mrb[140].mxu1  ;;  %v8167_v58 = vpop.f32.mrb[4].mxu0  ;;  %v6441_v53 = vadd.f32 %v6440_v39, %v6378_v23  ;;  %v8537_v39 = vld [vmem:[%s15539_s7 + $0x18] sm:$0xff]   ;;  %v6381_v23 = vmul.f32 %v14395_v18, %v14395_v18 }
 0x8ad   : > { %v14497_v14 = vadd.f32 %v8167_v58, %v14236_v6  ;;  %v5397_v37 = vpop.f32.mrb[141].mxu1  ;;  %v6091_v16 = vpop.f32.mrb[5].mxu0  ;;  %8191 = vmatprep.subr.bf16.mxu0 %v8537_v39 }
 0x8ae   : > { %v6192_v24 = vadd.f32 %v5397_v37, %v5385_v41  ;;  %v14501_v13 = vadd.f32 %v6091_v16, %v14228_v11  ;;  %v5399_v20 = vpop.f32.mrb[142].mxu1  ;;  %v8168_v38 = vpop.f32.mrb[6].mxu0  ;;  %v6379_v11 = vmul.f32 %v14376_v63, %v14376_v63  ;;  %8192 = vmatpush3.bf16.msra.mxu0 %v8537_v39 }
 0x8af   : > { %v14506_v42 = vadd.f32 %v8168_v38, %v14238_v4  ;;  %v5401_v28 = vpop.f32.mrb[143].mxu1  ;;  %v6094_v6 = vpop.f32.mrb[7].mxu0  ;;  %v6309_v4 = vadd.f32 %v6308_v7, %v14376_v63 }
 0x8b0   : > { %v14509_v34 = vadd.f32 %v6192_v24, %v14387_v52  ;;  %v6193_v56 = vadd.f32 %v5401_v28, %v5389_v19  ;;  %v14512_v41 = vadd.f32 %v6094_v6, %v16240_v50  ;;  %v6442_v38 = vadd.f32 %v6441_v53, %v6379_v11  ;;  %v16241_v19 = vld [vmem:[#allocation58_spill] sm:$0xff]  ;;  %v16243_v11 = vld [vmem:[#allocation3_spill] sm:$0xff] }
 0x8b1   : > { %v6380_v52 = vmul.f32 %v14381_v48, %v14381_v48 }
 0x8b2   : > { %16239 = vst [vmem:[#allocation53_spill] sm:$0xff] %v14509_v34  ;;  %v14518_v58 = vadd.f32 %v6193_v56, %v14398_v35 }
 0x8b3   : > { %v6443_v63 = vadd.f32 %v6442_v38, %v6380_v52 }
 0x8b4   : > { %v5405_v37 = vpop.f32.mrb[144].mxu1  ;;  %v8171_v16 = vpop.f32.mrb[8].mxu0 }
 0x8b5   : > { %v14524_v24 = vadd.f32 %v8171_v16, %v16241_v19  ;;  %v5407_v28 = vpop.f32.mrb[145].mxu1  ;;  %v6107_v6 = vpop.f32.mrb[9].mxu0  ;;  %v6310_v19 = vadd.f32 %v6309_v4, %v14381_v48 }
 0x8b6   : > { %v6194_v50 = vadd.f32 %v5407_v28, %v5395_v9  ;;  %v14527_v57 = vadd.f32 %v6107_v6, %v16242_v29  ;;  %v5409_v35 = vpop.f32.mrb[146].mxu1  ;;  %v8172_v56 = vpop.f32.mrb[10].mxu0  ;;  %v16244_v28 = vld [vmem:[#allocation59_spill] sm:$0xff] }
 0x8b7   : > { %v14535_v7 = vadd.f32 %v8172_v56, %v16243_v11  ;;  %v5411_v53 = vpop.f32.mrb[147].mxu1  ;;  %v6110_v16 = vpop.f32.mrb[11].mxu0  ;;  %v6311_v15 = vadd.f32 %v6310_v19, %v14395_v18  ;;  %v6444_v56 = vadd.f32 %v6443_v63, %v6381_v23  ;;  %v6382_v11 = vmul.f32 %v14400_v40, %v14400_v40 }
 0x8b8   : > { %v14539_v9 = vadd.f32 %v6194_v50, %v14384_v44  ;;  %v6195_v29 = vadd.f32 %v5411_v53, %v5399_v20  ;;  %v14542_v6 = vadd.f32 %v6110_v16, %v16244_v28  ;;  %v6383_v44 = vmul.f32 %v14411_v21, %v14411_v21  ;;  %v16245_v20 = vld [vmem:[#allocation5_spill] sm:$0xff]  ;;  %v16246_v16 = vld [vmem:[#allocation60_spill] sm:$0xff] }
 0x8b9   : > { %v6312_v52 = vadd.f32 %v6311_v15, %v14400_v40  ;;  %v6445_v19 = vadd.f32 %v6444_v56, %v6382_v11  ;;  %v6385_v11 = vmul.f32 %v14428_v55, %v14428_v55 }
 0x8ba   : > { %v14546_v26 = vadd.f32 %v6195_v29, %v14393_v61  ;;  %v16247_v29 = vld [vmem:[#allocation7_spill] sm:$0xff] }
 0x8bb   : > { %v6313_v12 = vadd.f32 %v6312_v52, %v14411_v21 }
 0x8bc   : > { %v5415_v4 = vpop.f32.mrb[148].mxu1  ;;  %v8175_v48 = vpop.f32.mrb[12].mxu0 }
 0x8bd   : > { %v14553_v50 = vadd.f32 %v8175_v48, %v16245_v20  ;;  %v5417_v53 = vpop.f32.mrb[149].mxu1  ;;  %v6123_v38 = vpop.f32.mrb[13].mxu0 }
 0x8be   : > { %v6196_v39 = vadd.f32 %v5417_v53, %v5405_v37  ;;  %v14557_v61 = vadd.f32 %v6123_v38, %v16246_v16  ;;  %v5419_v63 = vpop.f32.mrb[150].mxu1  ;;  %v8176_v23 = vpop.f32.mrb[14].mxu0  ;;  %v6446_v37 = vadd.f32 %v6445_v19, %v6383_v44  ;;  %v6384_v53 = vmul.f32 %v14416_v1, %v14416_v1 }
 0x8bf   : > { %v14560_v28 = vadd.f32 %v8176_v23, %v16247_v29  ;;  %v5421_v18 = vpop.f32.mrb[151].mxu1  ;;  %v6126_v46 = vpop.f32.mrb[15].mxu0  ;;  %v6314_v38 = vadd.f32 %v6313_v12, %v14416_v1  ;;  %v16251_v23 = vld [vmem:[#allocation6_spill] sm:$0xff]  ;;  %v16252_v1 = vld [vmem:[#allocation12_spill] sm:$0xff] }
 0x8c0   : > { %v14564_v48 = vadd.f32 %v6196_v39, %v14406_v10  ;;  %v6197_v20 = vadd.f32 %v5421_v18, %v5409_v35  ;;  %v14567_v15 = vadd.f32 %v6126_v46, %v16248_v36  ;;  %v6447_v10 = vadd.f32 %v6446_v37, %v6384_v53  ;;  %v16250_v39 = vld [vmem:[#allocation11_spill] sm:$0xff]  ;;  %v8538_v12 = vld [vmem:[%s15539_s7 + $0x20] sm:$0xff]  }
 0x8c1   : > { %v6315_v35 = vadd.f32 %v6314_v38, %v14428_v55  ;;  %8193 = vmatprep.subr.bf16.mxu0 %v8538_v12 }
 0x8c2   : > { %v14572_v56 = vadd.f32 %v6197_v20, %v14414_v51  ;;  %v6448_v20 = vadd.f32 %v6447_v10, %v6385_v11  ;;  %8194 = vmatpush3.bf16.msra.mxu0 %v8538_v12 }
 0x8c4   : > { %16249 = vst [vmem:[#allocation57_spill] sm:$0xff] %v14572_v56  ;;  %v5425_v52 = vpop.f32.mrb[152].mxu1  ;;  %v8179_v16 = vpop.f32.mrb[16].mxu0 }
 0x8c5   : > { %v14578_v18 = vadd.f32 %v8179_v16, %v16250_v39  ;;  %v5427_v36 = vpop.f32.mrb[153].mxu1  ;;  %v6139_v46 = vpop.f32.mrb[17].mxu0  ;;  %v6386_v39 = vmul.f32 %v14437_v0, %v14437_v0 }
 0x8c6   : > { %v6198_v44 = vadd.f32 %v5427_v36, %v5415_v4  ;;  %v14582_v19 = vadd.f32 %v6139_v46, %v16251_v23  ;;  %v5429_v51 = vpop.f32.mrb[154].mxu1  ;;  %v8180_v29 = vpop.f32.mrb[18].mxu0  ;;  %v16253_v36 = vld [vmem:[#allocation51_spill] sm:$0xff]  ;;  %v6316_v23 = vadd.f32 %v6315_v35, %v14437_v0  ;;  %v6388_v35 = vmul.f32 %v14462_v22, %v14462_v22 }
 0x8c7   : > { %v14588_v37 = vadd.f32 %v8180_v29, %v16252_v1  ;;  %v5431_v53 = vpop.f32.mrb[155].mxu1  ;;  %v6142_v16 = vpop.f32.mrb[19].mxu0  ;;  %v6387_v1 = vmul.f32 %v14455_v31, %v14455_v31  ;;  %v6449_v10 = vadd.f32 %v6448_v20, %v6386_v39  ;;  %v16255_v0 = vld [vmem:[#allocation15_spill] sm:$0xff] }
 0x8c8   : > { %v14593_v4 = vadd.f32 %v6198_v44, %v14403_v60  ;;  %v6199_v38 = vadd.f32 %v5431_v53, %v5419_v63  ;;  %v14596_v46 = vadd.f32 %v6142_v16, %v16253_v36  ;;  %v6317_v29 = vadd.f32 %v6316_v23, %v14455_v31  ;;  %v16254_v44 = vld [vmem:[#allocation18_spill] sm:$0xff]  ;;  %v16256_v39 = vld [vmem:[#allocation31_spill] sm:$0xff] }
 0x8c9   : > { %v6450_v36 = vadd.f32 %v6449_v10, %v6387_v1  ;;  %v6389_v1 = vmul.f32 %v14483_v3, %v14483_v3 }
 0x8ca   : > { %v14602_v11 = vadd.f32 %v6199_v38, %v14409_v43 }
 0x8cc   : > { %v5435_v55 = vpop.f32.mrb[156].mxu1  ;;  %v8183_v60 = vpop.f32.mrb[20].mxu0 }
 0x8cd   : > { %v14606_v63 = vadd.f32 %v8183_v60, %v16254_v44  ;;  %v5436_v53 = vpop.f32.mrb[157].mxu1  ;;  %v6155_v16 = vpop.f32.mrb[21].mxu0  ;;  %v6318_v60 = vadd.f32 %v6317_v29, %v14462_v22  ;;  %v16257_v44 = vld [vmem:[#allocation44_spill] sm:$0xff]  ;;  %v6391_v29 = vmul.f32 %v14509_v34, %v14509_v34 }
 0x8ce   : > { %v14610_v12 = vadd.f32 %v5436_v53, %v5425_v52  ;;  %v14613_v21 = vadd.f32 %v6155_v16, %v16255_v0  ;;  %v5438_v43 = vpop.f32.mrb[158].mxu1  ;;  %v8184_v20 = vpop.f32.mrb[22].mxu0  ;;  %v6451_v53 = vadd.f32 %v6450_v36, %v6388_v35 }
 0x8cf   : > { %v14616_v38 = vadd.f32 %v8184_v20, %v16256_v39  ;;  %v5439_v55 = vpop.f32.mrb[159].mxu1  ;;  %v6158_v23 = vpop.f32.mrb[23].mxu0  ;;  %v6319_v0 = vadd.f32 %v6318_v60, %v14483_v3  ;;  %v6390_v43 = vmul.f32 %v14491_v5, %v14491_v5 }
 0x8d0   : > { %v14621_v10 = vadd.f32 %v5439_v55, %v5429_v51  ;;  %v14624_v52 = vadd.f32 %v6158_v23, %v16257_v44  ;;  %v6452_v16 = vadd.f32 %v6451_v53, %v6389_v1  ;;  %v6392_v1 = vmul.f32 %v14518_v58, %v14518_v58 }
 0x8d1   : > { %v6320_v31 = vadd.f32 %v6319_v0, %v14491_v5  ;;  %v6393_v0 = vmul.f32 %v14539_v9, %v14539_v9 }
 0x8d2   : > { %v6453_v44 = vadd.f32 %v6452_v16, %v6390_v43 }
 0x8d3   : > { %v6321_v36 = vadd.f32 %v6320_v31, %v14509_v34 }
 0x8d4   : > { %v5443_v20 = vpop.f32.mrb[160].mxu1  ;;  %v6454_v60 = vadd.f32 %v6453_v44, %v6391_v29 }
 0x8d5   : > { %v5445_v39 = vpop.f32.mrb[161].mxu1  ;;  %v6322_v53 = vadd.f32 %v6321_v36, %v14518_v58  ;;  %v6395_v36 = vmul.f32 %v14564_v48, %v14564_v48 }
 0x8d6   : > { %v14633_v51 = vadd.f32 %v14418_v45, %v5445_v39  ;;  %v5447_v55 = vpop.f32.mrb[162].mxu1  ;;  %v6455_v39 = vadd.f32 %v6454_v60, %v6392_v1 }
 0x8d7   : > { %v5449_v23 = vpop.f32.mrb[163].mxu1  ;;  %v6323_v3 = vadd.f32 %v6322_v53, %v14539_v9 }
 0x8d8   : > { %v14637_v35 = vadd.f32 %v14420_v30, %v5449_v23  ;;  %v6456_v34 = vadd.f32 %v6455_v39, %v6393_v0  ;;  %v6394_v30 = vmul.f32 %v14546_v26, %v14546_v26  ;;  %v6396_v39 = vmul.f32 %v14572_v56, %v14572_v56 }
 0x8d9   : > { %v6324_v44 = vadd.f32 %v6323_v3, %v14546_v26 }
 0x8da   : > { %v6457_v1 = vadd.f32 %v6456_v34, %v6394_v30 }
 0x8dc   : > { %v5453_v5 = vpop.f32.mrb[164].mxu1 }
 0x8dd   : > { %v5455_v45 = vpop.f32.mrb[165].mxu1 }
 0x8de   : > { %v6204_v16 = vadd.f32 %v5455_v45, %v5443_v20  ;;  %v5457_v43 = vpop.f32.mrb[166].mxu1  ;;  %v6325_v20 = vadd.f32 %v6324_v44, %v14564_v48  ;;  %v6458_v45 = vadd.f32 %v6457_v1, %v6395_v36 }
 0x8df   : > { %v5459_v31 = vpop.f32.mrb[167].mxu1 }
 0x8e0   : > { %v14648_v29 = vadd.f32 %v6204_v16, %v14446_v47  ;;  %v6205_v23 = vadd.f32 %v5459_v31, %v5447_v55  ;;  %v6326_v3 = vadd.f32 %v6325_v20, %v14572_v56  ;;  %v6397_v31 = vmul.f32 %v14593_v4, %v14593_v4 }
 0x8e1   : > { %v6459_v30 = vadd.f32 %v6458_v45, %v6396_v39  ;;  %v6399_v56 = vmul.f32 %v14610_v12, %v14610_v12 }
 0x8e2   : > { %v14654_v60 = vadd.f32 %v6205_v23, %v14458_v33  ;;  %v6327_v23 = vadd.f32 %v6326_v3, %v14593_v4 }
 0x8e3   : > { %v6460_v36 = vadd.f32 %v6459_v30, %v6397_v31  ;;  %v6400_v31 = vmul.f32 %v14621_v10, %v14621_v10 }
 0x8e4   : > { %v5463_v53 = vpop.f32.mrb[168].mxu1  ;;  %v6328_v20 = vadd.f32 %v6327_v23, %v14602_v11 }
 0x8e5   : > { %v5465_v0 = vpop.f32.mrb[169].mxu1 }
 0x8e6   : > { %v6206_v47 = vadd.f32 %v5465_v0, %v5453_v5  ;;  %v5467_v16 = vpop.f32.mrb[170].mxu1  ;;  %v6398_v5 = vmul.f32 %v14602_v11, %v14602_v11  ;;  %v6329_v45 = vadd.f32 %v6328_v20, %v14610_v12 }
 0x8e7   : > { %v5469_v55 = vpop.f32.mrb[171].mxu1 }
 0x8e8   : > { %v14663_v33 = vadd.f32 %v6206_v47, %v14443_v8  ;;  %v6207_v34 = vadd.f32 %v5469_v55, %v5457_v43  ;;  %v6461_v39 = vadd.f32 %v6460_v36, %v6398_v5  ;;  %v6330_v30 = vadd.f32 %v6329_v45, %v14621_v10 }
 0x8ea   : > { %v14667_v44 = vadd.f32 %v6207_v34, %v14451_v59  ;;  %v6462_v3 = vadd.f32 %v6461_v39, %v6399_v56  ;;  %v6331_v36 = vadd.f32 %v6330_v30, %v14633_v51  ;;  %v6403_v39 = vmul.f32 %v14648_v29, %v14648_v29 }
 0x8ec   : > { %v5473_v1 = vpop.f32.mrb[172].mxu1  ;;  %v6463_v20 = vadd.f32 %v6462_v3, %v6400_v31  ;;  %v6332_v45 = vadd.f32 %v6331_v36, %v14637_v35 }
 0x8ed   : > { %v5475_v0 = vpop.f32.mrb[173].mxu1 }
 0x8ee   : > { %v6208_v8 = vadd.f32 %v5475_v0, %v5463_v53  ;;  %v5477_v47 = vpop.f32.mrb[174].mxu1  ;;  %v6401_v53 = vmul.f32 %v14633_v51, %v14633_v51 }
 0x8ef   : > { %v5479_v43 = vpop.f32.mrb[175].mxu1 }
 0x8f0   : > { %v14676_v59 = vadd.f32 %v6208_v8, %v14473_v49  ;;  %v6209_v55 = vadd.f32 %v5479_v43, %v5467_v16  ;;  %v6464_v56 = vadd.f32 %v6463_v20, %v6401_v53  ;;  %v6402_v8 = vmul.f32 %v14637_v35, %v14637_v35 }
 0x8f2   : > { %v14681_v34 = vadd.f32 %v6209_v55, %v14486_v17  ;;  %v6465_v3 = vadd.f32 %v6464_v56, %v6402_v8 }
 0x8f4   : > { %v5483_v23 = vpop.f32.mrb[176].mxu1  ;;  %v6466_v53 = vadd.f32 %v6465_v3, %v6403_v39 }
 0x8f5   : > { %v5485_v0 = vpop.f32.mrb[177].mxu1 }
 0x8f6   : > { %v6210_v49 = vadd.f32 %v5485_v0, %v5473_v1  ;;  %v5487_v5 = vpop.f32.mrb[178].mxu1  ;;  %v6333_v1 = vadd.f32 %v6332_v45, %v14648_v29  ;;  %v6404_v0 = vmul.f32 %v14654_v60, %v14654_v60 }
 0x8f7   : > { %v5489_v16 = vpop.f32.mrb[179].mxu1 }
 0x8f8   : > { %v14690_v17 = vadd.f32 %v6210_v49, %v14469_v2  ;;  %v6211_v43 = vadd.f32 %v5489_v16, %v5477_v47  ;;  %v6334_v36 = vadd.f32 %v6333_v1, %v14654_v60  ;;  %v6405_v49 = vmul.f32 %v14663_v33, %v14663_v33 }
 0x8f9   : > { %v6467_v56 = vadd.f32 %v6466_v53, %v6404_v0 }
 0x8fa   : > { %v14696_v55 = vadd.f32 %v6211_v43, %v14479_v27  ;;  %v6335_v8 = vadd.f32 %v6334_v36, %v14663_v33 }
 0x8fb   : > { %v6468_v45 = vadd.f32 %v6467_v56, %v6405_v49  ;;  %v6408_v49 = vmul.f32 %v14681_v34, %v14681_v34 }
 0x8fc   : > { %v5493_v31 = vpop.f32.mrb[180].mxu1  ;;  %v6336_v1 = vadd.f32 %v6335_v8, %v14667_v44 }
 0x8fd   : > { %v5495_v30 = vpop.f32.mrb[181].mxu1 }
 0x8fe   : > { %v6212_v2 = vadd.f32 %v5495_v30, %v5483_v23  ;;  %v5497_v20 = vpop.f32.mrb[182].mxu1  ;;  %v6406_v23 = vmul.f32 %v14667_v44, %v14667_v44  ;;  %v6407_v30 = vmul.f32 %v14676_v59, %v14676_v59  ;;  %v6337_v0 = vadd.f32 %v6336_v1, %v14676_v59 }
 0x8ff   : > { %v5499_v47 = vpop.f32.mrb[183].mxu1 }
 0x900   : > { %v14705_v27 = vadd.f32 %v6212_v2, %v14501_v13  ;;  %v6213_v16 = vadd.f32 %v5499_v47, %v5487_v5  ;;  %v6469_v53 = vadd.f32 %v6468_v45, %v6406_v23  ;;  %v6338_v56 = vadd.f32 %v6337_v0, %v14681_v34 }
 0x902   : > { %v14709_v43 = vadd.f32 %v6213_v16, %v14512_v41  ;;  %v6470_v36 = vadd.f32 %v6469_v53, %v6407_v30  ;;  %v6411_v0 = vmul.f32 %v14705_v27, %v14705_v27 }
 0x904   : > { %v5503_v39 = vpop.f32.mrb[184].mxu1  ;;  %v6471_v23 = vadd.f32 %v6470_v36, %v6408_v49 }
 0x905   : > { %v5505_v3 = vpop.f32.mrb[185].mxu1 }
 0x906   : > { %v6214_v13 = vadd.f32 %v5505_v3, %v5493_v31  ;;  %v5507_v2 = vpop.f32.mrb[186].mxu1  ;;  %v6409_v31 = vmul.f32 %v14690_v17, %v14690_v17  ;;  %v6339_v3 = vadd.f32 %v6338_v56, %v14690_v17 }
 0x907   : > { %v5509_v5 = vpop.f32.mrb[187].mxu1 }
 0x908   : > { %v14718_v41 = vadd.f32 %v6214_v13, %v14497_v14  ;;  %v6215_v47 = vadd.f32 %v5509_v5, %v5497_v20  ;;  %v6472_v30 = vadd.f32 %v6471_v23, %v6409_v31  ;;  %v6410_v13 = vmul.f32 %v14696_v55, %v14696_v55 }
 0x909   : > { %v6340_v53 = vadd.f32 %v6339_v3, %v14696_v55 }
 0x90a   : > { %v14723_v16 = vadd.f32 %v6215_v47, %v14506_v42  ;;  %v6473_v36 = vadd.f32 %v6472_v30, %v6410_v13 }
 0x90c   : > { %v5513_v8 = vpop.f32.mrb[188].mxu1  ;;  %v6474_v31 = vadd.f32 %v6473_v36, %v6411_v0 }
 0x90d   : > { %v5515_v45 = vpop.f32.mrb[189].mxu1 }
 0x90e   : > { %v6216_v14 = vadd.f32 %v5515_v45, %v5503_v39  ;;  %v5517_v1 = vpop.f32.mrb[190].mxu1  ;;  %v6341_v39 = vadd.f32 %v6340_v53, %v14705_v27  ;;  %v6412_v45 = vmul.f32 %v14709_v43, %v14709_v43  ;;  %v8540_v53 = vld [vmem:[%s15539_s7 + $0x30] sm:$0xff]  }
 0x90f   : > { %v5519_v20 = vpop.f32.mrb[191].mxu1 }
 0x910   : > { %v14732_v42 = vadd.f32 %v6216_v14, %v14527_v57  ;;  %v6217_v5 = vadd.f32 %v5519_v20, %v5507_v2  ;;  %v6342_v3 = vadd.f32 %v6341_v39, %v14709_v43  ;;  %v6413_v14 = vmul.f32 %v14718_v41, %v14718_v41 }
 0x911   : > { %v6475_v30 = vadd.f32 %v6474_v31, %v6412_v45 }
 0x912   : > { %v14738_v47 = vadd.f32 %v6217_v5, %v14542_v6  ;;  %v6343_v13 = vadd.f32 %v6342_v3, %v14718_v41 }
 0x913   : > { %v6476_v0 = vadd.f32 %v6475_v30, %v6413_v14 }
 0x914   : > { %v5523_v49 = vpop.f32.mrb[192].mxu1  ;;  %v6344_v39 = vadd.f32 %v6343_v13, %v14723_v16  ;;  %v6416_v13 = vmul.f32 %v14738_v47, %v14738_v47 }
 0x915   : > { %v5525_v56 = vpop.f32.mrb[193].mxu1 }
 0x916   : > { %v6218_v57 = vadd.f32 %v5525_v56, %v5513_v8  ;;  %v5527_v23 = vpop.f32.mrb[194].mxu1  ;;  %v8539_v8 = vld [vmem:[%s15539_s7 + $0x28] sm:$0xff]   ;;  %v6345_v3 = vadd.f32 %v6344_v39, %v14732_v42 }
 0x917   : > { %v5529_v2 = vpop.f32.mrb[195].mxu1  ;;  %8195 = vmatprep.subr.bf16.mxu0 %v8539_v8 }
 0x918   : > { %v14747_v6 = vadd.f32 %v6218_v57, %v14524_v24  ;;  %v6219_v20 = vadd.f32 %v5529_v2, %v5517_v1  ;;  %v6414_v24 = vmul.f32 %v14723_v16, %v14723_v16  ;;  %8196 = vmatpush3.bf16.msra.mxu0 %v8539_v8  ;;  %v8541_v57 = vld [vmem:[%s15539_s7 + $0x38] sm:$0xff]   ;;  %v6346_v8 = vadd.f32 %v6345_v3, %v14738_v47 }
 0x919   : > { %8197 = vmatprep.subr.bf16.mxu0 %v8540_v53 }
 0x91a   : > { %v14751_v5 = vadd.f32 %v6219_v20, %v14535_v7  ;;  %v6415_v7 = vmul.f32 %v14732_v42, %v14732_v42  ;;  %v6477_v2 = vadd.f32 %v6476_v0, %v6414_v24  ;;  %v6417_v0 = vmul.f32 %v14747_v6, %v14747_v6 }
 0x91c   : > { %v5533_v36 = vpop.f32.mrb[196].mxu1  ;;  %v6478_v30 = vadd.f32 %v6477_v2, %v6415_v7  ;;  %8198 = vmatpush3.bf16.msra.mxu0 %v8540_v53 }
 0x91d   : > { %v5535_v1 = vpop.f32.mrb[197].mxu1  ;;  %8199 = vmatprep.subr.bf16.mxu0 %v8541_v57 }
 0x91e   : > { %v6220_v56 = vadd.f32 %v5535_v1, %v5523_v49  ;;  %v5537_v31 = vpop.f32.mrb[198].mxu1  ;;  %v6479_v39 = vadd.f32 %v6478_v30, %v6416_v13 }
 0x91f   : > { %v5539_v45 = vpop.f32.mrb[199].mxu1 }
 0x920   : > { %v14769_v14 = vadd.f32 %v6220_v56, %v14557_v61  ;;  %v6221_v20 = vadd.f32 %v5539_v45, %v5527_v23  ;;  %v6347_v61 = vadd.f32 %v6346_v8, %v14747_v6  ;;  %8200 = vmatpush3.bf16.msra.mxu0 %v8541_v57  ;;  %v6480_v45 = vadd.f32 %v6479_v39, %v6417_v0 }
 0x922   : > { %v14774_v49 = vadd.f32 %v6221_v20, %v14567_v15  ;;  %v6418_v15 = vmul.f32 %v14751_v5, %v14751_v5  ;;  %v6348_v3 = vadd.f32 %v6347_v61, %v14751_v5  ;;  %v6419_v20 = vmul.f32 %v14769_v14, %v14769_v14 }
 0x924   : > { %v5543_v24 = vpop.f32.mrb[200].mxu1  ;;  %v6349_v57 = vadd.f32 %v6348_v3, %v14769_v14 }
 0x925   : > { %v5545_v1 = vpop.f32.mrb[201].mxu1 }
 0x926   : > { %v6222_v23 = vadd.f32 %v5545_v1, %v5533_v36  ;;  %v5547_v7 = vpop.f32.mrb[202].mxu1  ;;  %v6481_v36 = vadd.f32 %v6480_v45, %v6418_v15  ;;  %v6420_v1 = vmul.f32 %v14774_v49, %v14774_v49  ;;  %v6350_v61 = vadd.f32 %v6349_v57, %v14774_v49 }
 0x927   : > { %v5549_v56 = vpop.f32.mrb[203].mxu1 }
 0x928   : > { %v14783_v53 = vadd.f32 %v6222_v23, %v14553_v50  ;;  %v6223_v2 = vadd.f32 %v5549_v56, %v5537_v31  ;;  %v6482_v0 = vadd.f32 %v6481_v36, %v6419_v20 }
 0x92a   : > { %v14789_v30 = vadd.f32 %v6223_v2, %v14560_v28  ;;  %v6421_v23 = vmul.f32 %v14783_v53, %v14783_v53  ;;  %v6483_v45 = vadd.f32 %v6482_v0, %v6420_v1  ;;  %v6351_v15 = vadd.f32 %v6350_v61, %v14783_v53 }
 0x92c   : > { %v5553_v13 = vpop.f32.mrb[204].mxu1  ;;  %v6484_v3 = vadd.f32 %v6483_v45, %v6421_v23  ;;  %v6352_v57 = vadd.f32 %v6351_v15, %v14789_v30 }
 0x92d   : > { %v5555_v8 = vpop.f32.mrb[205].mxu1 }
 0x92e   : > { %v6224_v50 = vadd.f32 %v5555_v8, %v5543_v24  ;;  %v5557_v39 = vpop.f32.mrb[206].mxu1  ;;  %v6422_v24 = vmul.f32 %v14789_v30, %v14789_v30 }
 0x92f   : > { %v5559_v31 = vpop.f32.mrb[207].mxu1 }
 0x930   : > { %v14798_v28 = vadd.f32 %v6224_v50, %v14582_v19  ;;  %v6225_v56 = vadd.f32 %v5559_v31, %v5547_v7  ;;  %v6485_v0 = vadd.f32 %v6484_v3, %v6422_v24 }
 0x932   : > { %v14802_v2 = vadd.f32 %v6225_v56, %v14596_v46  ;;  %v6423_v8 = vmul.f32 %v14798_v28, %v14798_v28  ;;  %v6353_v1 = vadd.f32 %v6352_v57, %v14798_v28 }
 0x934   : > { %v5563_v20 = vpop.f32.mrb[208].mxu1  ;;  %v6486_v61 = vadd.f32 %v6485_v0, %v6423_v8  ;;  %v6424_v23 = vmul.f32 %v14802_v2, %v14802_v2  ;;  %v6354_v45 = vadd.f32 %v6353_v1, %v14802_v2 }
 0x935   : > { %v5565_v36 = vpop.f32.mrb[209].mxu1 }
 0x936   : > { %v6226_v19 = vadd.f32 %v5565_v36, %v5553_v13  ;;  %v5567_v50 = vpop.f32.mrb[210].mxu1  ;;  %v6487_v24 = vadd.f32 %v6486_v61, %v6424_v23 }
 0x937   : > { %v5569_v7 = vpop.f32.mrb[211].mxu1 }
 0x938   : > { %v14811_v46 = vadd.f32 %v6226_v19, %v14578_v18  ;;  %v6227_v31 = vadd.f32 %v5569_v7, %v5557_v39 }
 0x93a   : > { %16258 = vst [vmem:[#allocation55_spill] sm:$0xff] %v14811_v46  ;;  %v14816_v56 = vadd.f32 %v6227_v31, %v14588_v37  ;;  %v6425_v13 = vmul.f32 %v14811_v46, %v14811_v46  ;;  %v6355_v36 = vadd.f32 %v6354_v45, %v14811_v46 }
 0x93c   : > { %16259 = vst [vmem:[#allocation24_spill] sm:$0xff] %v14816_v56  ;;  %v5573_v15 = vpop.f32.mrb[212].mxu1  ;;  %v6488_v8 = vadd.f32 %v6487_v24, %v6425_v13  ;;  %v6426_v19 = vmul.f32 %v14816_v56, %v14816_v56  ;;  %v6356_v0 = vadd.f32 %v6355_v36, %v14816_v56 }
 0x93d   : > { %v5575_v3 = vpop.f32.mrb[213].mxu1 }
 0x93e   : > { %v6228_v18 = vadd.f32 %v5575_v3, %v5563_v20  ;;  %v5577_v57 = vpop.f32.mrb[214].mxu1  ;;  %v6489_v61 = vadd.f32 %v6488_v8, %v6426_v19 }
 0x93f   : > { %v5579_v39 = vpop.f32.mrb[215].mxu1 }
 0x940   : > { %v14825_v37 = vadd.f32 %v6228_v18, %v14613_v21  ;;  %v6229_v7 = vadd.f32 %v5579_v39, %v5567_v50 }
 0x942   : > { %16260 = vst [vmem:[#allocation28_spill] sm:$0xff] %v14825_v37  ;;  %v6427_v1 = vmul.f32 %v14825_v37, %v14825_v37  ;;  %v14831_v31 = vadd.f32 %v6229_v7, %v14624_v52  ;;  %v6357_v20 = vadd.f32 %v6356_v0, %v14825_v37 }
 0x944   : > { %16261 = vst [vmem:[#allocation30_spill] sm:$0xff] %v14831_v31  ;;  %v5583_v23 = vpop.f32.mrb[216].mxu1  ;;  %v6490_v13 = vadd.f32 %v6489_v61, %v6427_v1  ;;  %v6428_v3 = vmul.f32 %v14831_v31, %v14831_v31  ;;  %v6358_v36 = vadd.f32 %v6357_v20, %v14831_v31 }
 0x945   : > { %v5585_v45 = vpop.f32.mrb[217].mxu1 }
 0x946   : > { %v6230_v21 = vadd.f32 %v5585_v45, %v5573_v15  ;;  %v5587_v24 = vpop.f32.mrb[218].mxu1  ;;  %v6491_v52 = vadd.f32 %v6490_v13, %v6428_v3 }
 0x947   : > { %v5589_v50 = vpop.f32.mrb[219].mxu1 }
 0x948   : > { %v14838_v18 = vadd.f32 %v6230_v21, %v14606_v63  ;;  %v6231_v39 = vadd.f32 %v5589_v50, %v5577_v57 }
 0x94a   : > { %16262 = vst [vmem:[#allocation34_spill] sm:$0xff] %v14838_v18  ;;  %v6359_v8 = vadd.f32 %v6358_v36, %v14838_v18  ;;  %v6429_v19 = vmul.f32 %v14838_v18, %v14838_v18  ;;  %v14844_v7 = vadd.f32 %v6231_v39, %v14616_v38 }
 0x94c   : > { %16263 = vst [vmem:[#allocation33_spill] sm:$0xff] %v14844_v7  ;;  %v6492_v0 = vadd.f32 %v6491_v52, %v6429_v19  ;;  %v6430_v15 = vmul.f32 %v14844_v7, %v14844_v7  ;;  %v5593_v1 = vpop.f32.mrb[220].mxu1  ;;  %v6360_v61 = vadd.f32 %v6359_v8, %v14844_v7 }
 0x94d   : > { %v5594_v20 = vpop.f32.mrb[221].mxu1 }
 0x94e   : > { %v6232_v63 = vadd.f32 %v5594_v20, %v5583_v23  ;;  %v6493_v45 = vadd.f32 %v6492_v0, %v6430_v15  ;;  %v5596_v57 = vpop.f32.mrb[222].mxu1 }
 0x94f   : > { %v5597_v13 = vpop.f32.mrb[223].mxu1 }
 0x950   : > { %v6361_v3 = vadd.f32 %v6360_v61, %v6232_v63  ;;  %v6431_v21 = vmul.f32 %v6232_v63, %v6232_v63  ;;  %v6233_v50 = vadd.f32 %v5597_v13, %v5587_v24 }
 0x952   : > { %v6494_v36 = vadd.f32 %v6493_v45, %v6431_v21  ;;  %v6362_v18 = vadd.f32 %v6361_v3, %v6233_v50  ;;  %v6432_v31 = vmul.f32 %v6233_v50, %v6233_v50 }
 0x954   : > { %v6363_v38 = vrot.slane %v6362_v18, 4  ;;  %v6495_v39 = vadd.f32 %v6494_v36, %v6432_v31  ;;  %v6298_v31 = vld [vmem:[%s15537_s5] sm:$0x1] }
 0x956   : > { %v6364_v52 = vadd.f32 %v6363_v38, %v6362_v18  ;;  %v6496_v19 = vrot.slane %v6495_v39, 4 }
 0x958   : > { %v6365_v37 = vrot.slane %v6364_v52, 2  ;;  %v6497_v56 = vadd.f32 %v6496_v19, %v6495_v39 }
 0x95a   : > { %v6366_v1 = vadd.f32 %v6365_v37, %v6364_v52  ;;  %v6498_v46 = vrot.slane %v6497_v56, 2  ;;  %v6299_v37 = vld [vmem:[%s15538_s6] sm:$0x1] }
 0x95c   : > { %v6367_v8 = vrot.slane %v6366_v1, 1  ;;  %v6499_v7 = vadd.f32 %v6498_v46, %v6497_v56  ;;  %v16264_v56 = vld [vmem:[#allocation48_spill] sm:$0xff] }
 0x95e   : > { %v6368_v23 = vadd.f32 %v6367_v8, %v6366_v1  ;;  %v6500_v0 = vrot.slane %v6499_v7, 1  ;;  %v16265_v1 = vld [vmem:[#allocation8_spill] sm:$0xff] }
 0x960   : > { %v6501_v15 = vadd.f32 %v6500_v0, %v6499_v7  ;;  %v6502_v20 = vmul.f32 0.001953125, %v6368_v23 }
 0x962   : > { %v6503_v61 = vmul.f32 0.001953125, %v6501_v15  ;;  %v6504_v57 = vmul.f32 %v6502_v20, %v6502_v20 }
 0x964   : > { %v6505_v24 = vsub.f32 %v6503_v61, %v6504_v57  ;;  %v16271_v57 = vld [vmem:[#allocation52_spill] sm:$0xff] }
 0x966   : > { %v6506_v45 = vadd.f32 1e-05, %v6505_v24 }
 0x968   : > { %8800 = vrsqrt.f32 %v6506_v45  ;;  %v16272_v45 = vld [vmem:[#allocation19_spill] sm:$0xff] }
 0x972   : > { %v8801_v18 = vpop.eup %8800 }
 0x973   : > { %v6508_v13 = vmul.f32 %v8801_v18, %v6298_v31 }
 0x975   : > { %v6509_v46 = vmul.f32 %v6508_v13, %v6502_v20  ;;  %v14856_v3 = vrot.slane %v6508_v13, %v16264_v56  ;;  %v16270_v20 = vld [vmem:[#allocation23_spill] sm:$0xff] }
 0x977   : > { %v6510_v7 = vsub.f32 %v6299_v37, %v6509_v46  ;;  %v6579_v21 = vmul.f32 %v14856_v3, %v6232_v63  ;;  %v6580_v36 = vmul.f32 %v14856_v3, %v6233_v50  ;;  %v14862_v38 = vmul.f32 %v14856_v3, %v14308_v32  ;;  %v16266_v32 = vld [vmem:[#allocation10_spill] sm:$0xff]  ;;  %v16273_v37 = vld [vmem:[#allocation20_spill] sm:$0xff] }
 0x978   : > { %v14866_v39 = vmul.f32 %v14856_v3, %v14310_v54  ;;  %v14870_v52 = vmul.f32 %v14856_v3, %v14319_v62  ;;  %v14874_v19 = vmul.f32 %v14856_v3, %v14325_v25  ;;  %v14878_v63 = vmul.f32 %v14856_v3, %v16265_v1  ;;  %v16267_v54 = vld [vmem:[#allocation43_spill] sm:$0xff]  ;;  %v16268_v62 = vld [vmem:[#allocation14_spill] sm:$0xff]  ;;  %v16269_v25 = vld [vmem:[#allocation41_spill] sm:$0xff] }
 0x979   : > { %v14881_v50 = vrot.slane %v6510_v7, %v16264_v56  ;;  %v14885_v8 = vmul.f32 %v14856_v3, %v16266_v32  ;;  %v14889_v23 = vmul.f32 %v14856_v3, %v16267_v54  ;;  %v14893_v0 = vmul.f32 %v14856_v3, %v16268_v62  ;;  %v16275_v7 = vld [vmem:[#allocation27_spill] sm:$0xff]  ;;  %v16276_v32 = vld [vmem:[#allocation29_spill] sm:$0xff] }
 0x97a   : > { %v14897_v15 = vmul.f32 %v14856_v3, %v16269_v25  ;;  %v14901_v61 = vmul.f32 %v14856_v3, %v16270_v20  ;;  %v6527_v24 = vmul.f32 %v14856_v3, %v16271_v57  ;;  %v6528_v31 = vmul.f32 %v14856_v3, %v16272_v45  ;;  %v16277_v62 = vld [vmem:[#allocation45_spill] sm:$0xff]  ;;  %v16280_v45 = vld [vmem:[#allocation42_spill] sm:$0xff] }
 0x97b   : > { %v6649_v18 = vadd.f32 %v14881_v50, %v6579_v21  ;;  %v6650_v13 = vadd.f32 %v14881_v50, %v6580_v36  ;;  %v14911_v46 = vmul.f32 %v14856_v3, %v16273_v37  ;;  %v14915_v56 = vmul.f32 %v14856_v3, %v14400_v40  ;;  %v16279_v21 = vld [vmem:[#allocation49_spill] sm:$0xff] }
 0x97c   : > { %v6531_v1 = vmul.f32 %v14856_v3, %v16275_v7  ;;  %v6532_v54 = vmul.f32 %v14856_v3, %v16276_v32  ;;  %v14923_v25 = vmul.f32 %v14856_v3, %v16277_v62  ;;  %v14927_v36 = vmul.f32 %v14856_v3, %v16279_v21  ;;  %v16281_v7 = vld [vmem:[#allocation40_spill] sm:$0xff]  ;;  %v16282_v32 = vld [vmem:[#allocation50_spill] sm:$0xff] }
 0x97d   : > { %16274 = vst [vmem:[#allocation38_spill] sm:$0xff] %v14915_v56  ;;  %v6713_v20 = vmax.f32 %v6649_v18, 0.0  ;;  %v6714_v57 = vmax.f32 %v6650_v13, 0.0  ;;  %v6535_v40 = vmul.f32 %v14856_v3, %v16280_v45  ;;  %v6536_v37 = vmul.f32 %v14856_v3, %v14462_v22 }
 0x97e   : > { %16278 = vst [vmem:[#allocation35_spill] sm:$0xff] %v14923_v25  ;;  %v14935_v56 = vmul.f32 %v14856_v3, %v16281_v7  ;;  %v14939_v62 = vmul.f32 %v14856_v3, %v16282_v32  ;;  %v16284_v25 = vld [vmem:[#allocation53_spill] sm:$0xff]  ;;  %v6540_v18 = vmul.f32 %v14856_v3, %v14518_v58  ;;  %v14949_v45 = vmul.f32 %v14856_v3, %v14539_v9 }
 0x97f   : > { %v6539_v21 = vmul.f32 %v14856_v3, %v16284_v25  ;;  %v14945_v13 = vpack.c.bf16 %v6714_v57, %v6713_v20  ;;  %v14953_v22 = vmul.f32 %v14856_v3, %v14546_v26  ;;  %v6543_v7 = vmul.f32 %v14856_v3, %v14564_v48  ;;  %v16286_v32 = vld [vmem:[#allocation57_spill] sm:$0xff]  ;;  %v16299_v57 = vld [vmem:[#allocation55_spill] sm:$0xff] }
 0x980   : > { %16283 = vst [vmem:[#allocation46_spill] sm:$0xff] %v14939_v62  ;;  %v6544_v62 = vmul.f32 %v14856_v3, %v16286_v32  ;;  %v14961_v25 = vmul.f32 %v14856_v3, %v14593_v4  ;;  %v14965_v58 = vmul.f32 %v14856_v3, %v14602_v11  ;;  %v6547_v9 = vmul.f32 %v14856_v3, %v14610_v12  ;;  %v16301_v32 = vld [vmem:[#allocation24_spill] sm:$0xff] }
 0x981   : > { %16285 = vst [vmem:[#allocation54_spill] sm:$0xff] %v14945_v13  ;;  %v6548_v26 = vmul.f32 %v14856_v3, %v14621_v10  ;;  %v14973_v48 = vmul.f32 %v14856_v3, %v14633_v51  ;;  %v14977_v20 = vmul.f32 %v14856_v3, %v14637_v35  ;;  %v6551_v4 = vmul.f32 %v14856_v3, %v14648_v29 }
 0x982   : > { %v6552_v11 = vmul.f32 %v14856_v3, %v14654_v60  ;;  %v14985_v12 = vmul.f32 %v14856_v3, %v14663_v33  ;;  %v14989_v10 = vmul.f32 %v14856_v3, %v14667_v44  ;;  %v6555_v51 = vmul.f32 %v14856_v3, %v14676_v59 }
 0x983   : > { %16287 = vst [vmem:[#allocation56_spill] sm:$0xff] %v14973_v48  ;;  %16288 = vst [vmem:[#allocation25_spill] sm:$0xff] %v14977_v20  ;;  %v6556_v35 = vmul.f32 %v14856_v3, %v14681_v34  ;;  %v14997_v29 = vmul.f32 %v14856_v3, %v14690_v17  ;;  %v15001_v60 = vmul.f32 %v14856_v3, %v14696_v55 }
 0x984   : > { %16289 = vst [vmem:[#allocation4_spill] sm:$0xff] %v14985_v12  ;;  %16290 = vst [vmem:[#allocation26_spill] sm:$0xff] %v14989_v10  ;;  %v6559_v33 = vmul.f32 %v14856_v3, %v14705_v27  ;;  %v6560_v44 = vmul.f32 %v14856_v3, %v14709_v43  ;;  %v15009_v59 = vmul.f32 %v14856_v3, %v14718_v41 }
 0x985   : > { %16291 = vst [vmem:[#allocation9_spill] sm:$0xff] %v14997_v29  ;;  %16292 = vst [vmem:[#allocation36_spill] sm:$0xff] %v15001_v60  ;;  %v15013_v34 = vmul.f32 %v14856_v3, %v14723_v16  ;;  %v6563_v17 = vmul.f32 %v14856_v3, %v14732_v42  ;;  %v6564_v55 = vmul.f32 %v14856_v3, %v14738_v47 }
 0x986   : > { %16293 = vst [vmem:[#allocation37_spill] sm:$0xff] %v15009_v59  ;;  %v15021_v27 = vmul.f32 %v14856_v3, %v14747_v6  ;;  %v15025_v43 = vmul.f32 %v14856_v3, %v14751_v5  ;;  %v6567_v41 = vmul.f32 %v14856_v3, %v14769_v14  ;;  %v6568_v16 = vmul.f32 %v14856_v3, %v14774_v49 }
 0x987   : > { %16294 = vst [vmem:[#allocation16_spill] sm:$0xff] %v15013_v34  ;;  %v15033_v42 = vmul.f32 %v14856_v3, %v14783_v53  ;;  %v15037_v47 = vmul.f32 %v14856_v3, %v14789_v30  ;;  %v6571_v6 = vmul.f32 %v14856_v3, %v14798_v28  ;;  %v6572_v5 = vmul.f32 %v14856_v3, %v14802_v2  ;;  %v16303_v53 = vld [vmem:[#allocation28_spill] sm:$0xff] }
 0x988   : > { %16295 = vst [vmem:[#allocation2_spill] sm:$0xff] %v15021_v27  ;;  %16296 = vst [vmem:[#allocation32_spill] sm:$0xff] %v15025_v43  ;;  %v15045_v14 = vmul.f32 %v14856_v3, %v16299_v57  ;;  %v15049_v49 = vmul.f32 %v14856_v3, %v16301_v32  ;;  %v6575_v13 = vmul.f32 %v14856_v3, %v16303_v53  ;;  %v16307_v43 = vld [vmem:[#allocation33_spill] sm:$0xff] }
 0x989   : > { %16297 = vst [vmem:[#allocation47_spill] sm:$0xff] %v15033_v42  ;;  %16298 = vst [vmem:[#allocation21_spill] sm:$0xff] %v15037_v47  ;;  %v16304_v42 = vld [vmem:[#allocation30_spill] sm:$0xff]  ;;  %v15061_v2 = vmul.f32 %v14856_v3, %v16307_v43  ;;  %v6589_v57 = vadd.f32 %v14881_v50, %v14870_v52  ;;  %v6590_v32 = vadd.f32 %v14881_v50, %v14874_v19 }
 0x98a   : > { %16300 = vst [vmem:[#allocation13_spill] sm:$0xff] %v15045_v14  ;;  %16302 = vst [vmem:[#allocation17_spill] sm:$0xff] %v15049_v49  ;;  %v6576_v30 = vmul.f32 %v14856_v3, %v16304_v42  ;;  %v16305_v47 = vld [vmem:[#allocation34_spill] sm:$0xff]  ;;  %v6593_v53 = vadd.f32 %v14881_v50, %v14889_v23  ;;  %v6594_v42 = vadd.f32 %v14881_v50, %v14893_v0 }
 0x98b   : > { %v15057_v28 = vmul.f32 %v14856_v3, %v16305_v47  ;;  %16308 = vst [vmem:[#allocation39_spill] sm:$0xff] %v15061_v2  ;;  %v6597_v49 = vadd.f32 %v14881_v50, %v6527_v24  ;;  %v6598_v47 = vadd.f32 %v14881_v50, %v6528_v31  ;;  %v6602_v3 = vadd.f32 %v14881_v50, %v6532_v54 }
 0x98c   : > { %v6605_v43 = vadd.f32 %v14881_v50, %v6535_v40  ;;  %v6606_v52 = vadd.f32 %v14881_v50, %v6536_v37  ;;  %v6609_v19 = vadd.f32 %v14881_v50, %v6539_v21  ;;  %v6610_v2 = vadd.f32 %v14881_v50, %v6540_v18 }
 0x98d   : > { %16306 = vst [vmem:[#allocation58_spill] sm:$0xff] %v15057_v28  ;;  %v6601_v28 = vadd.f32 %v14881_v50, %v6531_v1  ;;  %v6613_v23 = vadd.f32 %v14881_v50, %v6543_v7  ;;  %v6614_v0 = vadd.f32 %v14881_v50, %v6544_v62  ;;  %v6617_v24 = vadd.f32 %v14881_v50, %v6547_v9 }
 0x98e   : > { %v6618_v31 = vadd.f32 %v14881_v50, %v6548_v26  ;;  %v6621_v1 = vadd.f32 %v14881_v50, %v6551_v4  ;;  %v6622_v54 = vadd.f32 %v14881_v50, %v6552_v11  ;;  %v6625_v40 = vadd.f32 %v14881_v50, %v6555_v51 }
 0x98f   : > { %v6626_v37 = vadd.f32 %v14881_v50, %v6556_v35  ;;  %v6629_v21 = vadd.f32 %v14881_v50, %v6559_v33  ;;  %v6630_v18 = vadd.f32 %v14881_v50, %v6560_v44  ;;  %v6633_v7 = vadd.f32 %v14881_v50, %v6563_v17 }
 0x990   : > { %v6634_v62 = vadd.f32 %v14881_v50, %v6564_v55  ;;  %v6637_v9 = vadd.f32 %v14881_v50, %v6567_v41  ;;  %v6638_v26 = vadd.f32 %v14881_v50, %v6568_v16  ;;  %v6641_v4 = vadd.f32 %v14881_v50, %v6571_v6 }
 0x991   : > { %v6642_v11 = vadd.f32 %v14881_v50, %v6572_v5  ;;  %v6645_v51 = vadd.f32 %v14881_v50, %v6575_v13  ;;  %v6646_v35 = vadd.f32 %v14881_v50, %v6576_v30  ;;  %v6653_v14 = vmax.f32 %v6589_v57, 0.0 }
 0x992   : > { %v6654_v33 = vmax.f32 %v6590_v32, 0.0  ;;  %v6657_v27 = vmax.f32 %v6593_v53, 0.0  ;;  %v6658_v44 = vmax.f32 %v6594_v42, 0.0  ;;  %v6661_v34 = vmax.f32 %v6597_v49, 0.0 }
 0x993   : > { %v6662_v17 = vmax.f32 %v6598_v47, 0.0  ;;  %v6665_v59 = vmax.f32 %v6601_v28, 0.0  ;;  %v6666_v55 = vmax.f32 %v6602_v3, 0.0  ;;  %v6669_v60 = vmax.f32 %v6605_v43, 0.0 }
 0x994   : > { %v6670_v41 = vmax.f32 %v6606_v52, 0.0  ;;  %v6673_v29 = vmax.f32 %v6609_v19, 0.0  ;;  %v6674_v16 = vmax.f32 %v6610_v2, 0.0  ;;  %v6677_v10 = vmax.f32 %v6613_v23, 0.0 }
 0x995   : > { %v6678_v6 = vmax.f32 %v6614_v0, 0.0  ;;  %v6681_v12 = vmax.f32 %v6617_v24, 0.0  ;;  %v6682_v5 = vmax.f32 %v6618_v31, 0.0  ;;  %v6685_v20 = vmax.f32 %v6621_v1, 0.0 }
 0x996   : > { %v6686_v13 = vmax.f32 %v6622_v54, 0.0  ;;  %v6689_v48 = vmax.f32 %v6625_v40, 0.0  ;;  %v6690_v30 = vmax.f32 %v6626_v37, 0.0  ;;  %v6693_v57 = vmax.f32 %v6629_v21, 0.0 }
 0x997   : > { %v6694_v32 = vmax.f32 %v6630_v18, 0.0  ;;  %v6697_v53 = vmax.f32 %v6633_v7, 0.0  ;;  %v6698_v42 = vmax.f32 %v6634_v62, 0.0  ;;  %v6701_v49 = vmax.f32 %v6637_v9, 0.0  ;;  %v16309_v62 = vld [vmem:[#allocation38_spill] sm:$0xff] }
 0x998   : > { %v6702_v47 = vmax.f32 %v6638_v26, 0.0  ;;  %v6705_v28 = vmax.f32 %v6641_v4, 0.0  ;;  %v6706_v3 = vmax.f32 %v6642_v11, 0.0  ;;  %v6709_v43 = vmax.f32 %v6645_v51, 0.0 }
 0x999   : > { %v6710_v52 = vmax.f32 %v6646_v35, 0.0  ;;  %v6716_v19 = vpack.c.bf16 %v6654_v33, %v6653_v14  ;;  %v15097_v2 = vpack.c.bf16 %v6658_v44, %v6657_v27  ;;  %v15099_v23 = vpack.c.bf16 %v6662_v17, %v6661_v34  ;;  %v16310_v35 = vld [vmem:[#allocation35_spill] sm:$0xff] }
 0x99a   : > { %v15101_v0 = vpack.c.bf16 %v6666_v55, %v6665_v59  ;;  %v15103_v24 = vpack.c.bf16 %v6670_v41, %v6669_v60  ;;  %v15105_v31 = vpack.c.bf16 %v6674_v16, %v6673_v29  ;;  %v15107_v1 = vpack.c.bf16 %v6678_v6, %v6677_v10  ;;  %v16311_v41 = vld [vmem:[#allocation46_spill] sm:$0xff] }
 0x99b   : > { %v15109_v54 = vpack.c.bf16 %v6682_v5, %v6681_v12  ;;  %v15111_v40 = vpack.c.bf16 %v6686_v13, %v6685_v20  ;;  %v15113_v37 = vpack.c.bf16 %v6690_v30, %v6689_v48  ;;  %v15115_v21 = vpack.c.bf16 %v6694_v32, %v6693_v57 }
 0x99c   : > { %v15117_v27 = vpack.c.bf16 %v6698_v42, %v6697_v53  ;;  %v15119_v34 = vpack.c.bf16 %v6702_v47, %v6701_v49  ;;  %v15121_v59 = vpack.c.bf16 %v6706_v3, %v6705_v28  ;;  %v15123_v60 = vpack.c.bf16 %v6710_v52, %v6709_v43  ;;  %v16312_v53 = vld [vmem:[#allocation56_spill] sm:$0xff]  ;;  %v16313_v28 = vld [vmem:[#allocation25_spill] sm:$0xff] }
 0x99d   : > { %v6587_v10 = vadd.f32 %v14881_v50, %v14862_v38  ;;  %v6588_v12 = vadd.f32 %v14881_v50, %v14866_v39  ;;  %v6591_v48 = vadd.f32 %v14881_v50, %v14878_v63  ;;  %v6592_v20 = vadd.f32 %v14881_v50, %v14885_v8 }
 0x99e   : > { %v6595_v29 = vadd.f32 %v14881_v50, %v14897_v15  ;;  %v6596_v14 = vadd.f32 %v14881_v50, %v14901_v61  ;;  %v6599_v38 = vadd.f32 %v14881_v50, %v14911_v46  ;;  %v6600_v39 = vadd.f32 %v14881_v50, %v16309_v62  ;;  %v16318_v62 = vld [vmem:[#allocation37_spill] sm:$0xff] }
 0x99f   : > { %v6651_v18 = vmax.f32 %v6587_v10, 0.0  ;;  %v6652_v7 = vmax.f32 %v6588_v12, 0.0  ;;  %v6655_v9 = vmax.f32 %v6591_v48, 0.0  ;;  %v6656_v26 = vmax.f32 %v6592_v20, 0.0  ;;  %v16315_v48 = vld [vmem:[#allocation26_spill] sm:$0xff]  ;;  %v16316_v20 = vld [vmem:[#allocation9_spill] sm:$0xff] }
 0x9a0   : > { %v6659_v63 = vmax.f32 %v6595_v29, 0.0  ;;  %v6660_v4 = vmax.f32 %v6596_v14, 0.0  ;;  %v6663_v8 = vmax.f32 %v6599_v38, 0.0  ;;  %v6664_v51 = vmax.f32 %v6600_v39, 0.0 }
 0x9a1   : > { %v6715_v11 = vpack.c.bf16 %v6652_v7, %v6651_v18  ;;  %v6603_v15 = vadd.f32 %v14881_v50, %v16310_v35  ;;  %v6717_v33 = vpack.c.bf16 %v6656_v26, %v6655_v9  ;;  %v6604_v44 = vadd.f32 %v14881_v50, %v14927_v36  ;;  %v16317_v7 = vld [vmem:[#allocation36_spill] sm:$0xff]  ;;  %v16320_v35 = vld [vmem:[#allocation2_spill] sm:$0xff] }
 0x9a2   : > { %v6719_v61 = vpack.c.bf16 %v6660_v4, %v6659_v63  ;;  %v6607_v46 = vadd.f32 %v14881_v50, %v14935_v56  ;;  %v6721_v17 = vpack.c.bf16 %v6664_v51, %v6663_v8  ;;  %v6608_v16 = vadd.f32 %v14881_v50, %v16311_v41  ;;  %v16319_v4 = vld [vmem:[#allocation16_spill] sm:$0xff]  ;;  %v16322_v41 = vld [vmem:[#allocation47_spill] sm:$0xff] }
 0x9a3   : > { %8201 = vmatprep.mubr.bf16.mxu0 %v6715_v11  ;;  %v6667_v55 = vmax.f32 %v6603_v15, 0.0  ;;  %v6611_v6 = vadd.f32 %v14881_v50, %v14949_v45  ;;  %v6668_v5 = vmax.f32 %v6604_v44, 0.0  ;;  %v6612_v30 = vadd.f32 %v14881_v50, %v14953_v22 }
 0x9a4   : > { %8202 = vmatmul.mubr.bf16.vlgmr.msra.gmra.mrb[24].mxu0 %v6716_v19  ;;  %v6671_v13 = vmax.f32 %v6607_v46, 0.0  ;;  %v6615_v36 = vadd.f32 %v14881_v50, %v14961_v25  ;;  %v6672_v56 = vmax.f32 %v6608_v16, 0.0  ;;  %v6616_v32 = vadd.f32 %v14881_v50, %v14965_v58  ;;  %v16314_v19 = vld [vmem:[#allocation4_spill] sm:$0xff] }
 0x9a5   : > { %8205 = vmatprep.mubr.bf16.mxu0 %v6717_v33  ;;  %v6675_v57 = vmax.f32 %v6611_v6, 0.0  ;;  %v6619_v42 = vadd.f32 %v14881_v50, %v16312_v53  ;;  %v6723_v49 = vpack.c.bf16 %v6668_v5, %v6667_v55  ;;  %v6676_v45 = vmax.f32 %v6612_v30, 0.0  ;;  %v16321_v33 = vld [vmem:[#allocation32_spill] sm:$0xff]  ;;  %v16323_v6 = vld [vmem:[#allocation21_spill] sm:$0xff] }
 0x9a6   : > { %v6679_v47 = vmax.f32 %v6615_v36, 0.0  ;;  %v6620_v3 = vadd.f32 %v14881_v50, %v16313_v28  ;;  %v6725_v43 = vpack.c.bf16 %v6672_v56, %v6671_v13  ;;  %v6680_v22 = vmax.f32 %v6616_v32, 0.0  ;;  %v16324_v56 = vld [vmem:[#allocation13_spill] sm:$0xff] }
 0x9a7   : > { %v6683_v52 = vmax.f32 %v6619_v42, 0.0  ;;  %v6623_v25 = vadd.f32 %v14881_v50, %v16314_v19  ;;  %v6727_v10 = vpack.c.bf16 %v6676_v45, %v6675_v57  ;;  %v6624_v58 = vadd.f32 %v14881_v50, %v16315_v48  ;;  %v16325_v45 = vld [vmem:[#allocation17_spill] sm:$0xff] }
 0x9a8   : > { %v6684_v12 = vmax.f32 %v6620_v3, 0.0  ;;  %v6627_v29 = vadd.f32 %v14881_v50, %v16316_v20  ;;  %v6729_v14 = vpack.c.bf16 %v6680_v22, %v6679_v47  ;;  %v6628_v38 = vadd.f32 %v14881_v50, %v16317_v7  ;;  %v16326_v3 = vld [vmem:[#allocation58_spill] sm:$0xff] }
 0x9a9   : > { %v6687_v18 = vmax.f32 %v6623_v25, 0.0  ;;  %v6631_v39 = vadd.f32 %v14881_v50, %v16318_v62  ;;  %v6688_v26 = vmax.f32 %v6624_v58, 0.0  ;;  %v6632_v11 = vadd.f32 %v14881_v50, %v16319_v4 }
 0x9aa   : > { %v6731_v9 = vpack.c.bf16 %v6684_v12, %v6683_v52  ;;  %v6691_v63 = vmax.f32 %v6627_v29, 0.0  ;;  %v6692_v8 = vmax.f32 %v6628_v38, 0.0  ;;  %v6635_v15 = vadd.f32 %v14881_v50, %v16320_v35  ;;  %v16327_v52 = vld [vmem:[#allocation39_spill] sm:$0xff] }
 0x9ab   : > { %v6695_v51 = vmax.f32 %v6631_v39, 0.0  ;;  %v6636_v44 = vadd.f32 %v14881_v50, %v16321_v33  ;;  %v6733_v46 = vpack.c.bf16 %v6688_v26, %v6687_v18  ;;  %v6696_v55 = vmax.f32 %v6632_v11, 0.0 }
 0x9ac   : > { %8206 = vmatmul.mubr.bf16.gmra.mrb[28].mxu0 %v15097_v2  ;;  %v6639_v16 = vadd.f32 %v14881_v50, %v16322_v41  ;;  %v6640_v5 = vadd.f32 %v14881_v50, %v16323_v6  ;;  %v6735_v13 = vpack.c.bf16 %v6692_v8, %v6691_v63  ;;  %v6699_v30 = vmax.f32 %v6635_v15, 0.0 }
 0x9ad   : > { %8209 = vmatprep.mubr.bf16.mxu0 %v6719_v61  ;;  %v6700_v36 = vmax.f32 %v6636_v44, 0.0  ;;  %v6643_v57 = vadd.f32 %v14881_v50, %v16324_v56  ;;  %v6737_v32 = vpack.c.bf16 %v6696_v55, %v6695_v51  ;;  %v6644_v2 = vadd.f32 %v14881_v50, %v16325_v45 }
 0x9ae   : > { %v6703_v53 = vmax.f32 %v6639_v16, 0.0  ;;  %v6704_v42 = vmax.f32 %v6640_v5, 0.0  ;;  %v6647_v22 = vadd.f32 %v14881_v50, %v16326_v3  ;;  %v6648_v61 = vadd.f32 %v14881_v50, %v16327_v52  ;;  %v16328_v50 = vld [vmem:[#allocation54_spill] sm:$0xff] }
 0x9af   : > { %v6739_v47 = vpack.c.bf16 %v6700_v36, %v6699_v30  ;;  %v6707_v28 = vmax.f32 %v6643_v57, 0.0  ;;  %v6708_v25 = vmax.f32 %v6644_v2, 0.0 }
 0x9b0   : > { %v6741_v19 = vpack.c.bf16 %v6704_v42, %v6703_v53  ;;  %v6711_v12 = vmax.f32 %v6647_v22, 0.0  ;;  %v6712_v48 = vmax.f32 %v6648_v61, 0.0 }
 0x9b1   : > { %v6743_v58 = vpack.c.bf16 %v6708_v25, %v6707_v28 }
 0x9b2   : > { %v6745_v20 = vpack.c.bf16 %v6712_v48, %v6711_v12 }
 0x9b4   : > { %8210 = vmatmul.mubr.bf16.gmra.mrb[32].mxu0 %v15099_v23  ;;  %v15207_v23 = vld [vmem:[%s15540_s8] ss:$0 sm:$0xff] }
 0x9b5   : > { %8213 = vmatprep.mubr.bf16.mxu0 %v6721_v17 }
 0x9bc   : > { %8214 = vmatmul.mubr.bf16.gmra.mrb[36].mxu0 %v15101_v0 }
 0x9bd   : > { %8217 = vmatprep.mubr.bf16.mxu0 %v6723_v49 }
 0x9c4   : > { %8218 = vmatmul.mubr.bf16.gmra.mrb[40].mxu0 %v15103_v24 }
 0x9c5   : > { %8221 = vmatprep.mubr.bf16.mxu0 %v6725_v43 }
 0x9cc   : > { %8222 = vmatmul.mubr.bf16.gmra.mrb[44].mxu0 %v15105_v31 }
 0x9cd   : > { %8225 = vmatprep.mubr.bf16.mxu0 %v6727_v10 }
 0x9d4   : > { %8226 = vmatmul.mubr.bf16.gmra.mrb[48].mxu0 %v15107_v1 }
 0x9d5   : > { %8229 = vmatprep.mubr.bf16.mxu0 %v6729_v14 }
 0x9dc   : > { %8230 = vmatmul.mubr.bf16.gmra.mrb[52].mxu0 %v15109_v54 }
 0x9dd   : > { %8233 = vmatprep.mubr.bf16.mxu0 %v6731_v9 }
 0x9e4   : > { %8234 = vmatmul.mubr.bf16.gmra.mrb[56].mxu0 %v15111_v40 }
 0x9e5   : > { %8237 = vmatprep.mubr.bf16.mxu0 %v6733_v46 }
 0x9ec   : > { %8238 = vmatmul.mubr.bf16.gmra.mrb[60].mxu0 %v15113_v37 }
 0x9ed   : > { %8241 = vmatprep.mubr.bf16.mxu0 %v6735_v13 }
 0x9f4   : > { %8242 = vmatmul.mubr.bf16.gmra.mrb[64].mxu0 %v15115_v21 }
 0x9f5   : > { %8245 = vmatprep.mubr.bf16.mxu0 %v6737_v32 }
 0x9fc   : > { %8246 = vmatmul.mubr.bf16.gmra.mrb[68].mxu0 %v15117_v27 }
 0x9fd   : > { %8249 = vmatprep.mubr.bf16.mxu0 %v6739_v47 }
 0xa04   : > { %8250 = vmatmul.mubr.bf16.gmra.mrb[72].mxu0 %v15119_v34 }
 0xa05   : > { %8253 = vmatprep.mubr.bf16.mxu0 %v6741_v19 }
 0xa0c   : > { %8254 = vmatmul.mubr.bf16.gmra.mrb[76].mxu0 %v15121_v59 }
 0xa0d   : > { %8257 = vmatprep.mubr.bf16.mxu0 %v6743_v58 }
 0xa14   : > { %8258 = vmatmul.mubr.bf16.gmra.mrb[80].mxu0 %v15123_v60 }
 0xa15   : > { %8261 = vmatprep.mubr.bf16.mxu0 %v6745_v20 }
 0xa1c   : > { %8262 = vmatmul.mubr.bf16.gmra.mrb[84].mxu0 %v16328_v50 }
 0xa77   : > { %v8203_v0 = vpop.f32.mrb[24].mxu0 }
 0xa78   : > { %v6861_v24 = vadd.f32 %v8203_v0, %v15207_v23  ;;  %v6852_v31 = vpop.f32.mrb[25].mxu0 }
 0xa79   : > { %v6853_v1 = vadd.f32 %v15207_v23, %v6852_v31  ;;  %v8204_v54 = vpop.f32.mrb[26].mxu0 }
 0xa7a   : > { %7109 = vst.msk [vmem:[%s15541_s9 + $0x10] sm:$0xff] %vm496_vm1, %v6861_v24  ;;  %v6864_v40 = vadd.f32 %v8204_v54, %v15207_v23  ;;  %v6855_v37 = vpop.f32.mrb[27].mxu0 }
 0xa7b   : > { %7107 = vst.msk [vmem:[%s15541_s9] sm:$0xff] %vm496_vm1, %v6853_v1  ;;  %v6856_v21 = vadd.f32 %v15207_v23, %v6855_v37 }
 0xa7c   : > { %7110 = vst.msk [vmem:[%s15541_s9 + $0x18] sm:$0xff] %vm496_vm1, %v6864_v40 }
 0xa7d   : > { %7108 = vst.msk [vmem:[%s15541_s9 + $0x8] sm:$0xff] %vm496_vm1, %v6856_v21 }
 0xa7f   : > { %v8207_v27 = vpop.f32.mrb[28].mxu0 }
 0xa80   : > { %v6877_v34 = vadd.f32 %v8207_v27, %v15207_v23  ;;  %v6868_v59 = vpop.f32.mrb[29].mxu0 }
 0xa81   : > { %v6869_v60 = vadd.f32 %v15207_v23, %v6868_v59  ;;  %v8208_v17 = vpop.f32.mrb[30].mxu0 }
 0xa82   : > { %7113 = vst.msk [vmem:[%s15541_s9 + $0x30] sm:$0xff] %vm496_vm1, %v6877_v34  ;;  %v6880_v49 = vadd.f32 %v8208_v17, %v15207_v23  ;;  %v6871_v43 = vpop.f32.mrb[31].mxu0 }
 0xa83   : > { %7111 = vst.msk [vmem:[%s15541_s9 + $0x20] sm:$0xff] %vm496_vm1, %v6869_v60  ;;  %v6872_v10 = vadd.f32 %v15207_v23, %v6871_v43 }
 0xa84   : > { %7114 = vst.msk [vmem:[%s15541_s9 + $0x38] sm:$0xff] %vm496_vm1, %v6880_v49 }
 0xa85   : > { %7112 = vst.msk [vmem:[%s15541_s9 + $0x28] sm:$0xff] %vm496_vm1, %v6872_v10 }
 0xa87   : > { %v8211_v29 = vpop.f32.mrb[32].mxu0 }
 0xa88   : > { %v6893_v14 = vadd.f32 %v8211_v29, %v15207_v23  ;;  %v6884_v18 = vpop.f32.mrb[33].mxu0 }
 0xa89   : > { %v6885_v7 = vadd.f32 %v15207_v23, %v6884_v18  ;;  %v8212_v38 = vpop.f32.mrb[34].mxu0 }
 0xa8a   : > { %7117 = vst.msk [vmem:[%s15541_s9 + $0x50] sm:$0xff] %vm496_vm1, %v6893_v14  ;;  %v6896_v62 = vadd.f32 %v8212_v38, %v15207_v23  ;;  %v6887_v39 = vpop.f32.mrb[35].mxu0 }
 0xa8b   : > { %7115 = vst.msk [vmem:[%s15541_s9 + $0x40] sm:$0xff] %vm496_vm1, %v6885_v7  ;;  %v6888_v9 = vadd.f32 %v15207_v23, %v6887_v39 }
 0xa8c   : > { %7118 = vst.msk [vmem:[%s15541_s9 + $0x58] sm:$0xff] %vm496_vm1, %v6896_v62 }
 0xa8d   : > { %7116 = vst.msk [vmem:[%s15541_s9 + $0x48] sm:$0xff] %vm496_vm1, %v6888_v9 }
 0xa8f   : > { %v8215_v26 = vpop.f32.mrb[36].mxu0 }
 0xa90   : > { %v6909_v63 = vadd.f32 %v8215_v26, %v15207_v23  ;;  %v6900_v4 = vpop.f32.mrb[37].mxu0 }
 0xa91   : > { %v6901_v11 = vadd.f32 %v15207_v23, %v6900_v4  ;;  %v8216_v8 = vpop.f32.mrb[38].mxu0 }
 0xa92   : > { %7121 = vst.msk [vmem:[%s15541_s9 + $0x70] sm:$0xff] %vm496_vm1, %v6909_v63  ;;  %v6912_v51 = vadd.f32 %v8216_v8, %v15207_v23  ;;  %v6903_v35 = vpop.f32.mrb[39].mxu0 }
 0xa93   : > { %7119 = vst.msk [vmem:[%s15541_s9 + $0x60] sm:$0xff] %vm496_vm1, %v6901_v11  ;;  %v6904_v15 = vadd.f32 %v15207_v23, %v6903_v35 }
 0xa94   : > { %7122 = vst.msk [vmem:[%s15541_s9 + $0x78] sm:$0xff] %vm496_vm1, %v6912_v51 }
 0xa95   : > { %7120 = vst.msk [vmem:[%s15541_s9 + $0x68] sm:$0xff] %vm496_vm1, %v6904_v15 }
 0xa97   : > { %v8219_v33 = vpop.f32.mrb[40].mxu0 }
 0xa98   : > { %v6925_v44 = vadd.f32 %v8219_v33, %v15207_v23  ;;  %v6916_v46 = vpop.f32.mrb[41].mxu0 }
 0xa99   : > { %v6917_v55 = vadd.f32 %v15207_v23, %v6916_v46  ;;  %v8220_v41 = vpop.f32.mrb[42].mxu0 }
 0xa9a   : > { %7125 = vst.msk [vmem:[%s15541_s9 + $0x90] sm:$0xff] %vm496_vm1, %v6925_v44  ;;  %v6928_v16 = vadd.f32 %v8220_v41, %v15207_v23  ;;  %v6919_v6 = vpop.f32.mrb[43].mxu0 }
 0xa9b   : > { %7123 = vst.msk [vmem:[%s15541_s9 + $0x80] sm:$0xff] %vm496_vm1, %v6917_v55  ;;  %v6920_v5 = vadd.f32 %v15207_v23, %v6919_v6 }
 0xa9c   : > { %7126 = vst.msk [vmem:[%s15541_s9 + $0x98] sm:$0xff] %vm496_vm1, %v6928_v16 }
 0xa9d   : > { %7124 = vst.msk [vmem:[%s15541_s9 + $0x88] sm:$0xff] %vm496_vm1, %v6920_v5 }
 0xa9f   : > { %v8223_v13 = vpop.f32.mrb[44].mxu0 }
 0xaa0   : > { %v6941_v30 = vadd.f32 %v8223_v13, %v15207_v23  ;;  %v6932_v36 = vpop.f32.mrb[45].mxu0 }
 0xaa1   : > { %v6933_v56 = vadd.f32 %v15207_v23, %v6932_v36  ;;  %v8224_v57 = vpop.f32.mrb[46].mxu0 }
 0xaa2   : > { %7129 = vst.msk [vmem:[%s15541_s9 + $0xb0] sm:$0xff] %vm496_vm1, %v6941_v30  ;;  %v6944_v32 = vadd.f32 %v8224_v57, %v15207_v23  ;;  %v6935_v53 = vpop.f32.mrb[47].mxu0 }
 0xaa3   : > { %7127 = vst.msk [vmem:[%s15541_s9 + $0xa0] sm:$0xff] %vm496_vm1, %v6933_v56  ;;  %v6936_v42 = vadd.f32 %v15207_v23, %v6935_v53 }
 0xaa4   : > { %7130 = vst.msk [vmem:[%s15541_s9 + $0xb8] sm:$0xff] %vm496_vm1, %v6944_v32 }
 0xaa5   : > { %7128 = vst.msk [vmem:[%s15541_s9 + $0xa8] sm:$0xff] %vm496_vm1, %v6936_v42 }
 0xaa7   : > { %v8227_v45 = vpop.f32.mrb[48].mxu0 }
 0xaa8   : > { %v6957_v2 = vadd.f32 %v8227_v45, %v15207_v23  ;;  %v6948_v47 = vpop.f32.mrb[49].mxu0 }
 0xaa9   : > { %v6949_v28 = vadd.f32 %v15207_v23, %v6948_v47  ;;  %v8228_v3 = vpop.f32.mrb[50].mxu0 }
 0xaaa   : > { %7133 = vst.msk [vmem:[%s15541_s9 + $0xd0] sm:$0xff] %vm496_vm1, %v6957_v2  ;;  %v6960_v22 = vadd.f32 %v8228_v3, %v15207_v23  ;;  %v6951_v52 = vpop.f32.mrb[51].mxu0 }
 0xaab   : > { %7131 = vst.msk [vmem:[%s15541_s9 + $0xc0] sm:$0xff] %vm496_vm1, %v6949_v28  ;;  %v6952_v61 = vadd.f32 %v15207_v23, %v6951_v52 }
 0xaac   : > { %7134 = vst.msk [vmem:[%s15541_s9 + $0xd8] sm:$0xff] %vm496_vm1, %v6960_v22 }
 0xaad   : > { %7132 = vst.msk [vmem:[%s15541_s9 + $0xc8] sm:$0xff] %vm496_vm1, %v6952_v61 }
 0xaaf   : > { %v8231_v19 = vpop.f32.mrb[52].mxu0 }
 0xab0   : > { %v6973_v25 = vadd.f32 %v8231_v19, %v15207_v23  ;;  %v6964_v12 = vpop.f32.mrb[53].mxu0 }
 0xab1   : > { %v6965_v48 = vadd.f32 %v15207_v23, %v6964_v12  ;;  %v8232_v58 = vpop.f32.mrb[54].mxu0 }
 0xab2   : > { %7137 = vst.msk [vmem:[%s15541_s9 + $0xf0] sm:$0xff] %vm496_vm1, %v6973_v25  ;;  %v6976_v20 = vadd.f32 %v8232_v58, %v15207_v23  ;;  %v6967_v50 = vpop.f32.mrb[55].mxu0 }
 0xab3   : > { %7135 = vst.msk [vmem:[%s15541_s9 + $0xe0] sm:$0xff] %vm496_vm1, %v6965_v48  ;;  %v6968_v0 = vadd.f32 %v15207_v23, %v6967_v50 }
 0xab4   : > { %7138 = vst.msk [vmem:[%s15541_s9 + $0xf8] sm:$0xff] %vm496_vm1, %v6976_v20 }
 0xab5   : > { %7136 = vst.msk [vmem:[%s15541_s9 + $0xe8] sm:$0xff] %vm496_vm1, %v6968_v0 }
 0xab7   : > { %v8235_v24 = vpop.f32.mrb[56].mxu0 }
 0xab8   : > { %v6989_v31 = vadd.f32 %v8235_v24, %v15207_v23  ;;  %v6980_v1 = vpop.f32.mrb[57].mxu0 }
 0xab9   : > { %v6981_v54 = vadd.f32 %v15207_v23, %v6980_v1  ;;  %v8236_v40 = vpop.f32.mrb[58].mxu0 }
 0xaba   : > { %7141 = vst.msk [vmem:[%s15541_s9 + $0x110] sm:$0xff] %vm496_vm1, %v6989_v31  ;;  %v6992_v37 = vadd.f32 %v8236_v40, %v15207_v23  ;;  %v6983_v21 = vpop.f32.mrb[59].mxu0 }
 0xabb   : > { %7139 = vst.msk [vmem:[%s15541_s9 + $0x100] sm:$0xff] %vm496_vm1, %v6981_v54  ;;  %v6984_v27 = vadd.f32 %v15207_v23, %v6983_v21 }
 0xabc   : > { %7142 = vst.msk [vmem:[%s15541_s9 + $0x118] sm:$0xff] %vm496_vm1, %v6992_v37 }
 0xabd   : > { %7140 = vst.msk [vmem:[%s15541_s9 + $0x108] sm:$0xff] %vm496_vm1, %v6984_v27 }
 0xabf   : > { %v8239_v34 = vpop.f32.mrb[60].mxu0 }
 0xac0   : > { %v7005_v59 = vadd.f32 %v8239_v34, %v15207_v23  ;;  %v6996_v60 = vpop.f32.mrb[61].mxu0 }
 0xac1   : > { %v6997_v17 = vadd.f32 %v15207_v23, %v6996_v60  ;;  %v8240_v49 = vpop.f32.mrb[62].mxu0 }
 0xac2   : > { %7145 = vst.msk [vmem:[%s15541_s9 + $0x130] sm:$0xff] %vm496_vm1, %v7005_v59  ;;  %v7008_v43 = vadd.f32 %v8240_v49, %v15207_v23  ;;  %v6999_v10 = vpop.f32.mrb[63].mxu0 }
 0xac3   : > { %7143 = vst.msk [vmem:[%s15541_s9 + $0x120] sm:$0xff] %vm496_vm1, %v6997_v17  ;;  %v7000_v29 = vadd.f32 %v15207_v23, %v6999_v10 }
 0xac4   : > { %7146 = vst.msk [vmem:[%s15541_s9 + $0x138] sm:$0xff] %vm496_vm1, %v7008_v43 }
 0xac5   : > { %7144 = vst.msk [vmem:[%s15541_s9 + $0x128] sm:$0xff] %vm496_vm1, %v7000_v29 }
 0xac7   : > { %v8243_v14 = vpop.f32.mrb[64].mxu0 }
 0xac8   : > { %v7021_v18 = vadd.f32 %v8243_v14, %v15207_v23  ;;  %v7012_v7 = vpop.f32.mrb[65].mxu0 }
 0xac9   : > { %v7013_v38 = vadd.f32 %v15207_v23, %v7012_v7  ;;  %v8244_v62 = vpop.f32.mrb[66].mxu0 }
 0xaca   : > { %7149 = vst.msk [vmem:[%s15541_s9 + $0x150] sm:$0xff] %vm496_vm1, %v7021_v18  ;;  %v7024_v39 = vadd.f32 %v8244_v62, %v15207_v23  ;;  %v7015_v9 = vpop.f32.mrb[67].mxu0 }
 0xacb   : > { %7147 = vst.msk [vmem:[%s15541_s9 + $0x140] sm:$0xff] %vm496_vm1, %v7013_v38  ;;  %v7016_v26 = vadd.f32 %v15207_v23, %v7015_v9 }
 0xacc   : > { %7150 = vst.msk [vmem:[%s15541_s9 + $0x158] sm:$0xff] %vm496_vm1, %v7024_v39 }
 0xacd   : > { %7148 = vst.msk [vmem:[%s15541_s9 + $0x148] sm:$0xff] %vm496_vm1, %v7016_v26 }
 0xacf   : > { %v8247_v63 = vpop.f32.mrb[68].mxu0 }
 0xad0   : > { %v7037_v4 = vadd.f32 %v8247_v63, %v15207_v23  ;;  %v7028_v11 = vpop.f32.mrb[69].mxu0 }
 0xad1   : > { %v7029_v8 = vadd.f32 %v15207_v23, %v7028_v11  ;;  %v8248_v51 = vpop.f32.mrb[70].mxu0 }
 0xad2   : > { %7153 = vst.msk [vmem:[%s15541_s9 + $0x170] sm:$0xff] %vm496_vm1, %v7037_v4  ;;  %v7040_v35 = vadd.f32 %v8248_v51, %v15207_v23  ;;  %v7031_v15 = vpop.f32.mrb[71].mxu0 }
 0xad3   : > { %7151 = vst.msk [vmem:[%s15541_s9 + $0x160] sm:$0xff] %vm496_vm1, %v7029_v8  ;;  %v7032_v33 = vadd.f32 %v15207_v23, %v7031_v15 }
 0xad4   : > { %7154 = vst.msk [vmem:[%s15541_s9 + $0x178] sm:$0xff] %vm496_vm1, %v7040_v35 }
 0xad5   : > { %7152 = vst.msk [vmem:[%s15541_s9 + $0x168] sm:$0xff] %vm496_vm1, %v7032_v33 }
 0xad7   : > { %v8251_v44 = vpop.f32.mrb[72].mxu0 }
 0xad8   : > { %v7053_v46 = vadd.f32 %v8251_v44, %v15207_v23  ;;  %v7044_v55 = vpop.f32.mrb[73].mxu0 }
 0xad9   : > { %v7045_v41 = vadd.f32 %v15207_v23, %v7044_v55  ;;  %v8252_v16 = vpop.f32.mrb[74].mxu0 }
 0xada   : > { %7157 = vst.msk [vmem:[%s15541_s9 + $0x190] sm:$0xff] %vm496_vm1, %v7053_v46  ;;  %v7056_v6 = vadd.f32 %v8252_v16, %v15207_v23  ;;  %v7047_v5 = vpop.f32.mrb[75].mxu0 }
 0xadb   : > { %7155 = vst.msk [vmem:[%s15541_s9 + $0x180] sm:$0xff] %vm496_vm1, %v7045_v41  ;;  %v7048_v13 = vadd.f32 %v15207_v23, %v7047_v5 }
 0xadc   : > { %7158 = vst.msk [vmem:[%s15541_s9 + $0x198] sm:$0xff] %vm496_vm1, %v7056_v6 }
 0xadd   : > { %7156 = vst.msk [vmem:[%s15541_s9 + $0x188] sm:$0xff] %vm496_vm1, %v7048_v13 }
 0xadf   : > { %v8255_v30 = vpop.f32.mrb[76].mxu0 }
 0xae0   : > { %v7069_v36 = vadd.f32 %v8255_v30, %v15207_v23  ;;  %v7060_v56 = vpop.f32.mrb[77].mxu0 }
 0xae1   : > { %v7061_v57 = vadd.f32 %v15207_v23, %v7060_v56  ;;  %v8256_v32 = vpop.f32.mrb[78].mxu0 }
 0xae2   : > { %7161 = vst.msk [vmem:[%s15541_s9 + $0x1b0] sm:$0xff] %vm496_vm1, %v7069_v36  ;;  %v7072_v53 = vadd.f32 %v8256_v32, %v15207_v23  ;;  %v7063_v42 = vpop.f32.mrb[79].mxu0 }
 0xae3   : > { %7159 = vst.msk [vmem:[%s15541_s9 + $0x1a0] sm:$0xff] %vm496_vm1, %v7061_v57  ;;  %v7064_v45 = vadd.f32 %v15207_v23, %v7063_v42 }
 0xae4   : > { %7162 = vst.msk [vmem:[%s15541_s9 + $0x1b8] sm:$0xff] %vm496_vm1, %v7072_v53 }
 0xae5   : > { %7160 = vst.msk [vmem:[%s15541_s9 + $0x1a8] sm:$0xff] %vm496_vm1, %v7064_v45 }
 0xae7   : > { %v8259_v2 = vpop.f32.mrb[80].mxu0 }
 0xae8   : > { %v7085_v47 = vadd.f32 %v8259_v2, %v15207_v23  ;;  %v7076_v28 = vpop.f32.mrb[81].mxu0 }
 0xae9   : > { %v7077_v3 = vadd.f32 %v15207_v23, %v7076_v28  ;;  %v8260_v22 = vpop.f32.mrb[82].mxu0 }
 0xaea   : > { %7165 = vst.msk [vmem:[%s15541_s9 + $0x1d0] sm:$0xff] %vm496_vm1, %v7085_v47  ;;  %v7088_v52 = vadd.f32 %v8260_v22, %v15207_v23  ;;  %v7079_v61 = vpop.f32.mrb[83].mxu0 }
 0xaeb   : > { %7163 = vst.msk [vmem:[%s15541_s9 + $0x1c0] sm:$0xff] %vm496_vm1, %v7077_v3  ;;  %v7080_v19 = vadd.f32 %v15207_v23, %v7079_v61 }
 0xaec   : > { %7166 = vst.msk [vmem:[%s15541_s9 + $0x1d8] sm:$0xff] %vm496_vm1, %v7088_v52 }
 0xaed   : > { %7164 = vst.msk [vmem:[%s15541_s9 + $0x1c8] sm:$0xff] %vm496_vm1, %v7080_v19 }
 0xaef   : > { %v8263_v25 = vpop.f32.mrb[84].mxu0 }
 0xaf0   : > { %v7101_v12 = vadd.f32 %v8263_v25, %v15207_v23  ;;  %v7092_v48 = vpop.f32.mrb[85].mxu0 }
 0xaf1   : > { %v7093_v58 = vadd.f32 %v15207_v23, %v7092_v48  ;;  %v8264_v20 = vpop.f32.mrb[86].mxu0 }
 0xaf2   : > { %7169 = vst.msk [vmem:[%s15541_s9 + $0x1f0] sm:$0xff] %vm496_vm1, %v7101_v12  ;;  %v7104_v50 = vadd.f32 %v8264_v20, %v15207_v23  ;;  %v7095_v0 = vpop.f32.mrb[87].mxu0 }
 0xaf3   : > { %7167 = vst.msk [vmem:[%s15541_s9 + $0x1e0] sm:$0xff] %vm496_vm1, %v7093_v58  ;;  %v7096_v24 = vadd.f32 %v15207_v23, %v7095_v0 }
 0xaf4   : > { %7170 = vst.msk [vmem:[%s15541_s9 + $0x1f8] sm:$0xff] %vm496_vm1, %v7104_v50 }
 0xaf5   : > { %7168 = vst.msk [vmem:[%s15541_s9 + $0x1e8] sm:$0xff] %vm496_vm1, %v7096_v24 }
 0xaf6 PF: > { %s19_s30 = sadd.s32 1, %s8826_s30  }
 0xaf7   : > { %p16_p4 = scmp.ge.s32.totalorder %s19_s30, 4  }
 0xaf9   :  { %18 = sbr.rel (!%p16_p4) target bundleno = 1 (0x1), region = 83 }

</bundles_post_ra>
